<compile_context>
chip_gen: v7x
topology: tpu7x:2x2x1
jax: 0.10.0
libtpu: 0.0.40
codegen_flags: <defaults>
</compile_context>

<pallas_src>
import functools

import jax
import jax.numpy as jnp
import numpy as np
from jax.experimental import pallas as pl
from jax.experimental.pallas import tpu as pltpu

EPS = 1e-5      # PyTorch BatchNorm2d default eps
LANE = 128      # TPU lane width


def _round_up(x, m):
    return (x + m - 1) // m * m


def _vmem_limit_bytes():
    # Derive scoped-VMEM limit from hardware (don't pin at v7x's 64 MiB
    # physical ceiling); leave ~25% headroom for compiler scratch.
    try:
        cap = int(pltpu.get_tpu_info().vmem_capacity_bytes)
    except Exception:
        cap = 64 * 1024 * 1024
    return int(max(32 * 1024 * 1024, min(100 * 1024 * 1024, (cap * 3) // 4)))


def _compiler_params():
    return pltpu.CompilerParams(
        dimension_semantics=("parallel",),
        vmem_limit_bytes=_vmem_limit_bytes(),
    )


def _const_spec(block_shape):
    """Grid-invariant block (weights / BN vectors): single-buffered if supported."""
    index_map = lambda *_: (0,) * len(block_shape)
    try:
        return pl.BlockSpec(block_shape, index_map, pipeline_mode=pl.Buffered(1))
    except Exception:
        return pl.BlockSpec(block_shape, index_map)


# ---------------------------------------------------------------------------
# K1: conv (stride-1 windows over (possibly space-to-depth'd) padded input)
#     as im2col + one MXU matmul, + BN partial stats (+ fused 1x1 shortcut)
# ---------------------------------------------------------------------------
def _conv_stats_kernel(ks2, ho, wo, sc_tap, has_sc, *refs):
    if has_sc:
        (x_ref, w_ref, wsc_ref,
         y_ref, mean_ref, m2_ref, ysc_ref, msc_ref, m2sc_ref, col_ref) = refs
    else:
        x_ref, w_ref, y_ref, mean_ref, m2_ref, col_ref = refs

    cp = x_ref.shape[-1]
    hw = ho * wo
    inv_hw = 1.0 / hw

    # im2col into VMEM scratch: one contiguous-window copy per tap, then a
    # single long-K matmul (accumulation stays inside the MXU, no f32 slab RMW).
    for a in range(ks2):
        for b in range(ks2):
            t = a * ks2 + b
            win = x_ref[0, pl.ds(a, ho), pl.ds(b, wo), :]
            col_ref[:, pl.ds(t * cp, cp)] = win.reshape(hw, cp)

    acc = jnp.dot(col_ref[...], w_ref[...], preferred_element_type=jnp.float32)
    y_ref[0] = acc.astype(y_ref.dtype)

    # per-image BN partials: mean and centered M2 (f32, computed pre-downcast)
    mu = jnp.sum(acc, axis=0, keepdims=True) * inv_hw
    d = acc - mu
    mean_ref[0] = mu
    m2_ref[0] = jnp.sum(d * d, axis=0, keepdims=True)

    if has_sc:
        # fused 1x1 projection shortcut (its window is already in col_ref)
        xs = col_ref[:, pl.ds(sc_tap * cp, cp)]
        ysc = jnp.dot(xs, wsc_ref[...], preferred_element_type=jnp.float32)
        ysc_ref[0] = ysc.astype(ysc_ref.dtype)
        mus = jnp.sum(ysc, axis=0, keepdims=True) * inv_hw
        ds = ysc - mus
        msc_ref[0] = mus
        m2sc_ref[0] = jnp.sum(ds * ds, axis=0, keepdims=True)


def _conv_stats_call(xin, w, *, ks2, ho, wo, sc_tap, wsc=None):
    n, H2, W2, cin_p = xin.shape
    ktot, cout_p = w.shape
    hw = ho * wo
    has_sc = wsc is not None

    in_specs = [pl.BlockSpec((1, H2, W2, cin_p), lambda i: (i, 0, 0, 0)),
                _const_spec((ktot, cout_p))]
    inputs = [xin, w]
    if has_sc:
        in_specs.append(_const_spec((cin_p, cout_p)))
        inputs.append(wsc)

    y_shape = jax.ShapeDtypeStruct((n, hw, cout_p), jnp.bfloat16)
    y_spec = pl.BlockSpec((1, hw, cout_p), lambda i: (i, 0, 0))
    stat_shape = jax.ShapeDtypeStruct((n, 1, cout_p), jnp.float32)
    stat_spec = pl.BlockSpec((1, 1, cout_p), lambda i: (i, 0, 0))

    out_shape = [y_shape, stat_shape, stat_shape]
    out_specs = [y_spec, stat_spec, stat_spec]
    if has_sc:
        out_shape += [y_shape, stat_shape, stat_shape]
        out_specs += [y_spec, stat_spec, stat_spec]

    flops = 2 * n * hw * ktot * cout_p
    if has_sc:
        flops += 2 * n * hw * cin_p * cout_p
    bytes_accessed = (sum(int(a.size) * a.dtype.itemsize for a in inputs)
                      + sum(int(np.prod(s.shape)) * jnp.dtype(s.dtype).itemsize
                            for s in out_shape))

    return pl.pallas_call(
        functools.partial(_conv_stats_kernel, ks2, ho, wo, sc_tap, has_sc),
        grid=(n,),
        in_specs=in_specs,
        out_specs=tuple(out_specs),
        out_shape=tuple(out_shape),
        scratch_shapes=[pltpu.VMEM((hw, ktot), jnp.bfloat16)],
        compiler_params=_compiler_params(),
        cost_estimate=pl.CostEstimate(flops=int(flops), transcendentals=0,
                                      bytes_accessed=int(bytes_accessed)),
    )(*inputs)


# ---------------------------------------------------------------------------
# K2: BN1 + ReLU fused into conv2 (3x3, stride 1) + BN2 partial stats
# ---------------------------------------------------------------------------
def _bnrelu_conv_stats_kernel(ho, wo, y_ref, scale_ref, shift_ref, w_ref,
                              o_ref, mean_ref, m2_ref, pad_ref, col_ref):
    cp = y_ref.shape[-1]
    hw = ho * wo
    inv_hw = 1.0 / hw

    # BN1 + ReLU on the fly, written into a spatially padded bf16 scratch.
    pad_ref[...] = jnp.zeros(pad_ref.shape, pad_ref.dtype)
    act = jnp.maximum(y_ref[0].astype(jnp.float32) * scale_ref[...]
                      + shift_ref[...], 0.0)
    pad_ref[pl.ds(1, ho), pl.ds(1, wo), :] = act.reshape(ho, wo, cp).astype(pad_ref.dtype)

    # im2col + one matmul
    for kh in range(3):
        for kw in range(3):
            t = kh * 3 + kw
            win = pad_ref[pl.ds(kh, ho), pl.ds(kw, wo), :]
            col_ref[:, pl.ds(t * cp, cp)] = win.reshape(hw, cp)

    acc = jnp.dot(col_ref[...], w_ref[...], preferred_element_type=jnp.float32)
    o_ref[0] = acc.astype(o_ref.dtype)

    mu = jnp.sum(acc, axis=0, keepdims=True) * inv_hw
    d = acc - mu
    mean_ref[0] = mu
    m2_ref[0] = jnp.sum(d * d, axis=0, keepdims=True)


def _bnrelu_conv_stats_call(y1, scale, shift, w, *, ho, wo):
    n, hw, cout_p = y1.shape
    ktot = w.shape[0]

    in_specs = [pl.BlockSpec((1, hw, cout_p), lambda i: (i, 0, 0)),
                _const_spec((1, cout_p)),
                _const_spec((1, cout_p)),
                _const_spec((ktot, cout_p))]
    stat_shape = jax.ShapeDtypeStruct((n, 1, cout_p), jnp.float32)
    stat_spec = pl.BlockSpec((1, 1, cout_p), lambda i: (i, 0, 0))
    out_shape = (jax.ShapeDtypeStruct((n, hw, cout_p), jnp.bfloat16),
                 stat_shape, stat_shape)
    out_specs = (pl.BlockSpec((1, hw, cout_p), lambda i: (i, 0, 0)),
                 stat_spec, stat_spec)
    scratch = [pltpu.VMEM((ho + 2, wo + 2, cout_p), jnp.bfloat16),
               pltpu.VMEM((hw, ktot), jnp.bfloat16)]

    flops = 2 * n * hw * ktot * cout_p + 6 * n * hw * cout_p
    bytes_accessed = (int(y1.size) * 2 + int(w.size) * 2
                      + n * hw * cout_p * 2 + 2 * n * cout_p * 4)

    return pl.pallas_call(
        functools.partial(_bnrelu_conv_stats_kernel, ho, wo),
        grid=(n,),
        in_specs=in_specs,
        out_specs=out_specs,
        out_shape=out_shape,
        scratch_shapes=scratch,
        compiler_params=_compiler_params(),
        cost_estimate=pl.CostEstimate(flops=int(flops), transcendentals=0,
                                      bytes_accessed=int(bytes_accessed)),
    )(y1, scale, shift, w)


# ---------------------------------------------------------------------------
# K3: BN2 + shortcut(BN) + residual add + ReLU (bf16 streams)
# ---------------------------------------------------------------------------
def _finalize_kernel(mode, ho, wo, *refs):
    hw = ho * wo
    if mode == "add":
        y_ref, x_ref, scale_ref, shift_ref, o_ref = refs
        cp = y_ref.shape[-1]
        res = x_ref[0, pl.ds(1, ho), pl.ds(1, wo), :].reshape(hw, cp).astype(jnp.float32)
        val = y_ref[0].astype(jnp.float32) * scale_ref[...] + shift_ref[...] + res
    else:  # "proj"
        y_ref, ysc_ref, scale_ref, shift_ref, ssc_ref, bsc_ref, o_ref = refs
        val = (y_ref[0].astype(jnp.float32) * scale_ref[...] + shift_ref[...]
               + ysc_ref[0].astype(jnp.float32) * ssc_ref[...] + bsc_ref[...])
    o_ref[0] = jnp.maximum(val, 0.0).astype(o_ref.dtype)


def _finalize_call(y2, scale, shift, *, mode, ho, wo, res,
                   scale_sc=None, shift_sc=None):
    n, hw, cout_p = y2.shape
    row_spec = pl.BlockSpec((1, hw, cout_p), lambda i: (i, 0, 0))

    if mode == "add":
        _, H2, W2, cp = res.shape
        in_specs = [row_spec,
                    pl.BlockSpec((1, H2, W2, cp), lambda i: (i, 0, 0, 0)),
                    _const_spec((1, cout_p)), _const_spec((1, cout_p))]
        inputs = [y2, res, scale, shift]
    else:
        in_specs = [row_spec, row_spec,
                    _const_spec((1, cout_p)), _const_spec((1, cout_p)),
                    _const_spec((1, cout_p)), _const_spec((1, cout_p))]
        inputs = [y2, res, scale, shift, scale_sc, shift_sc]

    bytes_accessed = (sum(int(a.size) * a.dtype.itemsize for a in inputs)
                      + n * hw * cout_p * 2)

    return pl.pallas_call(
        functools.partial(_finalize_kernel, mode, ho, wo),
        grid=(n,),
        in_specs=in_specs,
        out_specs=pl.BlockSpec((1, hw, cout_p), lambda i: (i, 0, 0)),
        out_shape=jax.ShapeDtypeStruct((n, hw, cout_p), jnp.bfloat16),
        compiler_params=_compiler_params(),
        cost_estimate=pl.CostEstimate(flops=int(6 * n * hw * cout_p),
                                      transcendentals=0,
                                      bytes_accessed=int(bytes_accessed)),
    )(*inputs)


# ---------------------------------------------------------------------------
# XLA glue: weight packing (space-to-depth layout) + BN stat folding
# ---------------------------------------------------------------------------
def _bn_scale_shift(mean_i, m2_i, gamma, beta, hw, cout_p):
    """Chan/Welford combine of per-image (mean, M2) partials -> scale/shift."""
    n = mean_i.shape[0]
    means = mean_i.reshape(n, cout_p)
    mean = jnp.mean(means, axis=0)
    dm = means - mean[None, :]
    m2 = jnp.sum(m2_i.reshape(n, cout_p), axis=0) + hw * jnp.sum(dm * dm, axis=0)
    var = jnp.maximum(m2 / (n * hw), 0.0)
    g = jnp.pad(gamma.astype(jnp.float32), (0, cout_p - gamma.shape[0]))
    b = jnp.pad(beta.astype(jnp.float32), (0, cout_p - beta.shape[0]))
    scale = g * jax.lax.rsqrt(var + EPS)
    shift = b - mean * scale
    return scale.reshape(1, cout_p), shift.reshape(1, cout_p)


def _pack_conv3x3(w_oihw, s, cin_p, cout_p):
    """(Cout,Cin,3,3) -> (ks2*ks2*cin_p, cout_p) bf16 in space-to-depth layout."""
    co, ci, kh, kw = w_oihw.shape
    ks2 = -(-kh // s)
    w = jnp.transpose(w_oihw.astype(jnp.float32), (2, 3, 1, 0))            # (3,3,ci,co)
    w = jnp.pad(w, ((0, ks2 * s - kh), (0, ks2 * s - kw), (0, 0), (0, 0)))
    w = w.reshape(ks2, s, ks2, s, ci, co).transpose(0, 2, 1, 3, 4, 5)      # (a,b,p,q,ci,co)
    w = w.reshape(ks2, ks2, s * s * ci, co)
    w = jnp.pad(w, ((0, 0), (0, 0), (0, cin_p - s * s * ci), (0, cout_p - co)))
    return w.reshape(ks2 * ks2 * cin_p, cout_p).astype(jnp.bfloat16)


def _pack_shortcut1x1(w_oihw, s, cin_p, cout_p):
    co, ci = w_oihw.shape[:2]
    w = jnp.transpose(w_oihw.astype(jnp.float32), (2, 3, 1, 0)).reshape(ci, co)
    wbig = jnp.zeros((s, s, ci, co), jnp.float32).at[1 % s, 1 % s].set(w)
    wbig = wbig.reshape(s * s * ci, co)
    wbig = jnp.pad(wbig, ((0, cin_p - s * s * ci), (0, cout_p - co)))
    return wbig.astype(jnp.bfloat16)


def basic_block_forward(x_nchw, params, stride=1):
    """ResNet BasicBlock forward (training-mode BatchNorm statistics)."""
    n, cin, h, w = x_nchw.shape
    cout = params["w1"].shape[0]
    s = stride
    ks2 = -(-3 // s)                    # 3x3 conv -> ks2 taps per axis after s2d
    ho = (h - 1) // s + 1
    wo = (w - 1) // s + 1
    hw = ho * wo
    H2 = ho + ks2 - 1
    W2 = wo + ks2 - 1
    cin_s2d = s * s * cin
    cin_p = _round_up(cin_s2d, LANE)
    cout_p = _round_up(cout, LANE)
    projection = (s != 1) or (cin != cout)
    sc_tap = (1 // s) * ks2 + (1 // s)  # im2col tap holding x[s*r, s*t]

    # ---- input staging: NHWC bf16, one fused spatial+channel pad ----
    x = jnp.transpose(x_nchw, (0, 2, 3, 1)).astype(jnp.bfloat16)
    if s == 1:
        xin = jnp.pad(x, ((0, 0), (1, 1), (1, 1), (0, cin_p - cin)))
    else:
        # space-to-depth so kernels only see stride-1 contiguous windows
        hp, wp = s * H2, s * W2
        xpad = jnp.pad(x, ((0, 0), (1, hp - h - 1), (1, wp - w - 1), (0, 0)))
        xin = xpad.reshape(n, H2, s, W2, s, cin).transpose(0, 1, 3, 2, 4, 5)
        xin = xin.reshape(n, H2, W2, cin_s2d)
        xin = jnp.pad(xin, ((0, 0), (0, 0), (0, 0), (0, cin_p - cin_s2d)))

    w1 = _pack_conv3x3(params["w1"], s, cin_p, cout_p)
    w2 = _pack_conv3x3(params["w2"], 1, cout_p, cout_p)
    wsc = _pack_shortcut1x1(params["ws"], s, cin_p, cout_p) if projection else None

    # ---- conv1 (+ fused 1x1 shortcut) + BN partial stats ----
    outs = _conv_stats_call(xin, w1, ks2=ks2, ho=ho, wo=wo, sc_tap=sc_tap, wsc=wsc)
    if projection:
        y1, mean1, m21, ysc, mean_sc, m2_sc = outs
    else:
        y1, mean1, m21 = outs
    scale1, shift1 = _bn_scale_shift(mean1, m21, params["g1"], params["b1"], hw, cout_p)

    # ---- BN1 + ReLU fused into conv2, + BN2 partial stats ----
    y2, mean2, m22 = _bnrelu_conv_stats_call(y1, scale1, shift1, w2, ho=ho, wo=wo)
    scale2, shift2 = _bn_scale_shift(mean2, m22, params["g2"], params["b2"], hw, cout_p)

    # ---- BN2 + shortcut + residual add + ReLU ----
    if projection:
        scale_sc, shift_sc = _bn_scale_shift(mean_sc, m2_sc, params["gs"], params["bs"],
                                             hw, cout_p)
        out = _finalize_call(y2, scale2, shift2, mode="proj", ho=ho, wo=wo,
                             res=ysc, scale_sc=scale_sc, shift_sc=shift_sc)
    else:
        out = _finalize_call(y2, scale2, shift2, mode="add", ho=ho, wo=wo, res=xin)

    out = out.reshape(n, ho, wo, cout_p)[..., :cout]
    return jnp.transpose(out, (0, 3, 1, 2)).astype(jnp.float32)   # NHWC -> NCHW


# ---------------------------------------------------------------------------
# Pure-JAX references (f32 and bf16-matched) for numerical checks
# ---------------------------------------------------------------------------
def _bn_ref(y_stats, y_apply, gamma, beta):
    mean = jnp.mean(y_stats, axis=(0, 2, 3), keepdims=True)
    var = jnp.mean((y_stats - mean) ** 2, axis=(0, 2, 3), keepdims=True)
    return ((y_apply - mean) * jax.lax.rsqrt(var + EPS)
            * gamma.reshape(1, -1, 1, 1) + beta.reshape(1, -1, 1, 1))


def reference_forward(x, params, stride=1, match_kernel_precision=False):
    mp = match_kernel_precision

    def conv(x_, w_, s_, p_):
        if mp:
            x_ = x_.astype(jnp.bfloat16)
            w_ = w_.astype(jnp.bfloat16)
        return jax.lax.conv_general_dilated(
            x_, w_, (s_, s_), [(p_, p_)] * 2,
            dimension_numbers=("NCHW", "OIHW", "NCHW"),
            preferred_element_type=jnp.float32)

    def q(t):
        return t.astype(jnp.bfloat16).astype(jnp.float32) if mp else t

    y1 = conv(x, params["w1"], stride, 1)
    out1 = q(jnp.maximum(_bn_ref(y1, q(y1), params["g1"], params["b1"]), 0.0))
    y2 = conv(out1, params["w2"], 1, 1)
    bn2 = _bn_ref(y2, q(y2), params["g2"], params["b2"])
    cin, cout = x.shape[1], params["w1"].shape[0]
    if stride != 1 or cin != cout:
        ysc = conv(x, params["ws"], stride, 0)
        sc = _bn_ref(ysc, q(ysc), params["gs"], params["bs"])
    else:
        sc = q(x)
    return q(jnp.maximum(bn2 + sc, 0.0))


# ---------------------------------------------------------------------------
if __name__ == "__main__":
    def make_params(key, cin, cout, projection):
        ks = jax.random.split(key, 9)
        p = {
            "w1": 0.1 * jax.random.normal(ks[0], (cout, cin, 3, 3), jnp.float32),
            "g1": 1.0 + 0.1 * jax.random.normal(ks[1], (cout,), jnp.float32),
            "b1": 0.1 * jax.random.normal(ks[2], (cout,), jnp.float32),
            "w2": 0.1 * jax.random.normal(ks[3], (cout, cout, 3, 3), jnp.float32),
            "g2": 1.0 + 0.1 * jax.random.normal(ks[4], (cout,), jnp.float32),
            "b2": 0.1 * jax.random.normal(ks[5], (cout,), jnp.float32),
        }
        if projection:
            p["ws"] = 0.1 * jax.random.normal(ks[6], (cout, cin, 1, 1), jnp.float32)
            p["gs"] = 1.0 + 0.1 * jax.random.normal(ks[7], (cout,), jnp.float32)
            p["bs"] = 0.1 * jax.random.normal(ks[8], (cout,), jnp.float32)
        return p

    def run_case(seed, n, cin, h, w, cout, stride):
        key = jax.random.PRNGKey(seed)
        kx, kp = jax.random.split(key)
        x = jax.random.normal(kx, (n, cin, h, w), jnp.float32)
        projection = (stride != 1) or (cin != cout)
        params = make_params(kp, cin, cout, projection)

        fwd = jax.jit(functools.partial(basic_block_forward, stride=stride))
        out = jax.block_until_ready(fwd(x, params))

        ho = (h - 1) // stride + 1
        wo = (w - 1) // stride + 1
        assert out.shape == (n, cout, ho, wo), out.shape

        # Tight check vs the bf16-matched reference.
        ref_m = reference_forward(x, params, stride=stride,
                                  match_kernel_precision=True)
        np.testing.assert_allclose(np.asarray(out), np.asarray(ref_m),
                                   rtol=2e-2, atol=2e-2)
        # Loose sanity check vs the pure-f32 reference.
        ref_f = reference_forward(x, params, stride=stride,
                                  match_kernel_precision=False)
        np.testing.assert_allclose(np.asarray(out), np.asarray(ref_f),
                                   rtol=1e-1, atol=1e-1)

    # Projection shortcut (cin != cout), stride 1.
    run_case(0, n=2, cin=4, h=16, w=16, cout=8, stride=1)
    # Identity shortcut.
    run_case(1, n=2, cin=8, h=16, w=16, cout=8, stride=1)
    # Downsampling projection block (stride 2, cin != cout).
    run_case(2, n=2, cin=8, h=16, w=16, cout=16, stride=2)
    print("KERNEL_OK")
</pallas_src>

<mosaic_0001>
module attributes {stable_mosaic.version = 11 : i64} {
  func.func @_conv_stats_kernel(%arg0: i32, %arg1: memref<1x18x18x128xbf16, #tpu.memory_space<vmem>>, %arg2: memref<1152x128xbf16, #tpu.memory_space<vmem>>, %arg3: memref<128x128xbf16, #tpu.memory_space<vmem>>, %arg4: memref<1x256x128xbf16, #tpu.memory_space<vmem>>, %arg5: memref<1x1x128xf32, #tpu.memory_space<vmem>>, %arg6: memref<1x1x128xf32, #tpu.memory_space<vmem>>, %arg7: memref<1x256x128xbf16, #tpu.memory_space<vmem>>, %arg8: memref<1x1x128xf32, #tpu.memory_space<vmem>>, %arg9: memref<1x1x128xf32, #tpu.memory_space<vmem>>, %arg10: memref<256x1152xbf16, #tpu.memory_space<vmem>>) attributes {dimension_semantics = [#tpu.dimension_semantics<parallel>], iteration_bounds = array<i64: 2>, scalar_prefetch = 0 : i64, scratch_operands = 1 : i64, tpu.core_type = #tpu.core_type<tc>, window_params = [{transform_indices = @transform_0, window_bounds = array<i64: 1, 18, 18, 128>}, {pipeline_mode = #tpu.pipeline_mode<synchronous>, transform_indices = @transform_1, window_bounds = array<i64: 1152, 128>}, {pipeline_mode = #tpu.pipeline_mode<synchronous>, transform_indices = @transform_2, window_bounds = array<i64: 128, 128>}, {transform_indices = @transform_3, window_bounds = array<i64: 1, 256, 128>}, {transform_indices = @transform_4, window_bounds = array<i64: 1, 1, 128>}, {transform_indices = @transform_5, window_bounds = array<i64: 1, 1, 128>}, {transform_indices = @transform_6, window_bounds = array<i64: 1, 256, 128>}, {transform_indices = @transform_7, window_bounds = array<i64: 1, 1, 128>}, {transform_indices = @transform_8, window_bounds = array<i64: 1, 1, 128>}]} {
    %c0 = arith.constant 0 : index
    %c0_0 = arith.constant 0 : index
    %c0_1 = arith.constant 0 : index
    %c0_2 = arith.constant 0 : index
    %0 = vector.load %arg1[%c0, %c0_0, %c0_1, %c0_2] : memref<1x18x18x128xbf16, #tpu.memory_space<vmem>>, vector<1x16x16x128xbf16>
    %1 = vector.shape_cast %0 : vector<1x16x16x128xbf16> to vector<16x16x128xbf16>
    %2 = vector.shape_cast %1 : vector<16x16x128xbf16> to vector<256x128xbf16>
    %c0_3 = arith.constant 0 : index
    %c0_4 = arith.constant 0 : index
    %3 = vector.load %arg10[%c0_3, %c0_4] : memref<256x1152xbf16, #tpu.memory_space<vmem>>, vector<256x128xbf16>
    tpu.vector_store %arg10[%c0_3, %c0_4], %2 {strides = array<i32>} : memref<256x1152xbf16, #tpu.memory_space<vmem>>, vector<256x128xbf16>,
    %c0_5 = arith.constant 0 : index
    %c0_6 = arith.constant 0 : index
    %c1 = arith.constant 1 : index
    %c0_7 = arith.constant 0 : index
    %4 = vector.load %arg1[%c0_5, %c0_6, %c1, %c0_7] : memref<1x18x18x128xbf16, #tpu.memory_space<vmem>>, vector<1x16x16x128xbf16>
    %5 = vector.shape_cast %4 : vector<1x16x16x128xbf16> to vector<16x16x128xbf16>
    %6 = vector.shape_cast %5 : vector<16x16x128xbf16> to vector<256x128xbf16>
    %c0_8 = arith.constant 0 : index
    %c128 = arith.constant 128 : index
    %7 = vector.load %arg10[%c0_8, %c128] : memref<256x1152xbf16, #tpu.memory_space<vmem>>, vector<256x128xbf16>
    tpu.vector_store %arg10[%c0_8, %c128], %6 {strides = array<i32>} : memref<256x1152xbf16, #tpu.memory_space<vmem>>, vector<256x128xbf16>,
    %c0_9 = arith.constant 0 : index
    %c0_10 = arith.constant 0 : index
    %c2 = arith.constant 2 : index
    %c0_11 = arith.constant 0 : index
    %8 = vector.load %arg1[%c0_9, %c0_10, %c2, %c0_11] : memref<1x18x18x128xbf16, #tpu.memory_space<vmem>>, vector<1x16x16x128xbf16>
    %9 = vector.shape_cast %8 : vector<1x16x16x128xbf16> to vector<16x16x128xbf16>
    %10 = vector.shape_cast %9 : vector<16x16x128xbf16> to vector<256x128xbf16>
    %c0_12 = arith.constant 0 : index
    %c256 = arith.constant 256 : index
    %11 = vector.load %arg10[%c0_12, %c256] : memref<256x1152xbf16, #tpu.memory_space<vmem>>, vector<256x128xbf16>
    tpu.vector_store %arg10[%c0_12, %c256], %10 {strides = array<i32>} : memref<256x1152xbf16, #tpu.memory_space<vmem>>, vector<256x128xbf16>,
    %c0_13 = arith.constant 0 : index
    %c1_14 = arith.constant 1 : index
    %c0_15 = arith.constant 0 : index
    %c0_16 = arith.constant 0 : index
    %12 = vector.load %arg1[%c0_13, %c1_14, %c0_15, %c0_16] : memref<1x18x18x128xbf16, #tpu.memory_space<vmem>>, vector<1x16x16x128xbf16>
    %13 = vector.shape_cast %12 : vector<1x16x16x128xbf16> to vector<16x16x128xbf16>
    %14 = vector.shape_cast %13 : vector<16x16x128xbf16> to vector<256x128xbf16>
    %c0_17 = arith.constant 0 : index
    %c384 = arith.constant 384 : index
    %15 = vector.load %arg10[%c0_17, %c384] : memref<256x1152xbf16, #tpu.memory_space<vmem>>, vector<256x128xbf16>
    tpu.vector_store %arg10[%c0_17, %c384], %14 {strides = array<i32>} : memref<256x1152xbf16, #tpu.memory_space<vmem>>, vector<256x128xbf16>,
    %c0_18 = arith.constant 0 : index
    %c1_19 = arith.constant 1 : index
    %c1_20 = arith.constant 1 : index
    %c0_21 = arith.constant 0 : index
    %16 = vector.load %arg1[%c0_18, %c1_19, %c1_20, %c0_21] : memref<1x18x18x128xbf16, #tpu.memory_space<vmem>>, vector<1x16x16x128xbf16>
    %17 = vector.shape_cast %16 : vector<1x16x16x128xbf16> to vector<16x16x128xbf16>
    %18 = vector.shape_cast %17 : vector<16x16x128xbf16> to vector<256x128xbf16>
    %c0_22 = arith.constant 0 : index
    %c512 = arith.constant 512 : index
    %19 = vector.load %arg10[%c0_22, %c512] : memref<256x1152xbf16, #tpu.memory_space<vmem>>, vector<256x128xbf16>
    tpu.vector_store %arg10[%c0_22, %c512], %18 {strides = array<i32>} : memref<256x1152xbf16, #tpu.memory_space<vmem>>, vector<256x128xbf16>,
    %c0_23 = arith.constant 0 : index
    %c1_24 = arith.constant 1 : index
    %c2_25 = arith.constant 2 : index
    %c0_26 = arith.constant 0 : index
    %20 = vector.load %arg1[%c0_23, %c1_24, %c2_25, %c0_26] : memref<1x18x18x128xbf16, #tpu.memory_space<vmem>>, vector<1x16x16x128xbf16>
    %21 = vector.shape_cast %20 : vector<1x16x16x128xbf16> to vector<16x16x128xbf16>
    %22 = vector.shape_cast %21 : vector<16x16x128xbf16> to vector<256x128xbf16>
    %c0_27 = arith.constant 0 : index
    %c640 = arith.constant 640 : index
    %23 = vector.load %arg10[%c0_27, %c640] : memref<256x1152xbf16, #tpu.memory_space<vmem>>, vector<256x128xbf16>
    tpu.vector_store %arg10[%c0_27, %c640], %22 {strides = array<i32>} : memref<256x1152xbf16, #tpu.memory_space<vmem>>, vector<256x128xbf16>,
    %c0_28 = arith.constant 0 : index
    %c2_29 = arith.constant 2 : index
    %c0_30 = arith.constant 0 : index
    %c0_31 = arith.constant 0 : index
    %24 = vector.load %arg1[%c0_28, %c2_29, %c0_30, %c0_31] : memref<1x18x18x128xbf16, #tpu.memory_space<vmem>>, vector<1x16x16x128xbf16>
    %25 = vector.shape_cast %24 : vector<1x16x16x128xbf16> to vector<16x16x128xbf16>
    %26 = vector.shape_cast %25 : vector<16x16x128xbf16> to vector<256x128xbf16>
    %c0_32 = arith.constant 0 : index
    %c768 = arith.constant 768 : index
    %27 = vector.load %arg10[%c0_32, %c768] : memref<256x1152xbf16, #tpu.memory_space<vmem>>, vector<256x128xbf16>
    tpu.vector_store %arg10[%c0_32, %c768], %26 {strides = array<i32>} : memref<256x1152xbf16, #tpu.memory_space<vmem>>, vector<256x128xbf16>,
    %c0_33 = arith.constant 0 : index
    %c2_34 = arith.constant 2 : index
    %c1_35 = arith.constant 1 : index
    %c0_36 = arith.constant 0 : index
    %28 = vector.load %arg1[%c0_33, %c2_34, %c1_35, %c0_36] : memref<1x18x18x128xbf16, #tpu.memory_space<vmem>>, vector<1x16x16x128xbf16>
    %29 = vector.shape_cast %28 : vector<1x16x16x128xbf16> to vector<16x16x128xbf16>
    %30 = vector.shape_cast %29 : vector<16x16x128xbf16> to vector<256x128xbf16>
    %c0_37 = arith.constant 0 : index
    %c896 = arith.constant 896 : index
    %31 = vector.load %arg10[%c0_37, %c896] : memref<256x1152xbf16, #tpu.memory_space<vmem>>, vector<256x128xbf16>
    tpu.vector_store %arg10[%c0_37, %c896], %30 {strides = array<i32>} : memref<256x1152xbf16, #tpu.memory_space<vmem>>, vector<256x128xbf16>,
    %c0_38 = arith.constant 0 : index
    %c2_39 = arith.constant 2 : index
    %c2_40 = arith.constant 2 : index
    %c0_41 = arith.constant 0 : index
    %32 = vector.load %arg1[%c0_38, %c2_39, %c2_40, %c0_41] : memref<1x18x18x128xbf16, #tpu.memory_space<vmem>>, vector<1x16x16x128xbf16>
    %33 = vector.shape_cast %32 : vector<1x16x16x128xbf16> to vector<16x16x128xbf16>
    %34 = vector.shape_cast %33 : vector<16x16x128xbf16> to vector<256x128xbf16>
    %c0_42 = arith.constant 0 : index
    %c1024 = arith.constant 1024 : index
    %35 = vector.load %arg10[%c0_42, %c1024] : memref<256x1152xbf16, #tpu.memory_space<vmem>>, vector<256x128xbf16>
    tpu.vector_store %arg10[%c0_42, %c1024], %34 {strides = array<i32>} : memref<256x1152xbf16, #tpu.memory_space<vmem>>, vector<256x128xbf16>,
    %c0_43 = arith.constant 0 : index
    %c0_44 = arith.constant 0 : index
    %36 = vector.load %arg10[%c0_43, %c0_44] : memref<256x1152xbf16, #tpu.memory_space<vmem>>, vector<256x1152xbf16>
    %c0_45 = arith.constant 0 : index
    %c0_46 = arith.constant 0 : index
    %37 = vector.load %arg2[%c0_45, %c0_46] : memref<1152x128xbf16, #tpu.memory_space<vmem>>, vector<1152x128xbf16>
    %cst = arith.constant dense<0.000000e+00> : vector<256x128xf32>
    %38 = tpu.matmul %36, %37, %cst {dimension_numbers = #tpu.dot_dimension_numbers<[1], [0], [0], [1], [0, 0, 1, 1], [], []>} : vector<256x1152xbf16>, vector<1152x128xbf16>, vector<256x128xf32> -> vector<256x128xf32>
    %39 = arith.truncf %38 : vector<256x128xf32> to vector<256x128xbf16>
    %c0_47 = arith.constant 0 : index
    %c0_48 = arith.constant 0 : index
    %c0_49 = arith.constant 0 : index
    %40 = vector.load %arg4[%c0_47, %c0_48, %c0_49] : memref<1x256x128xbf16, #tpu.memory_space<vmem>>, vector<1x256x128xbf16>
    %41 = vector.shape_cast %40 : vector<1x256x128xbf16> to vector<256x128xbf16>
    %42 = vector.shape_cast %39 : vector<256x128xbf16> to vector<1x256x128xbf16>
    tpu.vector_store %arg4[%c0_47, %c0_48, %c0_49], %42 {strides = array<i32>} : memref<1x256x128xbf16, #tpu.memory_space<vmem>>, vector<1x256x128xbf16>,
    %cst_50 = arith.constant dense<0.000000e+00> : vector<128xf32>
    %43 = vector.multi_reduction <add>, %38, %cst_50 [0] : vector<256x128xf32> to vector<128xf32>
    %44 = vector.shape_cast %43 : vector<128xf32> to vector<1x128xf32>
    %cst_51 = arith.constant 3.906250e-03 : f32
    %45 = vector.broadcast %cst_51 : f32 to vector<1x128xf32>
    %46 = arith.mulf %44, %45 : vector<1x128xf32>
    %47 = vector.broadcast %46 : vector<1x128xf32> to vector<256x128xf32>
    %48 = arith.subf %38, %47 : vector<256x128xf32>
    %c0_52 = arith.constant 0 : index
    %c0_53 = arith.constant 0 : index
    %c0_54 = arith.constant 0 : index
    %49 = vector.load %arg5[%c0_52, %c0_53, %c0_54] : memref<1x1x128xf32, #tpu.memory_space<vmem>>, vector<1x1x128xf32>
    %50 = vector.shape_cast %49 : vector<1x1x128xf32> to vector<1x128xf32>
    %51 = vector.shape_cast %46 : vector<1x128xf32> to vector<1x1x128xf32>
    tpu.vector_store %arg5[%c0_52, %c0_53, %c0_54], %51 {strides = array<i32>} : memref<1x1x128xf32, #tpu.memory_space<vmem>>, vector<1x1x128xf32>,
    %52 = arith.mulf %48, %48 : vector<256x128xf32>
    %cst_55 = arith.constant dense<0.000000e+00> : vector<128xf32>
    %53 = vector.multi_reduction <add>, %52, %cst_55 [0] : vector<256x128xf32> to vector<128xf32>
    %54 = vector.shape_cast %53 : vector<128xf32> to vector<1x128xf32>
    %c0_56 = arith.constant 0 : index
    %c0_57 = arith.constant 0 : index
    %c0_58 = arith.constant 0 : index
    %55 = vector.load %arg6[%c0_56, %c0_57, %c0_58] : memref<1x1x128xf32, #tpu.memory_space<vmem>>, vector<1x1x128xf32>
    %56 = vector.shape_cast %55 : vector<1x1x128xf32> to vector<1x128xf32>
    %57 = vector.shape_cast %54 : vector<1x128xf32> to vector<1x1x128xf32>
    tpu.vector_store %arg6[%c0_56, %c0_57, %c0_58], %57 {strides = array<i32>} : memref<1x1x128xf32, #tpu.memory_space<vmem>>, vector<1x1x128xf32>,
    %c0_59 = arith.constant 0 : index
    %c512_60 = arith.constant 512 : index
    %58 = vector.load %arg10[%c0_59, %c512_60] : memref<256x1152xbf16, #tpu.memory_space<vmem>>, vector<256x128xbf16>
    %c0_61 = arith.constant 0 : index
    %c0_62 = arith.constant 0 : index
    %59 = vector.load %arg3[%c0_61, %c0_62] : memref<128x128xbf16, #tpu.memory_space<vmem>>, vector<128x128xbf16>
    %cst_63 = arith.constant dense<0.000000e+00> : vector<256x128xf32>
    %60 = tpu.matmul %58, %59, %cst_63 {dimension_numbers = #tpu.dot_dimension_numbers<[1], [0], [0], [1], [0, 0, 1, 1], [], []>} : vector<256x128xbf16>, vector<128x128xbf16>, vector<256x128xf32> -> vector<256x128xf32>
    %61 = arith.truncf %60 : vector<256x128xf32> to vector<256x128xbf16>
    %c0_64 = arith.constant 0 : index
    %c0_65 = arith.constant 0 : index
    %c0_66 = arith.constant 0 : index
    %62 = vector.load %arg7[%c0_64, %c0_65, %c0_66] : memref<1x256x128xbf16, #tpu.memory_space<vmem>>, vector<1x256x128xbf16>
    %63 = vector.shape_cast %62 : vector<1x256x128xbf16> to vector<256x128xbf16>
    %64 = vector.shape_cast %61 : vector<256x128xbf16> to vector<1x256x128xbf16>
    tpu.vector_store %arg7[%c0_64, %c0_65, %c0_66], %64 {strides = array<i32>} : memref<1x256x128xbf16, #tpu.memory_space<vmem>>, vector<1x256x128xbf16>,
    %cst_67 = arith.constant dense<0.000000e+00> : vector<128xf32>
    %65 = vector.multi_reduction <add>, %60, %cst_67 [0] : vector<256x128xf32> to vector<128xf32>
    %66 = vector.shape_cast %65 : vector<128xf32> to vector<1x128xf32>
    %cst_68 = arith.constant 3.906250e-03 : f32
    %67 = vector.broadcast %cst_68 : f32 to vector<1x128xf32>
    %68 = arith.mulf %66, %67 : vector<1x128xf32>
    %69 = vector.broadcast %68 : vector<1x128xf32> to vector<256x128xf32>
    %70 = arith.subf %60, %69 : vector<256x128xf32>
    %c0_69 = arith.constant 0 : index
    %c0_70 = arith.constant 0 : index
    %c0_71 = arith.constant 0 : index
    %71 = vector.load %arg8[%c0_69, %c0_70, %c0_71] : memref<1x1x128xf32, #tpu.memory_space<vmem>>, vector<1x1x128xf32>
    %72 = vector.shape_cast %71 : vector<1x1x128xf32> to vector<1x128xf32>
    %73 = vector.shape_cast %68 : vector<1x128xf32> to vector<1x1x128xf32>
    tpu.vector_store %arg8[%c0_69, %c0_70, %c0_71], %73 {strides = array<i32>} : memref<1x1x128xf32, #tpu.memory_space<vmem>>, vector<1x1x128xf32>,
    %74 = arith.mulf %70, %70 : vector<256x128xf32>
    %cst_72 = arith.constant dense<0.000000e+00> : vector<128xf32>
    %75 = vector.multi_reduction <add>, %74, %cst_72 [0] : vector<256x128xf32> to vector<128xf32>
    %76 = vector.shape_cast %75 : vector<128xf32> to vector<1x128xf32>
    %c0_73 = arith.constant 0 : index
    %c0_74 = arith.constant 0 : index
    %c0_75 = arith.constant 0 : index
    %77 = vector.load %arg9[%c0_73, %c0_74, %c0_75] : memref<1x1x128xf32, #tpu.memory_space<vmem>>, vector<1x1x128xf32>
    %78 = vector.shape_cast %77 : vector<1x1x128xf32> to vector<1x128xf32>
    %79 = vector.shape_cast %76 : vector<1x128xf32> to vector<1x1x128xf32>
    tpu.vector_store %arg9[%c0_73, %c0_74, %c0_75], %79 {strides = array<i32>} : memref<1x1x128xf32, #tpu.memory_space<vmem>>, vector<1x1x128xf32>,
    return
  }
  func.func @transform_0(%arg0: i32) -> (i32, i32, i32, i32) {
    %c0_i32 = arith.constant 0 : i32
    %c0_i32_0 = arith.constant 0 : i32
    %c0_i32_1 = arith.constant 0 : i32
    %c0_i32_2 = arith.constant 0 : i32
    return %arg0, %c0_i32, %c0_i32_0, %c0_i32_1 : i32, i32, i32, i32
  }
  func.func @transform_1(%arg0: i32) -> (i32, i32) {
    %c0_i32 = arith.constant 0 : i32
    %c0_i32_0 = arith.constant 0 : i32
    %c0_i32_1 = arith.constant 0 : i32
    return %c0_i32, %c0_i32_0 : i32, i32
  }
  func.func @transform_2(%arg0: i32) -> (i32, i32) {
    %c0_i32 = arith.constant 0 : i32
    %c0_i32_0 = arith.constant 0 : i32
    %c0_i32_1 = arith.constant 0 : i32
    return %c0_i32, %c0_i32_0 : i32, i32
  }
  func.func @transform_3(%arg0: i32) -> (i32, i32, i32) {
    %c0_i32 = arith.constant 0 : i32
    %c0_i32_0 = arith.constant 0 : i32
    %c0_i32_1 = arith.constant 0 : i32
    return %arg0, %c0_i32, %c0_i32_0 : i32, i32, i32
  }
  func.func @transform_4(%arg0: i32) -> (i32, i32, i32) {
    %c0_i32 = arith.constant 0 : i32
    %c0_i32_0 = arith.constant 0 : i32
    %c0_i32_1 = arith.constant 0 : i32
    return %arg0, %c0_i32, %c0_i32_0 : i32, i32, i32
  }
  func.func @transform_5(%arg0: i32) -> (i32, i32, i32) {
    %c0_i32 = arith.constant 0 : i32
    %c0_i32_0 = arith.constant 0 : i32
    %c0_i32_1 = arith.constant 0 : i32
    return %arg0, %c0_i32, %c0_i32_0 : i32, i32, i32
  }
  func.func @transform_6(%arg0: i32) -> (i32, i32, i32) {
    %c0_i32 = arith.constant 0 : i32
    %c0_i32_0 = arith.constant 0 : i32
    %c0_i32_1 = arith.constant 0 : i32
    return %arg0, %c0_i32, %c0_i32_0 : i32, i32, i32
  }
  func.func @transform_7(%arg0: i32) -> (i32, i32, i32) {
    %c0_i32 = arith.constant 0 : i32
    %c0_i32_0 = arith.constant 0 : i32
    %c0_i32_1 = arith.constant 0 : i32
    return %arg0, %c0_i32, %c0_i32_0 : i32, i32, i32
  }
  func.func @transform_8(%arg0: i32) -> (i32, i32, i32) {
    %c0_i32 = arith.constant 0 : i32
    %c0_i32_0 = arith.constant 0 : i32
    %c0_i32_1 = arith.constant 0 : i32
    return %arg0, %c0_i32, %c0_i32_0 : i32, i32, i32
  }
}

module attributes {stable_mosaic.version = 11 : i64} {
  func.func @_bnrelu_conv_stats_kernel(%arg0: i32, %arg1: memref<1x256x128xbf16, #tpu.memory_space<vmem>>, %arg2: memref<1x128xf32, #tpu.memory_space<vmem>>, %arg3: memref<1x128xf32, #tpu.memory_space<vmem>>, %arg4: memref<1152x128xbf16, #tpu.memory_space<vmem>>, %arg5: memref<1x256x128xbf16, #tpu.memory_space<vmem>>, %arg6: memref<1x1x128xf32, #tpu.memory_space<vmem>>, %arg7: memref<1x1x128xf32, #tpu.memory_space<vmem>>, %arg8: memref<18x18x128xbf16, #tpu.memory_space<vmem>>, %arg9: memref<256x1152xbf16, #tpu.memory_space<vmem>>) attributes {dimension_semantics = [#tpu.dimension_semantics<parallel>], iteration_bounds = array<i64: 2>, scalar_prefetch = 0 : i64, scratch_operands = 2 : i64, tpu.core_type = #tpu.core_type<tc>, window_params = [{transform_indices = @transform_0, window_bounds = array<i64: 1, 256, 128>}, {pipeline_mode = #tpu.pipeline_mode<synchronous>, transform_indices = @transform_1, window_bounds = array<i64: 1, 128>}, {pipeline_mode = #tpu.pipeline_mode<synchronous>, transform_indices = @transform_2, window_bounds = array<i64: 1, 128>}, {pipeline_mode = #tpu.pipeline_mode<synchronous>, transform_indices = @transform_3, window_bounds = array<i64: 1152, 128>}, {transform_indices = @transform_4, window_bounds = array<i64: 1, 256, 128>}, {transform_indices = @transform_5, window_bounds = array<i64: 1, 1, 128>}, {transform_indices = @transform_6, window_bounds = array<i64: 1, 1, 128>}]} {
    %cst = arith.constant 0.000000e+00 : bf16
    %0 = vector.broadcast %cst : bf16 to vector<18x18x128xbf16>
    %c0 = arith.constant 0 : index
    %c0_0 = arith.constant 0 : index
    %c0_1 = arith.constant 0 : index
    %1 = vector.load %arg8[%c0, %c0_0, %c0_1] : memref<18x18x128xbf16, #tpu.memory_space<vmem>>, vector<18x18x128xbf16>
    tpu.vector_store %arg8[%c0, %c0_0, %c0_1], %0 {strides = array<i32>} : memref<18x18x128xbf16, #tpu.memory_space<vmem>>, vector<18x18x128xbf16>,
    %c0_2 = arith.constant 0 : index
    %c0_3 = arith.constant 0 : index
    %c0_4 = arith.constant 0 : index
    %2 = vector.load %arg1[%c0_2, %c0_3, %c0_4] : memref<1x256x128xbf16, #tpu.memory_space<vmem>>, vector<1x256x128xbf16>
    %3 = vector.shape_cast %2 : vector<1x256x128xbf16> to vector<256x128xbf16>
    %4 = arith.extf %3 : vector<256x128xbf16> to vector<256x128xf32>
    %c0_5 = arith.constant 0 : index
    %c0_6 = arith.constant 0 : index
    %5 = vector.load %arg2[%c0_5, %c0_6] : memref<1x128xf32, #tpu.memory_space<vmem>>, vector<1x128xf32>
    %6 = vector.broadcast %5 : vector<1x128xf32> to vector<256x128xf32>
    %7 = arith.mulf %4, %6 : vector<256x128xf32>
    %c0_7 = arith.constant 0 : index
    %c0_8 = arith.constant 0 : index
    %8 = vector.load %arg3[%c0_7, %c0_8] : memref<1x128xf32, #tpu.memory_space<vmem>>, vector<1x128xf32>
    %9 = vector.broadcast %8 : vector<1x128xf32> to vector<256x128xf32>
    %10 = arith.addf %7, %9 : vector<256x128xf32>
    %cst_9 = arith.constant 0.000000e+00 : f32
    %11 = vector.broadcast %cst_9 : f32 to vector<256x128xf32>
    %12 = arith.maximumf %10, %11 : vector<256x128xf32>
    %13 = vector.shape_cast %12 : vector<256x128xf32> to vector<16x16x128xf32>
    %14 = arith.truncf %13 : vector<16x16x128xf32> to vector<16x16x128xbf16>
    %c1 = arith.constant 1 : index
    %c1_10 = arith.constant 1 : index
    %c0_11 = arith.constant 0 : index
    %15 = vector.load %arg8[%c1, %c1_10, %c0_11] : memref<18x18x128xbf16, #tpu.memory_space<vmem>>, vector<16x16x128xbf16>
    tpu.vector_store %arg8[%c1, %c1_10, %c0_11], %14 {strides = array<i32>} : memref<18x18x128xbf16, #tpu.memory_space<vmem>>, vector<16x16x128xbf16>,
    %c0_12 = arith.constant 0 : index
    %c0_13 = arith.constant 0 : index
    %c0_14 = arith.constant 0 : index
    %16 = vector.load %arg8[%c0_12, %c0_13, %c0_14] : memref<18x18x128xbf16, #tpu.memory_space<vmem>>, vector<16x16x128xbf16>
    %17 = vector.shape_cast %16 : vector<16x16x128xbf16> to vector<256x128xbf16>
    %c0_15 = arith.constant 0 : index
    %c0_16 = arith.constant 0 : index
    %18 = vector.load %arg9[%c0_15, %c0_16] : memref<256x1152xbf16, #tpu.memory_space<vmem>>, vector<256x128xbf16>
    tpu.vector_store %arg9[%c0_15, %c0_16], %17 {strides = array<i32>} : memref<256x1152xbf16, #tpu.memory_space<vmem>>, vector<256x128xbf16>,
    %c0_17 = arith.constant 0 : index
    %c1_18 = arith.constant 1 : index
    %c0_19 = arith.constant 0 : index
    %19 = vector.load %arg8[%c0_17, %c1_18, %c0_19] : memref<18x18x128xbf16, #tpu.memory_space<vmem>>, vector<16x16x128xbf16>
    %20 = vector.shape_cast %19 : vector<16x16x128xbf16> to vector<256x128xbf16>
    %c0_20 = arith.constant 0 : index
    %c128 = arith.constant 128 : index
    %21 = vector.load %arg9[%c0_20, %c128] : memref<256x1152xbf16, #tpu.memory_space<vmem>>, vector<256x128xbf16>
    tpu.vector_store %arg9[%c0_20, %c128], %20 {strides = array<i32>} : memref<256x1152xbf16, #tpu.memory_space<vmem>>, vector<256x128xbf16>,
    %c0_21 = arith.constant 0 : index
    %c2 = arith.constant 2 : index
    %c0_22 = arith.constant 0 : index
    %22 = vector.load %arg8[%c0_21, %c2, %c0_22] : memref<18x18x128xbf16, #tpu.memory_space<vmem>>, vector<16x16x128xbf16>
    %23 = vector.shape_cast %22 : vector<16x16x128xbf16> to vector<256x128xbf16>
    %c0_23 = arith.constant 0 : index
    %c256 = arith.constant 256 : index
    %24 = vector.load %arg9[%c0_23, %c256] : memref<256x1152xbf16, #tpu.memory_space<vmem>>, vector<256x128xbf16>
    tpu.vector_store %arg9[%c0_23, %c256], %23 {strides = array<i32>} : memref<256x1152xbf16, #tpu.memory_space<vmem>>, vector<256x128xbf16>,
    %c1_24 = arith.constant 1 : index
    %c0_25 = arith.constant 0 : index
    %c0_26 = arith.constant 0 : index
    %25 = vector.load %arg8[%c1_24, %c0_25, %c0_26] : memref<18x18x128xbf16, #tpu.memory_space<vmem>>, vector<16x16x128xbf16>
    %26 = vector.shape_cast %25 : vector<16x16x128xbf16> to vector<256x128xbf16>
    %c0_27 = arith.constant 0 : index
    %c384 = arith.constant 384 : index
    %27 = vector.load %arg9[%c0_27, %c384] : memref<256x1152xbf16, #tpu.memory_space<vmem>>, vector<256x128xbf16>
    tpu.vector_store %arg9[%c0_27, %c384], %26 {strides = array<i32>} : memref<256x1152xbf16, #tpu.memory_space<vmem>>, vector<256x128xbf16>,
    %c1_28 = arith.constant 1 : index
    %c1_29 = arith.constant 1 : index
    %c0_30 = arith.constant 0 : index
    %28 = vector.load %arg8[%c1_28, %c1_29, %c0_30] : memref<18x18x128xbf16, #tpu.memory_space<vmem>>, vector<16x16x128xbf16>
    %29 = vector.shape_cast %28 : vector<16x16x128xbf16> to vector<256x128xbf16>
    %c0_31 = arith.constant 0 : index
    %c512 = arith.constant 512 : index
    %30 = vector.load %arg9[%c0_31, %c512] : memref<256x1152xbf16, #tpu.memory_space<vmem>>, vector<256x128xbf16>
    tpu.vector_store %arg9[%c0_31, %c512], %29 {strides = array<i32>} : memref<256x1152xbf16, #tpu.memory_space<vmem>>, vector<256x128xbf16>,
    %c1_32 = arith.constant 1 : index
    %c2_33 = arith.constant 2 : index
    %c0_34 = arith.constant 0 : index
    %31 = vector.load %arg8[%c1_32, %c2_33, %c0_34] : memref<18x18x128xbf16, #tpu.memory_space<vmem>>, vector<16x16x128xbf16>
    %32 = vector.shape_cast %31 : vector<16x16x128xbf16> to vector<256x128xbf16>
    %c0_35 = arith.constant 0 : index
    %c640 = arith.constant 640 : index
    %33 = vector.load %arg9[%c0_35, %c640] : memref<256x1152xbf16, #tpu.memory_space<vmem>>, vector<256x128xbf16>
    tpu.vector_store %arg9[%c0_35, %c640], %32 {strides = array<i32>} : memref<256x1152xbf16, #tpu.memory_space<vmem>>, vector<256x128xbf16>,
    %c2_36 = arith.constant 2 : index
    %c0_37 = arith.constant 0 : index
    %c0_38 = arith.constant 0 : index
    %34 = vector.load %arg8[%c2_36, %c0_37, %c0_38] : memref<18x18x128xbf16, #tpu.memory_space<vmem>>, vector<16x16x128xbf16>
    %35 = vector.shape_cast %34 : vector<16x16x128xbf16> to vector<256x128xbf16>
    %c0_39 = arith.constant 0 : index
    %c768 = arith.constant 768 : index
    %36 = vector.load %arg9[%c0_39, %c768] : memref<256x1152xbf16, #tpu.memory_space<vmem>>, vector<256x128xbf16>
    tpu.vector_store %arg9[%c0_39, %c768], %35 {strides = array<i32>} : memref<256x1152xbf16, #tpu.memory_space<vmem>>, vector<256x128xbf16>,
    %c2_40 = arith.constant 2 : index
    %c1_41 = arith.constant 1 : index
    %c0_42 = arith.constant 0 : index
    %37 = vector.load %arg8[%c2_40, %c1_41, %c0_42] : memref<18x18x128xbf16, #tpu.memory_space<vmem>>, vector<16x16x128xbf16>
    %38 = vector.shape_cast %37 : vector<16x16x128xbf16> to vector<256x128xbf16>
    %c0_43 = arith.constant 0 : index
    %c896 = arith.constant 896 : index
    %39 = vector.load %arg9[%c0_43, %c896] : memref<256x1152xbf16, #tpu.memory_space<vmem>>, vector<256x128xbf16>
    tpu.vector_store %arg9[%c0_43, %c896], %38 {strides = array<i32>} : memref<256x1152xbf16, #tpu.memory_space<vmem>>, vector<256x128xbf16>,
    %c2_44 = arith.constant 2 : index
    %c2_45 = arith.constant 2 : index
    %c0_46 = arith.constant 0 : index
    %40 = vector.load %arg8[%c2_44, %c2_45, %c0_46] : memref<18x18x128xbf16, #tpu.memory_space<vmem>>, vector<16x16x128xbf16>
    %41 = vector.shape_cast %40 : vector<16x16x128xbf16> to vector<256x128xbf16>
    %c0_47 = arith.constant 0 : index
    %c1024 = arith.constant 1024 : index
    %42 = vector.load %arg9[%c0_47, %c1024] : memref<256x1152xbf16, #tpu.memory_space<vmem>>, vector<256x128xbf16>
    tpu.vector_store %arg9[%c0_47, %c1024], %41 {strides = array<i32>} : memref<256x1152xbf16, #tpu.memory_space<vmem>>, vector<256x128xbf16>,
    %c0_48 = arith.constant 0 : index
    %c0_49 = arith.constant 0 : index
    %43 = vector.load %arg9[%c0_48, %c0_49] : memref<256x1152xbf16, #tpu.memory_space<vmem>>, vector<256x1152xbf16>
    %c0_50 = arith.constant 0 : index
    %c0_51 = arith.constant 0 : index
    %44 = vector.load %arg4[%c0_50, %c0_51] : memref<1152x128xbf16, #tpu.memory_space<vmem>>, vector<1152x128xbf16>
    %cst_52 = arith.constant dense<0.000000e+00> : vector<256x128xf32>
    %45 = tpu.matmul %43, %44, %cst_52 {dimension_numbers = #tpu.dot_dimension_numbers<[1], [0], [0], [1], [0, 0, 1, 1], [], []>} : vector<256x1152xbf16>, vector<1152x128xbf16>, vector<256x128xf32> -> vector<256x128xf32>
    %46 = arith.truncf %45 : vector<256x128xf32> to vector<256x128xbf16>
    %c0_53 = arith.constant 0 : index
    %c0_54 = arith.constant 0 : index
    %c0_55 = arith.constant 0 : index
    %47 = vector.load %arg5[%c0_53, %c0_54, %c0_55] : memref<1x256x128xbf16, #tpu.memory_space<vmem>>, vector<1x256x128xbf16>
    %48 = vector.shape_cast %47 : vector<1x256x128xbf16> to vector<256x128xbf16>
    %49 = vector.shape_cast %46 : vector<256x128xbf16> to vector<1x256x128xbf16>
    tpu.vector_store %arg5[%c0_53, %c0_54, %c0_55], %49 {strides = array<i32>} : memref<1x256x128xbf16, #tpu.memory_space<vmem>>, vector<1x256x128xbf16>,
    %cst_56 = arith.constant dense<0.000000e+00> : vector<128xf32>
    %50 = vector.multi_reduction <add>, %45, %cst_56 [0] : vector<256x128xf32> to vector<128xf32>
    %51 = vector.shape_cast %50 : vector<128xf32> to vector<1x128xf32>
    %cst_57 = arith.constant 3.906250e-03 : f32
    %52 = vector.broadcast %cst_57 : f32 to vector<1x128xf32>
    %53 = arith.mulf %51, %52 : vector<1x128xf32>
    %54 = vector.broadcast %53 : vector<1x128xf32> to vector<256x128xf32>
    %55 = arith.subf %45, %54 : vector<256x128xf32>
    %c0_58 = arith.constant 0 : index
    %c0_59 = arith.constant 0 : index
    %c0_60 = arith.constant 0 : index
    %56 = vector.load %arg6[%c0_58, %c0_59, %c0_60] : memref<1x1x128xf32, #tpu.memory_space<vmem>>, vector<1x1x128xf32>
    %57 = vector.shape_cast %56 : vector<1x1x128xf32> to vector<1x128xf32>
    %58 = vector.shape_cast %53 : vector<1x128xf32> to vector<1x1x128xf32>
    tpu.vector_store %arg6[%c0_58, %c0_59, %c0_60], %58 {strides = array<i32>} : memref<1x1x128xf32, #tpu.memory_space<vmem>>, vector<1x1x128xf32>,
    %59 = arith.mulf %55, %55 : vector<256x128xf32>
    %cst_61 = arith.constant dense<0.000000e+00> : vector<128xf32>
    %60 = vector.multi_reduction <add>, %59, %cst_61 [0] : vector<256x128xf32> to vector<128xf32>
    %61 = vector.shape_cast %60 : vector<128xf32> to vector<1x128xf32>
    %c0_62 = arith.constant 0 : index
    %c0_63 = arith.constant 0 : index
    %c0_64 = arith.constant 0 : index
    %62 = vector.load %arg7[%c0_62, %c0_63, %c0_64] : memref<1x1x128xf32, #tpu.memory_space<vmem>>, vector<1x1x128xf32>
    %63 = vector.shape_cast %62 : vector<1x1x128xf32> to vector<1x128xf32>
    %64 = vector.shape_cast %61 : vector<1x128xf32> to vector<1x1x128xf32>
    tpu.vector_store %arg7[%c0_62, %c0_63, %c0_64], %64 {strides = array<i32>} : memref<1x1x128xf32, #tpu.memory_space<vmem>>, vector<1x1x128xf32>,
    return
  }
  func.func @transform_0(%arg0: i32) -> (i32, i32, i32) {
    %c0_i32 = arith.constant 0 : i32
    %c0_i32_0 = arith.constant 0 : i32
    %c0_i32_1 = arith.constant 0 : i32
    return %arg0, %c0_i32, %c0_i32_0 : i32, i32, i32
  }
  func.func @transform_1(%arg0: i32) -> (i32, i32) {
    %c0_i32 = arith.constant 0 : i32
    %c0_i32_0 = arith.constant 0 : i32
    %c0_i32_1 = arith.constant 0 : i32
    return %c0_i32, %c0_i32_0 : i32, i32
  }
  func.func @transform_2(%arg0: i32) -> (i32, i32) {
    %c0_i32 = arith.constant 0 : i32
    %c0_i32_0 = arith.constant 0 : i32
    %c0_i32_1 = arith.constant 0 : i32
    return %c0_i32, %c0_i32_0 : i32, i32
  }
  func.func @transform_3(%arg0: i32) -> (i32, i32) {
    %c0_i32 = arith.constant 0 : i32
    %c0_i32_0 = arith.constant 0 : i32
    %c0_i32_1 = arith.constant 0 : i32
    return %c0_i32, %c0_i32_0 : i32, i32
  }
  func.func @transform_4(%arg0: i32) -> (i32, i32, i32) {
    %c0_i32 = arith.constant 0 : i32
    %c0_i32_0 = arith.constant 0 : i32
    %c0_i32_1 = arith.constant 0 : i32
    return %arg0, %c0_i32, %c0_i32_0 : i32, i32, i32
  }
  func.func @transform_5(%arg0: i32) -> (i32, i32, i32) {
    %c0_i32 = arith.constant 0 : i32
    %c0_i32_0 = arith.constant 0 : i32
    %c0_i32_1 = arith.constant 0 : i32
    return %arg0, %c0_i32, %c0_i32_0 : i32, i32, i32
  }
  func.func @transform_6(%arg0: i32) -> (i32, i32, i32) {
    %c0_i32 = arith.constant 0 : i32
    %c0_i32_0 = arith.constant 0 : i32
    %c0_i32_1 = arith.constant 0 : i32
    return %arg0, %c0_i32, %c0_i32_0 : i32, i32, i32
  }
}

module attributes {stable_mosaic.version = 11 : i64} {
  func.func @_finalize_kernel(%arg0: i32, %arg1: memref<1x256x128xbf16, #tpu.memory_space<vmem>>, %arg2: memref<1x256x128xbf16, #tpu.memory_space<vmem>>, %arg3: memref<1x128xf32, #tpu.memory_space<vmem>>, %arg4: memref<1x128xf32, #tpu.memory_space<vmem>>, %arg5: memref<1x128xf32, #tpu.memory_space<vmem>>, %arg6: memref<1x128xf32, #tpu.memory_space<vmem>>, %arg7: memref<1x256x128xbf16, #tpu.memory_space<vmem>>) attributes {dimension_semantics = [#tpu.dimension_semantics<parallel>], iteration_bounds = array<i64: 2>, scalar_prefetch = 0 : i64, scratch_operands = 0 : i64, tpu.core_type = #tpu.core_type<tc>, window_params = [{transform_indices = @transform_0, window_bounds = array<i64: 1, 256, 128>}, {transform_indices = @transform_1, window_bounds = array<i64: 1, 256, 128>}, {pipeline_mode = #tpu.pipeline_mode<synchronous>, transform_indices = @transform_2, window_bounds = array<i64: 1, 128>}, {pipeline_mode = #tpu.pipeline_mode<synchronous>, transform_indices = @transform_3, window_bounds = array<i64: 1, 128>}, {pipeline_mode = #tpu.pipeline_mode<synchronous>, transform_indices = @transform_4, window_bounds = array<i64: 1, 128>}, {pipeline_mode = #tpu.pipeline_mode<synchronous>, transform_indices = @transform_5, window_bounds = array<i64: 1, 128>}, {transform_indices = @transform_6, window_bounds = array<i64: 1, 256, 128>}]} {
    %c0 = arith.constant 0 : index
    %c0_0 = arith.constant 0 : index
    %c0_1 = arith.constant 0 : index
    %0 = vector.load %arg1[%c0, %c0_0, %c0_1] : memref<1x256x128xbf16, #tpu.memory_space<vmem>>, vector<1x256x128xbf16>
    %1 = vector.shape_cast %0 : vector<1x256x128xbf16> to vector<256x128xbf16>
    %2 = arith.extf %1 : vector<256x128xbf16> to vector<256x128xf32>
    %c0_2 = arith.constant 0 : index
    %c0_3 = arith.constant 0 : index
    %3 = vector.load %arg3[%c0_2, %c0_3] : memref<1x128xf32, #tpu.memory_space<vmem>>, vector<1x128xf32>
    %4 = vector.broadcast %3 : vector<1x128xf32> to vector<256x128xf32>
    %5 = arith.mulf %2, %4 : vector<256x128xf32>
    %c0_4 = arith.constant 0 : index
    %c0_5 = arith.constant 0 : index
    %6 = vector.load %arg4[%c0_4, %c0_5] : memref<1x128xf32, #tpu.memory_space<vmem>>, vector<1x128xf32>
    %7 = vector.broadcast %6 : vector<1x128xf32> to vector<256x128xf32>
    %8 = arith.addf %5, %7 : vector<256x128xf32>
    %c0_6 = arith.constant 0 : index
    %c0_7 = arith.constant 0 : index
    %c0_8 = arith.constant 0 : index
    %9 = vector.load %arg2[%c0_6, %c0_7, %c0_8] : memref<1x256x128xbf16, #tpu.memory_space<vmem>>, vector<1x256x128xbf16>
    %10 = vector.shape_cast %9 : vector<1x256x128xbf16> to vector<256x128xbf16>
    %11 = arith.extf %10 : vector<256x128xbf16> to vector<256x128xf32>
    %c0_9 = arith.constant 0 : index
    %c0_10 = arith.constant 0 : index
    %12 = vector.load %arg5[%c0_9, %c0_10] : memref<1x128xf32, #tpu.memory_space<vmem>>, vector<1x128xf32>
    %13 = vector.broadcast %12 : vector<1x128xf32> to vector<256x128xf32>
    %14 = arith.mulf %11, %13 : vector<256x128xf32>
    %15 = arith.addf %8, %14 : vector<256x128xf32>
    %c0_11 = arith.constant 0 : index
    %c0_12 = arith.constant 0 : index
    %16 = vector.load %arg6[%c0_11, %c0_12] : memref<1x128xf32, #tpu.memory_space<vmem>>, vector<1x128xf32>
    %17 = vector.broadcast %16 : vector<1x128xf32> to vector<256x128xf32>
    %18 = arith.addf %15, %17 : vector<256x128xf32>
    %cst = arith.constant 0.000000e+00 : f32
    %19 = vector.broadcast %cst : f32 to vector<256x128xf32>
    %20 = arith.maximumf %18, %19 : vector<256x128xf32>
    %21 = arith.truncf %20 : vector<256x128xf32> to vector<256x128xbf16>
    %c0_13 = arith.constant 0 : index
    %c0_14 = arith.constant 0 : index
    %c0_15 = arith.constant 0 : index
    %22 = vector.load %arg7[%c0_13, %c0_14, %c0_15] : memref<1x256x128xbf16, #tpu.memory_space<vmem>>, vector<1x256x128xbf16>
    %23 = vector.shape_cast %22 : vector<1x256x128xbf16> to vector<256x128xbf16>
    %24 = vector.shape_cast %21 : vector<256x128xbf16> to vector<1x256x128xbf16>
    tpu.vector_store %arg7[%c0_13, %c0_14, %c0_15], %24 {strides = array<i32>} : memref<1x256x128xbf16, #tpu.memory_space<vmem>>, vector<1x256x128xbf16>,
    return
  }
  func.func @transform_0(%arg0: i32) -> (i32, i32, i32) {
    %c0_i32 = arith.constant 0 : i32
    %c0_i32_0 = arith.constant 0 : i32
    %c0_i32_1 = arith.constant 0 : i32
    return %arg0, %c0_i32, %c0_i32_0 : i32, i32, i32
  }
  func.func @transform_1(%arg0: i32) -> (i32, i32, i32) {
    %c0_i32 = arith.constant 0 : i32
    %c0_i32_0 = arith.constant 0 : i32
    %c0_i32_1 = arith.constant 0 : i32
    return %arg0, %c0_i32, %c0_i32_0 : i32, i32, i32
  }
  func.func @transform_2(%arg0: i32) -> (i32, i32) {
    %c0_i32 = arith.constant 0 : i32
    %c0_i32_0 = arith.constant 0 : i32
    %c0_i32_1 = arith.constant 0 : i32
    return %c0_i32, %c0_i32_0 : i32, i32
  }
  func.func @transform_3(%arg0: i32) -> (i32, i32) {
    %c0_i32 = arith.constant 0 : i32
    %c0_i32_0 = arith.constant 0 : i32
    %c0_i32_1 = arith.constant 0 : i32
    return %c0_i32, %c0_i32_0 : i32, i32
  }
  func.func @transform_4(%arg0: i32) -> (i32, i32) {
    %c0_i32 = arith.constant 0 : i32
    %c0_i32_0 = arith.constant 0 : i32
    %c0_i32_1 = arith.constant 0 : i32
    return %c0_i32, %c0_i32_0 : i32, i32
  }
  func.func @transform_5(%arg0: i32) -> (i32, i32) {
    %c0_i32 = arith.constant 0 : i32
    %c0_i32_0 = arith.constant 0 : i32
    %c0_i32_1 = arith.constant 0 : i32
    return %c0_i32, %c0_i32_0 : i32, i32
  }
  func.func @transform_6(%arg0: i32) -> (i32, i32, i32) {
    %c0_i32 = arith.constant 0 : i32
    %c0_i32_0 = arith.constant 0 : i32
    %c0_i32_1 = arith.constant 0 : i32
    return %arg0, %c0_i32, %c0_i32_0 : i32, i32, i32
  }
}

</mosaic_0001>

<bundles_post_ra>
// kernel: basic_block_forward.5
= control target key start
LH: loop header
LB: loop body
LE: loop exit
PB: predicated region body
PF: predicated region fallthrough
CT: control target
= control target key end

     0   :  { %s1235_s21 = smov 0   ;;  %s1462_s0 = inlined_call_operand.vmem [shape: bf16[2,256,128], index: 0, kind: input, shape index: {}]   ;;  %s1463_s1 = inlined_call_operand.vmem [shape: bf16[2,256,128], index: 1, kind: input, shape index: {}]   ;;  %s1464_s2 = inlined_call_operand.vmem [shape: f32[1,128], index: 2, kind: input, shape index: {}]   ;;  %s1465_s3 = inlined_call_operand.vmem [shape: f32[1,128], index: 3, kind: input, shape index: {}]   ;;  %s1466_s4 = inlined_call_operand.vmem [shape: f32[1,128], index: 4, kind: input, shape index: {}]   ;;  %s1467_s5 = inlined_call_operand.vmem [shape: f32[1,128], index: 5, kind: input, shape index: {}]   ;;  %s1468_s6 = inlined_call_operand.vmem [shape: bf16[2,256,128], index: 6, kind: output, shape index: {}]  }
   0x1 LB: > { %s847_s22 = sadd.s32 4294967295, %s1198_s21   ;;  %p851_p0 = scmp.ge.s32.totalorder %s1198_s21, 1  ;;  %s1198_s21 = sphi %s1235_s21, %s16_s21  }
   0x2   : > { %p222_p1 = scmp.lt.s32.totalorder %s1198_s21, 3 }
   0x4   : > { %p223_p2 = pnand %p851_p0, %p222_p1 }
   0x5   : > { %p257_p3 = scmp.lt.s32.totalorder (!%p223_p2), %s847_s22, 1  ;;  %v1260_v0 = vld [vmem:[%s1464_s2] ss:$0 sm:$0xff] (!%p223_p2) }
   0x6   : > { %226 = sbr.rel (%p223_p2) target bundleno = 93 (0x5d), region = 44  ;;  %v1265_v1 = vld [vmem:[%s1466_s4] ss:$0 sm:$0xff] (!%p223_p2) }
   0x7   : > { %v1274_v10 = vld [vmem:[%s1465_s3] ss:$0 sm:$0xff] (!%p223_p2) }
   0x8   : > { %v1291_v29 = vld [vmem:[%s1467_s5] ss:$0 sm:$0xff] (!%p223_p2) }
   0xd   : > { %s1470_s22 = smov (!%p257_p3, %s847_s22), 1 }
   0xe   : > { %s1243_s23 = sshll.u32 %s1470_s22, 7 }
   0xf   : > { %s1249_s26 = scalar_lea.vmem %s1462_s0, %s1243_s23  ;;  %s1255_s29 = scalar_lea.vmem %s1463_s1, %s1243_s23 }
  0x10   : > { %v932_v2 = vld [vmem:[%s1249_s26] sm:$0xff]   ;;  %v1139_v4 = vld [vmem:[%s1249_s26 + $0x8] sm:$0xff]   ;;  %v1140_v15 = vld [vmem:[%s1249_s26 + $0x10] sm:$0xff]   ;;  %s1311_s16 = scalar_lea.vmem %s1468_s6, %s1243_s23 }
  0x11   : > { %v996_v3 = vld [vmem:[%s1255_s29] sm:$0xff]   ;;  %v933_v5 = vunpack.c.l.bf16 %v932_v2  ;;  %v934_v6 = vunpack.c.h.bf16 %v932_v2  ;;  %v1154_v9 = vld [vmem:[%s1255_s29 + $0x8] sm:$0xff]   ;;  %v937_v11 = vunpack.c.l.bf16 %v1139_v4  ;;  %v938_v12 = vunpack.c.h.bf16 %v1139_v4  ;;  %v1155_v20 = vld [vmem:[%s1255_s29 + $0x10] sm:$0xff]  }
  0x12   : > { %v997_v7 = vunpack.c.l.bf16 %v996_v3  ;;  %v998_v8 = vunpack.c.h.bf16 %v996_v3  ;;  %v1001_v13 = vunpack.c.l.bf16 %v1154_v9  ;;  %v1002_v14 = vunpack.c.h.bf16 %v1154_v9  ;;  %v1141_v38 = vld [vmem:[%s1249_s26 + $0x18] sm:$0xff]   ;;  %v1142_v60 = vld [vmem:[%s1249_s26 + $0x20] sm:$0xff]  }
  0x13   : > { %v343_v16 = vmul.f32 %v933_v5, %v1260_v0  ;;  %v344_v17 = vmul.f32 %v934_v6, %v1260_v0  ;;  %v345_v21 = vmul.f32 %v937_v11, %v1260_v0  ;;  %v346_v22 = vmul.f32 %v938_v12, %v1260_v0  ;;  %v1156_v51 = vld [vmem:[%s1255_s29 + $0x18] sm:$0xff]   ;;  %v1157_v3 = vld [vmem:[%s1255_s29 + $0x20] sm:$0xff]  }
  0x14   : > { %v485_v18 = vmul.f32 %v997_v7, %v1265_v1  ;;  %v486_v19 = vmul.f32 %v998_v8, %v1265_v1  ;;  %v487_v23 = vmul.f32 %v1001_v13, %v1265_v1  ;;  %v488_v24 = vmul.f32 %v1002_v14, %v1265_v1  ;;  %v1143_v8 = vld [vmem:[%s1249_s26 + $0x28] sm:$0xff]  }
  0x15   : > { %v382_v25 = vadd.f32 %v1274_v10, %v343_v16  ;;  %v383_v26 = vadd.f32 %v1274_v10, %v344_v17  ;;  %v941_v27 = vunpack.c.l.bf16 %v1140_v15  ;;  %v942_v28 = vunpack.c.h.bf16 %v1140_v15 }
  0x16   : > { %v384_v30 = vadd.f32 %v1274_v10, %v345_v21  ;;  %v385_v31 = vadd.f32 %v1274_v10, %v346_v22  ;;  %v1005_v32 = vunpack.c.l.bf16 %v1155_v20  ;;  %v1006_v33 = vunpack.c.h.bf16 %v1155_v20  ;;  %v1158_v22 = vld [vmem:[%s1255_s29 + $0x28] sm:$0xff]  }
  0x17   : > { %v517_v34 = vadd.f32 %v485_v18, %v382_v25  ;;  %v518_v35 = vadd.f32 %v486_v19, %v383_v26  ;;  %v347_v36 = vmul.f32 %v941_v27, %v1260_v0  ;;  %v348_v37 = vmul.f32 %v942_v28, %v1260_v0 }
  0x18   : > { %v519_v39 = vadd.f32 %v487_v23, %v384_v30  ;;  %v520_v40 = vadd.f32 %v488_v24, %v385_v31  ;;  %v489_v41 = vmul.f32 %v1005_v32, %v1265_v1  ;;  %v490_v42 = vmul.f32 %v1006_v33, %v1265_v1 }
  0x19   : > { %v556_v43 = vadd.f32 %v1291_v29, %v517_v34  ;;  %v557_v44 = vadd.f32 %v1291_v29, %v518_v35  ;;  %v386_v45 = vadd.f32 %v1274_v10, %v347_v36  ;;  %v387_v46 = vadd.f32 %v1274_v10, %v348_v37  ;;  %v1144_v36 = vld [vmem:[%s1249_s26 + $0x30] sm:$0xff]  }
  0x1a   : > { %v558_v47 = vadd.f32 %v1291_v29, %v519_v39  ;;  %v559_v48 = vadd.f32 %v1291_v29, %v520_v40  ;;  %v945_v49 = vunpack.c.l.bf16 %v1141_v38  ;;  %v946_v50 = vunpack.c.h.bf16 %v1141_v38 }
  0x1b   : > { %v588_v52 = vmax.f32 %v556_v43, 0.0  ;;  %v589_v53 = vmax.f32 %v557_v44, 0.0  ;;  %v521_v54 = vadd.f32 %v489_v41, %v386_v45  ;;  %v522_v55 = vadd.f32 %v490_v42, %v387_v46  ;;  %v1159_v41 = vld [vmem:[%s1255_s29 + $0x30] sm:$0xff]  }
  0x1c   : > { %v590_v56 = vmax.f32 %v558_v47, 0.0  ;;  %v591_v57 = vmax.f32 %v559_v48, 0.0  ;;  %v349_v58 = vmul.f32 %v945_v49, %v1260_v0  ;;  %v350_v59 = vmul.f32 %v946_v50, %v1260_v0 }
  0x1d   : > { %v1062_v61 = vpack.c.bf16 %v589_v53, %v588_v52  ;;  %v560_v62 = vadd.f32 %v1291_v29, %v521_v54  ;;  %v561_v63 = vadd.f32 %v1291_v29, %v522_v55  ;;  %v1009_v2 = vunpack.c.l.bf16 %v1156_v51  ;;  %v1145_v54 = vld [vmem:[%s1249_s26 + $0x38] sm:$0xff]  }
  0x1e   : > { %v1067_v4 = vpack.c.bf16 %v591_v57, %v590_v56  ;;  %v388_v5 = vadd.f32 %v1274_v10, %v349_v58  ;;  %v389_v6 = vadd.f32 %v1274_v10, %v350_v59  ;;  %v1010_v7 = vunpack.c.h.bf16 %v1156_v51 }
  0x1f   : > { %1063 = vst [vmem:[%s1311_s16] sm:$0xff] %v1062_v61   ;;  %v592_v9 = vmax.f32 %v560_v62, 0.0  ;;  %v593_v11 = vmax.f32 %v561_v63, 0.0  ;;  %v491_v12 = vmul.f32 %v1009_v2, %v1265_v1  ;;  %v949_v13 = vunpack.c.l.bf16 %v1142_v60  ;;  %v1160_v63 = vld [vmem:[%s1255_s29 + $0x38] sm:$0xff]  }
  0x20   : > { %1169 = vst [vmem:[%s1311_s16 + $0x8] sm:$0xff] %v1067_v4   ;;  %v492_v14 = vmul.f32 %v1010_v7, %v1265_v1  ;;  %v950_v15 = vunpack.c.h.bf16 %v1142_v60  ;;  %v1013_v16 = vunpack.c.l.bf16 %v1157_v3  ;;  %v1014_v17 = vunpack.c.h.bf16 %v1157_v3 }
  0x21   : > { %v1072_v18 = vpack.c.bf16 %v593_v11, %v592_v9  ;;  %v523_v19 = vadd.f32 %v491_v12, %v388_v5  ;;  %v351_v20 = vmul.f32 %v949_v13, %v1260_v0  ;;  %v953_v21 = vunpack.c.l.bf16 %v1143_v8 }
  0x22   : > { %v524_v23 = vadd.f32 %v492_v14, %v389_v6  ;;  %v352_v24 = vmul.f32 %v950_v15, %v1260_v0  ;;  %v493_v25 = vmul.f32 %v1013_v16, %v1265_v1  ;;  %v494_v26 = vmul.f32 %v1014_v17, %v1265_v1  ;;  %v1146_v6 = vld [vmem:[%s1249_s26 + $0x40] sm:$0xff]  }
  0x23   : > { %1170 = vst [vmem:[%s1311_s16 + $0x10] sm:$0xff] %v1072_v18   ;;  %v562_v27 = vadd.f32 %v1291_v29, %v523_v19  ;;  %v390_v28 = vadd.f32 %v1274_v10, %v351_v20  ;;  %v954_v30 = vunpack.c.h.bf16 %v1143_v8  ;;  %v353_v31 = vmul.f32 %v953_v21, %v1260_v0  ;;  %v1161_v20 = vld [vmem:[%s1255_s29 + $0x40] sm:$0xff]  }
  0x24   : > { %v563_v32 = vadd.f32 %v1291_v29, %v524_v23  ;;  %v391_v33 = vadd.f32 %v1274_v10, %v352_v24  ;;  %v1017_v34 = vunpack.c.l.bf16 %v1158_v22  ;;  %v1018_v35 = vunpack.c.h.bf16 %v1158_v22 }
  0x25   : > { %v594_v37 = vmax.f32 %v562_v27, 0.0  ;;  %v525_v38 = vadd.f32 %v493_v25, %v390_v28  ;;  %v354_v39 = vmul.f32 %v954_v30, %v1260_v0  ;;  %v392_v40 = vadd.f32 %v1274_v10, %v353_v31  ;;  %v1147_v30 = vld [vmem:[%s1249_s26 + $0x48] sm:$0xff]  }
  0x26   : > { %v595_v42 = vmax.f32 %v563_v32, 0.0  ;;  %v526_v43 = vadd.f32 %v494_v26, %v391_v33  ;;  %v495_v44 = vmul.f32 %v1017_v34, %v1265_v1  ;;  %v496_v45 = vmul.f32 %v1018_v35, %v1265_v1 }
  0x27   : > { %v564_v46 = vadd.f32 %v1291_v29, %v525_v38  ;;  %v393_v47 = vadd.f32 %v1274_v10, %v354_v39  ;;  %v957_v48 = vunpack.c.l.bf16 %v1144_v36  ;;  %v958_v49 = vunpack.c.h.bf16 %v1144_v36 }
  0x28   : > { %v1077_v50 = vpack.c.bf16 %v595_v42, %v594_v37  ;;  %v565_v51 = vadd.f32 %v1291_v29, %v526_v43  ;;  %v527_v52 = vadd.f32 %v495_v44, %v392_v40  ;;  %v1021_v53 = vunpack.c.l.bf16 %v1159_v41  ;;  %v1162_v43 = vld [vmem:[%s1255_s29 + $0x48] sm:$0xff]  }
  0x29   : > { %v596_v55 = vmax.f32 %v564_v46, 0.0  ;;  %v528_v56 = vadd.f32 %v496_v45, %v393_v47  ;;  %v355_v57 = vmul.f32 %v957_v48, %v1260_v0  ;;  %v356_v58 = vmul.f32 %v958_v49, %v1260_v0  ;;  %v1148_v48 = vld [vmem:[%s1249_s26 + $0x50] sm:$0xff]  }
  0x2a   : > { %1171 = vst [vmem:[%s1311_s16 + $0x18] sm:$0xff] %v1077_v50   ;;  %v597_v59 = vmax.f32 %v565_v51, 0.0  ;;  %v566_v60 = vadd.f32 %v1291_v29, %v527_v52  ;;  %v1022_v61 = vunpack.c.h.bf16 %v1159_v41  ;;  %v497_v62 = vmul.f32 %v1021_v53, %v1265_v1 }
  0x2b   : > { %v567_v2 = vadd.f32 %v1291_v29, %v528_v56  ;;  %v394_v3 = vadd.f32 %v1274_v10, %v355_v57  ;;  %v395_v4 = vadd.f32 %v1274_v10, %v356_v58  ;;  %v961_v5 = vunpack.c.l.bf16 %v1145_v54 }
  0x2c   : > { %v1082_v7 = vpack.c.bf16 %v597_v59, %v596_v55  ;;  %v598_v8 = vmax.f32 %v566_v60, 0.0  ;;  %v498_v9 = vmul.f32 %v1022_v61, %v1265_v1  ;;  %v962_v11 = vunpack.c.h.bf16 %v1145_v54  ;;  %v1163_v61 = vld [vmem:[%s1255_s29 + $0x50] sm:$0xff]  }
  0x2d   : > { %v599_v12 = vmax.f32 %v567_v2, 0.0  ;;  %v529_v13 = vadd.f32 %v497_v62, %v394_v3  ;;  %v357_v14 = vmul.f32 %v961_v5, %v1260_v0  ;;  %v1025_v15 = vunpack.c.l.bf16 %v1160_v63 }
  0x2e   : > { %1172 = vst [vmem:[%s1311_s16 + $0x20] sm:$0xff] %v1082_v7   ;;  %v530_v16 = vadd.f32 %v498_v9, %v395_v4  ;;  %v358_v17 = vmul.f32 %v962_v11, %v1260_v0  ;;  %v1026_v18 = vunpack.c.h.bf16 %v1160_v63  ;;  %v965_v19 = vunpack.c.l.bf16 %v1146_v6  ;;  %v1149_v4 = vld [vmem:[%s1249_s26 + $0x58] sm:$0xff]  }
  0x2f   : > { %v1087_v21 = vpack.c.bf16 %v599_v12, %v598_v8  ;;  %v568_v22 = vadd.f32 %v1291_v29, %v529_v13  ;;  %v396_v23 = vadd.f32 %v1274_v10, %v357_v14  ;;  %v499_v24 = vmul.f32 %v1025_v15, %v1265_v1 }
  0x30   : > { %v569_v25 = vadd.f32 %v1291_v29, %v530_v16  ;;  %v397_v26 = vadd.f32 %v1274_v10, %v358_v17  ;;  %v500_v27 = vmul.f32 %v1026_v18, %v1265_v1  ;;  %v966_v28 = vunpack.c.h.bf16 %v1146_v6  ;;  %v1164_v18 = vld [vmem:[%s1255_s29 + $0x58] sm:$0xff]  }
  0x31   : > { %1173 = vst [vmem:[%s1311_s16 + $0x28] sm:$0xff] %v1087_v21   ;;  %v600_v31 = vmax.f32 %v568_v22, 0.0  ;;  %v531_v32 = vadd.f32 %v499_v24, %v396_v23  ;;  %v359_v33 = vmul.f32 %v965_v19, %v1260_v0  ;;  %v1029_v34 = vunpack.c.l.bf16 %v1161_v20 }
  0x32   : > { %v601_v35 = vmax.f32 %v569_v25, 0.0  ;;  %v532_v36 = vadd.f32 %v500_v27, %v397_v26  ;;  %v360_v37 = vmul.f32 %v966_v28, %v1260_v0  ;;  %v1030_v38 = vunpack.c.h.bf16 %v1161_v20  ;;  %v1150_v27 = vld [vmem:[%s1249_s26 + $0x60] sm:$0xff]  }
  0x33   : > { %v570_v39 = vadd.f32 %v1291_v29, %v531_v32  ;;  %v398_v40 = vadd.f32 %v1274_v10, %v359_v33  ;;  %v501_v41 = vmul.f32 %v1029_v34, %v1265_v1  ;;  %v969_v42 = vunpack.c.l.bf16 %v1147_v30 }
  0x34   : > { %v1092_v44 = vpack.c.bf16 %v601_v35, %v600_v31  ;;  %v571_v45 = vadd.f32 %v1291_v29, %v532_v36  ;;  %v399_v46 = vadd.f32 %v1274_v10, %v360_v37  ;;  %v502_v47 = vmul.f32 %v1030_v38, %v1265_v1  ;;  %v1165_v37 = vld [vmem:[%s1255_s29 + $0x60] sm:$0xff]  }
  0x35   : > { %v602_v49 = vmax.f32 %v570_v39, 0.0  ;;  %v533_v50 = vadd.f32 %v501_v41, %v398_v40  ;;  %v970_v51 = vunpack.c.h.bf16 %v1147_v30  ;;  %v361_v52 = vmul.f32 %v969_v42, %v1260_v0 }
  0x36   : > { %1174 = vst [vmem:[%s1311_s16 + $0x30] sm:$0xff] %v1092_v44   ;;  %v603_v53 = vmax.f32 %v571_v45, 0.0  ;;  %v534_v54 = vadd.f32 %v502_v47, %v399_v46  ;;  %v1033_v55 = vunpack.c.l.bf16 %v1162_v43  ;;  %v1034_v56 = vunpack.c.h.bf16 %v1162_v43  ;;  %v1151_v46 = vld [vmem:[%s1249_s26 + $0x68] sm:$0xff]  }
  0x37   : > { %v572_v57 = vadd.f32 %v1291_v29, %v533_v50  ;;  %v362_v58 = vmul.f32 %v970_v51, %v1260_v0  ;;  %v400_v59 = vadd.f32 %v1274_v10, %v361_v52  ;;  %v973_v60 = vunpack.c.l.bf16 %v1148_v48 }
  0x38   : > { %v1097_v62 = vpack.c.bf16 %v603_v53, %v602_v49  ;;  %v573_v63 = vadd.f32 %v1291_v29, %v534_v54  ;;  %v503_v2 = vmul.f32 %v1033_v55, %v1265_v1  ;;  %v504_v3 = vmul.f32 %v1034_v56, %v1265_v1 }
  0x39   : > { %v604_v5 = vmax.f32 %v572_v57, 0.0  ;;  %v401_v6 = vadd.f32 %v1274_v10, %v362_v58  ;;  %v974_v7 = vunpack.c.h.bf16 %v1148_v48  ;;  %v363_v8 = vmul.f32 %v973_v60, %v1260_v0 }
  0x3a   : > { %1175 = vst [vmem:[%s1311_s16 + $0x38] sm:$0xff] %v1097_v62   ;;  %v605_v9 = vmax.f32 %v573_v63, 0.0  ;;  %v535_v11 = vadd.f32 %v503_v2, %v400_v59  ;;  %v1037_v12 = vunpack.c.l.bf16 %v1163_v61  ;;  %v1038_v13 = vunpack.c.h.bf16 %v1163_v61  ;;  %v1166_v59 = vld [vmem:[%s1255_s29 + $0x68] sm:$0xff]   ;;  %v1152_v2 = vld [vmem:[%s1249_s26 + $0x70] sm:$0xff]  }
  0x3b   : > { %v536_v14 = vadd.f32 %v504_v3, %v401_v6  ;;  %v364_v15 = vmul.f32 %v974_v7, %v1260_v0  ;;  %v402_v16 = vadd.f32 %v1274_v10, %v363_v8  ;;  %v977_v17 = vunpack.c.l.bf16 %v1149_v4 }
  0x3c   : > { %v1102_v19 = vpack.c.bf16 %v605_v9, %v604_v5  ;;  %v574_v20 = vadd.f32 %v1291_v29, %v535_v11  ;;  %v505_v21 = vmul.f32 %v1037_v12, %v1265_v1  ;;  %v506_v22 = vmul.f32 %v1038_v13, %v1265_v1 }
  0x3d   : > { %v575_v23 = vadd.f32 %v1291_v29, %v536_v14  ;;  %v403_v24 = vadd.f32 %v1274_v10, %v364_v15  ;;  %v978_v25 = vunpack.c.h.bf16 %v1149_v4  ;;  %v365_v26 = vmul.f32 %v977_v17, %v1260_v0 }
  0x3e   : > { %1176 = vst [vmem:[%s1311_s16 + $0x40] sm:$0xff] %v1102_v19   ;;  %v606_v28 = vmax.f32 %v574_v20, 0.0  ;;  %v537_v30 = vadd.f32 %v505_v21, %v402_v16  ;;  %v1041_v31 = vunpack.c.l.bf16 %v1164_v18  ;;  %v1042_v32 = vunpack.c.h.bf16 %v1164_v18  ;;  %v1167_v16 = vld [vmem:[%s1255_s29 + $0x70] sm:$0xff]   ;;  %v1153_v21 = vld [vmem:[%s1249_s26 + $0x78] sm:$0xff]  }
  0x3f   : > { %v607_v33 = vmax.f32 %v575_v23, 0.0  ;;  %v538_v34 = vadd.f32 %v506_v22, %v403_v24  ;;  %v366_v35 = vmul.f32 %v978_v25, %v1260_v0  ;;  %v404_v36 = vadd.f32 %v1274_v10, %v365_v26 }
  0x40   : > { %v576_v38 = vadd.f32 %v1291_v29, %v537_v30  ;;  %v507_v39 = vmul.f32 %v1041_v31, %v1265_v1  ;;  %v508_v40 = vmul.f32 %v1042_v32, %v1265_v1  ;;  %v981_v41 = vunpack.c.l.bf16 %v1150_v27 }
  0x41   : > { %v1107_v42 = vpack.c.bf16 %v607_v33, %v606_v28  ;;  %v577_v43 = vadd.f32 %v1291_v29, %v538_v34  ;;  %v405_v44 = vadd.f32 %v1274_v10, %v366_v35  ;;  %v982_v45 = vunpack.c.h.bf16 %v1150_v27  ;;  %v1168_v35 = vld [vmem:[%s1255_s29 + $0x78] sm:$0xff]  }
  0x42   : > { %v608_v47 = vmax.f32 %v576_v38, 0.0  ;;  %v539_v48 = vadd.f32 %v507_v39, %v404_v36  ;;  %v367_v49 = vmul.f32 %v981_v41, %v1260_v0  ;;  %v1045_v50 = vunpack.c.l.bf16 %v1165_v37 }
  0x43   : > { %1177 = vst [vmem:[%s1311_s16 + $0x48] sm:$0xff] %v1107_v42   ;;  %v609_v51 = vmax.f32 %v577_v43, 0.0  ;;  %v540_v52 = vadd.f32 %v508_v40, %v405_v44  ;;  %v368_v53 = vmul.f32 %v982_v45, %v1260_v0  ;;  %v1046_v54 = vunpack.c.h.bf16 %v1165_v37 }
  0x44   : > { %v578_v55 = vadd.f32 %v1291_v29, %v539_v48  ;;  %v406_v56 = vadd.f32 %v1274_v10, %v367_v49  ;;  %v509_v57 = vmul.f32 %v1045_v50, %v1265_v1  ;;  %v985_v58 = vunpack.c.l.bf16 %v1151_v46 }
  0x45   : > { %v1112_v60 = vpack.c.bf16 %v609_v51, %v608_v47  ;;  %v579_v61 = vadd.f32 %v1291_v29, %v540_v52  ;;  %v407_v62 = vadd.f32 %v1274_v10, %v368_v53  ;;  %v510_v63 = vmul.f32 %v1046_v54, %v1265_v1 }
  0x46   : > { %v610_v3 = vmax.f32 %v578_v55, 0.0  ;;  %v541_v4 = vadd.f32 %v509_v57, %v406_v56  ;;  %v986_v5 = vunpack.c.h.bf16 %v1151_v46  ;;  %v369_v6 = vmul.f32 %v985_v58, %v1260_v0 }
  0x47   : > { %1178 = vst [vmem:[%s1311_s16 + $0x50] sm:$0xff] %v1112_v60   ;;  %v611_v7 = vmax.f32 %v579_v61, 0.0  ;;  %v542_v8 = vadd.f32 %v510_v63, %v407_v62  ;;  %v1049_v9 = vunpack.c.l.bf16 %v1166_v59  ;;  %v1050_v11 = vunpack.c.h.bf16 %v1166_v59 }
  0x48   : > { %v580_v12 = vadd.f32 %v1291_v29, %v541_v4  ;;  %v370_v13 = vmul.f32 %v986_v5, %v1260_v0  ;;  %v408_v14 = vadd.f32 %v1274_v10, %v369_v6  ;;  %v989_v15 = vunpack.c.l.bf16 %v1152_v2 }
  0x49   : > { %v1117_v17 = vpack.c.bf16 %v611_v7, %v610_v3  ;;  %v581_v18 = vadd.f32 %v1291_v29, %v542_v8  ;;  %v511_v19 = vmul.f32 %v1049_v9, %v1265_v1  ;;  %v512_v20 = vmul.f32 %v1050_v11, %v1265_v1 }
  0x4a   : > { %v612_v22 = vmax.f32 %v580_v12, 0.0  ;;  %v409_v23 = vadd.f32 %v1274_v10, %v370_v13  ;;  %v990_v24 = vunpack.c.h.bf16 %v1152_v2  ;;  %v371_v25 = vmul.f32 %v989_v15, %v1260_v0 }
  0x4b   : > { %1179 = vst [vmem:[%s1311_s16 + $0x58] sm:$0xff] %v1117_v17   ;;  %v613_v26 = vmax.f32 %v581_v18, 0.0  ;;  %v543_v27 = vadd.f32 %v511_v19, %v408_v14  ;;  %v1053_v28 = vunpack.c.l.bf16 %v1167_v16  ;;  %v1054_v30 = vunpack.c.h.bf16 %v1167_v16 }
  0x4c   : > { %v544_v31 = vadd.f32 %v512_v20, %v409_v23  ;;  %v372_v32 = vmul.f32 %v990_v24, %v1260_v0  ;;  %v410_v33 = vadd.f32 %v1274_v10, %v371_v25  ;;  %v993_v34 = vunpack.c.l.bf16 %v1153_v21 }
  0x4d   : > { %v1122_v36 = vpack.c.bf16 %v613_v26, %v612_v22  ;;  %v582_v37 = vadd.f32 %v1291_v29, %v543_v27  ;;  %v513_v38 = vmul.f32 %v1053_v28, %v1265_v1  ;;  %v514_v39 = vmul.f32 %v1054_v30, %v1265_v1 }
  0x4e   : > { %v583_v40 = vadd.f32 %v1291_v29, %v544_v31  ;;  %v411_v41 = vadd.f32 %v1274_v10, %v372_v32  ;;  %v994_v42 = vunpack.c.h.bf16 %v1153_v21  ;;  %v373_v43 = vmul.f32 %v993_v34, %v1260_v0 }
  0x4f   : > { %1180 = vst [vmem:[%s1311_s16 + $0x60] sm:$0xff] %v1122_v36   ;;  %v614_v44 = vmax.f32 %v582_v37, 0.0  ;;  %v545_v45 = vadd.f32 %v513_v38, %v410_v33  ;;  %v1057_v46 = vunpack.c.l.bf16 %v1168_v35  ;;  %v1058_v47 = vunpack.c.h.bf16 %v1168_v35 }
  0x50   : > { %v615_v48 = vmax.f32 %v583_v40, 0.0  ;;  %v546_v49 = vadd.f32 %v514_v39, %v411_v41  ;;  %v374_v50 = vmul.f32 %v994_v42, %v1260_v0  ;;  %v412_v51 = vadd.f32 %v1274_v10, %v373_v43 }
  0x51   : > { %v584_v52 = vadd.f32 %v1291_v29, %v545_v45  ;;  %v515_v53 = vmul.f32 %v1057_v46, %v1265_v1  ;;  %v516_v54 = vmul.f32 %v1058_v47, %v1265_v1 }
  0x52   : > { %v1127_v55 = vpack.c.bf16 %v615_v48, %v614_v44  ;;  %v585_v56 = vadd.f32 %v1291_v29, %v546_v49  ;;  %v413_v57 = vadd.f32 %v1274_v10, %v374_v50 }
  0x53   : > { %v616_v58 = vmax.f32 %v584_v52, 0.0  ;;  %v547_v59 = vadd.f32 %v515_v53, %v412_v51 }
  0x54   : > { %1181 = vst [vmem:[%s1311_s16 + $0x68] sm:$0xff] %v1127_v55   ;;  %v617_v60 = vmax.f32 %v585_v56, 0.0  ;;  %v548_v0 = vadd.f32 %v516_v54, %v413_v57 }
  0x55   : > { %v586_v61 = vadd.f32 %v1291_v29, %v547_v59 }
  0x56   : > { %v1132_v62 = vpack.c.bf16 %v617_v60, %v616_v58  ;;  %v587_v63 = vadd.f32 %v1291_v29, %v548_v0 }
  0x57   : > { %v618_v2 = vmax.f32 %v586_v61, 0.0 }
  0x58   : > { %1182 = vst [vmem:[%s1311_s16 + $0x70] sm:$0xff] %v1132_v62   ;;  %v619_v3 = vmax.f32 %v587_v63, 0.0 }
  0x5a   : > { %v1137_v1 = vpack.c.bf16 %v619_v3, %v618_v2 }
  0x5c   : > { %1183 = vst [vmem:[%s1311_s16 + $0x78] sm:$0xff] %v1137_v1  }
  0x5d PF: > { %s16_s21 = sadd.s32 1, %s1198_s21  }
  0x5e   : > { %p13_p4 = scmp.ge.s32.totalorder %s16_s21, 4  }
  0x60   :  { %15 = sbr.rel (!%p13_p4) target bundleno = 1 (0x1), region = 77 }

// kernel: basic_block_forward.4
= control target key start
LH: loop header
LB: loop body
LE: loop exit
PB: predicated region body
PF: predicated region fallthrough
CT: control target
= control target key end

     0   :  { %s7100_s21 = smov 0   ;;  %s9024_s0 = inlined_call_operand.vmem [shape: bf16[2,256,128], index: 0, kind: input, shape index: {}]   ;;  %s9025_s1 = inlined_call_operand.vmem [shape: f32[1,128], index: 1, kind: input, shape index: {}]   ;;  %s9026_s2 = inlined_call_operand.vmem [shape: f32[1,128], index: 2, kind: input, shape index: {}]   ;;  %s9027_s3 = inlined_call_operand.vmem [shape: bf16[1152,128], index: 3, kind: input, shape index: {}]   ;;  %s9028_s4 = inlined_call_operand.vmem [shape: bf16[2,256,128], index: 4, kind: output, shape index: {0}]   ;;  %s9029_s5 = inlined_call_operand.vmem [shape: f32[2,1,128], index: 5, kind: output, shape index: {1}]   ;;  %s9030_s6 = inlined_call_operand.vmem [shape: f32[2,1,128], index: 6, kind: output, shape index: {2}]  }
   0x1 LB: > { %s5805_s22 = sadd.s32 4294967295, %s7062_s21   ;;  %p5809_p0 = scmp.ge.s32.totalorder %s7062_s21, 1  ;;  %s7062_s21 = sphi %s7100_s21, %s17_s21  }
   0x2   : > { %p217_p1 = scmp.lt.s32.totalorder %s7062_s21, 3 }
   0x4   : > { %p218_p2 = pnand %p5809_p0, %p217_p1 }
   0x6   : > { %221 = sbr.rel (%p218_p2) target bundleno = 754 (0x2f2), region = 36 }
   0xd   : > { %v6931_v0 = vld [vmem:[%s9027_s3 + $0x40] sm:$0xff]   ;;  %v7064_v2 = vmov 0   ;;  %v6933_v3 = vld [vmem:[%s9027_s3 + $0x48] sm:$0xff]   ;;  %v6935_v5 = vld [vmem:[%s9027_s3 + $0x50] sm:$0xff]   ;;  %p253_p3 = scmp.lt.s32.totalorder %s5805_s22, 1  ;;  %vm918_vm3 = vcmask 1043456  }
   0xe   : > { %v6932_v1 = vld [vmem:[%s9027_s3] sm:$0xff]   ;;  %270 = vst [vmem:[#allocation2] sm:$0xf] %v7064_v2  ;;  %271 = vst [vmem:[#allocation2 + $0x4] sm:$0xf] %v7064_v2  ;;  %6386 = vmatprep.subr.bf16.mxu0 %v6931_v0  ;;  %6906 = vmatprep.subr.bf16.mxu1 %v6931_v0  ;;  %v6934_v4 = vld [vmem:[%s9027_s3 + $0x8] sm:$0xff]  }
   0xf   : > { %272 = vst [vmem:[#allocation2 + $0x8] sm:$0x1] %v7064_v2  ;;  %273 = vst [vmem:[#allocation2 + $0xc] sm:$0xf] %v7064_v2  ;;  %6387 = vmatpush3.bf16.msra.mxu0 %v6932_v1  ;;  %6914 = vmatpush3.bf16.msra.mxu1 %v6932_v1  ;;  %v6936_v6 = vld [vmem:[%s9027_s3 + $0x10] sm:$0xff]   ;;  %v6937_v7 = vld [vmem:[%s9027_s3 + $0x58] sm:$0xff]  }
  0x10   : > { %274 = vst [vmem:[#allocation2 + $0x10] sm:$0xf] %v7064_v2  ;;  %275 = vst [vmem:[#allocation2 + $0x14] sm:$0x1] %v7064_v2  ;;  %6388 = vmatprep.subr.bf16.mxu0 %v6933_v3  ;;  %6907 = vmatprep.subr.bf16.mxu1 %v6933_v3  ;;  %s9066_s22 = smov (!%p253_p3, %s5805_s22), 1  ;;  %v6938_v8 = vld [vmem:[%s9027_s3 + $0x18] sm:$0xff]  }
  0x11   : > { %276 = vst [vmem:[#allocation2 + $0x18] sm:$0xf] %v7064_v2  ;;  %277 = vst [vmem:[#allocation2 + $0x1c] sm:$0xf] %v7064_v2  ;;  %v6939_v9 = vld [vmem:[%s9027_s3 + $0x60] sm:$0xff]   ;;  %s6146_s17 = sshll.u32 %s9066_s22, 7  ;;  %s265_s24 = scalar_lea.vmem %s9029_s5, %s9066_s22 }
  0x12   : > { %278 = vst [vmem:[#allocation2 + $0x20] sm:$0x1] %v7064_v2  ;;  %279 = vst [vmem:[#allocation2 + $0x24] sm:$0xf] %v7064_v2  ;;  %v6940_v10 = vld [vmem:[%s9027_s3 + $0x20] sm:$0xff]   ;;  %v6941_v11 = vld [vmem:[%s9027_s3 + $0x68] sm:$0xff]   ;;  %s7153_s26 = scalar_lea.vmem %s9024_s0, %s6146_s17  ;;  %s8779_s23 = scalar_lea.vmem %s9028_s4, %s6146_s17 }
  0x13   : > { %280 = vst [vmem:[#allocation2 + $0x28] sm:$0xf] %v7064_v2  ;;  %281 = vst [vmem:[#allocation2 + $0x2c] sm:$0x1] %v7064_v2  ;;  %6389 = vmatpush3.bf16.msra.mxu0 %v6934_v4  ;;  %6915 = vmatpush3.bf16.msra.mxu1 %v6934_v4  ;;  %vm1227_vm0 = vsmask.f32 3328  ;;  %s268_s28 = scalar_lea.vmem %s9030_s6, %s9066_s22 }
  0x14   : > { %282 = vst [vmem:[#allocation2 + $0x30] sm:$0xf] %v7064_v2  ;;  %283 = vst [vmem:[#allocation2 + $0x34] sm:$0xf] %v7064_v2  ;;  %6390 = vmatprep.subr.bf16.mxu0 %v6935_v5  ;;  %6908 = vmatprep.subr.bf16.mxu1 %v6935_v5  ;;  %vm1228_vm1 = vsmask.f32 7440 }
  0x15   : > { %284 = vst [vmem:[#allocation2 + $0x38] sm:$0x1] %v7064_v2  ;;  %285 = vst [vmem:[#allocation2 + $0x3c] sm:$0xf] %v7064_v2  ;;  %v1179_v12 = vld [vmem:[#allocation2] sm:$0xf] }
  0x16   : > { %286 = vst [vmem:[#allocation2 + $0x40] sm:$0xf] %v7064_v2  ;;  %287 = vst [vmem:[#allocation2 + $0x44] sm:$0x1] %v7064_v2  ;;  %v1180_v13 = vld [vmem:[#allocation2 + $0x4] sm:$0xf] }
  0x17   : > { %288 = vst [vmem:[#allocation2 + $0x48] sm:$0xf] %v7064_v2  ;;  %289 = vst [vmem:[#allocation2 + $0x4c] sm:$0xf] %v7064_v2  ;;  %6391 = vmatpush3.bf16.msra.mxu0 %v6936_v6  ;;  %6916 = vmatpush3.bf16.msra.mxu1 %v6936_v6  ;;  %v1181_v14 = vld [vmem:[#allocation2 + $0x8] sm:$0x1] }
  0x18   : > { %290 = vst [vmem:[#allocation2 + $0x50] sm:$0x1] %v7064_v2  ;;  %291 = vst [vmem:[#allocation2 + $0x54] sm:$0xf] %v7064_v2  ;;  %6392 = vmatprep.subr.bf16.mxu0 %v6937_v7  ;;  %6909 = vmatprep.subr.bf16.mxu1 %v6937_v7  ;;  %v1231_v15 = vshrl.u32 %v1179_v12, 16  ;;  %v1234_v16 = vshll.u32 %v1179_v12, 16 }
  0x19   : > { %292 = vst [vmem:[#allocation2 + $0x58] sm:$0xf] %v7064_v2  ;;  %293 = vst [vmem:[#allocation2 + $0x5c] sm:$0x1] %v7064_v2  ;;  %v6942_v17 = vld [vmem:[%s9027_s3 + $0x28] sm:$0xff]   ;;  %v1240_v18 = vshll.u32 %v1180_v13, 16 }
  0x1a   : > { %294 = vst [vmem:[#allocation2 + $0x60] sm:$0xf] %v7064_v2  ;;  %295 = vst [vmem:[#allocation2 + $0x64] sm:$0xf] %v7064_v2  ;;  %v1244_v19 = vshrl.u32 %v1180_v13, 16  ;;  %v1250_v20 = vshll.u32 %v1181_v14, 16 }
  0x1b   : > { %296 = vst [vmem:[#allocation2 + $0x68] sm:$0x1] %v7064_v2  ;;  %297 = vst [vmem:[#allocation2 + $0x6c] sm:$0xf] %v7064_v2  ;;  %6393 = vmatpush3.bf16.msra.mxu0 %v6938_v8  ;;  %6917 = vmatpush3.bf16.msra.mxu1 %v6938_v8  ;;  %v1233_v21 = vrot.slane %v1231_v15, 4  ;;  %v1236_v22 = vrot.slane %v1234_v16, 5 }
  0x1c   : > { %298 = vst [vmem:[#allocation2 + $0x70] sm:$0xf] %v7064_v2  ;;  %299 = vst [vmem:[#allocation2 + $0x74] sm:$0x1] %v7064_v2  ;;  %6394 = vmatprep.subr.bf16.mxu0 %v6939_v9  ;;  %6910 = vmatprep.subr.bf16.mxu1 %v6939_v9  ;;  %v6213_v23 = vld [vmem:[%s7153_s26] sm:$0xff]   ;;  %v6366_v24 = vld [vmem:[%s7153_s26 + $0x58] sm:$0xff]  }
  0x1d   : > { %300 = vst [vmem:[#allocation2 + $0x78] sm:$0xf] %v7064_v2  ;;  %301 = vst [vmem:[#allocation2 + $0x7c] sm:$0xf] %v7064_v2  ;;  %v6943_v25 = vld [vmem:[%s9027_s3 + $0x70] sm:$0xff]   ;;  %v1242_v26 = vrot.slane %v1240_v18, 5  ;;  %v6214_v28 = vunpack.c.l.bf16 %v6213_v23  ;;  %v1237_v30 = vor.u32 %v1236_v22, %v1233_v21  ;;  %v6215_v31 = vunpack.c.h.bf16 %v6213_v23 }
  0x1e   : > { %302 = vst [vmem:[#allocation2 + $0x80] sm:$0x1] %v7064_v2  ;;  %303 = vst [vmem:[#allocation2 + $0x84] sm:$0xf] %v7064_v2  ;;  %v1246_v27 = vrot.slane %v1244_v19, 4  ;;  %v1252_v35 = vrot.slane %v1250_v20, 5  ;;  %v6258_v37 = vunpack.c.l.bf16 %v6366_v24  ;;  %v6259_v41 = vunpack.c.h.bf16 %v6366_v24 }
  0x1f   : > { %304 = vst [vmem:[#allocation2 + $0x88] sm:$0xf] %v7064_v2  ;;  %305 = vst [vmem:[#allocation2 + $0x8c] sm:$0x1] %v7064_v2  ;;  %6395 = vmatpush3.bf16.msra.mxu0 %v6940_v10  ;;  %6918 = vmatpush3.bf16.msra.mxu1 %v6940_v10  ;;  %v7166_v29 = vld [vmem:[%s9025_s1] ss:$0 sm:$0xff] }
  0x20   : > { %306 = vst [vmem:[#allocation2 + $0x90] sm:$0xf] %v7064_v2  ;;  %307 = vst [vmem:[#allocation2 + $0x94] sm:$0xf] %v7064_v2  ;;  %6396 = vmatprep.subr.bf16.mxu0 %v6941_v11  ;;  %6911 = vmatprep.subr.bf16.mxu1 %v6941_v11  ;;  %v7171_v32 = vld [vmem:[%s9026_s2] ss:$0 sm:$0xff]  ;;  %v1247_v34 = vor.u32 %v1246_v27, %v1242_v26  ;;  %v395_v36 = vmul.f32 %v6214_v28, %v7166_v29 }
  0x21   : > { %308 = vst [vmem:[#allocation2 + $0x98] sm:$0x1] %v7064_v2  ;;  %309 = vst [vmem:[#allocation2 + $0x9c] sm:$0xf] %v7064_v2  ;;  %v6944_v38 = vld [vmem:[%s9027_s3 + $0x30] sm:$0xff]   ;;  %v1238_v39 = vrot.slane %v1237_v30, 4  ;;  %v396_v40 = vmul.f32 %v6215_v31, %v7166_v29  ;;  %v417_v45 = vmul.f32 %v6258_v37, %v7166_v29  ;;  %v418_v48 = vmul.f32 %v6259_v41, %v7166_v29 }
  0x22   : > { %310 = vst [vmem:[#allocation2 + $0xa0] sm:$0xf] %v7064_v2  ;;  %311 = vst [vmem:[#allocation2 + $0xa4] sm:$0x1] %v7064_v2  ;;  %vm594_vm4 = vsmask.f32 256  ;;  %v434_v44 = vadd.f32 %v7171_v32, %v395_v36 }
  0x23   : > { %312 = vst [vmem:[#allocation2 + $0xa8] sm:$0xf] %v7064_v2  ;;  %313 = vst [vmem:[#allocation2 + $0xac] sm:$0xf] %v7064_v2  ;;  %6397 = vmatpush3.bf16.msra.mxu0 %v6942_v17  ;;  %6919 = vmatpush3.bf16.msra.mxu1 %v6942_v17  ;;  %v6945_v42 = vld [vmem:[%s9027_s3 + $0x78] sm:$0xff]   ;;  %v1248_v43 = vrot.slane %v1247_v34, 4  ;;  %v435_v47 = vadd.f32 %v7171_v32, %v396_v40  ;;  %v456_v52 = vadd.f32 %v7171_v32, %v417_v45 }
  0x24   : > { %314 = vst [vmem:[#allocation2 + $0xb0] sm:$0x1] %v7064_v2  ;;  %315 = vst [vmem:[#allocation2 + $0xb4] sm:$0xf] %v7064_v2  ;;  %6398 = vmatprep.subr.bf16.mxu0 %v6943_v25  ;;  %6912 = vmatprep.subr.bf16.mxu1 %v6943_v25  ;;  %vm595_vm5 = vsmask.f32 4368  ;;  %v457_v55 = vadd.f32 %v7171_v32, %v418_v48 }
  0x25   : > { %316 = vst [vmem:[#allocation2 + $0xb8] sm:$0xf] %v7064_v2  ;;  %317 = vst [vmem:[#allocation2 + $0xbc] sm:$0x1] %v7064_v2  ;;  %v6946_v49 = vld [vmem:[%s9027_s3 + $0x38] sm:$0xff]   ;;  %v466_v51 = vmax.f32 %v434_v44, 0.0 }
  0x26   : > { %318 = vst [vmem:[#allocation2 + $0xc0] sm:$0xf] %v7064_v2  ;;  %319 = vst [vmem:[#allocation2 + $0xc4] sm:$0xf] %v7064_v2  ;;  %v467_v54 = vmax.f32 %v435_v47, 0.0  ;;  %v6948_v56 = vld [vmem:[%s9027_s3 + $0xc0] sm:$0xff]  }
  0x27   : > { %320 = vst [vmem:[#allocation2 + $0xc8] sm:$0x1] %v7064_v2  ;;  %321 = vst [vmem:[#allocation2 + $0xcc] sm:$0xf] %v7064_v2  ;;  %6399 = vmatpush3.bf16.msra.mxu0 %v6944_v38  ;;  %6920 = vmatpush3.bf16.msra.mxu1 %v6944_v38  ;;  %v6148_v57 = vpack.c.bf16 %v466_v51, %v466_v51  ;;  %v488_v58 = vmax.f32 %v456_v52, 0.0  ;;  %v6949_v59 = vld [vmem:[%s9027_s3 + $0x140] sm:$0xff]  }
  0x28   : > { %322 = vst [vmem:[#allocation2 + $0xd0] sm:$0xf] %v7064_v2  ;;  %323 = vst [vmem:[#allocation2 + $0xd4] sm:$0x1] %v7064_v2  ;;  %6400 = vmatprep.subr.bf16.mxu0 %v6945_v42  ;;  %6913 = vmatprep.subr.bf16.mxu1 %v6945_v42  ;;  %v6149_v60 = vpack.c.bf16 %v467_v54, %v467_v54  ;;  %vm925_vm6 = vcmask 1040384   ;;  %v489_v61 = vmax.f32 %v457_v55, 0.0 }
  0x29   : > { %vm7175_vm2 = vmor %vm1227_vm0, %vm1228_vm1  ;;  %v6947_v62 = vld [vmem:[#allocation2] sm:$0xff]   ;;  %v598_v63 = vshrl.u32 %v6148_v57, 16  ;;  %v601_v0 = vshll.u32 %v6148_v57, 16  ;;  %vm919_vm7 = vsmask.f32 7938  ;;  %v6170_v1 = vpack.c.bf16 %v488_v58, %v488_v58  ;;  %v6356_v2 = vld [vmem:[%s7153_s26 + $0x8] sm:$0xff]  }
  0x2a   : > { %v1243_v46 = vsel %vm7175_vm2, %v1238_v39, %v1242_v26  ;;  %v1253_v50 = vsel %vm7175_vm2, %v1248_v43, %v1252_v35  ;;  %v606_v3 = vshrl.u32 %v6149_v60, 16  ;;  %v609_v4 = vshll.u32 %v6149_v60, 16  ;;  %v921_v5 = vld [vmem:[#allocation2 + $0xc] sm:$0xf]  ;;  %v6953_v7 = vld [vmem:[%s9027_s3 + $0x100] sm:$0xff]   ;;  %vm7212_vm8 = vmor %vm594_vm4, %vm595_vm5 }
  0x2b   : > { %v5864_v53 = vcombine.low %v1243_v46, %v1253_v50  ;;  %6401 = vmatpush3.bf16.msra.mxu0 %v6946_v49  ;;  %6921 = vmatpush3.bf16.msra.mxu1 %v6946_v49  ;;  %v6171_v6 = vpack.c.bf16 %v489_v61, %v489_v61  ;;  %v6218_v8 = vunpack.c.l.bf16 %v6356_v2  ;;  %v600_v10 = vrot.slane %v598_v63, 7  ;;  %v927_v11 = vld [vmem:[#allocation2 + $0x14] sm:$0x1]  ;;  %vm7218_vm9 = vmand %vm918_vm3, %vm919_vm7  ;;  %v1000_v19 = vld [vmem:[#allocation2 + $0x90] sm:$0xf] }
  0x2c   : > { %v785_v12 = vshrl.u32 %v6170_v1, 16  ;;  %v788_v13 = vshll.u32 %v6170_v1, 16  ;;  %6498 = vmatprep.subr.bf16.mxu1 %v6948_v56  ;;  %6610 = vmatprep.subr.bf16.mxu0 %v6949_v59  ;;  %v6219_v14 = vunpack.c.h.bf16 %v6356_v2  ;;  %v608_v15 = vrot.slane %v606_v3, 7  ;;  %v6367_v21 = vld [vmem:[%s7153_s26 + $0x60] sm:$0xff]   ;;  %vm7226_vm10 = vmand %vm925_vm6, %vm594_vm4  ;;  %v1004_v26 = vld [vmem:[#allocation2 + $0x98] sm:$0x1] }
  0x2d   : > { %4626 = vmatprep.mubr.bf16.mxu0 %v5864_v53  ;;  %v793_v17 = vshrl.u32 %v6171_v6, 16  ;;  %v796_v18 = vshll.u32 %v6171_v6, 16  ;;  %v397_v20 = vmul.f32 %v6218_v8, %v7166_v29  ;;  %v603_v22 = vor.u32 %v601_v0, %v600_v10  ;;  %v6961_v43 = vld [vmem:[%s9027_s3 + $0x148] sm:$0xff]   ;;  %v6357_v52 = vld [vmem:[%s7153_s26 + $0x10] sm:$0xff]  }
  0x2e   : > { %4627 = vmatmul.mubr.bf16.vlgmr.msra.gmra.mrb[0].mxu0 %v6947_v62  ;;  %v604_v23 = vrot.slane %v600_v10, 4  ;;  %v787_v25 = vrot.slane %v785_v12, 7  ;;  %v398_v27 = vmul.f32 %v6219_v14, %v7166_v29  ;;  %v611_v28 = vor.u32 %v609_v4, %v608_v15  ;;  %v6963_v48 = vld [vmem:[%s9027_s3 + $0x108] sm:$0xff]  }
  0x2f   : > { %v613_v30 = vrot.slane %v608_v15, 4  ;;  %v795_v31 = vrot.slane %v793_v17, 7  ;;  %6611 = vmatpush3.bf16.msra.mxu0 %v6953_v7  ;;  %v436_v34 = vadd.f32 %v7171_v32, %v397_v20  ;;  %v922_v35 = vsel %vm7218_vm9, %v603_v22, %v921_v5  ;;  %v6368_v57 = vld [vmem:[%s7153_s26 + $0x68] sm:$0xff]  }
  0x30   : > { %v790_v36 = vor.u32 %v788_v13, %v787_v25  ;;  %v791_v37 = vrot.slane %v787_v25, 4  ;;  %v437_v38 = vadd.f32 %v7171_v32, %v398_v27  ;;  %v612_v39 = vsel %vm7212_vm8, %v604_v23, %v611_v28  ;;  %923 = vst [vmem:[#allocation2 + $0xc] sm:$0xf] %v922_v35  ;;  %6612 = vmatprep.subr.bf16.mxu0 %v6961_v43  ;;  %v934_v43 = vld [vmem:[#allocation2 + $0x20] sm:$0x1] }
  0x31   : > { %v928_v40 = vsel %vm7226_vm10, %v613_v30, %v927_v11  ;;  %v798_v41 = vor.u32 %v796_v18, %v795_v31  ;;  %v800_v42 = vrot.slane %v795_v31, 4  ;;  %924 = vst [vmem:[#allocation2 + $0x10] sm:$0xf] %v612_v39  ;;  %v468_v45 = vmax.f32 %v436_v34, 0.0 }
  0x32   : > { %929 = vst [vmem:[#allocation2 + $0x14] sm:$0x1] %v928_v40  ;;  %v1001_v44 = vsel %vm7218_vm9, %v790_v36, %v1000_v19  ;;  %v469_v46 = vmax.f32 %v437_v38, 0.0  ;;  %v6262_v47 = vunpack.c.l.bf16 %v6367_v21  ;;  %v6263_v51 = vunpack.c.h.bf16 %v6367_v21  ;;  %v930_v38 = vld [vmem:[#allocation2 + $0x18] sm:$0xf] }
  0x33   : > { %v799_v49 = vsel %vm7212_vm8, %v791_v37, %v798_v41  ;;  %1002 = vst [vmem:[#allocation2 + $0x90] sm:$0xf] %v1001_v44  ;;  %v1005_v50 = vsel %vm7226_vm10, %v800_v42, %v1004_v26  ;;  %v6150_v53 = vpack.c.bf16 %v468_v45, %v468_v45  ;;  %6613 = vmatpush3.bf16.msra.mxu0 %v6963_v48  ;;  %v6222_v56 = vunpack.c.l.bf16 %v6357_v52 }
  0x34   : > { %1003 = vst [vmem:[#allocation2 + $0x94] sm:$0xf] %v799_v49  ;;  %1006 = vst [vmem:[#allocation2 + $0x98] sm:$0x1] %v1005_v50  ;;  %v6151_v54 = vpack.c.bf16 %v469_v46, %v469_v46  ;;  %v419_v55 = vmul.f32 %v6262_v47, %v7166_v29  ;;  %v420_v58 = vmul.f32 %v6263_v51, %v7166_v29  ;;  %v6223_v59 = vunpack.c.h.bf16 %v6357_v52 }
  0x35   : > { %v6266_v60 = vunpack.c.l.bf16 %v6368_v57  ;;  %v6267_v61 = vunpack.c.h.bf16 %v6368_v57  ;;  %v615_v62 = vshrl.u32 %v6150_v53, 16  ;;  %v618_v63 = vshll.u32 %v6150_v53, 16 }
  0x36   : > { %v623_v0 = vshrl.u32 %v6151_v54, 16  ;;  %v626_v1 = vshll.u32 %v6151_v54, 16  ;;  %v7256_v2 = vadd.f32 %v7171_v32, %v419_v55  ;;  %v7259_v3 = vadd.f32 %v7171_v32, %v420_v58 }
  0x37   : > { %v399_v4 = vmul.f32 %v6222_v56, %v7166_v29  ;;  %v400_v5 = vmul.f32 %v6223_v59, %v7166_v29  ;;  %v1182_v6 = vld [vmem:[#allocation2 + $0xc] sm:$0xf]  ;;  %v617_v7 = vrot.slane %v615_v62, 7  ;;  %v421_v10 = vmul.f32 %v6266_v60, %v7166_v29 }
  0x38   : > { %v625_v8 = vrot.slane %v623_v0, 7  ;;  %v422_v11 = vmul.f32 %v6267_v61, %v7166_v29  ;;  %v1183_v12 = vld [vmem:[#allocation2 + $0x10] sm:$0xf]  ;;  %v1255_v14 = vshrl.u32 %v1182_v6, 16  ;;  %v1258_v15 = vshll.u32 %v1182_v6, 16 }
  0x39   : > { %v1184_v13 = vld [vmem:[#allocation2 + $0x14] sm:$0x1]  ;;  %v7266_v17 = vadd.f32 %v7171_v32, %v399_v4  ;;  %v7269_v18 = vadd.f32 %v7171_v32, %v400_v5  ;;  %v1264_v19 = vshll.u32 %v1183_v12, 16  ;;  %v1268_v20 = vshrl.u32 %v1183_v12, 16  ;;  %v6950_v61 = vld [vmem:[#allocation2 + $0xc] sm:$0xff]  }
  0x3a   : > { %v1274_v21 = vshll.u32 %v1184_v13, 16  ;;  %v1215_v22 = vld [vmem:[#allocation2 + $0x90] sm:$0xf]  ;;  %v620_v23 = vor.u32 %v618_v63, %v617_v7  ;;  %v1257_v25 = vrot.slane %v1255_v14, 4  ;;  %v1260_v26 = vrot.slane %v1258_v15, 5 }
  0x3b   : > { %v1216_v27 = vld [vmem:[#allocation2 + $0x94] sm:$0xf]  ;;  %v1217_v28 = vld [vmem:[#allocation2 + $0x98] sm:$0x1]  ;;  %v628_v30 = vor.u32 %v626_v1, %v625_v8  ;;  %v7272_v31 = vadd.f32 %v7171_v32, %v421_v10  ;;  %v1266_v34 = vrot.slane %v1264_v19, 5  ;;  %v1270_v35 = vrot.slane %v1268_v20, 4 }
  0x3c   : > { %v1276_v36 = vrot.slane %v1274_v21, 5  ;;  %v1519_v37 = vshrl.u32 %v1215_v22, 16  ;;  %v1261_v39 = vor.u32 %v1260_v26, %v1257_v25  ;;  %v1522_v40 = vshll.u32 %v1215_v22, 16  ;;  %v6971_v14 = vld [vmem:[%s9027_s3 + $0x150] sm:$0xff]   ;;  %v6954_v26 = vld [vmem:[%s9027_s3 + $0xc8] sm:$0xff]  }
  0x3d   : > { %v1528_v41 = vshll.u32 %v1216_v27, 16  ;;  %v1532_v42 = vshrl.u32 %v1216_v27, 16  ;;  %v1271_v44 = vor.u32 %v1270_v35, %v1266_v34  ;;  %v1538_v46 = vshll.u32 %v1217_v28, 16  ;;  %v7308_v20 = vld [vmem:[%s7153_s26 + $0x70] sm:$0xff]   ;;  %6614 = vmatprep.subr.bf16.mxu0 %v6971_v14  ;;  %v1007_v28 = vld [vmem:[#allocation2 + $0x9c] sm:$0xf] }
  0x3e   : > { %v1521_v45 = vrot.slane %v1519_v37, 4  ;;  %v621_v47 = vrot.slane %v617_v7, 4  ;;  %v1262_v48 = vrot.slane %v1261_v39, 4  ;;  %v1524_v49 = vrot.slane %v1522_v40, 5  ;;  %v6951_v7 = vld [vmem:[#allocation2 + $0x90] sm:$0xff]  }
  0x3f   : > { %v1530_v50 = vrot.slane %v1528_v41, 5  ;;  %v1534_v51 = vrot.slane %v1532_v42, 4  ;;  %v1272_v52 = vrot.slane %v1271_v44, 4  ;;  %v1540_v53 = vrot.slane %v1538_v46, 5  ;;  %v6975_v25 = vld [vmem:[%s9027_s3 + $0x110] sm:$0xff]   ;;  %v6955_v46 = vld [vmem:[%s9027_s3 + $0x88] sm:$0xff]  }
  0x40   : > { %v629_v54 = vsel %vm7212_vm8, %v621_v47, %v628_v30  ;;  %v630_v55 = vrot.slane %v625_v8, 4  ;;  %v1267_v56 = vsel %vm7175_vm2, %v1262_v48, %v1266_v34  ;;  %v1525_v57 = vor.u32 %v1524_v49, %v1521_v45  ;;  %v6952_v8 = vld [vmem:[%s9027_s3 + $0x80] sm:$0xff]   ;;  %6615 = vmatpush3.bf16.msra.mxu0 %v6975_v25  ;;  %v941_v14 = vld [vmem:[#allocation2 + $0x2c] sm:$0x1] }
  0x41   : > { %v1535_v58 = vor.u32 %v1534_v51, %v1530_v50  ;;  %v931_v59 = vsel %vm7218_vm9, %v620_v23, %v930_v38  ;;  %933 = vst [vmem:[#allocation2 + $0x1c] sm:$0xf] %v629_v54  ;;  %v1277_v60 = vsel %vm7175_vm2, %v1272_v52, %v1276_v36  ;;  %v490_v63 = vmax.f32 %v7256_v2, 0.0 }
  0x42   : > { %932 = vst [vmem:[#allocation2 + $0x18] sm:$0xf] %v931_v59  ;;  %v935_v62 = vsel %vm7226_vm10, %v630_v55, %v934_v43  ;;  %v491_v0 = vmax.f32 %v7259_v3, 0.0  ;;  %v5865_v1 = vcombine.low %v1267_v56, %v1277_v60  ;;  %v1526_v4 = vrot.slane %v1525_v57, 4  ;;  %v7295_v3 = vld [vmem:[%s7153_s26 + $0x18] sm:$0xff]   ;;  %v6956_v56 = vld [vmem:[%s9027_s3 + $0xd0] sm:$0xff]  }
  0x43   : > { %v1536_v5 = vrot.slane %v1535_v58, 4  ;;  %936 = vst [vmem:[#allocation2 + $0x20] sm:$0x1] %v935_v62  ;;  %v470_v6 = vmax.f32 %v7266_v17, 0.0  ;;  %v6172_v10 = vpack.c.bf16 %v490_v63, %v490_v63  ;;  %v471_v13 = vmax.f32 %v7269_v18, 0.0 }
  0x44   : > { %v6173_v12 = vpack.c.bf16 %v491_v0, %v491_v0  ;;  %v7292_v2 = vadd.f32 %v7171_v32, %v422_v11  ;;  %4634 = vmatprep.mubr.bf16.mxu0 %v5865_v1  ;;  %v1531_v15 = vsel %vm7175_vm2, %v1526_v4, %v1530_v50  ;;  %v492_v18 = vmax.f32 %v7272_v31, 0.0  ;;  %v1011_v43 = vld [vmem:[#allocation2 + $0xa4] sm:$0x1] }
  0x45   : > { %v1541_v17 = vsel %vm7175_vm2, %v1536_v5, %v1540_v53  ;;  %v7304_v19 = vpack.c.bf16 %v470_v6, %v470_v6  ;;  %4635 = vmatmul.mubr.bf16.gmra.mrb[4].mxu0 %v6950_v61  ;;  %v802_v21 = vshrl.u32 %v6172_v10, 16  ;;  %v805_v22 = vshll.u32 %v6172_v10, 16  ;;  %v6959_v61 = vld [vmem:[%s9027_s3 + $0x90] sm:$0xff]   ;;  %v937_v62 = vld [vmem:[#allocation2 + $0x24] sm:$0xf] }
  0x46   : > { %v5876_v11 = vcombine.low %v1531_v15, %v1541_v17  ;;  %v810_v23 = vshrl.u32 %v6173_v12, 16  ;;  %v813_v27 = vshll.u32 %v6173_v12, 16  ;;  %v7316_v30 = vpack.c.bf16 %v471_v13, %v471_v13  ;;  %v6960_v12 = vld [vmem:[%s9027_s3 + $0xd8] sm:$0xff]  }
  0x47   : > { %v632_v31 = vshrl.u32 %v7304_v19, 16  ;;  %v635_v34 = vshll.u32 %v7304_v19, 16  ;;  %v804_v36 = vrot.slane %v802_v21, 7  ;;  %v7320_v38 = vpack.c.bf16 %v492_v18, %v492_v18  ;;  %v6962_v19 = vld [vmem:[%s9027_s3 + $0x98] sm:$0xff]  }
  0x48   : > { %4722 = vmatprep.mubr.bf16.mxu1 %v5876_v11  ;;  %v1186_v35 = vld [vmem:[#allocation2 + $0x1c] sm:$0xf]  ;;  %v812_v37 = vrot.slane %v810_v23, 7  ;;  %v6226_v39 = vunpack.c.l.bf16 %v7295_v3  ;;  %v6227_v44 = vunpack.c.h.bf16 %v7295_v3  ;;  %v6270_v45 = vunpack.c.l.bf16 %v7308_v20 }
  0x49   : > { %4723 = vmatmul.mubr.bf16.vlgmr.msra.gmra.mrb[0].mxu1 %v6951_v7  ;;  %v1185_v40 = vld [vmem:[#allocation2 + $0x18] sm:$0xf]  ;;  %v1288_v41 = vshll.u32 %v1186_v35, 16  ;;  %v1292_v42 = vshrl.u32 %v1186_v35, 16  ;;  %v807_v50 = vor.u32 %v805_v22, %v804_v36  ;;  %v808_v51 = vrot.slane %v804_v36, 4 }
  0x4a   : > { %6499 = vmatpush3.bf16.msra.mxu1 %v6952_v8  ;;  %v1187_v47 = vld [vmem:[#allocation2 + $0x20] sm:$0x1]  ;;  %v1279_v48 = vshrl.u32 %v1185_v40, 16  ;;  %v1282_v49 = vshll.u32 %v1185_v40, 16  ;;  %v815_v55 = vor.u32 %v813_v27, %v812_v37  ;;  %v817_v59 = vrot.slane %v812_v37, 4  ;;  %v6957_v23 = vld [vmem:[#allocation2 + $0x18] sm:$0xff]  }
  0x4b   : > { %6500 = vmatprep.subr.bf16.mxu1 %v6954_v26  ;;  %v1290_v52 = vrot.slane %v1288_v41, 5  ;;  %v1294_v53 = vrot.slane %v1292_v42, 4  ;;  %v1298_v54 = vshll.u32 %v1187_v47, 16  ;;  %v1008_v60 = vsel %vm7218_vm9, %v807_v50, %v1007_v28  ;;  %v1014_v27 = vld [vmem:[#allocation2 + $0xa8] sm:$0xf]  ;;  %v6982_v47 = vld [vmem:[%s9027_s3 + $0x158] sm:$0xff]  }
  0x4c   : > { %v1281_v57 = vrot.slane %v1279_v48, 4  ;;  %v1284_v58 = vrot.slane %v1282_v49, 5  ;;  %v816_v1 = vsel %vm7212_vm8, %v808_v51, %v815_v55  ;;  %1009 = vst [vmem:[#allocation2 + $0x9c] sm:$0xf] %v1008_v60  ;;  %v634_v4 = vrot.slane %v632_v31, 7  ;;  %6616 = vmatprep.subr.bf16.mxu0 %v6982_v47 }
  0x4d   : > { %v1295_v63 = vor.u32 %v1294_v53, %v1290_v52  ;;  %v1300_v0 = vrot.slane %v1298_v54, 5  ;;  %1010 = vst [vmem:[#allocation2 + $0xa0] sm:$0xf] %v816_v1  ;;  %v1012_v6 = vsel %vm7226_vm10, %v817_v59, %v1011_v43  ;;  %v640_v7 = vshrl.u32 %v7316_v30, 16 }
  0x4e   : > { %6501 = vmatpush3.bf16.msra.mxu1 %v6955_v46  ;;  %v1285_v5 = vor.u32 %v1284_v58, %v1281_v57  ;;  %v643_v8 = vshll.u32 %v7316_v30, 16  ;;  %1013 = vst [vmem:[#allocation2 + $0xa4] sm:$0x1] %v1012_v6  ;;  %v637_v13 = vor.u32 %v635_v34, %v634_v4  ;;  %v638_v3 = vrot.slane %v634_v4, 4  ;;  %v6967_v57 = vld [vmem:[%s9027_s3 + $0xa0] sm:$0xff]   ;;  %v6983_v6 = vld [vmem:[%s9027_s3 + $0x118] sm:$0xff]  }
  0x4f   : > { %v1296_v10 = vrot.slane %v1295_v63, 4  ;;  %6502 = vmatprep.subr.bf16.mxu1 %v6956_v56  ;;  %v493_v15 = vmax.f32 %v7292_v2, 0.0  ;;  %v642_v18 = vrot.slane %v640_v7, 7  ;;  %v819_v11 = vshrl.u32 %v7320_v38, 16  ;;  %6617 = vmatpush3.bf16.msra.mxu0 %v6983_v6 }
  0x50   : > { %v1286_v17 = vrot.slane %v1285_v5, 4  ;;  %v822_v21 = vshll.u32 %v7320_v38, 16  ;;  %v938_v25 = vsel %vm7218_vm9, %v637_v13, %v937_v62  ;;  %v401_v2 = vmul.f32 %v6226_v39, %v7166_v29  ;;  %v6964_v38 = vld [vmem:[%s9027_s3 + $0xe0] sm:$0xff]   ;;  %v1018_v5 = vld [vmem:[#allocation2 + $0xb0] sm:$0x1] }
  0x51   : > { %v1301_v22 = vsel %vm7175_vm2, %v1296_v10, %v1300_v0  ;;  %v6175_v26 = vpack.c.bf16 %v493_v15, %v493_v15  ;;  %v645_v30 = vor.u32 %v643_v8, %v642_v18  ;;  %v647_v31 = vrot.slane %v642_v18, 4  ;;  %939 = vst [vmem:[#allocation2 + $0x24] sm:$0xf] %v938_v25  ;;  %v6970_v18 = vld [vmem:[%s9027_s3 + $0xf0] sm:$0xff]  }
  0x52   : > { %v1291_v28 = vsel %vm7175_vm2, %v1286_v17, %v1290_v52  ;;  %6503 = vmatpush3.bf16.msra.mxu1 %v6959_v61  ;;  %v821_v34 = vrot.slane %v819_v11, 7  ;;  %v402_v40 = vmul.f32 %v6227_v44, %v7166_v29  ;;  %v440_v44 = vadd.f32 %v7171_v32, %v401_v2  ;;  %v6968_v61 = vld [vmem:[%s9027_s3 + $0xe8] sm:$0xff]  }
  0x53   : > { %v5866_v35 = vcombine.low %v1291_v28, %v1301_v22  ;;  %6504 = vmatprep.subr.bf16.mxu1 %v6960_v12  ;;  %v827_v36 = vshrl.u32 %v6175_v26, 16  ;;  %v830_v37 = vshll.u32 %v6175_v26, 16  ;;  %v1218_v41 = vld [vmem:[#allocation2 + $0x9c] sm:$0xf]  ;;  %v646_v39 = vsel %vm7212_vm8, %v638_v3, %v645_v30 }
  0x54   : > { %v942_v42 = vsel %vm7226_vm10, %v647_v31, %v941_v14  ;;  %v824_v43 = vor.u32 %v822_v21, %v821_v34  ;;  %v825_v46 = vrot.slane %v821_v34, 4  ;;  %v1219_v48 = vld [vmem:[#allocation2 + $0xa0] sm:$0xf]  ;;  %v1543_v49 = vshrl.u32 %v1218_v41, 16  ;;  %940 = vst [vmem:[#allocation2 + $0x28] sm:$0xf] %v646_v39 }
  0x55   : > { %4642 = vmatprep.mubr.bf16.mxu0 %v5866_v35  ;;  %v1546_v50 = vshll.u32 %v1218_v41, 16  ;;  %943 = vst [vmem:[#allocation2 + $0x2c] sm:$0x1] %v942_v42  ;;  %v441_v51 = vadd.f32 %v7171_v32, %v402_v40  ;;  %v1220_v52 = vld [vmem:[#allocation2 + $0xa4] sm:$0x1]  ;;  %v1552_v53 = vshll.u32 %v1219_v48, 16  ;;  %v6271_v28 = vunpack.c.h.bf16 %v7308_v20 }
  0x56   : > { %v1556_v54 = vshrl.u32 %v1219_v48, 16  ;;  %4643 = vmatmul.mubr.bf16.gmra.mrb[8].mxu0 %v6957_v23  ;;  %6505 = vmatpush3.bf16.msra.mxu1 %v6962_v19  ;;  %v829_v55 = vrot.slane %v827_v36, 7  ;;  %v1015_v56 = vsel %vm7218_vm9, %v824_v43, %v1014_v27  ;;  %v1545_v58 = vrot.slane %v1543_v49, 4  ;;  %v6969_v19 = vld [vmem:[%s9027_s3 + $0xa8] sm:$0xff]   ;;  %v6958_v34 = vld [vmem:[#allocation2 + $0x9c] sm:$0xff]  }
  0x57   : > { %v1548_v59 = vrot.slane %v1546_v50, 5  ;;  %v1562_v60 = vshll.u32 %v1220_v52, 16  ;;  %1016 = vst [vmem:[#allocation2 + $0xa8] sm:$0xf] %v1015_v56  ;;  %6506 = vmatprep.subr.bf16.mxu1 %v6964_v38  ;;  %v472_v62 = vmax.f32 %v440_v44, 0.0  ;;  %v1554_v63 = vrot.slane %v1552_v53, 5 }
  0x58   : > { %v1558_v0 = vrot.slane %v1556_v54, 4  ;;  %v832_v1 = vor.u32 %v830_v37, %v829_v55  ;;  %v834_v4 = vrot.slane %v829_v55, 4  ;;  %v1188_v10 = vld [vmem:[#allocation2 + $0x24] sm:$0xf]  ;;  %v473_v12 = vmax.f32 %v441_v51, 0.0  ;;  %v6974_v38 = vld [vmem:[%s9027_s3 + $0xb0] sm:$0xff]  }
  0x59   : > { %v1549_v7 = vor.u32 %v1548_v59, %v1545_v58  ;;  %v1564_v8 = vrot.slane %v1562_v60, 5  ;;  %v6154_v13 = vpack.c.bf16 %v472_v62, %v472_v62  ;;  %v1303_v14 = vshrl.u32 %v1188_v10, 16  ;;  %v944_v56 = vld [vmem:[#allocation2 + $0x30] sm:$0xf] }
  0x5a   : > { %v1559_v3 = vor.u32 %v1558_v0, %v1554_v63  ;;  %v1306_v15 = vshll.u32 %v1188_v10, 16  ;;  %v833_v17 = vsel %vm7212_vm8, %v825_v46, %v832_v1  ;;  %6507 = vmatpush3.bf16.msra.mxu1 %v6967_v57  ;;  %v1019_v21 = vsel %vm7226_vm10, %v834_v4, %v1018_v5  ;;  %v6977_v5 = vld [vmem:[%s9027_s3 + $0xb8] sm:$0xff]  }
  0x5b   : > { %v1550_v11 = vrot.slane %v1549_v7, 4  ;;  %1017 = vst [vmem:[#allocation2 + $0xac] sm:$0xf] %v833_v17  ;;  %6508 = vmatprep.subr.bf16.mxu1 %v6968_v61  ;;  %v7392_v22 = vpack.c.bf16 %v473_v12, %v473_v12  ;;  %v649_v23 = vshrl.u32 %v6154_v13, 16  ;;  %v1189_v26 = vld [vmem:[#allocation2 + $0x28] sm:$0xf]  ;;  %v423_v30 = vmul.f32 %v6270_v45, %v7166_v29 }
  0x5c   : > { %v1560_v25 = vrot.slane %v1559_v3, 4  ;;  %v1190_v27 = vld [vmem:[#allocation2 + $0x2c] sm:$0x1]  ;;  %v1305_v2 = vrot.slane %v1303_v14, 4  ;;  %1020 = vst [vmem:[#allocation2 + $0xb0] sm:$0x1] %v1019_v21  ;;  %v424_v20 = vmul.f32 %v6271_v28, %v7166_v29 }
  0x5d   : > { %v1555_v31 = vsel %vm7175_vm2, %v1550_v11, %v1554_v63  ;;  %v1308_v35 = vrot.slane %v1306_v15, 5  ;;  %v1312_v36 = vshll.u32 %v1189_v26, 16  ;;  %v1316_v37 = vshrl.u32 %v1189_v26, 16  ;;  %v6976_v45 = vld [vmem:[%s9027_s3 + $0xf8] sm:$0xff]   ;;  %v6979_v3 = vld [vmem:[%s9027_s3 + $0x1c0] sm:$0xff]  }
  0x5e   : > { %v1565_v40 = vsel %vm7175_vm2, %v1560_v25, %v1564_v8  ;;  %v1322_v41 = vshll.u32 %v1190_v27, 16  ;;  %v1221_v39 = vld [vmem:[#allocation2 + $0xa8] sm:$0xf]  ;;  %6509 = vmatpush3.bf16.msra.mxu1 %v6969_v19  ;;  %v651_v42 = vrot.slane %v649_v23, 7  ;;  %vm1790_vm11 = vcmask 1042432  }
  0x5f   : > { %vm1791_vm12 = vcmask 1046532   ;;  %v5877_v43 = vcombine.low %v1555_v31, %v1565_v40  ;;  %v1309_v46 = vor.u32 %v1308_v35, %v1305_v2  ;;  %v1314_v47 = vrot.slane %v1312_v36, 5  ;;  %6510 = vmatprep.subr.bf16.mxu1 %v6970_v18  ;;  %v6965_v8 = vld [vmem:[#allocation2 + $0x24] sm:$0xff]   ;;  %v1694_v28 = vld [vmem:[#allocation2] sm:$0xe] }
  0x60   : > { %v1318_v48 = vrot.slane %v1316_v37, 4  ;;  %v1324_v49 = vrot.slane %v1322_v41, 5  ;;  %v1567_v50 = vshrl.u32 %v1221_v39, 16  ;;  %v1570_v44 = vshll.u32 %v1221_v39, 16  ;;  %vm7434_vm13 = vmor %vm1790_vm11, %vm1791_vm12 }
  0x61   : > { %v652_v51 = vshll.u32 %v6154_v13, 16  ;;  %4730 = vmatprep.mubr.bf16.mxu1 %v5877_v43  ;;  %v1310_v52 = vrot.slane %v1309_v46, 4  ;;  %v655_v54 = vrot.slane %v651_v42, 4  ;;  %v657_v55 = vshrl.u32 %v7392_v22, 16  ;;  %v6359_v13 = vld [vmem:[%s7153_s26 + $0x20] sm:$0xff]  }
  0x62   : > { %v1319_v53 = vor.u32 %v1318_v48, %v1314_v47  ;;  %4731 = vmatmul.mubr.bf16.gmra.mrb[4].mxu1 %v6958_v34  ;;  %v1222_v57 = vld [vmem:[#allocation2 + $0xac] sm:$0xf]  ;;  %v1569_v58 = vrot.slane %v1567_v50, 4  ;;  %v1572_v59 = vrot.slane %v1570_v44, 5  ;;  %v462_v61 = vadd.f32 %v7171_v32, %v423_v30  ;;  %v1695_v30 = vld [vmem:[#allocation2 + $0x4] sm:$0xf] }
  0x63   : > { %v654_v60 = vor.u32 %v652_v51, %v651_v42  ;;  %v1315_v62 = vsel %vm7175_vm2, %v1310_v52, %v1314_v47  ;;  %v1223_v0 = vld [vmem:[#allocation2 + $0xb0] sm:$0x1]  ;;  %v1576_v1 = vshll.u32 %v1222_v57, 16  ;;  %v1580_v4 = vshrl.u32 %v1222_v57, 16  ;;  %6511 = vmatpush3.bf16.msra.mxu1 %v6974_v38  ;;  %v6966_v39 = vld [vmem:[#allocation2 + $0xa8] sm:$0xff]   ;;  %v6987_v46 = vld [vmem:[%s9027_s3 + $0x160] sm:$0xff]  }
  0x64   : > { %v1320_v63 = vrot.slane %v1319_v53, 4  ;;  %v1573_v6 = vor.u32 %v1572_v59, %v1569_v58  ;;  %v1586_v7 = vshll.u32 %v1223_v0, 16  ;;  %v659_v10 = vrot.slane %v657_v55, 7  ;;  %6512 = vmatprep.subr.bf16.mxu1 %v6976_v45  ;;  %v7448_v51 = vld [vmem:[%s9026_s2] ss:$0 sm:$0xff]  ;;  %6618 = vmatprep.subr.bf16.mxu0 %v6987_v46 }
  0x65   : > { %v660_v12 = vshll.u32 %v7392_v22, 16  ;;  %v1578_v15 = vrot.slane %v1576_v1, 5  ;;  %v1582_v17 = vrot.slane %v1580_v4, 4  ;;  %v945_v19 = vsel %vm7218_vm9, %v654_v60, %v944_v56  ;;  %v948_v22 = vld [vmem:[#allocation2 + $0x38] sm:$0x1] }
  0x66   : > { %v1325_v14 = vsel %vm7175_vm2, %v1320_v63, %v1324_v49  ;;  %v1574_v11 = vrot.slane %v1573_v6, 4  ;;  %v1588_v21 = vrot.slane %v1586_v7, 5  ;;  %946 = vst [vmem:[#allocation2 + $0x30] sm:$0xf] %v945_v19  ;;  %v664_v26 = vrot.slane %v659_v10, 4 }
  0x67   : > { %v5867_v18 = vcombine.low %v1315_v62, %v1325_v14  ;;  %v662_v23 = vor.u32 %v660_v12, %v659_v10  ;;  %v1583_v25 = vor.u32 %v1582_v17, %v1578_v15  ;;  %v463_v27 = vadd.f32 %v7171_v32, %v424_v20  ;;  %6513 = vmatpush3.bf16.msra.mxu1 %v6977_v5  ;;  %v1696_v53 = vld [vmem:[#allocation2 + $0x8] sm:$0x1]  ;;  %v1021_v59 = vld [vmem:[#allocation2 + $0xb4] sm:$0xf]  ;;  %v1025_v63 = vld [vmem:[#allocation2 + $0xbc] sm:$0x1] }
  0x68   : > { %v494_v2 = vmax.f32 %v462_v61, 0.0  ;;  %v1579_v31 = vsel %vm7175_vm2, %v1574_v11, %v1578_v15  ;;  %v6230_v35 = vunpack.c.l.bf16 %v6359_v13  ;;  %v6231_v36 = vunpack.c.h.bf16 %v6359_v13  ;;  %6722 = vmatprep.subr.bf16.mxu1 %v6979_v3 }
  0x69   : > { %4650 = vmatprep.mubr.bf16.mxu0 %v5867_v18  ;;  %v663_v34 = vsel %vm7212_vm8, %v655_v54, %v662_v23  ;;  %v1584_v37 = vrot.slane %v1583_v25, 4  ;;  %v949_v32 = vsel %vm7226_vm10, %v664_v26, %v948_v22  ;;  %v495_v38 = vmax.f32 %v463_v27, 0.0  ;;  %v6360_v26 = vld [vmem:[%s7153_s26 + $0x28] sm:$0xff]  }
  0x6a   : > { %4651 = vmatmul.mubr.bf16.gmra.mrb[12].mxu0 %v6965_v8  ;;  %947 = vst [vmem:[#allocation2 + $0x34] sm:$0xf] %v663_v34  ;;  %v6176_v40 = vpack.c.bf16 %v494_v2, %v494_v2  ;;  %950 = vst [vmem:[#allocation2 + $0x38] sm:$0x1] %v949_v32  ;;  %v403_v42 = vmul.f32 %v6230_v35, %v7166_v29  ;;  %v404_v20 = vmul.f32 %v6231_v36, %v7166_v29  ;;  %v6990_v8 = vld [vmem:[%s9027_s3 + $0x120] sm:$0xff]  }
  0x6b   : > { %v5880_v45 = vrot.slane %v1694_v28, 9  ;;  %v1795_v43 = vrot.slane %v1695_v30, 5  ;;  %v1589_v47 = vsel %vm7175_vm2, %v1584_v37, %v1588_v21  ;;  %v6177_v48 = vpack.c.bf16 %v495_v38, %v495_v38  ;;  %6619 = vmatpush3.bf16.msra.mxu0 %v6990_v8  ;;  %v1697_v34 = vld [vmem:[#allocation2 + $0xc] sm:$0xe]  ;;  %v1698_v38 = vld [vmem:[#allocation2 + $0x10] sm:$0xf] }
  0x6c   : > { %v836_v49 = vshrl.u32 %v6176_v40, 16  ;;  %v839_v50 = vshll.u32 %v6176_v40, 16  ;;  %v5878_v44 = vcombine.low %v1579_v31, %v1589_v47  ;;  %v442_v29 = vadd.f32 %v7448_v51, %v403_v42  ;;  %v951_v31 = vld [vmem:[#allocation2 + $0x3c] sm:$0xf] }
  0x6d   : > { %v443_v52 = vadd.f32 %v7448_v51, %v404_v20  ;;  %v7454_v54 = vsel %vm7434_vm13, %v5880_v45, %v1795_v43  ;;  %v1191_v55 = vld [vmem:[#allocation2 + $0x30] sm:$0xf]  ;;  %v844_v57 = vshrl.u32 %v6177_v48, 16  ;;  %v847_v58 = vshll.u32 %v6177_v48, 16  ;;  %v1699_v45 = vld [vmem:[#allocation2 + $0x14] sm:$0x1] }
  0x6e   : > { %v838_v56 = vrot.slane %v836_v49, 7  ;;  %v1797_v60 = vrot.slane %v1795_v43, 4  ;;  %4738 = vmatprep.mubr.bf16.mxu1 %v5878_v44  ;;  %v1327_v61 = vshrl.u32 %v1191_v55, 16  ;;  %v1330_v62 = vshll.u32 %v1191_v55, 16 }
  0x6f   : > { %v474_v0 = vmax.f32 %v442_v29, 0.0  ;;  %v475_v1 = vmax.f32 %v443_v52, 0.0  ;;  %4739 = vmatmul.mubr.bf16.gmra.mrb[8].mxu1 %v6966_v39  ;;  %v846_v6 = vrot.slane %v844_v57, 7  ;;  %v1798_v7 = vrot.slane %v1696_v53, 5  ;;  %v955_v29 = vld [vmem:[#allocation2 + $0x44] sm:$0x1] }
  0x70   : > { %v841_v4 = vor.u32 %v839_v50, %v838_v56  ;;  %v842_v5 = vrot.slane %v838_v56, 4  ;;  %v1329_v12 = vrot.slane %v1327_v61, 4  ;;  %v1332_v13 = vrot.slane %v1330_v62, 5 }
  0x71   : > { %v1192_v10 = vld [vmem:[#allocation2 + $0x34] sm:$0xf]  ;;  %v6156_v3 = vpack.c.bf16 %v474_v0, %v474_v0  ;;  %v6157_v14 = vpack.c.bf16 %v475_v1, %v475_v1  ;;  %v1193_v15 = vld [vmem:[#allocation2 + $0x38] sm:$0x1]  ;;  %v849_v18 = vor.u32 %v847_v58, %v846_v6  ;;  %v851_v11 = vrot.slane %v846_v6, 4  ;;  %v6995_v1 = vld [vmem:[%s9027_s3 + $0x128] sm:$0xff]  }
  0x72   : > { %v1336_v17 = vshll.u32 %v1192_v10, 16  ;;  %v1340_v19 = vshrl.u32 %v1192_v10, 16  ;;  %v1333_v21 = vor.u32 %v1332_v13, %v1329_v12  ;;  %v1346_v23 = vshll.u32 %v1193_v15, 16  ;;  %v6972_v50 = vld [vmem:[#allocation2 + $0x30] sm:$0xff]  }
  0x73   : > { %v1022_v22 = vsel %vm7218_vm9, %v841_v4, %v1021_v59  ;;  %v666_v25 = vshrl.u32 %v6156_v3, 16  ;;  %v850_v28 = vsel %vm7212_vm8, %v842_v5, %v849_v18  ;;  %v1026_v30 = vsel %vm7226_vm10, %v851_v11, %v1025_v63  ;;  %v6994_v59 = vld [vmem:[%s9027_s3 + $0x168] sm:$0xff]   ;;  %v7484_v63 = vld [vmem:[%s9025_s1] ss:$0 sm:$0xff] }
  0x74   : > { %v1338_v27 = vrot.slane %v1336_v17, 5  ;;  %v1342_v2 = vrot.slane %v1340_v19, 4  ;;  %1023 = vst [vmem:[#allocation2 + $0xb4] sm:$0xf] %v1022_v22  ;;  %v1334_v35 = vrot.slane %v1333_v21, 4  ;;  %v1348_v36 = vrot.slane %v1346_v23, 5  ;;  %6620 = vmatprep.subr.bf16.mxu0 %v6994_v59 }
  0x75   : > { %1024 = vst [vmem:[#allocation2 + $0xb8] sm:$0xf] %v850_v28  ;;  %1027 = vst [vmem:[#allocation2 + $0xbc] sm:$0x1] %v1026_v30  ;;  %v668_v37 = vrot.slane %v666_v25, 7  ;;  %v669_v32 = vshll.u32 %v6156_v3, 16  ;;  %v7468_v20 = vsel %vm7434_vm13, %v1797_v60, %v1798_v7  ;;  %v6234_v52 = vunpack.c.l.bf16 %v6360_v26  ;;  %6621 = vmatpush3.bf16.msra.mxu0 %v6995_v1 }
  0x76   : > { %v1343_v40 = vor.u32 %v1342_v2, %v1338_v27  ;;  %v674_v39 = vshrl.u32 %v6157_v14, 16  ;;  %v677_v42 = vshll.u32 %v6157_v14, 16  ;;  %v1339_v43 = vsel %vm7175_vm2, %v1334_v35, %v1338_v27  ;;  %v6361_v21 = vld [vmem:[%s7153_s26 + $0x30] sm:$0xff]   ;;  %v7506_v27 = vld [vmem:[#allocation2 + $0x18] sm:$0xe] }
  0x77   : > { %v671_v46 = vor.u32 %v669_v32, %v668_v37  ;;  %v672_v47 = vrot.slane %v668_v37, 4  ;;  %v5896_v48 = vcombine.low %v7454_v54, %v7468_v20  ;;  %v6235_v53 = vunpack.c.h.bf16 %v6360_v26 }
  0x78   : > { %v1344_v49 = vrot.slane %v1343_v40, 4  ;;  %v676_v44 = vrot.slane %v674_v39, 7  ;;  %v5881_v56 = vrot.slane %v1697_v34, 9  ;;  %v1802_v57 = vrot.slane %v1698_v38, 5 }
  0x79   : > { %v952_v55 = vsel %vm7218_vm9, %v671_v46, %v951_v31  ;;  %v1805_v58 = vrot.slane %v1699_v45, 5  ;;  %v405_v0 = vmul.f32 %v7484_v63, %v6234_v52  ;;  %v406_v6 = vmul.f32 %v7484_v63, %v6235_v53  ;;  %v7001_v52 = vld [vmem:[%s9027_s3 + $0x170] sm:$0xff]  }
  0x7a   : > { %v1349_v60 = vsel %vm7175_vm2, %v1344_v49, %v1348_v36  ;;  %v679_v61 = vor.u32 %v677_v42, %v676_v44  ;;  %v681_v62 = vrot.slane %v676_v44, 4  ;;  %953 = vst [vmem:[#allocation2 + $0x3c] sm:$0xf] %v952_v55  ;;  %v7493_v7 = vsel %vm7434_vm13, %v5881_v56, %v1802_v57  ;;  %6622 = vmatprep.subr.bf16.mxu0 %v7001_v52 }
  0x7b   : > { %v5868_v4 = vcombine.low %v1339_v43, %v1349_v60  ;;  %v1224_v5 = vld [vmem:[#allocation2 + $0xb4] sm:$0xf]  ;;  %v1804_v8 = vrot.slane %v1802_v57, 4  ;;  %v444_v11 = vadd.f32 %v7448_v51, %v405_v0  ;;  %v445_v25 = vadd.f32 %v7448_v51, %v406_v6  ;;  %v1701_v60 = vld [vmem:[#allocation2 + $0x1c] sm:$0xf] }
  0x7c   : > { %v1225_v10 = vld [vmem:[#allocation2 + $0xb8] sm:$0xf]  ;;  %v1226_v12 = vld [vmem:[#allocation2 + $0xbc] sm:$0x1]  ;;  %v1591_v13 = vshrl.u32 %v1224_v5, 16  ;;  %v1594_v3 = vshll.u32 %v1224_v5, 16  ;;  %v680_v14 = vsel %vm7212_vm8, %v672_v47, %v679_v61  ;;  %v956_v15 = vsel %vm7226_vm10, %v681_v62, %v955_v29 }
  0x7d   : > { %4658 = vmatprep.mubr.bf16.mxu0 %v5868_v4  ;;  %v1600_v17 = vshll.u32 %v1225_v10, 16  ;;  %v1604_v19 = vshrl.u32 %v1225_v10, 16  ;;  %v1610_v18 = vshll.u32 %v1226_v12, 16  ;;  %954 = vst [vmem:[#allocation2 + $0x40] sm:$0xf] %v680_v14  ;;  %v7504_v26 = vsel %vm7434_vm13, %v1804_v8, %v1805_v58  ;;  %v6973_v62 = vld [vmem:[#allocation2 + $0xb4] sm:$0xff]  }
  0x7e   : > { %957 = vst [vmem:[#allocation2 + $0x44] sm:$0x1] %v956_v15  ;;  %v1593_v23 = vrot.slane %v1591_v13, 4  ;;  %v1596_v22 = vrot.slane %v1594_v3, 5  ;;  %4659 = vmatmul.mubr.bf16.gmra.mrb[16].mxu0 %v6972_v50  ;;  %v476_v31 = vmax.f32 %v444_v11, 0.0  ;;  %v477_v35 = vmax.f32 %v445_v25, 0.0 }
  0x7f   : > { %v1602_v2 = vrot.slane %v1600_v17, 5  ;;  %v1606_v28 = vrot.slane %v1604_v19, 4  ;;  %v1612_v30 = vrot.slane %v1610_v18, 5  ;;  %v5897_v36 = vcombine.low %v7493_v7, %v7504_v26  ;;  %v958_v5 = vld [vmem:[#allocation2 + $0x48] sm:$0xf]  ;;  %v6978_v10 = vld [vmem:[#allocation2 + $0xc] sm:$0xff]  }
  0x80   : > { %v1597_v34 = vor.u32 %v1596_v22, %v1593_v23  ;;  %v6238_v37 = vunpack.c.l.bf16 %v6361_v21  ;;  %v6158_v40 = vpack.c.bf16 %v476_v31, %v476_v31  ;;  %v6239_v39 = vunpack.c.h.bf16 %v6361_v21  ;;  %v7003_v3 = vld [vmem:[%s9027_s3 + $0x130] sm:$0xff]   ;;  %v1702_v25 = vld [vmem:[#allocation2 + $0x20] sm:$0x1] }
  0x81   : > { %v1607_v32 = vor.u32 %v1606_v28, %v1602_v2  ;;  %v1194_v38 = vld [vmem:[#allocation2 + $0x3c] sm:$0xf]  ;;  %v5882_v42 = vrot.slane %v7506_v27, 9  ;;  %v6159_v47 = vpack.c.bf16 %v477_v35, %v477_v35  ;;  %v962_v18 = vld [vmem:[#allocation2 + $0x50] sm:$0x1]  ;;  %6623 = vmatpush3.bf16.msra.mxu0 %v7003_v3  ;;  %v1812_v52 = vrot.slane %v1702_v25, 5 }
  0x82   : > { %v1598_v45 = vrot.slane %v1597_v34, 4  ;;  %v1351_v43 = vshrl.u32 %v1194_v38, 16  ;;  %v1354_v46 = vshll.u32 %v1194_v38, 16  ;;  %v683_v50 = vshrl.u32 %v6158_v40, 16  ;;  %v1703_v38 = vld [vmem:[#allocation2 + $0x24] sm:$0xe] }
  0x83   : > { %v1608_v49 = vrot.slane %v1607_v32, 4  ;;  %v686_v44 = vshll.u32 %v6158_v40, 16  ;;  %v407_v29 = vmul.f32 %v7484_v63, %v6238_v37  ;;  %v408_v59 = vmul.f32 %v7484_v63, %v6239_v39  ;;  %v6362_v32 = vld [vmem:[%s7153_s26 + $0x38] sm:$0xff]   ;;  %v6991_v25 = vld [vmem:[%s9027_s3 + $0x188] sm:$0xff]  }
  0x84   : > { %v1603_v53 = vsel %vm7175_vm2, %v1598_v45, %v1602_v2  ;;  %v1195_v55 = vld [vmem:[#allocation2 + $0x40] sm:$0xf]  ;;  %v1353_v57 = vrot.slane %v1351_v43, 4  ;;  %v1356_v58 = vrot.slane %v1354_v46, 5  ;;  %v685_v12 = vrot.slane %v683_v50, 7  ;;  %v7008_v46 = vld [vmem:[%s9027_s3 + $0x178] sm:$0xff]  }
  0x85   : > { %v1196_v56 = vld [vmem:[#allocation2 + $0x44] sm:$0x1]  ;;  %v1613_v61 = vsel %vm7175_vm2, %v1608_v49, %v1612_v30  ;;  %v1360_v0 = vshll.u32 %v1195_v55, 16  ;;  %v1364_v1 = vshrl.u32 %v1195_v55, 16  ;;  %v691_v13 = vshrl.u32 %v6159_v47, 16  ;;  %v6980_v55 = vld [vmem:[#allocation2 + $0x3c] sm:$0xff]   ;;  %6624 = vmatprep.subr.bf16.mxu0 %v7008_v46 }
  0x86   : > { %v1370_v4 = vshll.u32 %v1196_v56, 16  ;;  %v5879_v6 = vcombine.low %v1603_v53, %v1613_v61  ;;  %v1357_v8 = vor.u32 %v1356_v58, %v1353_v57  ;;  %v694_v19 = vshll.u32 %v6159_v47, 16  ;;  %v6981_v47 = vld [vmem:[%s9027_s3 + $0x180] sm:$0xff]  }
  0x87   : > { %v1362_v14 = vrot.slane %v1360_v0, 5  ;;  %v1366_v15 = vrot.slane %v1364_v1, 4  ;;  %v688_v21 = vor.u32 %v686_v44, %v685_v12  ;;  %v689_v23 = vrot.slane %v685_v12, 4  ;;  %v6984_v44 = vld [vmem:[#allocation2 + $0x18] sm:$0xff]   ;;  %v7551_v1 = vld [vmem:[%s7153_s26 + $0x40] sm:$0xff]   ;;  %v6988_v12 = vld [vmem:[%s9027_s3 + $0x1c8] sm:$0xff]  }
  0x88   : > { %v1372_v17 = vrot.slane %v1370_v4, 5  ;;  %4746 = vmatprep.mubr.bf16.mxu1 %v5879_v6  ;;  %v1358_v11 = vrot.slane %v1357_v8, 4  ;;  %v693_v22 = vrot.slane %v691_v13, 7  ;;  %v446_v2 = vadd.f32 %v7448_v51, %v407_v29  ;;  %v7009_v4 = vld [vmem:[%s9027_s3 + $0x138] sm:$0xff]  }
  0x89   : > { %4747 = vmatmul.mubr.bf16.gmra.mrb[12].mxu1 %v6973_v62  ;;  %v1367_v27 = vor.u32 %v1366_v15, %v1362_v14  ;;  %v447_v28 = vadd.f32 %v7448_v51, %v408_v59  ;;  %v1809_v30 = vrot.slane %v1701_v60, 5  ;;  %v959_v37 = vsel %vm7218_vm9, %v688_v21, %v958_v5  ;;  %v1705_v59 = vld [vmem:[#allocation2 + $0x2c] sm:$0x1]  ;;  %6625 = vmatpush3.bf16.msra.mxu0 %v7009_v4 }
  0x8a   : > { %v1363_v31 = vsel %vm7175_vm2, %v1358_v11, %v1362_v14  ;;  %4787 = vmatprep.mubr.bf16.mxu1 %v6978_v10  ;;  %v696_v34 = vor.u32 %v694_v19, %v693_v22  ;;  %v698_v35 = vrot.slane %v693_v22, 4  ;;  %960 = vst [vmem:[#allocation2 + $0x48] sm:$0xf] %v959_v37  ;;  %v478_v39 = vmax.f32 %v446_v2, 0.0 }
  0x8b   : > { %v1368_v40 = vrot.slane %v1367_v27, 4  ;;  %v479_v45 = vmax.f32 %v447_v28, 0.0  ;;  %v7532_v43 = vsel %vm7434_vm13, %v5882_v42, %v1809_v30  ;;  %v1811_v29 = vrot.slane %v1809_v30, 4  ;;  %v1704_v42 = vld [vmem:[#allocation2 + $0x28] sm:$0xf] }
  0x8c   : > { %v697_v49 = vsel %vm7212_vm8, %v689_v23, %v696_v34  ;;  %v963_v50 = vsel %vm7226_vm10, %v698_v35, %v962_v18  ;;  %v6160_v56 = vpack.c.bf16 %v478_v39, %v478_v39  ;;  %v6242_v58 = vunpack.c.l.bf16 %v6362_v32  ;;  %v965_v18 = vld [vmem:[#allocation2 + $0x54] sm:$0xf]  ;;  %v7013_v23 = vld [vmem:[%s9027_s3 + $0x200] sm:$0xff]   ;;  %v969_v34 = vld [vmem:[#allocation2 + $0x5c] sm:$0x1] }
  0x8d   : > { %v1373_v53 = vsel %vm7175_vm2, %v1368_v40, %v1372_v17  ;;  %961 = vst [vmem:[#allocation2 + $0x4c] sm:$0xf] %v697_v49  ;;  %964 = vst [vmem:[#allocation2 + $0x50] sm:$0x1] %v963_v50  ;;  %v6161_v57 = vpack.c.bf16 %v479_v45, %v479_v45  ;;  %v7548_v61 = vsel %vm7434_vm13, %v1811_v29, %v1812_v52  ;;  %v6243_v62 = vunpack.c.h.bf16 %v6362_v32  ;;  %v6997_v35 = vld [vmem:[%s9027_s3 + $0x1d0] sm:$0xff]  }
  0x8e   : > { %v5869_v60 = vcombine.low %v1363_v31, %v1373_v53  ;;  %v5883_v0 = vrot.slane %v1703_v38, 9  ;;  %v700_v5 = vshrl.u32 %v6160_v56, 16  ;;  %v703_v6 = vshll.u32 %v6160_v56, 16  ;;  %6858 = vmatprep.subr.bf16.mxu0 %v7013_v23  ;;  %v6999_v29 = vld [vmem:[%s9027_s3 + $0x190] sm:$0xff]   ;;  %v7012_v23 = vld [vmem:[%s9027_s3 + $0x1e0] sm:$0xff]  }
  0x8f   : > { %v708_v8 = vshrl.u32 %v6161_v57, 16  ;;  %v711_v10 = vshll.u32 %v6161_v57, 16  ;;  %v5898_v13 = vcombine.low %v7532_v43, %v7548_v61  ;;  %v409_v3 = vmul.f32 %v7484_v63, %v6242_v58  ;;  %v1706_v56 = vld [vmem:[#allocation2 + $0x30] sm:$0xe]  ;;  %v1708_v43 = vld [vmem:[#allocation2 + $0x38] sm:$0x1] }
  0x90   : > { %4666 = vmatprep.mubr.bf16.mxu0 %v5869_v60  ;;  %v410_v14 = vmul.f32 %v7484_v63, %v6243_v62  ;;  %v1816_v15 = vrot.slane %v1704_v42, 5  ;;  %v702_v17 = vrot.slane %v700_v5, 7  ;;  %v1819_v11 = vrot.slane %v1705_v59, 5  ;;  %v1707_v62 = vld [vmem:[#allocation2 + $0x34] sm:$0xf] }
  0x91   : > { %4667 = vmatmul.mubr.bf16.gmra.mrb[20].mxu0 %v6980_v55  ;;  %4788 = vmatmul.mubr.bf16.vlgmr.msra.gmra.mrb[16].mxu1 %v5896_v48  ;;  %v710_v19 = vrot.slane %v708_v8, 7  ;;  %v6246_v21 = vunpack.c.l.bf16 %v7551_v1  ;;  %v1197_v22 = vld [vmem:[#allocation2 + $0x48] sm:$0xf]  ;;  %v448_v54 = vadd.f32 %v7448_v51, %v409_v3  ;;  %v6247_v39 = vunpack.c.h.bf16 %v7551_v1  ;;  %v7022_v61 = vld [vmem:[%s9027_s3 + $0x1f0] sm:$0xff]  }
  0x92   : > { %6723 = vmatpush3.bf16.msra.mxu1 %v6981_v47  ;;  %4795 = vmatprep.mubr.bf16.mxu1 %v6984_v44  ;;  %v449_v20 = vadd.f32 %v7448_v51, %v410_v14  ;;  %v7577_v48 = vsel %vm7434_vm13, %v5883_v0, %v1816_v15  ;;  %v1818_v27 = vrot.slane %v1816_v15, 4  ;;  %v1375_v2 = vshrl.u32 %v1197_v22, 16  ;;  %v6986_v44 = vld [vmem:[#allocation2 + $0x24] sm:$0xff]   ;;  %v7005_v0 = vld [vmem:[%s9027_s3 + $0x1d8] sm:$0xff]  }
  0x93   : > { %v1378_v28 = vshll.u32 %v1197_v22, 16  ;;  %v705_v30 = vor.u32 %v703_v6, %v702_v17  ;;  %v706_v31 = vrot.slane %v702_v17, 4  ;;  %6724 = vmatprep.subr.bf16.mxu1 %v6988_v12  ;;  %v713_v38 = vor.u32 %v711_v10, %v710_v19  ;;  %v7007_v14 = vld [vmem:[%s9027_s3 + $0x198] sm:$0xff]  }
  0x94   : > { %v1198_v37 = vld [vmem:[#allocation2 + $0x4c] sm:$0xf]  ;;  %v1199_v32 = vld [vmem:[#allocation2 + $0x50] sm:$0x1]  ;;  %v7584_v40 = vsel %vm7434_vm13, %v1818_v27, %v1819_v11  ;;  %v411_v45 = vmul.f32 %v7484_v63, %v6246_v21  ;;  %v1377_v46 = vrot.slane %v1375_v2, 4  ;;  %v715_v53 = vrot.slane %v710_v19, 4 }
  0x95   : > { %v1380_v47 = vrot.slane %v1378_v28, 5  ;;  %v1384_v49 = vshll.u32 %v1198_v37, 16  ;;  %v1388_v50 = vshrl.u32 %v1198_v37, 16  ;;  %v1394_v52 = vshll.u32 %v1199_v32, 16  ;;  %v7613_v21 = vld [vmem:[%s7153_s26 + $0x48] sm:$0xff]   ;;  %v7014_v37 = vld [vmem:[%s9027_s3 + $0x1a0] sm:$0xff]  }
  0x96   : > { %v714_v42 = vsel %vm7212_vm8, %v706_v31, %v713_v38  ;;  %v966_v55 = vsel %vm7218_vm9, %v705_v30, %v965_v18  ;;  %6725 = vmatpush3.bf16.msra.mxu1 %v6991_v25  ;;  %v480_v60 = vmax.f32 %v448_v54, 0.0  ;;  %v970_v4 = vsel %vm7226_vm10, %v715_v53, %v969_v34  ;;  %v6992_v54 = vld [vmem:[#allocation2 + $0x30] sm:$0xff]   ;;  %v6985_v28 = vld [vmem:[#allocation2 + $0x48] sm:$0xff]   ;;  %v972_v31 = vld [vmem:[#allocation2 + $0x60] sm:$0xf] }
  0x97   : > { %v1381_v57 = vor.u32 %v1380_v47, %v1377_v46  ;;  %v1386_v58 = vrot.slane %v1384_v49, 5  ;;  %v1390_v59 = vrot.slane %v1388_v50, 4  ;;  %967 = vst [vmem:[#allocation2 + $0x54] sm:$0xf] %v966_v55  ;;  %968 = vst [vmem:[#allocation2 + $0x58] sm:$0xf] %v714_v42  ;;  %6726 = vmatprep.subr.bf16.mxu1 %v6997_v35  ;;  %v5899_v6 = vcombine.low %v7577_v48, %v7584_v40 }
  0x98   : > { %v1396_v1 = vrot.slane %v1394_v52, 5  ;;  %v481_v5 = vmax.f32 %v449_v20, 0.0  ;;  %971 = vst [vmem:[#allocation2 + $0x5c] sm:$0x1] %v970_v4  ;;  %v6162_v12 = vpack.c.bf16 %v480_v60, %v480_v60  ;;  %v412_v3 = vmul.f32 %v7484_v63, %v6247_v39  ;;  %v7017_v32 = vld [vmem:[%s9027_s3 + $0x1e8] sm:$0xff]  }
  0x99   : > { %v1382_v8 = vrot.slane %v1381_v57, 4  ;;  %v1391_v10 = vor.u32 %v1390_v59, %v1386_v58  ;;  %4796 = vmatmul.mubr.bf16.gmra.mrb[20].mxu1 %v5897_v36  ;;  %v450_v17 = vadd.f32 %v7448_v51, %v411_v45  ;;  %v5884_v19 = vrot.slane %v1706_v56, 9  ;;  %v976_v42 = vld [vmem:[#allocation2 + $0x68] sm:$0x1] }
  0x9a   : > { %4803 = vmatprep.mubr.bf16.mxu1 %v6986_v44  ;;  %v6163_v15 = vpack.c.bf16 %v481_v5, %v481_v5  ;;  %v1823_v18 = vrot.slane %v1707_v62, 5  ;;  %6727 = vmatpush3.bf16.msra.mxu1 %v6999_v29  ;;  %v717_v36 = vshrl.u32 %v6162_v12, 16  ;;  %v720_v11 = vshll.u32 %v6162_v12, 16 }
  0x9b   : > { %v1387_v7 = vsel %vm7175_vm2, %v1382_v8, %v1386_v58  ;;  %v1392_v26 = vrot.slane %v1391_v10, 4  ;;  %6728 = vmatprep.subr.bf16.mxu1 %v7005_v0  ;;  %v451_v20 = vadd.f32 %v7448_v51, %v412_v3  ;;  %v482_v27 = vmax.f32 %v450_v17, 0.0  ;;  %v7019_v10 = vld [vmem:[%s9027_s3 + $0x1a8] sm:$0xff]  }
  0x9c   : > { %v725_v22 = vshrl.u32 %v6163_v15, 16  ;;  %v728_v25 = vshll.u32 %v6163_v15, 16  ;;  %v719_v30 = vrot.slane %v717_v36, 7  ;;  %v7623_v34 = vsel %vm7434_vm13, %v5884_v19, %v1823_v18 }
  0x9d   : > { %v1397_v2 = vsel %vm7175_vm2, %v1392_v26, %v1396_v1  ;;  %v7625_v35 = vrot.slane %v1823_v18, 4  ;;  %v6164_v46 = vpack.c.bf16 %v482_v27, %v482_v27  ;;  %v6250_v47 = vunpack.c.l.bf16 %v7613_v21 }
  0x9e   : > { %v5870_v38 = vcombine.low %v1387_v7, %v1397_v2  ;;  %v1200_v39 = vld [vmem:[#allocation2 + $0x54] sm:$0xf]  ;;  %v1201_v45 = vld [vmem:[#allocation2 + $0x58] sm:$0xf]  ;;  %v6251_v49 = vunpack.c.h.bf16 %v7613_v21  ;;  %6729 = vmatpush3.bf16.msra.mxu1 %v7007_v14  ;;  %v722_v55 = vor.u32 %v720_v11, %v719_v30  ;;  %v723_v56 = vrot.slane %v719_v30, 4 }
  0x9f   : > { %v1399_v50 = vshrl.u32 %v1200_v39, 16  ;;  %v1402_v44 = vshll.u32 %v1200_v39, 16  ;;  %v1408_v29 = vshll.u32 %v1201_v45, 16  ;;  %v1412_v52 = vshrl.u32 %v1201_v45, 16  ;;  %6730 = vmatprep.subr.bf16.mxu1 %v7012_v23  ;;  %v1202_v53 = vld [vmem:[#allocation2 + $0x5c] sm:$0x1] }
  0xa0   : > { %4674 = vmatprep.mubr.bf16.mxu0 %v5870_v38  ;;  %v727_v57 = vrot.slane %v725_v22, 7  ;;  %v483_v58 = vmax.f32 %v451_v20, 0.0  ;;  %v1418_v1 = vshll.u32 %v1202_v53, 16  ;;  %v973_v8 = vsel %vm7218_vm9, %v722_v55, %v972_v31  ;;  %v979_v7 = vld [vmem:[#allocation2 + $0x6c] sm:$0xf]  ;;  %v6996_v23 = vld [vmem:[#allocation2 + $0x3c] sm:$0xff]  }
  0xa1   : > { %4675 = vmatmul.mubr.bf16.gmra.mrb[24].mxu0 %v6985_v28  ;;  %v1401_v59 = vrot.slane %v1399_v50, 4  ;;  %v1404_v60 = vrot.slane %v1402_v44, 5  ;;  %v1410_v62 = vrot.slane %v1408_v29, 5  ;;  %v1414_v0 = vrot.slane %v1412_v52, 4  ;;  %4804 = vmatmul.mubr.bf16.gmra.mrb[24].mxu1 %v5898_v13  ;;  %974 = vst [vmem:[#allocation2 + $0x60] sm:$0xf] %v973_v8 }
  0xa2   : > { %v730_v4 = vor.u32 %v728_v25, %v727_v57  ;;  %v732_v5 = vrot.slane %v727_v57, 4  ;;  %4811 = vmatprep.mubr.bf16.mxu1 %v6992_v54  ;;  %6731 = vmatpush3.bf16.msra.mxu1 %v7014_v37  ;;  %v6165_v14 = vpack.c.bf16 %v483_v58, %v483_v58  ;;  %v734_v15 = vshrl.u32 %v6164_v46, 16  ;;  %v7651_v22 = vld [vmem:[%s7153_s26 + $0x50] sm:$0xff]   ;;  %v1709_v2 = vld [vmem:[#allocation2 + $0x3c] sm:$0xe] }
  0xa3   : > { %v1405_v12 = vor.u32 %v1404_v60, %v1401_v59  ;;  %v1415_v3 = vor.u32 %v1414_v0, %v1410_v62  ;;  %6732 = vmatprep.subr.bf16.mxu1 %v7017_v32  ;;  %v1420_v13 = vrot.slane %v1418_v1, 5  ;;  %v737_v18 = vshll.u32 %v6164_v46, 16  ;;  %v7655_v28 = vld [vmem:[#allocation2 + $0x40] sm:$0xf]  ;;  %v6989_v37 = vld [vmem:[#allocation2 + $0x54] sm:$0xff]  }
  0xa4   : > { %v731_v17 = vsel %vm7212_vm8, %v723_v56, %v730_v4  ;;  %v977_v19 = vsel %vm7226_vm10, %v732_v5, %v976_v42  ;;  %v736_v11 = vrot.slane %v734_v15, 7  ;;  %v742_v21 = vshrl.u32 %v6165_v14, 16  ;;  %v7024_v39 = vld [vmem:[%s9027_s3 + $0x1b0] sm:$0xff]  }
  0xa5   : > { %v1406_v26 = vrot.slane %v1405_v12, 4  ;;  %v1416_v36 = vrot.slane %v1415_v3, 4  ;;  %975 = vst [vmem:[#allocation2 + $0x64] sm:$0xf] %v731_v17  ;;  %978 = vst [vmem:[#allocation2 + $0x68] sm:$0x1] %v977_v19  ;;  %v413_v20 = vmul.f32 %v7484_v63, %v6250_v47  ;;  %v414_v27 = vmul.f32 %v7484_v63, %v6251_v49 }
  0xa6   : > { %v745_v25 = vshll.u32 %v6165_v14, 16  ;;  %v1826_v54 = vrot.slane %v1708_v43, 5  ;;  %6733 = vmatpush3.bf16.msra.mxu1 %v7019_v10  ;;  %v739_v32 = vor.u32 %v737_v18, %v736_v11  ;;  %v740_v38 = vrot.slane %v736_v11, 4  ;;  %v983_v44 = vld [vmem:[#allocation2 + $0x74] sm:$0x1]  ;;  %v7000_v10 = vld [vmem:[#allocation2 + $0x48] sm:$0xff]  }
  0xa7   : > { %v1411_v30 = vsel %vm7175_vm2, %v1406_v26, %v1410_v62  ;;  %v1421_v31 = vsel %vm7175_vm2, %v1416_v36, %v1420_v13  ;;  %6734 = vmatprep.subr.bf16.mxu1 %v7022_v61  ;;  %v744_v46 = vrot.slane %v742_v21, 7  ;;  %v452_v49 = vadd.f32 %v7448_v51, %v413_v20  ;;  %v7027_v43 = vld [vmem:[%s9027_s3 + $0x1f8] sm:$0xff]   ;;  %v1711_v21 = vld [vmem:[#allocation2 + $0x44] sm:$0x1] }
  0xa8   : > { %v5871_v45 = vcombine.low %v1411_v30, %v1421_v31  ;;  %v1827_v47 = vsel %vm7434_vm13, %v7625_v35, %v1826_v54  ;;  %v980_v50 = vsel %vm7218_vm9, %v739_v32, %v979_v7  ;;  %v453_v52 = vadd.f32 %v7448_v51, %v414_v27  ;;  %v1203_v53 = vld [vmem:[#allocation2 + $0x60] sm:$0xf]  ;;  %v986_v19 = vld [vmem:[#allocation2 + $0x78] sm:$0xf] }
  0xa9   : > { %4812 = vmatmul.mubr.bf16.gmra.mrb[28].mxu1 %v5899_v6  ;;  %v5900_v29 = vcombine.low %v7623_v34, %v1827_v47  ;;  %v5885_v42 = vrot.slane %v1709_v2, 9  ;;  %v747_v55 = vor.u32 %v745_v25, %v744_v46  ;;  %v749_v56 = vrot.slane %v744_v46, 4  ;;  %981 = vst [vmem:[#allocation2 + $0x6c] sm:$0xf] %v980_v50 }
  0xaa   : > { %4682 = vmatprep.mubr.bf16.mxu0 %v5871_v45  ;;  %4819 = vmatprep.mubr.bf16.mxu1 %v6996_v23  ;;  %v484_v35 = vmax.f32 %v452_v49, 0.0  ;;  %v6254_v57 = vunpack.c.l.bf16 %v7651_v22  ;;  %v1423_v48 = vshrl.u32 %v1203_v53, 16  ;;  %v1426_v40 = vshll.u32 %v1203_v53, 16  ;;  %v7029_v45 = vld [vmem:[%s9027_s3 + $0x1b8] sm:$0xff]  }
  0xab   : > { %4683 = vmatmul.mubr.bf16.gmra.mrb[28].mxu0 %v6989_v37  ;;  %v485_v6 = vmax.f32 %v453_v52, 0.0  ;;  %v1830_v58 = vrot.slane %v7655_v28, 5  ;;  %6735 = vmatpush3.bf16.msra.mxu1 %v7024_v39  ;;  %v748_v51 = vsel %vm7212_vm8, %v740_v38, %v747_v55  ;;  %v984_v60 = vsel %vm7226_vm10, %v749_v56, %v983_v44  ;;  %v990_v38 = vld [vmem:[#allocation2 + $0x80] sm:$0x1]  ;;  %v1712_v52 = vld [vmem:[#allocation2 + $0x48] sm:$0xe] }
  0xac   : > { %v1204_v34 = vld [vmem:[#allocation2 + $0x64] sm:$0xf]  ;;  %v1205_v59 = vld [vmem:[#allocation2 + $0x68] sm:$0x1]  ;;  %v6166_v62 = vpack.c.bf16 %v484_v35, %v484_v35  ;;  %v6255_v0 = vunpack.c.h.bf16 %v7651_v22  ;;  %v1425_v1 = vrot.slane %v1423_v48, 4  ;;  %v1428_v4 = vrot.slane %v1426_v40, 5  ;;  %6736 = vmatprep.subr.bf16.mxu1 %v7027_v43 }
  0xad   : > { %v1432_v5 = vshll.u32 %v1204_v34, 16  ;;  %v1436_v8 = vshrl.u32 %v1204_v34, 16  ;;  %982 = vst [vmem:[#allocation2 + $0x70] sm:$0xf] %v748_v51  ;;  %985 = vst [vmem:[#allocation2 + $0x74] sm:$0x1] %v984_v60  ;;  %v6167_v3 = vpack.c.bf16 %v485_v6, %v485_v6  ;;  %v7687_v18 = vsel %vm7434_vm13, %v5885_v42, %v1830_v58 }
  0xae   : > { %v1442_v12 = vshll.u32 %v1205_v59, 16  ;;  %v751_v14 = vshrl.u32 %v6166_v62, 16  ;;  %v754_v15 = vshll.u32 %v6166_v62, 16  ;;  %v1429_v61 = vor.u32 %v1428_v4, %v1425_v1  ;;  %v6993_v53 = vld [vmem:[#allocation2 + $0x60] sm:$0xff]   ;;  %v1714_v48 = vld [vmem:[#allocation2 + $0x50] sm:$0x1] }
  0xaf   : > { %v1434_v13 = vrot.slane %v1432_v5, 5  ;;  %v1438_v17 = vrot.slane %v1436_v8, 4  ;;  %v759_v36 = vshrl.u32 %v6167_v3, 16  ;;  %v762_v11 = vshll.u32 %v6167_v3, 16  ;;  %6737 = vmatpush3.bf16.msra.mxu1 %v7029_v45  ;;  %v2641_v59 = vld [vmem:[#allocation2 + $0xc] sm:$0xe] }
  0xb0   : > { %v1444_v7 = vrot.slane %v1442_v12, 5  ;;  %v753_v26 = vrot.slane %v751_v14, 7  ;;  %v1430_v23 = vrot.slane %v1429_v61, 4  ;;  %v1206_v25 = vld [vmem:[#allocation2 + $0x6c] sm:$0xf]  ;;  %v1832_v54 = vrot.slane %v1830_v58, 4 }
  0xb1   : > { %v1439_v22 = vor.u32 %v1438_v17, %v1434_v13  ;;  %4820 = vmatmul.mubr.bf16.gmra.mrb[32].mxu1 %v5900_v29  ;;  %v415_v20 = vmul.f32 %v7484_v63, %v6254_v57  ;;  %v1447_v27 = vshrl.u32 %v1206_v25, 16  ;;  %v1450_v2 = vshll.u32 %v1206_v25, 16  ;;  %v1713_v57 = vld [vmem:[#allocation2 + $0x4c] sm:$0xf]  ;;  %v7004_v1 = vld [vmem:[#allocation2 + $0x54] sm:$0xff]  }
  0xb2   : > { %v756_v28 = vor.u32 %v754_v15, %v753_v26  ;;  %v757_v30 = vrot.slane %v753_v26, 4  ;;  %4827 = vmatprep.mubr.bf16.mxu1 %v7000_v10  ;;  %v1435_v31 = vsel %vm7175_vm2, %v1430_v23, %v1434_v13  ;;  %v761_v32 = vrot.slane %v759_v36, 7  ;;  %v2642_v12 = vld [vmem:[#allocation2 + $0x10] sm:$0xf]  ;;  %v7710_v14 = vld [vmem:[%s9026_s2] ss:$0 sm:$0xff] }
  0xb3   : > { %v1440_v37 = vrot.slane %v1439_v22, 4  ;;  %v1833_v39 = vrot.slane %v1711_v21, 5  ;;  %v1449_v49 = vrot.slane %v1447_v27, 4  ;;  %v1452_v50 = vrot.slane %v1450_v2, 5  ;;  %v7714_v13 = vld [vmem:[#allocation2 + $0x14] sm:$0x1] }
  0xb4   : > { %v1207_v46 = vld [vmem:[#allocation2 + $0x70] sm:$0xf]  ;;  %v1208_v47 = vld [vmem:[#allocation2 + $0x74] sm:$0x1]  ;;  %v987_v44 = vsel %vm7218_vm9, %v756_v28, %v986_v19  ;;  %v416_v29 = vmul.f32 %v7484_v63, %v6255_v0  ;;  %v764_v58 = vor.u32 %v762_v11, %v761_v32  ;;  %v766_v34 = vrot.slane %v761_v32, 4  ;;  %v7719_v23 = vld [vmem:[%s7153_s26 + $0x78] sm:$0xff]  }
  0xb5   : > { %v1445_v42 = vsel %vm7175_vm2, %v1440_v37, %v1444_v7  ;;  %v1456_v55 = vshll.u32 %v1207_v46, 16  ;;  %v1460_v56 = vshrl.u32 %v1207_v46, 16  ;;  %v1466_v35 = vshll.u32 %v1208_v47, 16  ;;  %988 = vst [vmem:[#allocation2 + $0x78] sm:$0xf] %v987_v44  ;;  %v6998_v2 = vld [vmem:[#allocation2 + $0x6c] sm:$0xff]  }
  0xb6   : > { %v5872_v40 = vcombine.low %v1435_v31, %v1445_v42  ;;  %v1453_v6 = vor.u32 %v1452_v50, %v1449_v49  ;;  %v1834_v0 = vsel %vm7434_vm13, %v1832_v54, %v1833_v39  ;;  %v765_v5 = vsel %vm7212_vm8, %v757_v30, %v764_v58  ;;  %v7010_v50 = vld [vmem:[#allocation2 + $0x60] sm:$0xff]  }
  0xb7   : > { %v1458_v51 = vrot.slane %v1456_v55, 5  ;;  %v1462_v60 = vrot.slane %v1460_v56, 4  ;;  %v1468_v62 = vrot.slane %v1466_v35, 5  ;;  %v991_v8 = vsel %vm7226_vm10, %v766_v34, %v990_v38  ;;  %989 = vst [vmem:[#allocation2 + $0x7c] sm:$0xf] %v765_v5 }
  0xb8   : > { %4690 = vmatprep.mubr.bf16.mxu0 %v5872_v40  ;;  %v1454_v4 = vrot.slane %v1453_v6, 4  ;;  %v5901_v10 = vcombine.low %v7687_v18, %v1834_v0  ;;  %992 = vst [vmem:[#allocation2 + $0x80] sm:$0x1] %v991_v8  ;;  %v454_v15 = vadd.f32 %v7710_v14, %v415_v20  ;;  %v455_v43 = vadd.f32 %v7710_v14, %v416_v29  ;;  %v993_v40 = vld [vmem:[#allocation2 + $0x84] sm:$0xf] }
  0xb9   : > { %4691 = vmatmul.mubr.bf16.gmra.mrb[32].mxu0 %v6993_v53  ;;  %v1463_v3 = vor.u32 %v1462_v60, %v1458_v51  ;;  %v5886_v61 = vrot.slane %v1712_v52, 9  ;;  %v1837_v19 = vrot.slane %v1713_v57, 5  ;;  %v1840_v18 = vrot.slane %v1714_v48, 5  ;;  %v1715_v53 = vld [vmem:[#allocation2 + $0x54] sm:$0xe] }
  0xba   : > { %v1459_v17 = vsel %vm7175_vm2, %v1454_v4, %v1458_v51  ;;  %4828 = vmatmul.mubr.bf16.gmra.mrb[36].mxu1 %v5901_v10  ;;  %v5944_v7 = vrot.slane %v2641_v59, 9  ;;  %v486_v36 = vmax.f32 %v454_v15, 0.0  ;;  %v487_v11 = vmax.f32 %v455_v43, 0.0  ;;  %v1716_v51 = vld [vmem:[#allocation2 + $0x58] sm:$0xf] }
  0xbb   : > { %v1464_v26 = vrot.slane %v1463_v3, 4  ;;  %4835 = vmatprep.mubr.bf16.mxu1 %v7004_v1  ;;  %v2739_v21 = vrot.slane %v2642_v12, 5  ;;  %v1838_v25 = vsel %vm7434_vm13, %v5886_v61, %v1837_v19  ;;  %v1839_v54 = vrot.slane %v1837_v19, 4  ;;  %v2129_v60 = vld [vmem:[#allocation2 + $0xc] sm:$0xf] }
  0xbc   : > { %v1209_v22 = vld [vmem:[#allocation2 + $0x78] sm:$0xf]  ;;  %v2742_v20 = vrot.slane %v7714_v13, 5  ;;  %v6168_v31 = vpack.c.bf16 %v486_v36, %v486_v36  ;;  %v6169_v32 = vpack.c.bf16 %v487_v11, %v487_v11  ;;  %v6274_v39 = vunpack.c.l.bf16 %v7719_v23  ;;  %v997_v4 = vld [vmem:[#allocation2 + $0x8c] sm:$0x1] }
  0xbd   : > { %v1469_v27 = vsel %vm7175_vm2, %v1464_v26, %v1468_v62  ;;  %v1471_v28 = vshrl.u32 %v1209_v22, 16  ;;  %v1474_v30 = vshll.u32 %v1209_v22, 16  ;;  %v1841_v38 = vsel %vm7434_vm13, %v1839_v54, %v1840_v18  ;;  %v1717_v5 = vld [vmem:[#allocation2 + $0x5c] sm:$0x1]  ;;  %v2130_v43 = vld [vmem:[#allocation2 + $0x10] sm:$0xf] }
  0xbe   : > { %v5873_v37 = vcombine.low %v1459_v17, %v1469_v27  ;;  %v768_v47 = vshrl.u32 %v6168_v31, 16  ;;  %v771_v49 = vshll.u32 %v6168_v31, 16  ;;  %v1210_v44 = vld [vmem:[#allocation2 + $0x7c] sm:$0xf]  ;;  %v5902_v52 = vcombine.low %v1838_v25, %v1841_v38  ;;  %v2131_v18 = vld [vmem:[#allocation2 + $0x14] sm:$0x1] }
  0xbf   : > { %v1473_v45 = vrot.slane %v1471_v28, 4  ;;  %v1476_v46 = vrot.slane %v1474_v30, 5  ;;  %v1211_v29 = vld [vmem:[#allocation2 + $0x80] sm:$0x1]  ;;  %v7731_v42 = vsel %vm7434_vm13, %v5944_v7, %v2739_v21  ;;  %v6275_v55 = vunpack.c.h.bf16 %v7719_v23  ;;  %v2644_v11 = vld [vmem:[#allocation2 + $0x18] sm:$0xe] }
  0xc0   : > { %4698 = vmatprep.mubr.bf16.mxu0 %v5873_v37  ;;  %v1480_v35 = vshll.u32 %v1210_v44, 16  ;;  %v1484_v57 = vshrl.u32 %v1210_v44, 16  ;;  %v1490_v48 = vshll.u32 %v1211_v29, 16  ;;  %v770_v6 = vrot.slane %v768_v47, 7  ;;  %v2645_v27 = vld [vmem:[#allocation2 + $0x1c] sm:$0xf] }
  0xc1   : > { %4699 = vmatmul.mubr.bf16.gmra.mrb[36].mxu0 %v6998_v2  ;;  %v1477_v56 = vor.u32 %v1476_v46, %v1473_v45  ;;  %v776_v58 = vshrl.u32 %v6169_v32, 16  ;;  %v779_v34 = vshll.u32 %v6169_v32, 16  ;;  %v2741_v59 = vrot.slane %v2739_v21, 4  ;;  %v2646_v2 = vld [vmem:[#allocation2 + $0x20] sm:$0x1] }
  0xc2   : > { %4836 = vmatmul.mubr.bf16.gmra.mrb[40].mxu1 %v5902_v52  ;;  %v1482_v0 = vrot.slane %v1480_v35, 5  ;;  %v1486_v1 = vrot.slane %v1484_v57, 4  ;;  %v7735_v8 = vmul.f32 %v7484_v63, %v6274_v39  ;;  %v1492_v10 = vrot.slane %v1490_v48, 5  ;;  %v1718_v37 = vld [vmem:[#allocation2 + $0x60] sm:$0xe]  ;;  %v7002_v39 = vld [vmem:[#allocation2 + $0x78] sm:$0xff]  }
  0xc3   : > { %v1478_v62 = vrot.slane %v1477_v56, 4  ;;  %4843 = vmatprep.mubr.bf16.mxu1 %v7010_v50  ;;  %v773_v12 = vor.u32 %v771_v49, %v770_v6  ;;  %v774_v3 = vrot.slane %v770_v6, 4  ;;  %v778_v15 = vrot.slane %v776_v58, 7  ;;  %v1719_v32 = vld [vmem:[#allocation2 + $0x64] sm:$0xf] }
  0xc4   : > { %v1487_v13 = vor.u32 %v1486_v1, %v1482_v0  ;;  %v7741_v17 = vsel %vm7434_vm13, %v2741_v59, %v2742_v20  ;;  %v5887_v19 = vrot.slane %v1715_v53, 9  ;;  %v1844_v36 = vrot.slane %v1716_v51, 5  ;;  %v1720_v49 = vld [vmem:[#allocation2 + $0x68] sm:$0x1]  ;;  %v7011_v53 = vld [vmem:[#allocation2 + $0x6c] sm:$0xff]  }
  0xc5   : > { %v1483_v61 = vsel %vm7175_vm2, %v1478_v62, %v1482_v0  ;;  %v781_v7 = vor.u32 %v779_v34, %v778_v15  ;;  %v783_v26 = vrot.slane %v778_v15, 4  ;;  %v994_v63 = vsel %vm7218_vm9, %v773_v12, %v993_v40  ;;  %v2132_v56 = vld [vmem:[#allocation2 + $0x18] sm:$0xf] }
  0xc6   : > { %v1488_v21 = vrot.slane %v1487_v13, 4  ;;  %995 = vst [vmem:[#allocation2 + $0x84] sm:$0xf] %v994_v63  ;;  %v1847_v22 = vrot.slane %v1717_v5, 5  ;;  %v2178_v25 = vshrl.u32 %v2129_v60, 16  ;;  %v2181_v54 = vshll.u32 %v2129_v60, 16 }
  0xc7   : > { %v782_v20 = vsel %vm7212_vm8, %v774_v3, %v781_v7  ;;  %v998_v28 = vsel %vm7226_vm10, %v783_v26, %v997_v4  ;;  %v1845_v30 = vsel %vm7434_vm13, %v5887_v19, %v1844_v36  ;;  %v1846_v31 = vrot.slane %v1844_v36, 4  ;;  %v7054_v26 = vld [vmem:[%s9025_s1] ss:$0 sm:$0xff]  ;;  %v2156_v9 = vld [vmem:[#allocation2 + $0x78] sm:$0xf] }
  0xc8   : > { %v1493_v38 = vsel %vm7175_vm2, %v1488_v21, %v1492_v10  ;;  %996 = vst [vmem:[#allocation2 + $0x88] sm:$0xf] %v782_v20  ;;  %999 = vst [vmem:[#allocation2 + $0x8c] sm:$0x1] %v998_v28  ;;  %v2180_v45 = vrot.slane %v2178_v25, 4  ;;  %v2183_v46 = vrot.slane %v2181_v54, 5  ;;  %v5960_v6 = vcombine.low %v7731_v42, %v7741_v17 }
  0xc9   : > { %v2187_v47 = vshll.u32 %v2130_v43, 16  ;;  %v5874_v50 = vcombine.low %v1483_v61, %v1493_v38  ;;  %v1848_v44 = vsel %vm7434_vm13, %v1846_v31, %v1847_v22  ;;  %v2191_v29 = vshrl.u32 %v2130_v43, 16  ;;  %v2133_v54 = vld [vmem:[#allocation2 + $0x1c] sm:$0xf] }
  0xca   : > { %v2197_v52 = vshll.u32 %v2131_v18, 16  ;;  %v5903_v35 = vcombine.low %v1845_v30, %v1848_v44  ;;  %v2184_v57 = vor.u32 %v2183_v46, %v2180_v45  ;;  %v5945_v40 = vrot.slane %v2644_v11, 9  ;;  %v7015_v46 = vld [vmem:[#allocation2 + $0x78] sm:$0xff]  }
  0xcb   : > { %v2189_v48 = vrot.slane %v2187_v47, 5  ;;  %4706 = vmatprep.mubr.bf16.mxu0 %v5874_v50  ;;  %v2193_v58 = vrot.slane %v2191_v29, 4  ;;  %v2746_v34 = vrot.slane %v2645_v27, 5  ;;  %v2749_v59 = vrot.slane %v2646_v2, 5  ;;  %v2134_v27 = vld [vmem:[#allocation2 + $0x20] sm:$0x1] }
  0xcc   : > { %4707 = vmatmul.mubr.bf16.gmra.mrb[40].mxu0 %v7002_v39  ;;  %4844 = vmatmul.mubr.bf16.gmra.mrb[44].mxu1 %v5903_v35  ;;  %v2185_v51 = vrot.slane %v2184_v57, 4  ;;  %v2199_v60 = vrot.slane %v2197_v52, 5  ;;  %v5888_v62 = vrot.slane %v1718_v37, 9  ;;  %v1851_v0 = vrot.slane %v1719_v32, 5  ;;  %v2647_v32 = vld [vmem:[#allocation2 + $0x24] sm:$0xe] }
  0xcd   : > { %v1212_v1 = vld [vmem:[#allocation2 + $0x84] sm:$0xf]  ;;  %v2194_v4 = vor.u32 %v2193_v58, %v2189_v48  ;;  %4851 = vmatprep.mubr.bf16.mxu1 %v7011_v53  ;;  %v7759_v5 = vsel %vm7434_vm13, %v5945_v40, %v2746_v34  ;;  %v2748_v10 = vrot.slane %v2746_v34, 4  ;;  %v1854_v12 = vrot.slane %v1720_v49, 5  ;;  %v2648_v47 = vld [vmem:[#allocation2 + $0x28] sm:$0xf] }
  0xce   : > { %v1495_v3 = vshrl.u32 %v1212_v1, 16  ;;  %v1498_v15 = vshll.u32 %v1212_v1, 16  ;;  %v2190_v43 = vsel %vm7175_vm2, %v2185_v51, %v2189_v48  ;;  %v2202_v61 = vshrl.u32 %v2132_v56, 16  ;;  %v2649_v52 = vld [vmem:[#allocation2 + $0x2c] sm:$0x1] }
  0xcf   : > { %v1213_v13 = vld [vmem:[#allocation2 + $0x88] sm:$0xf]  ;;  %v1214_v19 = vld [vmem:[#allocation2 + $0x8c] sm:$0x1]  ;;  %v7765_v18 = vsel %vm7434_vm13, %v2748_v10, %v2749_v59  ;;  %v1852_v7 = vsel %vm7434_vm13, %v5888_v62, %v1851_v0  ;;  %v7774_v63 = vmul.f32 %v7054_v26, %v6275_v55  ;;  %v7778_v36 = vadd.f32 %v7710_v14, %v7735_v8  ;;  %v1721_v53 = vld [vmem:[#allocation2 + $0x6c] sm:$0xe] }
  0xd0   : > { %v1497_v11 = vrot.slane %v1495_v3, 4  ;;  %v1500_v21 = vrot.slane %v1498_v15, 5  ;;  %v1504_v22 = vshll.u32 %v1213_v13, 16  ;;  %v1508_v25 = vshrl.u32 %v1213_v13, 16  ;;  %v1722_v58 = vld [vmem:[#allocation2 + $0x70] sm:$0xf] }
  0xd1   : > { %v1514_v2 = vshll.u32 %v1214_v19, 16  ;;  %v2195_v20 = vrot.slane %v2194_v4, 4  ;;  %v5961_v28 = vcombine.low %v7759_v5, %v7765_v18  ;;  %v1853_v30 = vrot.slane %v1851_v0, 4  ;;  %v1723_v34 = vld [vmem:[#allocation2 + $0x74] sm:$0x1]  ;;  %v7006_v15 = vld [vmem:[#allocation2 + $0x84] sm:$0xff]  }
  0xd2   : > { %v1501_v31 = vor.u32 %v1500_v21, %v1497_v11  ;;  %v1506_v23 = vrot.slane %v1504_v22, 5  ;;  %v1510_v55 = vrot.slane %v1508_v25, 4  ;;  %v2204_v37 = vrot.slane %v2202_v61, 4  ;;  %v2135_v62 = vld [vmem:[#allocation2 + $0x24] sm:$0xf] }
  0xd3   : > { %v1516_v38 = vrot.slane %v1514_v2, 5  ;;  %v2200_v8 = vsel %vm7175_vm2, %v2195_v20, %v2199_v60  ;;  %v1855_v39 = vsel %vm7434_vm13, %v1853_v30, %v1854_v12  ;;  %v2205_v45 = vshll.u32 %v2132_v56, 16  ;;  %v2136_v12 = vld [vmem:[#allocation2 + $0x28] sm:$0xf]  ;;  %v2137_v21 = vld [vmem:[#allocation2 + $0x2c] sm:$0x1] }
  0xd4   : > { %v1502_v49 = vrot.slane %v1501_v31, 4  ;;  %v1511_v50 = vor.u32 %v1510_v55, %v1506_v23  ;;  %v7786_v44 = vcombine.low %v2190_v43, %v2200_v8  ;;  %v5904_v29 = vcombine.low %v1852_v7, %v1855_v39  ;;  %v2650_v22 = vld [vmem:[#allocation2 + $0x30] sm:$0xe]  ;;  %v2651_v55 = vld [vmem:[#allocation2 + $0x34] sm:$0xf] }
  0xd5   : > { %v2207_v35 = vrot.slane %v2205_v45, 5  ;;  %v2211_v57 = vshll.u32 %v2133_v54, 16  ;;  %v2215_v48 = vshrl.u32 %v2133_v54, 16  ;;  %v2221_v40 = vshll.u32 %v2134_v27, 16 }
  0xd6   : > { %v1507_v59 = vsel %vm7175_vm2, %v1502_v49, %v1506_v23  ;;  %v1512_v51 = vrot.slane %v1511_v50, 4  ;;  %4852 = vmatmul.mubr.bf16.gmra.mrb[48].mxu1 %v5904_v29  ;;  %v5946_v56 = vrot.slane %v2647_v32, 9  ;;  %v2753_v60 = vrot.slane %v2648_v47, 5  ;;  %v1724_v32 = vld [vmem:[#allocation2 + $0x78] sm:$0xe] }
  0xd7   : > { %v2208_v0 = vor.u32 %v2207_v35, %v2204_v37  ;;  %v2213_v1 = vrot.slane %v2211_v57, 5  ;;  %v2217_v4 = vrot.slane %v2215_v48, 4  ;;  %v2223_v10 = vrot.slane %v2221_v40, 5  ;;  %4859 = vmatprep.mubr.bf16.mxu1 %v7015_v46  ;;  %v2652_v37 = vld [vmem:[#allocation2 + $0x38] sm:$0x1]  ;;  %v7016_v48 = vld [vmem:[#allocation2 + $0x84] sm:$0xff]  }
  0xd8   : > { %v1517_v3 = vsel %vm7175_vm2, %v1512_v51, %v1516_v38  ;;  %v7794_v43 = vsel %vm7434_vm13, %v5946_v56, %v2753_v60  ;;  %v2755_v61 = vrot.slane %v2753_v60, 4  ;;  %v2756_v13 = vrot.slane %v2649_v52, 5  ;;  %v1725_v38 = vld [vmem:[#allocation2 + $0x7c] sm:$0xf]  ;;  %v1726_v52 = vld [vmem:[#allocation2 + $0x80] sm:$0x1] }
  0xd9   : > { %v5875_v19 = vcombine.low %v1507_v59, %v1517_v3  ;;  %v2209_v7 = vrot.slane %v2208_v0, 4  ;;  %v2218_v26 = vor.u32 %v2217_v4, %v2213_v1  ;;  %v5889_v11 = vrot.slane %v1721_v53, 9  ;;  %v7018_v4 = vld [vmem:[%s9027_s3 + $0x208] sm:$0xff]  }
  0xda   : > { %v7798_v25 = vsel %vm7434_vm13, %v2755_v61, %v2756_v13  ;;  %v1858_v54 = vrot.slane %v1722_v58, 5  ;;  %v1861_v27 = vrot.slane %v1723_v34, 5  ;;  %v2226_v2 = vshrl.u32 %v2135_v62, 16  ;;  %v2138_v58 = vld [vmem:[#allocation2 + $0x30] sm:$0xf] }
  0xdb   : > { %4714 = vmatprep.mubr.bf16.mxu0 %v5875_v19  ;;  %v2214_v20 = vsel %vm7175_vm2, %v2209_v7, %v2213_v1  ;;  %v2219_v30 = vrot.slane %v2218_v26, 4  ;;  %v5962_v31 = vcombine.low %v7794_v43, %v7798_v25  ;;  %v2229_v23 = vshll.u32 %v2135_v62, 16  ;;  %v2139_v62 = vld [vmem:[#allocation2 + $0x34] sm:$0xf]  ;;  %v2653_v7 = vld [vmem:[#allocation2 + $0x3c] sm:$0xe] }
  0xdc   : > { %4715 = vmatmul.mubr.bf16.gmra.mrb[44].mxu0 %v7006_v15  ;;  %v1859_v8 = vsel %vm7434_vm13, %v5889_v11, %v1858_v54  ;;  %v1860_v39 = vrot.slane %v1858_v54, 4  ;;  %v2228_v45 = vrot.slane %v2226_v2, 4  ;;  %v2235_v46 = vshll.u32 %v2136_v12, 16 }
  0xdd   : > { %4948 = vmatprep.mubr.bf16.mxu0 %v5960_v6  ;;  %v2224_v47 = vsel %vm7175_vm2, %v2219_v30, %v2223_v10  ;;  %v2231_v49 = vrot.slane %v2229_v23, 5  ;;  %v2239_v50 = vshrl.u32 %v2136_v12, 16  ;;  %v2245_v29 = vshll.u32 %v2137_v21, 16  ;;  %v2140_v12 = vld [vmem:[#allocation2 + $0x38] sm:$0x1] }
  0xde   : > { %v7811_v53 = vcombine.low %v2214_v20, %v2224_v47  ;;  %v1862_v35 = vsel %vm7434_vm13, %v1860_v39, %v1861_v27  ;;  %v2237_v57 = vrot.slane %v2235_v46, 5  ;;  %v5947_v40 = vrot.slane %v2650_v22, 9  ;;  %v2654_v30 = vld [vmem:[#allocation2 + $0x40] sm:$0xf]  ;;  %v2655_v23 = vld [vmem:[#allocation2 + $0x44] sm:$0x1] }
  0xdf   : > { %v5905_v34 = vcombine.low %v1859_v8, %v1862_v35  ;;  %v2232_v59 = vor.u32 %v2231_v49, %v2228_v45  ;;  %v2241_v42 = vrot.slane %v2239_v50, 4  ;;  %v2247_v17 = vrot.slane %v2245_v29, 5  ;;  %v7020_v8 = vld [vmem:[#allocation2 + $0x90] sm:$0xff]   ;;  %v1727_v39 = vld [vmem:[#allocation2 + $0x84] sm:$0xe] }
  0xe0   : > { %v2760_v6 = vrot.slane %v2651_v55, 5  ;;  %v2763_v51 = vrot.slane %v2652_v37, 5  ;;  %v5890_v56 = vrot.slane %v1724_v32, 9  ;;  %v1865_v60 = vrot.slane %v1725_v38, 5  ;;  %v7055_v55 = vld [vmem:[%s9027_s3 + $0x200] sm:$0xff]   ;;  %v7023_v49 = vld [vmem:[%s9027_s3 + $0x210] sm:$0xff]  }
  0xe1   : > { %4860 = vmatmul.mubr.bf16.gmra.mrb[52].mxu1 %v5905_v34  ;;  %v2233_v0 = vrot.slane %v2232_v59, 4  ;;  %v2242_v1 = vor.u32 %v2241_v42, %v2237_v57  ;;  %v1868_v10 = vrot.slane %v1726_v52, 5  ;;  %v2250_v3 = vshrl.u32 %v2138_v58, 16  ;;  %v1728_v45 = vld [vmem:[#allocation2 + $0x88] sm:$0xf] }
  0xe2   : > { %4867 = vmatprep.mubr.bf16.mxu1 %v7016_v48  ;;  %v7820_v15 = vsel %vm7434_vm13, %v5947_v40, %v2760_v6  ;;  %v2762_v61 = vrot.slane %v2760_v6, 4  ;;  %v1866_v13 = vsel %vm7434_vm13, %v5890_v56, %v1865_v60  ;;  %v1867_v19 = vrot.slane %v1865_v60, 4  ;;  %v1729_v47 = vld [vmem:[#allocation2 + $0x8c] sm:$0x1]  ;;  %v2142_v59 = vld [vmem:[#allocation2 + $0x40] sm:$0xf] }
  0xe3   : > { %v2238_v26 = vsel %vm7175_vm2, %v2233_v0, %v2237_v57  ;;  %v2243_v11 = vrot.slane %v2242_v1, 4  ;;  %v2252_v21 = vrot.slane %v2250_v3, 4  ;;  %v2253_v22 = vshll.u32 %v2138_v58, 16  ;;  %v2141_v57 = vld [vmem:[#allocation2 + $0x3c] sm:$0xf] }
  0xe4   : > { %4949 = vmatmul.mubr.bf16.vlgmr.msra.gmra.mrb[48].mxu0 %v7786_v44  ;;  %v7829_v54 = vsel %vm7434_vm13, %v2762_v61, %v2763_v51  ;;  %v1869_v27 = vsel %vm7434_vm13, %v1867_v19, %v1868_v10  ;;  %v2259_v2 = vshll.u32 %v2139_v62, 16  ;;  %v2263_v20 = vshrl.u32 %v2139_v62, 16  ;;  %v2143_v56 = vld [vmem:[#allocation2 + $0x44] sm:$0x1]  ;;  %v2656_v60 = vld [vmem:[#allocation2 + $0x48] sm:$0xe] }
  0xe5   : > { %4956 = vmatprep.mubr.bf16.mxu0 %v5961_v28  ;;  %6859 = vmatpush3.bf16.msra.mxu0 %v7055_v55  ;;  %v2248_v44 = vsel %vm7175_vm2, %v2243_v11, %v2247_v17  ;;  %v5963_v37 = vcombine.low %v7820_v15, %v7829_v54  ;;  %v5906_v32 = vcombine.low %v1866_v13, %v1869_v27  ;;  %v2255_v38 = vrot.slane %v2253_v22, 5  ;;  %v2657_v62 = vld [vmem:[#allocation2 + $0x4c] sm:$0xf]  ;;  %v2658_v3 = vld [vmem:[#allocation2 + $0x50] sm:$0x1] }
  0xe6   : > { %v7843_v46 = vcombine.low %v2238_v26, %v2248_v44  ;;  %6860 = vmatprep.subr.bf16.mxu0 %v7018_v4  ;;  %v2261_v5 = vrot.slane %v2259_v2, 5  ;;  %v2265_v18 = vrot.slane %v2263_v20, 4  ;;  %v2269_v28 = vshll.u32 %v2140_v12, 16  ;;  %v1730_v61 = vld [vmem:[#allocation2 + $0x90] sm:$0xe]  ;;  %v7021_v2 = vld [vmem:[#allocation2 + $0x9c] sm:$0xff]  }
  0xe7   : > { %v2256_v50 = vor.u32 %v2255_v38, %v2252_v21  ;;  %v5948_v29 = vrot.slane %v2653_v7, 9  ;;  %v2767_v52 = vrot.slane %v2654_v30, 5  ;;  %v2770_v35 = vrot.slane %v2655_v23, 5  ;;  %v1731_v20 = vld [vmem:[#allocation2 + $0x94] sm:$0xf]  ;;  %v7031_v23 = vld [vmem:[%s9027_s3 + $0x220] sm:$0xff]  }
  0xe8   : > { %v2266_v48 = vor.u32 %v2265_v18, %v2261_v5  ;;  %v2271_v40 = vrot.slane %v2269_v28, 5  ;;  %v5891_v58 = vrot.slane %v1727_v39, 9  ;;  %v1872_v34 = vrot.slane %v1728_v45, 5  ;;  %v1732_v30 = vld [vmem:[#allocation2 + $0x98] sm:$0x1] }
  0xe9   : > { %4868 = vmatmul.mubr.bf16.gmra.mrb[56].mxu1 %v5906_v32  ;;  %v2257_v42 = vrot.slane %v2256_v50, 4  ;;  %6861 = vmatpush3.bf16.msra.mxu0 %v7018_v4  ;;  %v7850_v17 = vsel %vm7434_vm13, %v5948_v29, %v2767_v52  ;;  %v2769_v6 = vrot.slane %v2767_v52, 4  ;;  %v1875_v51 = vrot.slane %v1729_v47, 5  ;;  %v7028_v4 = vld [vmem:[%s9027_s3 + $0x218] sm:$0xff]   ;;  %v2144_v38 = vld [vmem:[#allocation2 + $0x48] sm:$0xf] }
  0xea   : > { %v2267_v0 = vrot.slane %v2266_v48, 4  ;;  %4875 = vmatprep.mubr.bf16.mxu1 %v7020_v8  ;;  %v1873_v1 = vsel %vm7434_vm13, %v5891_v58, %v1872_v34  ;;  %v1874_v10 = vrot.slane %v1872_v34, 4  ;;  %v2274_v12 = vshrl.u32 %v2141_v57, 16  ;;  %6862 = vmatprep.subr.bf16.mxu0 %v7023_v49  ;;  %v2145_v18 = vld [vmem:[#allocation2 + $0x4c] sm:$0xf] }
  0xeb   : > { %v2262_v13 = vsel %vm7175_vm2, %v2257_v42, %v2261_v5  ;;  %v7861_v19 = vsel %vm7434_vm13, %v2769_v6, %v2770_v35  ;;  %v2277_v7 = vshll.u32 %v2141_v57, 16  ;;  %v2283_v26 = vshll.u32 %v2142_v59, 16  ;;  %v2146_v35 = vld [vmem:[#allocation2 + $0x50] sm:$0x1]  ;;  %v2659_v58 = vld [vmem:[#allocation2 + $0x54] sm:$0xe] }
  0xec   : > { %4957 = vmatmul.mubr.bf16.gmra.mrb[52].mxu0 %v7811_v53  ;;  %v2272_v11 = vsel %vm7175_vm2, %v2267_v0, %v2271_v40  ;;  %v5964_v21 = vcombine.low %v7850_v17, %v7861_v19  ;;  %v1876_v22 = vsel %vm7434_vm13, %v1874_v10, %v1875_v51  ;;  %v2276_v27 = vrot.slane %v2274_v12, 4  ;;  %v7034_v34 = vld [vmem:[%s9027_s3 + $0x228] sm:$0xff]   ;;  %v1733_v12 = vld [vmem:[#allocation2 + $0x9c] sm:$0xe]  ;;  %v2148_v15 = vld [vmem:[#allocation2 + $0x58] sm:$0xf] }
  0xed   : > { %4964 = vmatprep.mubr.bf16.mxu0 %v5962_v31  ;;  %v7876_v53 = vcombine.low %v2262_v13, %v2272_v11  ;;  %v5907_v55 = vcombine.low %v1873_v1, %v1876_v22  ;;  %v2279_v44 = vrot.slane %v2277_v7, 5  ;;  %v2285_v32 = vrot.slane %v2283_v26, 5  ;;  %6863 = vmatpush3.bf16.msra.mxu0 %v7023_v49  ;;  %v7025_v26 = vld [vmem:[#allocation2 + $0xa8] sm:$0xff]   ;;  %v1735_v11 = vld [vmem:[#allocation2 + $0xa4] sm:$0x1]  ;;  %v7037_v22 = vld [vmem:[%s9027_s3 + $0x230] sm:$0xff]  }
  0xee   : > { %v2287_v8 = vshrl.u32 %v2142_v59, 16  ;;  %v2293_v39 = vshll.u32 %v2143_v56, 16  ;;  %v5949_v45 = vrot.slane %v2656_v60, 9  ;;  %v2774_v5 = vrot.slane %v2657_v62, 5  ;;  %6864 = vmatprep.subr.bf16.mxu0 %v7028_v4  ;;  %v2660_v56 = vld [vmem:[#allocation2 + $0x58] sm:$0xf] }
  0xef   : > { %v2280_v28 = vor.u32 %v2279_v44, %v2276_v27  ;;  %v2777_v47 = vrot.slane %v2658_v3, 5  ;;  %v5892_v50 = vrot.slane %v1730_v61, 9  ;;  %v1879_v29 = vrot.slane %v1731_v20, 5  ;;  %v2661_v60 = vld [vmem:[#allocation2 + $0x5c] sm:$0x1] }
  0xf0   : > { %v2289_v52 = vrot.slane %v2287_v8, 4  ;;  %v2295_v43 = vrot.slane %v2293_v39, 5  ;;  %v7880_v25 = vsel %vm7434_vm13, %v5949_v45, %v2774_v5  ;;  %v2776_v31 = vrot.slane %v2774_v5, 4  ;;  %v1734_v3 = vld [vmem:[#allocation2 + $0xa0] sm:$0xf] }
  0xf1   : > { %4876 = vmatmul.mubr.bf16.gmra.mrb[60].mxu1 %v5907_v55  ;;  %v2281_v49 = vrot.slane %v2280_v28, 4  ;;  %v1880_v57 = vsel %vm7434_vm13, %v5892_v50, %v1879_v29  ;;  %v1881_v48 = vrot.slane %v1879_v29, 4  ;;  %v1882_v40 = vrot.slane %v1732_v30, 5  ;;  %6865 = vmatpush3.bf16.msra.mxu0 %v7028_v4  ;;  %v2149_v28 = vld [vmem:[#allocation2 + $0x5c] sm:$0x1] }
  0xf2   : > { %v2290_v59 = vor.u32 %v2289_v52, %v2285_v32  ;;  %4883 = vmatprep.mubr.bf16.mxu1 %v7021_v2  ;;  %v7889_v42 = vsel %vm7434_vm13, %v2776_v31, %v2777_v47  ;;  %v2298_v6 = vshrl.u32 %v2144_v38, 16  ;;  %v2301_v51 = vshll.u32 %v2144_v38, 16  ;;  %6866 = vmatprep.subr.bf16.mxu0 %v7031_v23  ;;  %v2147_v38 = vld [vmem:[#allocation2 + $0x54] sm:$0xf] }
  0xf3   : > { %v2286_v62 = vsel %vm7175_vm2, %v2281_v49, %v2285_v32  ;;  %v5965_v0 = vcombine.low %v7880_v25, %v7889_v42  ;;  %v1883_v1 = vsel %vm7434_vm13, %v1881_v48, %v1882_v40  ;;  %v2307_v10 = vshll.u32 %v2145_v18, 16  ;;  %v2663_v48 = vld [vmem:[#allocation2 + $0x64] sm:$0xf]  ;;  %v2664_v40 = vld [vmem:[#allocation2 + $0x68] sm:$0x1] }
  0xf4   : > { %4965 = vmatmul.mubr.bf16.gmra.mrb[56].mxu0 %v7843_v46  ;;  %v2291_v61 = vrot.slane %v2290_v59, 4  ;;  %v5908_v4 = vcombine.low %v1880_v57, %v1883_v1  ;;  %v2300_v13 = vrot.slane %v2298_v6, 4  ;;  %v2303_v7 = vrot.slane %v2301_v51, 5 }
  0xf5   : > { %4972 = vmatprep.mubr.bf16.mxu0 %v5963_v37  ;;  %v2309_v27 = vrot.slane %v2307_v10, 5  ;;  %v2311_v2 = vshrl.u32 %v2145_v18, 16  ;;  %v2317_v20 = vshll.u32 %v2146_v35, 16  ;;  %v5950_v30 = vrot.slane %v2659_v58, 9  ;;  %6867 = vmatpush3.bf16.msra.mxu0 %v7031_v23  ;;  %v7040_v58 = vld [vmem:[%s9027_s3 + $0x238] sm:$0xff]  }
  0xf6   : > { %v2296_v46 = vsel %vm7175_vm2, %v2291_v61, %v2295_v43  ;;  %v2304_v55 = vor.u32 %v2303_v7, %v2300_v13  ;;  %v2781_v44 = vrot.slane %v2660_v56, 5  ;;  %v2784_v32 = vrot.slane %v2661_v60, 5  ;;  %6868 = vmatprep.subr.bf16.mxu0 %v7034_v34  ;;  %v2662_v43 = vld [vmem:[#allocation2 + $0x60] sm:$0xe]  ;;  %v1736_v56 = vld [vmem:[#allocation2 + $0xa8] sm:$0xe] }
  0xf7   : > { %v7906_v8 = vcombine.low %v2286_v62, %v2296_v46  ;;  %v2313_v39 = vrot.slane %v2311_v2, 4  ;;  %v2319_v45 = vrot.slane %v2317_v20, 5  ;;  %v5893_v5 = vrot.slane %v1733_v12, 9  ;;  %v1737_v12 = vld [vmem:[#allocation2 + $0xac] sm:$0xf]  ;;  %v7026_v20 = vld [vmem:[#allocation2 + $0xb4] sm:$0xff]  }
  0xf8   : > { %v2305_v54 = vrot.slane %v2304_v55, 4  ;;  %v7910_v37 = vsel %vm7434_vm13, %v5950_v30, %v2781_v44  ;;  %v2783_v23 = vrot.slane %v2781_v44, 4  ;;  %v1886_v18 = vrot.slane %v1734_v3, 5  ;;  %v1738_v7 = vld [vmem:[#allocation2 + $0xb0] sm:$0x1] }
  0xf9   : > { %4884 = vmatmul.mubr.bf16.gmra.mrb[64].mxu1 %v5908_v4  ;;  %v2314_v47 = vor.u32 %v2313_v39, %v2309_v27  ;;  %v1889_v50 = vrot.slane %v1735_v11, 5  ;;  %v2322_v29 = vshrl.u32 %v2147_v38, 16  ;;  %v2325_v52 = vshll.u32 %v2147_v38, 16  ;;  %6869 = vmatpush3.bf16.msra.mxu0 %v7034_v34 }
  0xfa   : > { %v2310_v31 = vsel %vm7175_vm2, %v2305_v54, %v2309_v27  ;;  %4891 = vmatprep.mubr.bf16.mxu1 %v7025_v26  ;;  %v7916_v35 = vsel %vm7434_vm13, %v2783_v23, %v2784_v32  ;;  %v1887_v49 = vsel %vm7434_vm13, %v5893_v5, %v1886_v18  ;;  %v1888_v57 = vrot.slane %v1886_v18, 4  ;;  %6870 = vmatprep.subr.bf16.mxu0 %v7037_v22  ;;  %v2150_v26 = vld [vmem:[#allocation2 + $0x60] sm:$0xf]  ;;  %v2151_v32 = vld [vmem:[#allocation2 + $0x64] sm:$0xf] }
  0xfb   : > { %v2315_v34 = vrot.slane %v2314_v47, 4  ;;  %v5966_v59 = vcombine.low %v7910_v37, %v7916_v35  ;;  %v2324_v6 = vrot.slane %v2322_v29, 4  ;;  %v2327_v51 = vrot.slane %v2325_v52, 5  ;;  %v2152_v5 = vld [vmem:[#allocation2 + $0x68] sm:$0x1] }
  0xfc   : > { %4973 = vmatmul.mubr.bf16.gmra.mrb[60].mxu0 %v7876_v53  ;;  %v1890_v60 = vsel %vm7434_vm13, %v1888_v57, %v1889_v50  ;;  %v2331_v62 = vshll.u32 %v2148_v15, 16  ;;  %v2335_v1 = vshrl.u32 %v2148_v15, 16  ;;  %v2341_v10 = vshll.u32 %v2149_v28, 16  ;;  %v2665_v47 = vld [vmem:[#allocation2 + $0x6c] sm:$0xe] }
  0xfd   : > { %4980 = vmatprep.mubr.bf16.mxu0 %v5964_v21  ;;  %v2320_v3 = vsel %vm7175_vm2, %v2315_v34, %v2319_v45  ;;  %v5909_v61 = vcombine.low %v1887_v49, %v1890_v60  ;;  %v2328_v4 = vor.u32 %v2327_v51, %v2324_v6  ;;  %v5951_v13 = vrot.slane %v2662_v43, 9  ;;  %6871 = vmatpush3.bf16.msra.mxu0 %v7037_v22  ;;  %v2666_v50 = vld [vmem:[#allocation2 + $0x70] sm:$0xf]  ;;  %v2667_v6 = vld [vmem:[#allocation2 + $0x74] sm:$0x1] }
  0xfe   : > { %v7933_v53 = vcombine.low %v2310_v31, %v2320_v3  ;;  %v2333_v11 = vrot.slane %v2331_v62, 5  ;;  %v2337_v27 = vrot.slane %v2335_v1, 4  ;;  %v2343_v2 = vrot.slane %v2341_v10, 5  ;;  %6872 = vmatprep.subr.bf16.mxu0 %v7040_v58  ;;  %v1739_v1 = vld [vmem:[#allocation2 + $0xb4] sm:$0xe] }
  0xff   : > { %v2329_v30 = vrot.slane %v2328_v4, 4  ;;  %v2788_v46 = vrot.slane %v2663_v48, 5  ;;  %v2791_v17 = vrot.slane %v2664_v40, 5  ;;  %v5894_v19 = vrot.slane %v1736_v56, 9  ;;  %v1740_v10 = vld [vmem:[#allocation2 + $0xb8] sm:$0xf] }
 0x100   : > { %v2338_v21 = vor.u32 %v2337_v27, %v2333_v11  ;;  %v1893_v55 = vrot.slane %v1737_v12, 5  ;;  %v1896_v44 = vrot.slane %v1738_v7, 5  ;;  %v2346_v38 = vshrl.u32 %v2150_v26, 16  ;;  %v2669_v37 = vld [vmem:[#allocation2 + $0x7c] sm:$0xf] }
 0x101   : > { %4892 = vmatmul.mubr.bf16.gmra.mrb[68].mxu1 %v5909_v61  ;;  %v2334_v22 = vsel %vm7175_vm2, %v2329_v30, %v2333_v11  ;;  %v7939_v39 = vsel %vm7434_vm13, %v5951_v13, %v2788_v46  ;;  %v2790_v45 = vrot.slane %v2788_v46, 4  ;;  %v2349_v15 = vshll.u32 %v2150_v26, 16  ;;  %6873 = vmatpush3.bf16.msra.mxu0 %v7040_v58  ;;  %v7943_v29 = vpop.f32.mrb[0].mxu0 }
 0x102   : > { %v2339_v54 = vrot.slane %v2338_v21, 4  ;;  %4899 = vmatprep.mubr.bf16.mxu1 %v7026_v20  ;;  %v1894_v23 = vsel %vm7434_vm13, %v5894_v19, %v1893_v55  ;;  %v1895_v18 = vrot.slane %v1893_v55, 4  ;;  %v2348_v28 = vrot.slane %v2346_v38, 4  ;;  %v7949_v57 = vpop.f32.mrb[1].mxu0  ;;  %v2153_v55 = vld [vmem:[#allocation2 + $0x6c] sm:$0xf] }
 0x103   : > { %v7947_v52 = vsel %vm7434_vm13, %v2790_v45, %v2791_v17  ;;  %v2351_v43 = vrot.slane %v2349_v15, 5  ;;  %v2355_v31 = vshll.u32 %v2151_v32, 16  ;;  %v2359_v49 = vshrl.u32 %v2151_v32, 16  ;;  %v7958_v51 = vpop.f32.mrb[2].mxu0 }
 0x104   : > { %4981 = vmatmul.mubr.bf16.gmra.mrb[64].mxu0 %v7906_v8  ;;  %v2344_v48 = vsel %vm7175_vm2, %v2339_v54, %v2343_v2  ;;  %v5967_v40 = vcombine.low %v7939_v39, %v7947_v52  ;;  %v1897_v58 = vsel %vm7434_vm13, %v1895_v18, %v1896_v44  ;;  %v2365_v34 = vshll.u32 %v2152_v5, 16  ;;  %v7965_v12 = vpop.f32.mrb[3].mxu0  ;;  %v1741_v2 = vld [vmem:[#allocation2 + $0xbc] sm:$0x1]  ;;  %v1028_v44 = vld [vmem:[#allocation2 + $0xc0] sm:$0xf] }
 0x105   : > { %4988 = vmatprep.mubr.bf16.mxu0 %v5965_v0  ;;  %v7963_v56 = vcombine.low %v2334_v22, %v2344_v48  ;;  %v5910_v8 = vcombine.low %v1894_v23, %v1897_v58  ;;  %v2352_v60 = vor.u32 %v2351_v43, %v2348_v28  ;;  %v2357_v62 = vrot.slane %v2355_v31, 5  ;;  %v2154_v5 = vld [vmem:[#allocation2 + $0x70] sm:$0xf]  ;;  %v2155_v28 = vld [vmem:[#allocation2 + $0x74] sm:$0x1] }
 0x106   : > { %v2361_v3 = vrot.slane %v2359_v49, 4  ;;  %v2367_v61 = vrot.slane %v2365_v34, 5  ;;  %v465_v4 = vadd.f32 %v7710_v14, %v7774_v63  ;;  %v496_v13 = vmax.f32 %v7778_v36, 0.0  ;;  %v2668_v31 = vld [vmem:[#allocation2 + $0x78] sm:$0xe] }
 0x107   : > { %v2353_v7 = vrot.slane %v2352_v60, 4  ;;  %v5952_v26 = vrot.slane %v2665_v47, 9  ;;  %v2795_v25 = vrot.slane %v2666_v50, 5  ;;  %v2798_v42 = vrot.slane %v2667_v6, 5  ;;  %v2670_v60 = vld [vmem:[#allocation2 + $0x80] sm:$0x1] }
 0x108   : > { %v2362_v0 = vor.u32 %v2361_v3, %v2357_v62  ;;  %v497_v11 = vmax.f32 %v465_v4, 0.0  ;;  %v6178_v27 = vpack.c.bf16 %v496_v13, %v496_v13  ;;  %v5895_v20 = vrot.slane %v1739_v1, 9 }
 0x109   : > { %4900 = vmatmul.mubr.bf16.gmra.mrb[72].mxu1 %v5910_v8  ;;  %v2358_v30 = vsel %vm7175_vm2, %v2353_v7, %v2357_v62  ;;  %v7974_v46 = vsel %vm7434_vm13, %v5952_v26, %v2795_v25  ;;  %v2797_v14 = vrot.slane %v2795_v25, 4  ;;  %v1900_v63 = vrot.slane %v1740_v10, 5  ;;  %v3075_v25 = vld [vmem:[#allocation2 + $0x1c] sm:$0xf] }
 0x10a   : > { %v2363_v36 = vrot.slane %v2362_v0, 4  ;;  %v6179_v17 = vpack.c.bf16 %v497_v11, %v497_v11  ;;  %v853_v19 = vshrl.u32 %v6178_v27, 16  ;;  %v856_v21 = vshll.u32 %v6178_v27, 16 }
 0x10b   : > { %v7978_v32 = vsel %vm7434_vm13, %v2797_v14, %v2798_v42  ;;  %v7982_v38 = vsel %vm7434_vm13, %v5895_v20, %v1900_v63  ;;  %v1902_v22 = vrot.slane %v1900_v63, 4  ;;  %v1903_v45 = vrot.slane %v1741_v2, 5  ;;  %v3076_v2 = vld [vmem:[#allocation2 + $0x20] sm:$0x1] }
 0x10c   : > { %4989 = vmatmul.mubr.bf16.gmra.mrb[68].mxu0 %v7933_v53  ;;  %v2368_v15 = vsel %vm7175_vm2, %v2363_v36, %v2367_v61  ;;  %v855_v54 = vrot.slane %v853_v19, 7  ;;  %v861_v23 = vshrl.u32 %v6179_v17, 16  ;;  %v864_v18 = vshll.u32 %v6179_v17, 16  ;;  %v3074_v61 = vld [vmem:[#allocation2 + $0x18] sm:$0xf] }
 0x10d   : > { %4996 = vmatprep.mubr.bf16.mxu0 %v5966_v59  ;;  %v7990_v47 = vcombine.low %v2358_v30, %v2368_v15  ;;  %v5968_v50 = vcombine.low %v7974_v46, %v7978_v32  ;;  %v7996_v43 = vsel %vm7434_vm13, %v1902_v22, %v1903_v45  ;;  %v2370_v53 = vshrl.u32 %v2153_v55, 16  ;;  %v2157_v45 = vld [vmem:[#allocation2 + $0x7c] sm:$0xf]  ;;  %v2159_v46 = vld [vmem:[#allocation2 + $0x84] sm:$0xf] }
 0x10e   : > { %v858_v49 = vor.u32 %v856_v21, %v855_v54  ;;  %v859_v48 = vrot.slane %v855_v54, 4  ;;  %v7998_v58 = vrot.slane %v861_v23, 7  ;;  %v5911_v34 = vcombine.low %v7982_v38, %v7996_v43  ;;  %v2158_v23 = vld [vmem:[#allocation2 + $0x80] sm:$0x1]  ;;  %v2160_v32 = vld [vmem:[#allocation2 + $0x88] sm:$0xf] }
 0x10f   : > { %v2372_v35 = vrot.slane %v2370_v53, 4  ;;  %v2373_v59 = vshll.u32 %v2153_v55, 16  ;;  %v2379_v6 = vshll.u32 %v2154_v5, 16  ;;  %v2383_v8 = vshrl.u32 %v2154_v5, 16 }
 0x110   : > { %v866_v62 = vor.u32 %v864_v18, %v7998_v58  ;;  %v868_v1 = vrot.slane %v7998_v58, 4  ;;  %v1029_v10 = vsel %vm7218_vm9, %v858_v49, %v1028_v44  ;;  %v2389_v3 = vshll.u32 %v2155_v28, 16  ;;  %v2671_v28 = vld [vmem:[#allocation2 + $0x84] sm:$0xe] }
 0x111   : > { %1030 = vst [vmem:[#allocation2 + $0xc0] sm:$0xf] %v1029_v10  ;;  %v2375_v4 = vrot.slane %v2373_v59, 5  ;;  %v2381_v13 = vrot.slane %v2379_v6, 5  ;;  %v2385_v7 = vrot.slane %v2383_v8, 4  ;;  %v5953_v26 = vrot.slane %v2668_v31, 9 }
 0x112   : > { %v867_v42 = vsel %vm7212_vm8, %v859_v48, %v866_v62  ;;  %v2391_v0 = vrot.slane %v2389_v3, 5  ;;  %v2802_v11 = vrot.slane %v2669_v37, 5  ;;  %v2805_v27 = vrot.slane %v2670_v60, 5  ;;  %v2672_v37 = vld [vmem:[#allocation2 + $0x88] sm:$0xf] }
 0x113   : > { %1031 = vst [vmem:[#allocation2 + $0xc4] sm:$0xf] %v867_v42  ;;  %v2376_v20 = vor.u32 %v2375_v4, %v2372_v35  ;;  %v2386_v30 = vor.u32 %v2385_v7, %v2381_v13  ;;  %v3123_v16 = vshrl.u32 %v3074_v61, 16  ;;  %v3126_v14 = vshll.u32 %v3074_v61, 16  ;;  %v2673_v60 = vld [vmem:[#allocation2 + $0x8c] sm:$0x1] }
 0x114   : > { %4997 = vmatmul.mubr.bf16.gmra.mrb[72].mxu0 %v7963_v56  ;;  %v8011_v63 = vsel %vm7434_vm13, %v5953_v26, %v2802_v11  ;;  %v2804_v36 = vrot.slane %v2802_v11, 4  ;;  %v3132_v17 = vshll.u32 %v3075_v25, 16  ;;  %v3136_v19 = vshrl.u32 %v3075_v25, 16  ;;  %v3077_v42 = vld [vmem:[#allocation2 + $0x24] sm:$0xf] }
 0x115   : > { %5004 = vmatprep.mubr.bf16.mxu0 %v5967_v40  ;;  %v2377_v21 = vrot.slane %v2376_v20, 4  ;;  %v2387_v55 = vrot.slane %v2386_v30, 4  ;;  %v3125_v44 = vrot.slane %v3123_v16, 4  ;;  %v3128_v22 = vrot.slane %v3126_v14, 5 }
 0x116   : > { %v8018_v56 = vsel %vm7434_vm13, %v2804_v36, %v2805_v27  ;;  %v3134_v5 = vrot.slane %v3132_v17, 5  ;;  %v3138_v15 = vrot.slane %v3136_v19, 4  ;;  %v3142_v54 = vshll.u32 %v3076_v2, 16  ;;  %v3079_v36 = vld [vmem:[#allocation2 + $0x2c] sm:$0x1] }
 0x117   : > { %v2382_v18 = vsel %vm7175_vm2, %v2377_v21, %v2381_v13  ;;  %v2392_v39 = vsel %vm7175_vm2, %v2387_v55, %v2391_v0  ;;  %v5969_v52 = vcombine.low %v8011_v63, %v8018_v56  ;;  %v3129_v40 = vor.u32 %v3128_v22, %v3125_v44  ;;  %v3082_v63 = vld [vmem:[#allocation2 + $0x38] sm:$0x1] }
 0x118   : > { %v8026_v53 = vcombine.low %v2382_v18, %v2392_v39  ;;  %v3139_v31 = vor.u32 %v3138_v15, %v3134_v5  ;;  %v3144_v49 = vrot.slane %v3142_v54, 5  ;;  %v2394_v48 = vshrl.u32 %v2156_v9, 16  ;;  %v8034_v0 = vpop.f32.mrb[4].mxu0  ;;  %v2174_v24 = vld [vmem:[#allocation2 + $0xc0] sm:$0xf] }
 0x119   : > { %v3130_v35 = vrot.slane %v3129_v40, 4  ;;  %v2397_v59 = vshll.u32 %v2156_v9, 16  ;;  %v2403_v6 = vshll.u32 %v2157_v45, 16  ;;  %v2407_v8 = vshrl.u32 %v2157_v45, 16  ;;  %v2161_v45 = vld [vmem:[#allocation2 + $0x8c] sm:$0x1] }
 0x11a   : > { %v7030_v62 = vld [vmem:[#allocation2 + $0xc0] sm:$0xff]   ;;  %v3140_v10 = vrot.slane %v3139_v31, 4  ;;  %v2396_v3 = vrot.slane %v2394_v48, 4  ;;  %v2413_v61 = vshll.u32 %v2158_v23, 16  ;;  %v8030_v4 = vadd.f32 %v7949_v57, %v7943_v29  ;;  %v3078_v29 = vld [vmem:[#allocation2 + $0x28] sm:$0xf] }
 0x11b   : > { %v3135_v13 = vsel %vm7175_vm2, %v3130_v35, %v3134_v5  ;;  %v2399_v7 = vrot.slane %v2397_v59, 5  ;;  %v2405_v26 = vrot.slane %v2403_v6, 5  ;;  %v2409_v25 = vrot.slane %v2407_v8, 4  ;;  %4907 = vmatprep.mubr.bf16.mxu1 %v7030_v62  ;;  %v8067_v48 = vpop.f32.mrb[5].mxu0  ;;  %v2675_v8 = vld [vmem:[#allocation2 + $0x94] sm:$0xf] }
 0x11c   : > { %5005 = vmatmul.mubr.bf16.gmra.mrb[76].mxu0 %v7990_v47  ;;  %v3145_v11 = vsel %vm7175_vm2, %v3140_v10, %v3144_v49  ;;  %v2415_v27 = vrot.slane %v2413_v61, 5  ;;  %v5954_v2 = vrot.slane %v2671_v28, 9  ;;  %v2809_v20 = vrot.slane %v2672_v37, 5  ;;  %v8039_v57 = vpop.f32.mrb[0].mxu1  ;;  %4908 = vmatmul.mubr.bf16.gmra.mrb[76].mxu1 %v5911_v34  ;;  %v7032_v34 = vld [vmem:[#allocation2 + $0x18] sm:$0xff]  }
 0x11d   : > { %5012 = vmatprep.mubr.bf16.mxu0 %v5968_v50  ;;  %v5992_v30 = vcombine.low %v3135_v13, %v3145_v11  ;;  %v2400_v47 = vor.u32 %v2399_v7, %v2396_v3  ;;  %v2410_v16 = vor.u32 %v2409_v25, %v2405_v26  ;;  %v2812_v14 = vrot.slane %v2673_v60, 5  ;;  %v8047_v17 = vpop.f32.mrb[1].mxu1  ;;  %v2674_v49 = vld [vmem:[#allocation2 + $0x90] sm:$0xe]  ;;  %v2676_v61 = vld [vmem:[#allocation2 + $0x98] sm:$0x1] }
 0x11e   : > { %v8051_v19 = vsel %vm7434_vm13, %v5954_v2, %v2809_v20  ;;  %v2811_v9 = vrot.slane %v2809_v20, 4  ;;  %v3147_v21 = vshrl.u32 %v3077_v42, 16  ;;  %v3150_v55 = vshll.u32 %v3077_v42, 16  ;;  %v8053_v50 = vpop.f32.mrb[2].mxu1  ;;  %v3080_v42 = vld [vmem:[#allocation2 + $0x30] sm:$0xf] }
 0x11f   : > { %5109 = vmatprep.mubr.bf16.mxu1 %v5992_v30  ;;  %v2401_v38 = vrot.slane %v2400_v47, 4  ;;  %v2411_v43 = vrot.slane %v2410_v16, 4  ;;  %v3156_v44 = vshll.u32 %v3078_v29, 16  ;;  %v3160_v22 = vshrl.u32 %v3078_v29, 16  ;;  %v8059_v18 = vpop.f32.mrb[3].mxu1  ;;  %v8070_v11 = vpop.f32.mrb[6].mxu0 }
 0x120   : > { %v8057_v5 = vsel %vm7434_vm13, %v2811_v9, %v2812_v14  ;;  %v3149_v15 = vrot.slane %v3147_v21, 4  ;;  %v3152_v54 = vrot.slane %v3150_v55, 5  ;;  %v3166_v23 = vshll.u32 %v3079_v36, 16  ;;  %v3081_v30 = vld [vmem:[#allocation2 + $0x34] sm:$0xf]  ;;  %v8077_v36 = vpop.f32.mrb[7].mxu0 }
 0x121   : > { %v2406_v39 = vsel %vm7175_vm2, %v2401_v38, %v2405_v26  ;;  %v2416_v40 = vsel %vm7175_vm2, %v2411_v43, %v2415_v27  ;;  %v5970_v28 = vcombine.low %v8051_v19, %v8057_v5  ;;  %v3158_v31 = vrot.slane %v3156_v44, 5  ;;  %v7033_v55 = vld [vmem:[#allocation2 + $0x24] sm:$0xff]   ;;  %v2163_v44 = vld [vmem:[#allocation2 + $0x94] sm:$0xf] }
 0x122   : > { %v5937_v37 = vcombine.low %v2406_v39, %v2416_v40  ;;  %v3153_v35 = vor.u32 %v3152_v54, %v3149_v15  ;;  %v3162_v59 = vrot.slane %v3160_v22, 4  ;;  %v3168_v6 = vrot.slane %v3166_v23, 5 }
 0x123   : > { %v2418_v60 = vshrl.u32 %v2159_v46, 16  ;;  %v2421_v62 = vshll.u32 %v2159_v46, 16  ;;  %v2427_v10 = vshll.u32 %v2160_v32, 16  ;;  %v2431_v3 = vshrl.u32 %v2160_v32, 16 }
 0x124   : > { %5013 = vmatmul.mubr.bf16.gmra.mrb[80].mxu0 %v8026_v53  ;;  %v3154_v13 = vrot.slane %v3153_v35, 4  ;;  %v3163_v7 = vor.u32 %v3162_v59, %v3158_v31  ;;  %v2437_v26 = vshll.u32 %v2161_v45, 16  ;;  %v5955_v25 = vrot.slane %v2674_v49, 9  ;;  %5110 = vmatmul.mubr.bf16.vlgmr.msra.gmra.mrb[80].mxu1 %v7032_v34  ;;  %v2162_v34 = vld [vmem:[#allocation2 + $0x90] sm:$0xf] }
 0x125   : > { %5020 = vmatprep.mubr.bf16.mxu0 %v5969_v52  ;;  %v2420_v27 = vrot.slane %v2418_v60, 4  ;;  %v2423_v2 = vrot.slane %v2421_v62, 5  ;;  %v2429_v20 = vrot.slane %v2427_v10, 5  ;;  %v2433_v29 = vrot.slane %v2431_v3, 4  ;;  %v2164_v62 = vld [vmem:[#allocation2 + $0x98] sm:$0x1] }
 0x126   : > { %v3159_v53 = vsel %vm7175_vm2, %v3154_v13, %v3158_v31  ;;  %v3164_v47 = vrot.slane %v3163_v7, 4  ;;  %v2439_v16 = vrot.slane %v2437_v26, 5  ;;  %v2816_v14 = vrot.slane %v2675_v8, 5  ;;  %v2677_v26 = vld [vmem:[#allocation2 + $0x9c] sm:$0xe] }
 0x127   : > { %v2424_v9 = vor.u32 %v2423_v2, %v2420_v27  ;;  %v2434_v21 = vor.u32 %v2433_v29, %v2429_v20  ;;  %v2819_v46 = vrot.slane %v2676_v61, 5  ;;  %v3171_v56 = vshrl.u32 %v3080_v42, 16  ;;  %v2679_v29 = vld [vmem:[#allocation2 + $0xa4] sm:$0x1] }
 0x128   : > { %v3169_v52 = vsel %vm7175_vm2, %v3164_v47, %v3168_v6  ;;  %v8083_v32 = vsel %vm7434_vm13, %v5955_v25, %v2816_v14  ;;  %v2818_v38 = vrot.slane %v2816_v14, 4  ;;  %v3174_v43 = vshll.u32 %v3080_v42, 16  ;;  %v2678_v25 = vld [vmem:[#allocation2 + $0xa0] sm:$0xf] }
 0x129   : > { %v5993_v22 = vcombine.low %v3159_v53, %v3169_v52  ;;  %v2425_v45 = vrot.slane %v2424_v9, 4  ;;  %v2435_v15 = vrot.slane %v2434_v21, 4  ;;  %v3173_v54 = vrot.slane %v3171_v56, 4  ;;  %v8085_v23 = vpop.f32.mrb[8].mxu0  ;;  %v3084_v56 = vld [vmem:[#allocation2 + $0x40] sm:$0xf] }
 0x12a   : > { %v8089_v39 = vsel %vm7434_vm13, %v2818_v38, %v2819_v46  ;;  %v3176_v40 = vrot.slane %v3174_v43, 5  ;;  %v3180_v31 = vshll.u32 %v3081_v30, 16  ;;  %v3184_v49 = vshrl.u32 %v3081_v30, 16  ;;  %v8091_v35 = vpop.f32.mrb[9].mxu0 }
 0x12b   : > { %5117 = vmatprep.mubr.bf16.mxu1 %v5993_v22  ;;  %v2430_v59 = vsel %vm7175_vm2, %v2425_v45, %v2429_v20  ;;  %v2440_v6 = vsel %vm7175_vm2, %v2435_v15, %v2439_v16  ;;  %v5971_v8 = vcombine.low %v8083_v32, %v8089_v39  ;;  %v3190_v60 = vshll.u32 %v3082_v63, 16  ;;  %v8099_v10 = vpop.f32.mrb[10].mxu0  ;;  %v3083_v16 = vld [vmem:[#allocation2 + $0x3c] sm:$0xf]  ;;  %v7035_v32 = vld [vmem:[#allocation2 + $0x30] sm:$0xff]  }
 0x12c   : > { %5021 = vmatmul.mubr.bf16.gmra.mrb[84].mxu0 %v5937_v37  ;;  %v5938_v3 = vcombine.low %v2430_v59, %v2440_v6  ;;  %v3177_v61 = vor.u32 %v3176_v40, %v3173_v54  ;;  %v3182_v13 = vrot.slane %v3180_v31, 5  ;;  %v3186_v7 = vrot.slane %v3184_v49, 4  ;;  %5118 = vmatmul.mubr.bf16.gmra.mrb[84].mxu1 %v7033_v55  ;;  %v8104_v14 = vpop.f32.mrb[11].mxu0  ;;  %v2165_v59 = vld [vmem:[#allocation2 + $0x9c] sm:$0xf] }
 0x12d   : > { %5028 = vmatprep.mubr.bf16.mxu0 %v5970_v28  ;;  %v3192_v42 = vrot.slane %v3190_v60, 5  ;;  %v2442_v27 = vshrl.u32 %v2162_v34, 16  ;;  %v2445_v2 = vshll.u32 %v2162_v34, 16  ;;  %v2451_v20 = vshll.u32 %v2163_v44, 16  ;;  %v3085_v34 = vld [vmem:[#allocation2 + $0x44] sm:$0x1] }
 0x12e   : > { %v3178_v30 = vrot.slane %v3177_v61, 4  ;;  %v3187_v53 = vor.u32 %v3186_v7, %v3182_v13  ;;  %v2455_v47 = vshrl.u32 %v2163_v44, 16  ;;  %v2461_v37 = vshll.u32 %v2164_v62, 16  ;;  %v2166_v6 = vld [vmem:[#allocation2 + $0xa0] sm:$0xf] }
 0x12f   : > { %v2444_v9 = vrot.slane %v2442_v27, 4  ;;  %v2447_v21 = vrot.slane %v2445_v2, 5  ;;  %v2453_v46 = vrot.slane %v2451_v20, 5  ;;  %v5956_v63 = vrot.slane %v2677_v26, 9  ;;  %v2167_v7 = vld [vmem:[#allocation2 + $0xa4] sm:$0x1] }
 0x130   : > { %v3183_v19 = vsel %vm7175_vm2, %v3178_v30, %v3182_v13  ;;  %v3188_v5 = vrot.slane %v3187_v53, 4  ;;  %v2457_v28 = vrot.slane %v2455_v47, 4  ;;  %v2463_v55 = vrot.slane %v2461_v37, 5  ;;  %v2680_v2 = vld [vmem:[#allocation2 + $0xa8] sm:$0xe] }
 0x131   : > { %v2448_v52 = vor.u32 %v2447_v21, %v2444_v9  ;;  %v2823_v38 = vrot.slane %v2678_v25, 5  ;;  %v2826_v43 = vrot.slane %v2679_v29, 5  ;;  %v3195_v44 = vshrl.u32 %v3083_v16, 16  ;;  %v2681_v20 = vld [vmem:[#allocation2 + $0xac] sm:$0xf] }
 0x132   : > { %v3193_v22 = vsel %vm7175_vm2, %v3188_v5, %v3192_v42  ;;  %v2458_v45 = vor.u32 %v2457_v28, %v2453_v46  ;;  %v3198_v15 = vshll.u32 %v3083_v16, 16  ;;  %v3204_v54 = vshll.u32 %v3084_v56, 16  ;;  %v2682_v47 = vld [vmem:[#allocation2 + $0xb0] sm:$0x1]  ;;  %v3086_v28 = vld [vmem:[#allocation2 + $0x48] sm:$0xf] }
 0x133   : > { %v5994_v39 = vcombine.low %v3183_v19, %v3193_v22  ;;  %v2449_v40 = vrot.slane %v2448_v52, 4  ;;  %v2824_v31 = vsel %vm7434_vm13, %v5956_v63, %v2823_v38  ;;  %v2825_v49 = vrot.slane %v2823_v38, 4 }
 0x134   : > { %5029 = vmatmul.mubr.bf16.gmra.mrb[88].mxu0 %v5938_v3  ;;  %v2459_v60 = vrot.slane %v2458_v45, 4  ;;  %v3197_v62 = vrot.slane %v3195_v44, 4  ;;  %v3200_v61 = vrot.slane %v3198_v15, 5  ;;  %v3206_v13 = vrot.slane %v3204_v54, 5 }
 0x135   : > { %5036 = vmatprep.mubr.bf16.mxu0 %v5971_v8  ;;  %5125 = vmatprep.mubr.bf16.mxu1 %v5994_v39  ;;  %v2454_v26 = vsel %vm7175_vm2, %v2449_v40, %v2453_v46  ;;  %v2827_v25 = vsel %vm7434_vm13, %v2825_v49, %v2826_v43  ;;  %v3208_v42 = vshrl.u32 %v3084_v56, 16  ;;  %v3214_v27 = vshll.u32 %v3085_v34, 16  ;;  %v8118_v8 = vpop.f32.mrb[4].mxu1  ;;  %v3087_v43 = vld [vmem:[#allocation2 + $0x4c] sm:$0xf] }
 0x136   : > { %v2464_v3 = vsel %vm7175_vm2, %v2459_v60, %v2463_v55  ;;  %5126 = vmatmul.mubr.bf16.gmra.mrb[88].mxu1 %v7035_v32  ;;  %v5972_v29 = vcombine.low %v2824_v31, %v2827_v25  ;;  %v3201_v30 = vor.u32 %v3200_v61, %v3197_v62  ;;  %v2466_v53 = vshrl.u32 %v2165_v59, 16  ;;  %v8120_v46 = vpop.f32.mrb[5].mxu1  ;;  %v3088_v61 = vld [vmem:[#allocation2 + $0x50] sm:$0x1] }
 0x137   : > { %v5939_v37 = vcombine.low %v2454_v26, %v2464_v3  ;;  %v3210_v16 = vrot.slane %v3208_v42, 4  ;;  %v3216_v9 = vrot.slane %v3214_v27, 5  ;;  %v2469_v21 = vshll.u32 %v2165_v59, 16  ;;  %v8122_v34 = vpop.f32.mrb[6].mxu1  ;;  %v2168_v27 = vld [vmem:[#allocation2 + $0xa8] sm:$0xf] }
 0x138   : > { %v3202_v63 = vrot.slane %v3201_v30, 4  ;;  %v2468_v56 = vrot.slane %v2466_v53, 4  ;;  %v2475_v19 = vshll.u32 %v2166_v6, 16  ;;  %v2479_v5 = vshrl.u32 %v2166_v6, 16  ;;  %v8126_v54 = vpop.f32.mrb[7].mxu1  ;;  %v7036_v6 = vld [vmem:[#allocation2 + $0x3c] sm:$0xff]  }
 0x139   : > { %v3211_v52 = vor.u32 %v3210_v16, %v3206_v13  ;;  %v2471_v55 = vrot.slane %v2469_v21, 5  ;;  %v2485_v32 = vshll.u32 %v2167_v7, 16  ;;  %v5957_v38 = vrot.slane %v2680_v2, 9 }
 0x13a   : > { %v3207_v44 = vsel %vm7175_vm2, %v3202_v63, %v3206_v13  ;;  %v2477_v22 = vrot.slane %v2475_v19, 5  ;;  %v2481_v45 = vrot.slane %v2479_v5, 4  ;;  %v2830_v15 = vrot.slane %v2681_v20, 5 }
 0x13b   : > { %v3212_v39 = vrot.slane %v3211_v52, 4  ;;  %v2472_v40 = vor.u32 %v2471_v55, %v2468_v56  ;;  %v2487_v31 = vrot.slane %v2485_v32, 5  ;;  %v2833_v49 = vrot.slane %v2682_v47, 5  ;;  %v2169_v47 = vld [vmem:[#allocation2 + $0xac] sm:$0xf] }
 0x13c   : > { %5037 = vmatmul.mubr.bf16.gmra.mrb[92].mxu0 %v5939_v37  ;;  %v2482_v59 = vor.u32 %v2481_v45, %v2477_v22  ;;  %v2831_v60 = vsel %vm7434_vm13, %v5957_v38, %v2830_v15  ;;  %v2832_v62 = vrot.slane %v2830_v15, 4  ;;  %v3219_v7 = vshrl.u32 %v3086_v28, 16 }
 0x13d   : > { %5044 = vmatprep.mubr.bf16.mxu0 %v5972_v29  ;;  %v3217_v13 = vsel %vm7175_vm2, %v3212_v39, %v3216_v9  ;;  %v2473_v26 = vrot.slane %v2472_v40, 4  ;;  %v3222_v25 = vshll.u32 %v3086_v28, 16  ;;  %v3228_v42 = vshll.u32 %v3087_v43, 16  ;;  %v8132_v2 = vpop.f32.mrb[12].mxu0  ;;  %v2170_v9 = vld [vmem:[#allocation2 + $0xb0] sm:$0x1] }
 0x13e   : > { %v5995_v20 = vcombine.low %v3207_v44, %v3217_v13  ;;  %v2483_v3 = vrot.slane %v2482_v59, 4  ;;  %v2834_v30 = vsel %vm7434_vm13, %v2832_v62, %v2833_v49  ;;  %v3221_v53 = vrot.slane %v3219_v7, 4  ;;  %v8140_v28 = vpop.f32.mrb[13].mxu0  ;;  %v2683_v44 = vld [vmem:[#allocation2 + $0xb4] sm:$0xe] }
 0x13f   : > { %v2478_v37 = vsel %vm7175_vm2, %v2473_v26, %v2477_v22  ;;  %v5973_v29 = vcombine.low %v2831_v60, %v2834_v30  ;;  %v3224_v16 = vrot.slane %v3222_v25, 5  ;;  %v3230_v21 = vrot.slane %v3228_v42, 5  ;;  %v2684_v22 = vld [vmem:[#allocation2 + $0xb8] sm:$0xf]  ;;  %v2685_v49 = vld [vmem:[#allocation2 + $0xbc] sm:$0x1] }
 0x140   : > { %5133 = vmatprep.mubr.bf16.mxu1 %v5995_v20  ;;  %v2488_v63 = vsel %vm7175_vm2, %v2483_v3, %v2487_v31  ;;  %v3232_v56 = vshrl.u32 %v3087_v43, 16  ;;  %v3238_v19 = vshll.u32 %v3088_v61, 16  ;;  %v2490_v5 = vshrl.u32 %v2168_v27, 16  ;;  %v3089_v62 = vld [vmem:[#allocation2 + $0x54] sm:$0xf] }
 0x141   : > { %v5940_v52 = vcombine.low %v2478_v37, %v2488_v63  ;;  %5134 = vmatmul.mubr.bf16.gmra.mrb[92].mxu1 %v7036_v6  ;;  %v3225_v55 = vor.u32 %v3224_v16, %v3221_v53  ;;  %v2493_v32 = vshll.u32 %v2168_v27, 16  ;;  %v2499_v38 = vshll.u32 %v2169_v47, 16  ;;  %v3090_v26 = vld [vmem:[#allocation2 + $0x58] sm:$0xf] }
 0x142   : > { %v3234_v45 = vrot.slane %v3232_v56, 4  ;;  %v3240_v15 = vrot.slane %v3238_v19, 5  ;;  %v2492_v39 = vrot.slane %v2490_v5, 4  ;;  %v2503_v40 = vshrl.u32 %v2169_v47, 16  ;;  %v8142_v25 = vpop.f32.mrb[8].mxu1  ;;  %v7038_v47 = vld [vmem:[#allocation2 + $0x48] sm:$0xff]  }
 0x143   : > { %v3226_v59 = vrot.slane %v3225_v55, 4  ;;  %v2495_v60 = vrot.slane %v2493_v32, 5  ;;  %v2501_v31 = vrot.slane %v2499_v38, 5  ;;  %v2509_v43 = vshll.u32 %v2170_v9, 16  ;;  %v3091_v9 = vld [vmem:[#allocation2 + $0x5c] sm:$0x1] }
 0x144   : > { %5045 = vmatmul.mubr.bf16.gmra.mrb[96].mxu0 %v5940_v52  ;;  %v3235_v61 = vor.u32 %v3234_v45, %v3230_v21  ;;  %v2505_v7 = vrot.slane %v2503_v40, 4  ;;  %v5958_v13 = vrot.slane %v2683_v44, 9  ;;  %v2837_v6 = vrot.slane %v2684_v22, 5  ;;  %v2171_v32 = vld [vmem:[#allocation2 + $0xb4] sm:$0xf]  ;;  %v8154_v40 = vpop.f32.mrb[9].mxu1 }
 0x145   : > { %5052 = vmatprep.mubr.bf16.mxu0 %v5973_v29  ;;  %v3231_v42 = vsel %vm7175_vm2, %v3226_v59, %v3230_v21  ;;  %v2496_v27 = vor.u32 %v2495_v60, %v2492_v39  ;;  %v2511_v20 = vrot.slane %v2509_v43, 5  ;;  %v2840_v3 = vrot.slane %v2685_v49, 5  ;;  %v2172_v39 = vld [vmem:[#allocation2 + $0xb8] sm:$0xf]  ;;  %v2173_v43 = vld [vmem:[#allocation2 + $0xbc] sm:$0x1] }
 0x146   : > { %v3236_v30 = vrot.slane %v3235_v61, 4  ;;  %v2506_v53 = vor.u32 %v2505_v7, %v2501_v31  ;;  %v2838_v37 = vsel %vm7434_vm13, %v5958_v13, %v2837_v6  ;;  %v2839_v16 = vrot.slane %v2837_v6, 4 }
 0x147   : > { %v2497_v63 = vrot.slane %v2496_v27, 4  ;;  %v3243_v56 = vshrl.u32 %v3089_v62, 16  ;;  %v3246_v19 = vshll.u32 %v3089_v62, 16  ;;  %v3252_v5 = vshll.u32 %v3090_v26, 16  ;;  %v8158_v62 = vpop.f32.mrb[10].mxu1 }
 0x148   : > { %v3241_v29 = vsel %vm7175_vm2, %v3236_v30, %v3240_v15  ;;  %v2507_v52 = vrot.slane %v2506_v53, 4  ;;  %v2841_v21 = vsel %vm7434_vm13, %v2839_v16, %v2840_v3  ;;  %v3256_v55 = vshrl.u32 %v3090_v26, 16  ;;  %v8160_v26 = vpop.f32.mrb[11].mxu1  ;;  %v2687_v53 = vld [vmem:[#allocation2 + $0xc4] sm:$0xf] }
 0x149   : > { %v5996_v38 = vcombine.low %v3231_v42, %v3241_v29  ;;  %v2502_v44 = vsel %vm7175_vm2, %v2497_v63, %v2501_v31  ;;  %v5974_v22 = vcombine.low %v2838_v37, %v2841_v21  ;;  %v3245_v45 = vrot.slane %v3243_v56, 4  ;;  %v1032_v31 = vld [vmem:[#allocation2 + $0xc8] sm:$0x1]  ;;  %v3093_v21 = vld [vmem:[#allocation2 + $0x64] sm:$0xf] }
 0x14a   : > { %v2512_v49 = vsel %vm7175_vm2, %v2507_v52, %v2511_v20  ;;  %v3248_v59 = vrot.slane %v3246_v19, 5  ;;  %v3254_v15 = vrot.slane %v3252_v5, 5  ;;  %v3258_v60 = vrot.slane %v3256_v55, 4  ;;  %v2686_v20 = vld [vmem:[#allocation2 + $0xc0] sm:$0xe] }
 0x14b   : > { %5141 = vmatprep.mubr.bf16.mxu1 %v5996_v38  ;;  %v5941_v61 = vcombine.low %v2502_v44, %v2512_v49  ;;  %v3262_v7 = vshll.u32 %v3091_v9, 16  ;;  %v2514_v13 = vshrl.u32 %v2171_v32, 16  ;;  %v2517_v6 = vshll.u32 %v2171_v32, 16  ;;  %v3092_v19 = vld [vmem:[#allocation2 + $0x60] sm:$0xf] }
 0x14c   : > { %5142 = vmatmul.mubr.bf16.gmra.mrb[96].mxu1 %v7038_v47  ;;  %v3249_v42 = vor.u32 %v3248_v59, %v3245_v45  ;;  %v3259_v27 = vor.u32 %v3258_v60, %v3254_v15  ;;  %v2523_v3 = vshll.u32 %v2172_v39, 16  ;;  %v2527_v30 = vshrl.u32 %v2172_v39, 16  ;;  %v7039_v39 = vld [vmem:[#allocation2 + $0x54] sm:$0xff]   ;;  %v3094_v59 = vld [vmem:[#allocation2 + $0x68] sm:$0x1]  ;;  %v8170_v60 = vpop.f32.mrb[14].mxu0 }
 0x14d   : > { %5053 = vmatmul.mubr.bf16.gmra.mrb[100].mxu0 %v5941_v61  ;;  %v3264_v37 = vrot.slane %v3262_v7, 5  ;;  %v2516_v16 = vrot.slane %v2514_v13, 4  ;;  %v2519_v63 = vrot.slane %v2517_v6, 5  ;;  %v2533_v56 = vshll.u32 %v2173_v43, 16 }
 0x14e   : > { %5060 = vmatprep.mubr.bf16.mxu0 %v5974_v22  ;;  %v3250_v9 = vrot.slane %v3249_v42, 4  ;;  %v3260_v5 = vrot.slane %v3259_v27, 4  ;;  %v2525_v29 = vrot.slane %v2523_v3, 5  ;;  %v2529_v52 = vrot.slane %v2527_v30, 4 }
 0x14f   : > { %v2520_v55 = vor.u32 %v2519_v63, %v2516_v16  ;;  %v2535_v47 = vrot.slane %v2533_v56, 5  ;;  %v1033_v32 = vsel %vm7226_vm10, %v868_v1, %v1032_v31  ;;  %v5959_v38 = vrot.slane %v2686_v20, 9  ;;  %v8172_v1 = vpop.f32.mrb[15].mxu0 }
 0x150   : > { %v3255_v44 = vsel %vm7175_vm2, %v3250_v9, %v3254_v15  ;;  %v3265_v45 = vsel %vm7175_vm2, %v3260_v5, %v3264_v37  ;;  %v2530_v22 = vor.u32 %v2529_v52, %v2525_v29  ;;  %1034 = vst [vmem:[#allocation2 + $0xc8] sm:$0x1] %v1033_v32  ;;  %v2844_v49 = vrot.slane %v2687_v53, 5  ;;  %v2175_v53 = vld [vmem:[#allocation2 + $0xc4] sm:$0xf] }
 0x151   : > { %v5997_v43 = vcombine.low %v3255_v44, %v3265_v45  ;;  %v2521_v61 = vrot.slane %v2520_v55, 4  ;;  %v3267_v58 = vshrl.u32 %v3092_v19, 16  ;;  %v3270_v7 = vshll.u32 %v3092_v19, 16  ;;  %v8178_v42 = vpop.f32.mrb[16].mxu0  ;;  %v3095_v45 = vld [vmem:[#allocation2 + $0x6c] sm:$0xf] }
 0x152   : > { %v2531_v13 = vrot.slane %v2530_v22, 4  ;;  %v8176_v15 = vsel %vm7434_vm13, %v5959_v38, %v2844_v49  ;;  %v2846_v6 = vrot.slane %v2844_v49, 4  ;;  %v3276_v31 = vshll.u32 %v3093_v21, 16  ;;  %v8182_v37 = vpop.f32.mrb[17].mxu0 }
 0x153   : > { %5149 = vmatprep.mubr.bf16.mxu1 %v5997_v43  ;;  %v2526_v27 = vsel %vm7175_vm2, %v2521_v61, %v2525_v29  ;;  %v3269_v3 = vrot.slane %v3267_v58, 4  ;;  %v3272_v30 = vrot.slane %v3270_v7, 5  ;;  %v3280_v20 = vshrl.u32 %v3093_v21, 16  ;;  %v8186_v9 = vpop.f32.mrb[18].mxu0  ;;  %v3096_v61 = vld [vmem:[#allocation2 + $0x70] sm:$0xf] }
 0x154   : > { %v2536_v16 = vsel %vm7175_vm2, %v2531_v13, %v2535_v47  ;;  %5150 = vmatmul.mubr.bf16.gmra.mrb[100].mxu1 %v7039_v39  ;;  %v3278_v63 = vrot.slane %v3276_v31, 5  ;;  %v3286_v56 = vshll.u32 %v3094_v59, 16  ;;  %v2538_v19 = vshrl.u32 %v2174_v24, 16 }
 0x155   : > { %v5942_v5 = vcombine.low %v2526_v27, %v2536_v16  ;;  %v3273_v52 = vor.u32 %v3272_v30, %v3269_v3  ;;  %v3282_v55 = vrot.slane %v3280_v20, 4  ;;  %v2541_v32 = vshll.u32 %v2174_v24, 16  ;;  %v3097_v20 = vld [vmem:[#allocation2 + $0x74] sm:$0x1] }
 0x156   : > { %v3288_v29 = vrot.slane %v3286_v56, 5  ;;  %v2540_v38 = vrot.slane %v2538_v19, 4  ;;  %v2547_v44 = vshll.u32 %v2175_v53, 16  ;;  %v2551_v21 = vshrl.u32 %v2175_v53, 16  ;;  %v8198_v53 = vpop.f32.mrb[19].mxu0 }
 0x157   : > { %5061 = vmatmul.mubr.bf16.gmra.mrb[104].mxu0 %v5942_v5  ;;  %v2688_v22 = vld [vmem:[#allocation2 + $0xc8] sm:$0x1]  ;;  %v3274_v49 = vrot.slane %v3273_v52, 4  ;;  %v3283_v43 = vor.u32 %v3282_v55, %v3278_v63  ;;  %v2543_v39 = vrot.slane %v2541_v32, 5  ;;  %v8190_v59 = vadd.f32 %v7965_v12, %v7958_v51  ;;  %v3586_v19 = vld [vmem:[#allocation2 + $0x18] sm:$0xe] }
 0x158   : > { %v2176_v47 = vld [vmem:[#allocation2 + $0xc8] sm:$0x1]  ;;  %v2847_v58 = vrot.slane %v2688_v22, 5  ;;  %v2549_v7 = vrot.slane %v2547_v44, 5  ;;  %v2553_v13 = vrot.slane %v2551_v21, 4  ;;  %v8196_v30 = vadd.f32 %v8047_v17, %v8039_v57  ;;  %v7041_v52 = vld [vmem:[#allocation2 + $0x60] sm:$0xff]  }
 0x159   : > { %v2557_v24 = vshll.u32 %v2176_v47, 16  ;;  %v3279_v31 = vsel %vm7175_vm2, %v3274_v49, %v3278_v63  ;;  %v3284_v27 = vrot.slane %v3283_v43, 4  ;;  %v2544_v3 = vor.u32 %v2543_v39, %v2540_v38  ;;  %v3587_v63 = vld [vmem:[#allocation2 + $0x1c] sm:$0xf]  ;;  %v3588_v32 = vld [vmem:[#allocation2 + $0x20] sm:$0x1] }
 0x15a   : > { %9041 = vst [vmem:[#allocation4_spill] sm:$0xff] %v8196_v30  ;;  %v2848_v51 = vsel %vm7434_vm13, %v2846_v6, %v2847_v58  ;;  %v2554_v12 = vor.u32 %v2553_v13, %v2549_v7  ;;  %v8204_v56 = vadd.f32 %v8059_v18, %v8053_v50  ;;  %v3291_v55 = vshrl.u32 %v3095_v45, 16  ;;  %v3589_v49 = vld [vmem:[#allocation2 + $0x24] sm:$0xe]  ;;  %v3590_v47 = vld [vmem:[#allocation2 + $0x28] sm:$0xf] }
 0x15b   : > { %v2559_v16 = vrot.slane %v2557_v24, 5  ;;  %v5975_v5 = vcombine.low %v8176_v15, %v2848_v51  ;;  %v3289_v57 = vsel %vm7175_vm2, %v3284_v27, %v3288_v29  ;;  %v2545_v17 = vrot.slane %v2544_v3, 4 }
 0x15c   : > { %9042 = vst [vmem:[#allocation5_spill] sm:$0xff] %v8204_v56  ;;  %v8209_v38 = vpop.f32.mrb[12].mxu1  ;;  %v5998_v6 = vcombine.low %v3279_v31, %v3289_v57  ;;  %v2555_v44 = vrot.slane %v2554_v12, 4  ;;  %v3294_v21 = vshll.u32 %v3095_v45, 16  ;;  %v3300_v22 = vshll.u32 %v3096_v61, 16 }
 0x15d   : > { %v8211_v50 = vpop.f32.mrb[13].mxu1  ;;  %5068 = vmatprep.mubr.bf16.mxu0 %v5975_v5  ;;  %v2550_v18 = vsel %vm7175_vm2, %v2545_v17, %v2549_v7  ;;  %v3293_v15 = vrot.slane %v3291_v55, 4  ;;  %v3304_v43 = vshrl.u32 %v3096_v61, 16  ;;  %v3310_v29 = vshll.u32 %v3097_v20, 16  ;;  %v3591_v31 = vld [vmem:[#allocation2 + $0x2c] sm:$0x1] }
 0x15e   : > { %v8215_v39 = vpop.f32.mrb[14].mxu1  ;;  %5157 = vmatprep.mubr.bf16.mxu1 %v5998_v6  ;;  %v2560_v58 = vsel %vm7175_vm2, %v2555_v44, %v2559_v16  ;;  %v3296_v13 = vrot.slane %v3294_v21, 5  ;;  %v3302_v45 = vrot.slane %v3300_v22, 5  ;;  %v6008_v24 = vrot.slane %v3586_v19, 9  ;;  %v3098_v17 = vld [vmem:[#allocation2 + $0x78] sm:$0xf] }
 0x15f   : > { %v8219_v27 = vpop.f32.mrb[15].mxu1  ;;  %v5943_v3 = vcombine.low %v2550_v18, %v2560_v58  ;;  %5158 = vmatmul.mubr.bf16.gmra.mrb[104].mxu1 %v7041_v52  ;;  %v3306_v51 = vrot.slane %v3304_v43, 4  ;;  %v3312_v7 = vrot.slane %v3310_v29, 5  ;;  %v3684_v12 = vrot.slane %v3587_v63, 5  ;;  %v3099_v44 = vld [vmem:[#allocation2 + $0x7c] sm:$0xf] }
 0x160   : > { %v3297_v61 = vor.u32 %v3296_v13, %v3293_v15  ;;  %v3687_v20 = vrot.slane %v3588_v32, 5  ;;  %v6009_v5 = vrot.slane %v3589_v49, 9  ;;  %v3691_v57 = vrot.slane %v3590_v47, 5  ;;  %v3100_v32 = vld [vmem:[#allocation2 + $0x80] sm:$0x1]  ;;  %v7042_v43 = vld [vmem:[#allocation2 + $0x6c] sm:$0xff]  }
 0x161   : > { %5069 = vmatmul.mubr.bf16.gmra.mrb[108].mxu0 %v5943_v3  ;;  %v3307_v55 = vor.u32 %v3306_v51, %v3302_v45  ;;  %v3685_v16 = vsel %vm7434_vm13, %v6008_v24, %v3684_v12  ;;  %v3686_v6 = vrot.slane %v3684_v12, 4  ;;  %v3694_v19 = vrot.slane %v3591_v31, 5  ;;  %v3592_v49 = vld [vmem:[#allocation2 + $0x30] sm:$0xe]  ;;  %v3593_v58 = vld [vmem:[#allocation2 + $0x34] sm:$0xf] }
 0x162   : > { %v3298_v21 = vrot.slane %v3297_v61, 4  ;;  %v3692_v52 = vsel %vm7434_vm13, %v6009_v5, %v3691_v57  ;;  %v3693_v22 = vrot.slane %v3691_v57, 4  ;;  %v8227_v63 = vadd.f32 %v8067_v48, %v8034_v0  ;;  %v3595_v3 = vld [vmem:[#allocation2 + $0x3c] sm:$0xe] }
 0x163   : > { %v3308_v18 = vrot.slane %v3307_v55, 4  ;;  %v3688_v15 = vsel %vm7434_vm13, %v3686_v6, %v3687_v20  ;;  %v8233_v29 = vadd.f32 %v8077_v36, %v8070_v11  ;;  %v8237_v47 = vadd.f32 %v8120_v46, %v8118_v8  ;;  %v3594_v36 = vld [vmem:[#allocation2 + $0x38] sm:$0x1]  ;;  %v3596_v20 = vld [vmem:[#allocation2 + $0x40] sm:$0xf] }
 0x164   : > { %v8239_v13 = vpop.f32.mrb[16].mxu1  ;;  %v8241_v0 = vpop.f32.mrb[20].mxu0  ;;  %v3303_v48 = vsel %vm7175_vm2, %v3298_v21, %v3302_v45  ;;  %v6024_v24 = vcombine.low %v3685_v16, %v3688_v15  ;;  %v3695_v31 = vsel %vm7434_vm13, %v3693_v22, %v3694_v19  ;;  %v8249_v11 = vadd.f32 %v8126_v54, %v8122_v34 }
 0x165   : > { %9043 = vst [vmem:[#allocation6_spill] sm:$0xff] %v8237_v47  ;;  %v8251_v8 = vpop.f32.mrb[17].mxu1  ;;  %v8253_v46 = vpop.f32.mrb[21].mxu0  ;;  %v3313_v51 = vsel %vm7175_vm2, %v3308_v18, %v3312_v7  ;;  %v6025_v12 = vcombine.low %v3692_v52, %v3695_v31  ;;  %v3315_v61 = vshrl.u32 %v3098_v17, 16  ;;  %v3318_v45 = vshll.u32 %v3098_v17, 16 }
 0x166   : > { %9044 = vst [vmem:[#allocation7_spill] sm:$0xff] %v8249_v11  ;;  %v8257_v5 = vpop.f32.mrb[18].mxu1  ;;  %v8259_v57 = vpop.f32.mrb[22].mxu0  ;;  %v5999_v55 = vcombine.low %v3303_v48, %v3313_v51  ;;  %6874 = vmatprep.mubr.bf16.mxu0 %v6024_v24  ;;  %v3324_v34 = vshll.u32 %v3099_v44, 16  ;;  %v3328_v54 = vshrl.u32 %v3099_v44, 16  ;;  %v3334_v16 = vshll.u32 %v3100_v32, 16 }
 0x167   : > { %v8261_v6 = vpop.f32.mrb[19].mxu1  ;;  %v8263_v19 = vpop.f32.mrb[23].mxu0  ;;  %v3317_v21 = vrot.slane %v3315_v61, 4  ;;  %v3320_v22 = vrot.slane %v3318_v45, 5  ;;  %v6010_v7 = vrot.slane %v3592_v49, 9  ;;  %v3698_v52 = vrot.slane %v3593_v58, 5 }
 0x168   : > { %v3597_v18 = vld [vmem:[#allocation2 + $0x44] sm:$0x1]  ;;  %5165 = vmatprep.mubr.bf16.mxu1 %v5999_v55  ;;  %v3326_v17 = vrot.slane %v3324_v34, 5  ;;  %v3330_v15 = vrot.slane %v3328_v54, 4  ;;  %v3336_v31 = vrot.slane %v3334_v16, 5  ;;  %v3701_v11 = vrot.slane %v3594_v36, 5 }
 0x169   : > { %5166 = vmatmul.mubr.bf16.gmra.mrb[108].mxu1 %v7042_v43  ;;  %6875 = vmatmul.mubr.bf16.vlgmr.msra.gmra.mrb[112].mxu0 %v6025_v12  ;;  %v3321_v48 = vor.u32 %v3320_v22, %v3317_v21  ;;  %v3699_v44 = vsel %vm7434_vm13, %v6010_v7, %v3698_v52  ;;  %v3700_v32 = vrot.slane %v3698_v52, 4  ;;  %v6011_v24 = vrot.slane %v3595_v3, 9  ;;  %v3101_v51 = vld [vmem:[#allocation2 + $0x84] sm:$0xf]  ;;  %v3102_v58 = vld [vmem:[#allocation2 + $0x88] sm:$0xf] }
 0x16a   : > { %v3331_v47 = vor.u32 %v3330_v15, %v3326_v17  ;;  %v3705_v61 = vrot.slane %v3596_v20, 5  ;;  %v3708_v45 = vrot.slane %v3597_v18, 5  ;;  %v8269_v49 = vadd.f32 %v8091_v35, %v8085_v23  ;;  %v3103_v12 = vld [vmem:[#allocation2 + $0x8c] sm:$0x1]  ;;  %v3598_v20 = vld [vmem:[#allocation2 + $0x48] sm:$0xe] }
 0x16b   : > { %v3322_v55 = vrot.slane %v3321_v48, 4  ;;  %v3702_v43 = vsel %vm7434_vm13, %v3700_v32, %v3701_v11  ;;  %v8275_v36 = vadd.f32 %v8104_v14, %v8099_v10  ;;  %v8279_v3 = vadd.f32 %v8154_v40, %v8142_v25  ;;  %v3599_v21 = vld [vmem:[#allocation2 + $0x4c] sm:$0xf]  ;;  %v3600_v22 = vld [vmem:[#allocation2 + $0x50] sm:$0x1]  ;;  %v7043_v52 = vld [vmem:[#allocation2 + $0x78] sm:$0xff]  }
 0x16c   : > { %v8281_v34 = vpop.f32.mrb[20].mxu1  ;;  %v3332_v54 = vrot.slane %v3331_v47, 4  ;;  %v6026_v23 = vcombine.low %v3699_v44, %v3702_v43  ;;  %v3706_v35 = vsel %vm7434_vm13, %v6011_v24, %v3705_v61  ;;  %v3707_v16 = vrot.slane %v3705_v61, 4  ;;  %v3603_v61 = vld [vmem:[#allocation2 + $0x5c] sm:$0x1] }
 0x16d   : > { %9045 = vst [vmem:[#allocation8_spill] sm:$0xff] %v8279_v3  ;;  %v8285_v11 = vpop.f32.mrb[21].mxu1  ;;  %v3327_v10 = vsel %vm7175_vm2, %v3322_v55, %v3326_v17  ;;  %v8291_v14 = vadd.f32 %v8160_v26, %v8158_v62  ;;  %v3339_v25 = vshrl.u32 %v3101_v51, 16  ;;  %v3342_v40 = vshll.u32 %v3101_v51, 16  ;;  %v3601_v17 = vld [vmem:[#allocation2 + $0x54] sm:$0xe] }
 0x16e   : > { %v8293_v7 = vpop.f32.mrb[22].mxu1  ;;  %v3337_v47 = vsel %vm7175_vm2, %v3332_v54, %v3336_v31  ;;  %6878 = vmatprep.mubr.bf16.mxu0 %v6026_v23  ;;  %v3709_v18 = vsel %vm7434_vm13, %v3707_v16, %v3708_v45  ;;  %v3348_v15 = vshll.u32 %v3102_v58, 16  ;;  %v3352_v48 = vshrl.u32 %v3102_v58, 16  ;;  %v3602_v51 = vld [vmem:[#allocation2 + $0x58] sm:$0xf] }
 0x16f   : > { %9046 = vst [vmem:[#allocation9_spill] sm:$0xff] %v8291_v14  ;;  %v8299_v44 = vpop.f32.mrb[23].mxu1  ;;  %v6000_v62 = vcombine.low %v3327_v10, %v3337_v47  ;;  %v6027_v26 = vcombine.low %v3706_v35, %v3709_v18  ;;  %v3341_v32 = vrot.slane %v3339_v25, 4  ;;  %v3344_v24 = vrot.slane %v3342_v40, 5  ;;  %v3104_v58 = vld [vmem:[#allocation2 + $0x90] sm:$0xf] }
 0x170   : > { %v3350_v55 = vrot.slane %v3348_v15, 5  ;;  %v3354_v43 = vrot.slane %v3352_v48, 4  ;;  %v3358_v14 = vshll.u32 %v3103_v12, 16  ;;  %v6012_v31 = vrot.slane %v3598_v20, 9  ;;  %v3105_v25 = vld [vmem:[#allocation2 + $0x94] sm:$0xf] }
 0x171   : > { %5173 = vmatprep.mubr.bf16.mxu1 %v6000_v62  ;;  %6879 = vmatmul.mubr.bf16.gmra.mrb[116].mxu0 %v6027_v26  ;;  %v3345_v54 = vor.u32 %v3344_v24, %v3341_v32  ;;  %v3712_v23 = vrot.slane %v3599_v21, 5  ;;  %v3715_v45 = vrot.slane %v3600_v22, 5  ;;  %v6013_v16 = vrot.slane %v3601_v17, 9  ;;  %v3106_v20 = vld [vmem:[#allocation2 + $0x98] sm:$0x1] }
 0x172   : > { %5174 = vmatmul.mubr.bf16.gmra.mrb[112].mxu1 %v7043_v52  ;;  %v3355_v3 = vor.u32 %v3354_v43, %v3350_v55  ;;  %v3360_v56 = vrot.slane %v3358_v14, 5  ;;  %v3719_v10 = vrot.slane %v3602_v51, 5  ;;  %v3722_v35 = vrot.slane %v3603_v61, 5  ;;  %v3604_v21 = vld [vmem:[#allocation2 + $0x60] sm:$0xe] }
 0x173   : > { %v3346_v40 = vrot.slane %v3345_v54, 4  ;;  %v3713_v47 = vsel %vm7434_vm13, %v6012_v31, %v3712_v23  ;;  %v3714_v18 = vrot.slane %v3712_v23, 4  ;;  %v8305_v12 = vadd.f32 %v8140_v28, %v8132_v2  ;;  %v3605_v62 = vld [vmem:[#allocation2 + $0x64] sm:$0xf] }
 0x174   : > { %v8307_v22 = vpop.f32.mrb[24].mxu0  ;;  %v8309_v15 = vpop.f32.mrb[24].mxu1  ;;  %v3356_v52 = vrot.slane %v3355_v3, 4  ;;  %v3720_v14 = vsel %vm7434_vm13, %v6013_v16, %v3719_v10  ;;  %v3721_v48 = vrot.slane %v3719_v10, 4  ;;  %v8315_v17 = vadd.f32 %v8172_v1, %v8170_v60  ;;  %v3606_v60 = vld [vmem:[#allocation2 + $0x68] sm:$0x1] }
 0x175   : > { %v8317_v26 = vpop.f32.mrb[25].mxu0  ;;  %v8319_v2 = vpop.f32.mrb[25].mxu1  ;;  %v3351_v28 = vsel %vm7175_vm2, %v3346_v40, %v3350_v55  ;;  %v3716_v32 = vsel %vm7434_vm13, %v3714_v18, %v3715_v45  ;;  %v8327_v3 = vadd.f32 %v8211_v50, %v8209_v38  ;;  %v8331_v24 = vadd.f32 %v8219_v27, %v8215_v39  ;;  %v3607_v1 = vld [vmem:[#allocation2 + $0x6c] sm:$0xe]  ;;  %v7044_v31 = vld [vmem:[#allocation2 + $0x84] sm:$0xff]  }
 0x176   : > { %9047 = vst [vmem:[#allocation10_spill] sm:$0xff] %v8315_v17  ;;  %v8333_v51 = vpop.f32.mrb[26].mxu0  ;;  %v8335_v61 = vpop.f32.mrb[26].mxu1  ;;  %v3361_v55 = vsel %vm7175_vm2, %v3356_v52, %v3360_v56  ;;  %v6028_v43 = vcombine.low %v3713_v47, %v3716_v32  ;;  %v3723_v54 = vsel %vm7434_vm13, %v3721_v48, %v3722_v35  ;;  %v3363_v38 = vshrl.u32 %v3104_v58, 16  ;;  %v3608_v50 = vld [vmem:[#allocation2 + $0x70] sm:$0xf] }
 0x177   : > { %9048 = vst [vmem:[#allocation11_spill] sm:$0xff] %v8327_v3  ;;  %9049 = vst [vmem:[#allocation12_spill] sm:$0xff] %v8331_v24  ;;  %v8341_v23 = vpop.f32.mrb[27].mxu0  ;;  %v8343_v39 = vpop.f32.mrb[27].mxu1  ;;  %v6001_v27 = vcombine.low %v3351_v28, %v3361_v55  ;;  %v6029_v45 = vcombine.low %v3720_v14, %v3723_v54  ;;  %v3366_v16 = vshll.u32 %v3104_v58, 16  ;;  %v3372_v10 = vshll.u32 %v3105_v25, 16 }
 0x178   : > { %v3609_v40 = vld [vmem:[#allocation2 + $0x74] sm:$0x1]  ;;  %6882 = vmatprep.mubr.bf16.mxu0 %v6028_v43  ;;  %v3365_v18 = vrot.slane %v3363_v38, 4  ;;  %v3376_v24 = vshrl.u32 %v3105_v25, 16  ;;  %v3382_v56 = vshll.u32 %v3106_v20, 16  ;;  %v6014_v47 = vrot.slane %v3604_v21, 9 }
 0x179   : > { %5181 = vmatprep.mubr.bf16.mxu1 %v6001_v27  ;;  %6883 = vmatmul.mubr.bf16.gmra.mrb[120].mxu0 %v6029_v45  ;;  %v3368_v52 = vrot.slane %v3366_v16, 5  ;;  %v3374_v35 = vrot.slane %v3372_v10, 5  ;;  %v3726_v48 = vrot.slane %v3605_v62, 5  ;;  %v3729_v32 = vrot.slane %v3606_v60, 5  ;;  %v3107_v25 = vld [vmem:[#allocation2 + $0x9c] sm:$0xf] }
 0x17a   : > { %5182 = vmatmul.mubr.bf16.gmra.mrb[116].mxu1 %v7044_v31  ;;  %v3378_v3 = vrot.slane %v3376_v24, 4  ;;  %v3384_v30 = vrot.slane %v3382_v56, 5  ;;  %v6015_v17 = vrot.slane %v3607_v1, 9  ;;  %v3733_v28 = vrot.slane %v3608_v50, 5  ;;  %v3108_v60 = vld [vmem:[#allocation2 + $0xa0] sm:$0xf] }
 0x17b   : > { %v3369_v14 = vor.u32 %v3368_v52, %v3365_v18  ;;  %v3727_v58 = vsel %vm7434_vm13, %v6014_v47, %v3726_v48  ;;  %v3728_v55 = vrot.slane %v3726_v48, 4  ;;  %v3736_v43 = vrot.slane %v3609_v40, 5  ;;  %v3109_v1 = vld [vmem:[#allocation2 + $0xa4] sm:$0x1]  ;;  %v3611_v45 = vld [vmem:[#allocation2 + $0x7c] sm:$0xf] }
 0x17c   : > { %v8347_v20 = vpop.f32.mrb[28].mxu1  ;;  %v3379_v21 = vor.u32 %v3378_v3, %v3374_v35  ;;  %v3734_v54 = vsel %vm7434_vm13, %v6015_v17, %v3733_v28  ;;  %v3735_v62 = vrot.slane %v3733_v28, 4  ;;  %v8353_v24 = vadd.f32 %v8182_v37, %v8178_v42  ;;  %v3610_v3 = vld [vmem:[#allocation2 + $0x78] sm:$0xe]  ;;  %v3612_v56 = vld [vmem:[#allocation2 + $0x80] sm:$0x1] }
 0x17d   : > { %v8355_v31 = vpop.f32.mrb[29].mxu1  ;;  %v3370_v38 = vrot.slane %v3369_v14, 4  ;;  %v3730_v50 = vsel %vm7434_vm13, %v3728_v55, %v3729_v32  ;;  %v8361_v27 = vadd.f32 %v8198_v53, %v8186_v9  ;;  %v6516_v17 = vadd.f32 %v8251_v8, %v8239_v13  ;;  %v3613_v48 = vld [vmem:[#allocation2 + $0x84] sm:$0xe]  ;;  %v3614_v32 = vld [vmem:[#allocation2 + $0x88] sm:$0xf] }
 0x17e   : > { %v8365_v16 = vpop.f32.mrb[28].mxu0  ;;  %v8367_v42 = vpop.f32.mrb[30].mxu1  ;;  %v3380_v37 = vrot.slane %v3379_v21, 4  ;;  %v6030_v10 = vcombine.low %v3727_v58, %v3730_v50  ;;  %v3737_v40 = vsel %vm7434_vm13, %v3735_v62, %v3736_v43  ;;  %v6519_v18 = vadd.f32 %v8261_v6, %v8257_v5  ;;  %v7045_v6 = vld [vmem:[#allocation2 + $0x90] sm:$0xff]  }
 0x17f   : > { %v8373_v9 = vpop.f32.mrb[29].mxu0  ;;  %v8375_v53 = vpop.f32.mrb[31].mxu1  ;;  %v3375_v13 = vsel %vm7175_vm2, %v3370_v38, %v3374_v35  ;;  %v6031_v8 = vcombine.low %v3734_v54, %v3737_v40  ;;  %v8380_v47 = vadd.f32 %v6516_v17, %v8030_v4  ;;  %v3387_v52 = vshrl.u32 %v3107_v25, 16  ;;  %v3615_v40 = vld [vmem:[#allocation2 + $0x8c] sm:$0x1] }
 0x180   : > { %v8382_v28 = vpop.f32.mrb[30].mxu0  ;;  %v3385_v5 = vsel %vm7175_vm2, %v3380_v37, %v3384_v30  ;;  %6886 = vmatprep.mubr.bf16.mxu0 %v6030_v10  ;;  %v8387_v14 = vadd.f32 %v6519_v18, %v8190_v59  ;;  %v3390_v58 = vshll.u32 %v3107_v25, 16  ;;  %v3396_v55 = vshll.u32 %v3108_v60, 16 }
 0x181   : > { %v8389_v35 = vpop.f32.mrb[31].mxu0  ;;  %v6002_v43 = vcombine.low %v3375_v13, %v3385_v5  ;;  %6887 = vmatmul.mubr.bf16.gmra.mrb[124].mxu0 %v6031_v8  ;;  %v3389_v4 = vrot.slane %v3387_v52, 4  ;;  %v3400_v21 = vshrl.u32 %v3108_v60, 16  ;;  %v3406_v54 = vshll.u32 %v3109_v1, 16 }
 0x182   : > { %v3392_v62 = vrot.slane %v3390_v58, 5  ;;  %v3398_v38 = vrot.slane %v3396_v55, 5  ;;  %v6016_v50 = vrot.slane %v3610_v3, 9  ;;  %v3740_v17 = vrot.slane %v3611_v45, 5 }
 0x183   : > { %5189 = vmatprep.mubr.bf16.mxu1 %v6002_v43  ;;  %v3402_v30 = vrot.slane %v3400_v21, 4  ;;  %v3408_v37 = vrot.slane %v3406_v54, 5  ;;  %v3743_v10 = vrot.slane %v3612_v56, 5  ;;  %v6017_v59 = vrot.slane %v3613_v48, 9  ;;  %v3110_v48 = vld [vmem:[#allocation2 + $0xa8] sm:$0xf] }
 0x184   : > { %v8391_v18 = vpop.f32.mrb[32].mxu1  ;;  %5190 = vmatmul.mubr.bf16.gmra.mrb[120].mxu1 %v7045_v6  ;;  %v3393_v25 = vor.u32 %v3392_v62, %v3389_v4  ;;  %v3741_v13 = vsel %vm7434_vm13, %v6016_v50, %v3740_v17  ;;  %v3742_v8 = vrot.slane %v3740_v17, 4  ;;  %v3747_v60 = vrot.slane %v3614_v32, 5  ;;  %v3111_v21 = vld [vmem:[#allocation2 + $0xac] sm:$0xf] }
 0x185   : > { %v8395_v1 = vpop.f32.mrb[33].mxu1  ;;  %v3403_v52 = vor.u32 %v3402_v30, %v3398_v38  ;;  %v3750_v3 = vrot.slane %v3615_v40, 5  ;;  %v8399_v45 = vadd.f32 %v8253_v46, %v8241_v0  ;;  %v8403_v56 = vadd.f32 %v8263_v19, %v8259_v57  ;;  %v7046_v46 = vld [vmem:[#allocation2 + $0x9c] sm:$0xff]   ;;  %v3112_v54 = vld [vmem:[#allocation2 + $0xb0] sm:$0x1] }
 0x186   : > { %v8405_v5 = vpop.f32.mrb[34].mxu1  ;;  %v3394_v6 = vrot.slane %v3393_v25, 4  ;;  %v3744_v58 = vsel %vm7434_vm13, %v3742_v8, %v3743_v10  ;;  %v3748_v32 = vsel %vm7434_vm13, %v6017_v59, %v3747_v60  ;;  %v3749_v55 = vrot.slane %v3747_v60, 4  ;;  %v3616_v30 = vld [vmem:[#allocation2 + $0x90] sm:$0xe] }
 0x187   : > { %v8411_v43 = vpop.f32.mrb[35].mxu1  ;;  %v3404_v4 = vrot.slane %v3403_v52, 4  ;;  %v6032_v0 = vcombine.low %v3741_v13, %v3744_v58  ;;  %v6522_v57 = vadd.f32 %v8285_v11, %v8281_v34  ;;  %v6525_v19 = vadd.f32 %v8299_v44, %v8293_v7  ;;  %v3617_v10 = vld [vmem:[#allocation2 + $0x94] sm:$0xf]  ;;  %v3618_v44 = vld [vmem:[#allocation2 + $0x98] sm:$0x1] }
 0x188   : > { %v3399_v62 = vsel %vm7175_vm2, %v3394_v6, %v3398_v38  ;;  %v3751_v50 = vsel %vm7434_vm13, %v3749_v55, %v3750_v3  ;;  %v3411_v17 = vshrl.u32 %v3110_v48, 16  ;;  %v3414_v40 = vshll.u32 %v3110_v48, 16  ;;  %v3619_v38 = vld [vmem:[#allocation2 + $0x9c] sm:$0xe]  ;;  %v3620_v25 = vld [vmem:[#allocation2 + $0xa0] sm:$0xf] }
 0x189   : > { %v3409_v59 = vsel %vm7175_vm2, %v3404_v4, %v3408_v37  ;;  %6890 = vmatprep.mubr.bf16.mxu0 %v6032_v0  ;;  %v6033_v34 = vcombine.low %v3748_v32, %v3751_v50  ;;  %v8424_v11 = vadd.f32 %v6522_v57, %v8227_v63  ;;  %v8427_v7 = vadd.f32 %v6525_v19, %v8233_v29  ;;  %v3621_v3 = vld [vmem:[#allocation2 + $0xa4] sm:$0x1]  ;;  %v3113_v0 = vld [vmem:[#allocation2 + $0xb4] sm:$0xf] }
 0x18a   : > { %v6003_v13 = vcombine.low %v3399_v62, %v3409_v59  ;;  %v3413_v8 = vrot.slane %v3411_v17, 4  ;;  %v3416_v60 = vrot.slane %v3414_v40, 5  ;;  %v3420_v52 = vshll.u32 %v3111_v21, 16 }
 0x18b   : > { %6891 = vmatmul.mubr.bf16.gmra.mrb[128].mxu0 %v6033_v34  ;;  %v3424_v48 = vshrl.u32 %v3111_v21, 16  ;;  %v3430_v6 = vshll.u32 %v3112_v54, 16  ;;  %v6018_v37 = vrot.slane %v3616_v30, 9  ;;  %v3754_v58 = vrot.slane %v3617_v10, 5 }
 0x18c   : > { %v8429_v32 = vpop.f32.mrb[32].mxu0  ;;  %5197 = vmatprep.mubr.bf16.mxu1 %v6003_v13  ;;  %v3417_v63 = vor.u32 %v3416_v60, %v3413_v8  ;;  %v3422_v55 = vrot.slane %v3420_v52, 5  ;;  %v3757_v29 = vrot.slane %v3618_v44, 5  ;;  %v6019_v4 = vrot.slane %v3619_v38, 9  ;;  %v3114_v60 = vld [vmem:[#allocation2 + $0xb8] sm:$0xf] }
 0x18d   : > { %v8431_v57 = vpop.f32.mrb[33].mxu0  ;;  %v8433_v19 = vpop.f32.mrb[36].mxu1  ;;  %5198 = vmatmul.mubr.bf16.gmra.mrb[124].mxu1 %v7046_v46  ;;  %v3426_v62 = vrot.slane %v3424_v48, 4  ;;  %v3432_v50 = vrot.slane %v3430_v6, 5  ;;  %v3755_v21 = vsel %vm7434_vm13, %v6018_v37, %v3754_v58  ;;  %v3756_v54 = vrot.slane %v3754_v58, 4 }
 0x18e   : > { %v8437_v17 = vpop.f32.mrb[34].mxu0  ;;  %v8439_v40 = vpop.f32.mrb[37].mxu1  ;;  %v3418_v30 = vrot.slane %v3417_v63, 4  ;;  %v3761_v10 = vrot.slane %v3620_v25, 5  ;;  %v3764_v59 = vrot.slane %v3621_v3, 5  ;;  %v8443_v34 = vadd.f32 %v8317_v26, %v8307_v22 }
 0x18f   : > { %v8445_v44 = vpop.f32.mrb[35].mxu0  ;;  %v8447_v46 = vpop.f32.mrb[38].mxu1  ;;  %v3427_v38 = vor.u32 %v3426_v62, %v3422_v55  ;;  %v3758_v13 = vsel %vm7434_vm13, %v3756_v54, %v3757_v29  ;;  %v8453_v8 = vadd.f32 %v8341_v23, %v8333_v51  ;;  %v6528_v25 = vadd.f32 %v8319_v2, %v8309_v15  ;;  %v3115_v6 = vld [vmem:[#allocation2 + $0xbc] sm:$0x1]  ;;  %v3622_v37 = vld [vmem:[#allocation2 + $0xa8] sm:$0xe] }
 0x190   : > { %v8457_v52 = vpop.f32.mrb[39].mxu1  ;;  %v3423_v22 = vsel %vm7175_vm2, %v3418_v30, %v3422_v55  ;;  %v6034_v26 = vcombine.low %v3755_v21, %v3758_v13  ;;  %v3762_v3 = vsel %vm7434_vm13, %v6019_v4, %v3761_v10  ;;  %v3763_v48 = vrot.slane %v3761_v10, 4  ;;  %v3623_v23 = vld [vmem:[#allocation2 + $0xac] sm:$0xf]  ;;  %v3624_v63 = vld [vmem:[#allocation2 + $0xb0] sm:$0x1] }
 0x191   : > { %v3428_v58 = vrot.slane %v3427_v38, 4  ;;  %v8464_v51 = vadd.f32 %v6528_v25, %v8269_v49  ;;  %v6531_v15 = vadd.f32 %v8343_v39, %v8335_v61  ;;  %v3435_v2 = vshrl.u32 %v3113_v0, 16  ;;  %v7047_v29 = vld [vmem:[#allocation2 + $0xa8] sm:$0xff]   ;;  %v3625_v54 = vld [vmem:[#allocation2 + $0xb4] sm:$0xe] }
 0x192   : > { %6894 = vmatprep.mubr.bf16.mxu0 %v6034_v26  ;;  %v3765_v55 = vsel %vm7434_vm13, %v3763_v48, %v3764_v59  ;;  %v3438_v62 = vshll.u32 %v3113_v0, 16  ;;  %v3444_v4 = vshll.u32 %v3114_v60, 16  ;;  %v3448_v21 = vshrl.u32 %v3114_v60, 16  ;;  %v3626_v39 = vld [vmem:[#allocation2 + $0xb8] sm:$0xf] }
 0x193   : > { %9050 = vst [vmem:[#allocation13_spill] sm:$0xff] %v8464_v51  ;;  %v3433_v30 = vsel %vm7175_vm2, %v3428_v58, %v3432_v50  ;;  %v6035_v49 = vcombine.low %v3762_v3, %v3765_v55  ;;  %v8473_v10 = vadd.f32 %v6531_v15, %v8275_v36  ;;  %v3437_v61 = vrot.slane %v3435_v2, 4  ;;  %v3627_v38 = vld [vmem:[#allocation2 + $0xbc] sm:$0x1] }
 0x194   : > { %v8475_v13 = vpop.f32.mrb[36].mxu0  ;;  %v6004_v25 = vcombine.low %v3423_v22, %v3433_v30  ;;  %v3440_v26 = vrot.slane %v3438_v62, 5  ;;  %v3446_v51 = vrot.slane %v3444_v4, 5  ;;  %v3450_v59 = vrot.slane %v3448_v21, 4 }
 0x195   : > { %9051 = vst [vmem:[#allocation14_spill] sm:$0xff] %v8473_v10  ;;  %v8477_v0 = vpop.f32.mrb[37].mxu0  ;;  %v8479_v60 = vpop.f32.mrb[40].mxu1  ;;  %6895 = vmatmul.mubr.bf16.gmra.mrb[132].mxu0 %v6035_v49  ;;  %v3454_v48 = vshll.u32 %v3115_v6, 16  ;;  %v6020_v50 = vrot.slane %v3622_v37, 9  ;;  %v3768_v3 = vrot.slane %v3623_v23, 5 }
 0x196   : > { %v3771_v58 = vrot.slane %v3624_v63, 5  ;;  %v8481_v36 = vpop.f32.mrb[38].mxu0  ;;  %v8483_v15 = vpop.f32.mrb[41].mxu1  ;;  %5205 = vmatprep.mubr.bf16.mxu1 %v6004_v25  ;;  %v3441_v2 = vor.u32 %v3440_v26, %v3437_v61  ;;  %v3451_v55 = vor.u32 %v3450_v59, %v3446_v51  ;;  %v6021_v22 = vrot.slane %v3625_v54, 9  ;;  %v3116_v26 = vld [vmem:[#allocation2 + $0xc0] sm:$0xf] }
 0x197   : > { %v3775_v62 = vrot.slane %v3626_v39, 5  ;;  %v8485_v4 = vpop.f32.mrb[39].mxu0  ;;  %v8487_v21 = vpop.f32.mrb[42].mxu1  ;;  %5206 = vmatmul.mubr.bf16.gmra.mrb[128].mxu1 %v7047_v29  ;;  %v3456_v30 = vrot.slane %v3454_v48, 5  ;;  %v3769_v6 = vsel %vm7434_vm13, %v6020_v50, %v3768_v3  ;;  %v3770_v37 = vrot.slane %v3768_v3, 4 }
 0x198   : > { %v3778_v23 = vrot.slane %v3627_v38, 5  ;;  %v8491_v63 = vpop.f32.mrb[43].mxu1  ;;  %v3442_v49 = vrot.slane %v3441_v2, 4  ;;  %v3452_v10 = vrot.slane %v3451_v55, 4  ;;  %v8499_v29 = vadd.f32 %v8373_v9, %v8365_v16  ;;  %v3117_v59 = vld [vmem:[#allocation2 + $0xc4] sm:$0xf] }
 0x199   : > { %v3776_v61 = vsel %vm7434_vm13, %v6021_v22, %v3775_v62  ;;  %v3777_v54 = vrot.slane %v3775_v62, 4  ;;  %v3772_v39 = vsel %vm7434_vm13, %v3770_v37, %v3771_v58  ;;  %v8503_v25 = vadd.f32 %v8389_v35, %v8382_v28  ;;  %v3118_v9 = vld [vmem:[#allocation2 + $0xc8] sm:$0x1]  ;;  %v7048_v2 = vld [vmem:[#allocation2 + $0xb4] sm:$0xff]   ;;  %v3629_v55 = vld [vmem:[#allocation2 + $0xc4] sm:$0xf] }
 0x19a   : > { %v6534_v38 = vadd.f32 %v8355_v31, %v8347_v20  ;;  %v3447_v48 = vsel %vm7175_vm2, %v3442_v49, %v3446_v51  ;;  %v3457_v50 = vsel %vm7175_vm2, %v3452_v10, %v3456_v30  ;;  %v6036_v3 = vcombine.low %v3769_v6, %v3772_v39  ;;  %v3628_v31 = vld [vmem:[#allocation2 + $0xc0] sm:$0xe]  ;;  %v3630_v30 = vld [vmem:[#allocation2 + $0xc8] sm:$0x1]  ;;  %v3632_v49 = vld [vmem:[#allocation2 + $0xd0] sm:$0xf] }
 0x19b   : > { %v3779_v16 = vsel %vm7434_vm13, %v3777_v54, %v3778_v23  ;;  %v6005_v58 = vcombine.low %v3447_v48, %v3457_v50  ;;  %v6537_v20 = vadd.f32 %v8375_v53, %v8367_v42  ;;  %v3459_v51 = vshrl.u32 %v3116_v26, 16  ;;  %v9052_v6 = vld [vmem:[#allocation10_spill] sm:$0xff] }
 0x19c   : > { %v6037_v28 = vcombine.low %v3776_v61, %v3779_v16  ;;  %v8514_v35 = vadd.f32 %v6534_v38, %v8305_v12  ;;  %6898 = vmatprep.mubr.bf16.mxu0 %v6036_v3  ;;  %v3462_v22 = vshll.u32 %v3116_v26, 16  ;;  %v3468_v10 = vshll.u32 %v3117_v59, 16  ;;  %v3631_v53 = vld [vmem:[#allocation2 + $0xcc] sm:$0xe]  ;;  %v3633_v26 = vld [vmem:[#allocation2 + $0xd4] sm:$0x1] }
 0x19d   : > { %v3472_v62 = vshrl.u32 %v3117_v59, 16  ;;  %5213 = vmatprep.mubr.bf16.mxu1 %v6005_v58  ;;  %v8519_v37 = vadd.f32 %v6537_v20, %v9052_v6  ;;  %v3478_v23 = vshll.u32 %v3118_v9, 16  ;;  %v8523_v12 = vadd.f32 %v8431_v57, %v8429_v32  ;;  %v3119_v58 = vld [vmem:[#allocation2 + $0xcc] sm:$0xf] }
 0x19e   : > { %6899 = vmatmul.mubr.bf16.gmra.mrb[136].mxu0 %v6037_v28  ;;  %v8527_v42 = vadd.f32 %v8445_v44, %v8437_v17  ;;  %v3461_v61 = vrot.slane %v3459_v51, 4  ;;  %v3464_v54 = vrot.slane %v3462_v22, 5  ;;  %v3470_v39 = vrot.slane %v3468_v10, 5 }
 0x19f   : > { %v3474_v38 = vrot.slane %v3472_v62, 4  ;;  %5214 = vmatmul.mubr.bf16.gmra.mrb[132].mxu1 %v7048_v2  ;;  %v3480_v59 = vrot.slane %v3478_v23, 5  ;;  %v6022_v48 = vrot.slane %v3628_v31, 9  ;;  %v3782_v50 = vrot.slane %v3629_v55, 5  ;;  %v6462_v16 = vpop.f32.mrb[40].mxu0  ;;  %v6556_v9 = vpop.f32.mrb[44].mxu1 }
 0x1a0   : > { %v3785_v3 = vrot.slane %v3630_v30, 5  ;;  %v3465_v32 = vor.u32 %v3464_v54, %v3461_v61  ;;  %v6540_v17 = vadd.f32 %v8395_v1, %v8391_v18  ;;  %v6023_v44 = vrot.slane %v3631_v53, 9  ;;  %v6463_v28 = vpop.f32.mrb[41].mxu0  ;;  %v6557_v20 = vpop.f32.mrb[45].mxu1  ;;  %v3120_v54 = vld [vmem:[#allocation2 + $0xd0] sm:$0xf] }
 0x1a1   : > { %v3475_v57 = vor.u32 %v3474_v38, %v3470_v39  ;;  %v3783_v51 = vsel %vm7434_vm13, %v6022_v48, %v3782_v50  ;;  %v3784_v22 = vrot.slane %v3782_v50, 4  ;;  %v3789_v2 = vrot.slane %v3632_v49, 5  ;;  %v6465_v31 = vpop.f32.mrb[42].mxu0  ;;  %v6559_v55 = vpop.f32.mrb[46].mxu1  ;;  %v3121_v38 = vld [vmem:[#allocation2 + $0xd4] sm:$0x1] }
 0x1a2   : > { %v3792_v10 = vrot.slane %v3633_v26, 5  ;;  %v3466_v62 = vrot.slane %v3465_v32, 4  ;;  %v8534_v6 = vadd.f32 %v6540_v17, %v8353_v24  ;;  %v6543_v18 = vadd.f32 %v8411_v43, %v8405_v5  ;;  %v6466_v1 = vpop.f32.mrb[43].mxu0  ;;  %v6560_v23 = vpop.f32.mrb[47].mxu1  ;;  %v7049_v50 = vld [vmem:[#allocation2 + $0xc0] sm:$0xff]  }
 0x1a3   : > { %v3476_v30 = vrot.slane %v3475_v57, 4  ;;  %v3786_v53 = vsel %vm7434_vm13, %v3784_v22, %v3785_v3  ;;  %v3790_v61 = vsel %vm7434_vm13, %v6023_v44, %v3789_v2  ;;  %v3791_v49 = vrot.slane %v3789_v2, 4 }
 0x1a4   : > { %9053 = vst [vmem:[#allocation10_spill] sm:$0xff] %v8534_v6  ;;  %v3483_v26 = vshrl.u32 %v3119_v58, 16  ;;  %v3471_v48 = vsel %vm7175_vm2, %v3466_v62, %v3470_v39  ;;  %v6038_v5 = vcombine.low %v3783_v51, %v3786_v53  ;;  %v8547_v43 = vadd.f32 %v6543_v18, %v8361_v27 }
 0x1a5   : > { %v3481_v24 = vsel %vm7175_vm2, %v3476_v30, %v3480_v59  ;;  %v3793_v3 = vsel %vm7434_vm13, %v3791_v49, %v3792_v10  ;;  %v3486_v17 = vshll.u32 %v3119_v58, 16  ;;  %v3492_v22 = vshll.u32 %v3120_v54, 16 }
 0x1a6   : > { %v6006_v32 = vcombine.low %v3471_v48, %v3481_v24  ;;  %v3485_v57 = vrot.slane %v3483_v26, 4  ;;  %6902 = vmatprep.mubr.bf16.mxu0 %v6038_v5  ;;  %v6039_v44 = vcombine.low %v3790_v61, %v3793_v3  ;;  %v3496_v2 = vshrl.u32 %v3120_v54, 16 }
 0x1a7   : > { %v3502_v6 = vshll.u32 %v3121_v38, 16  ;;  %v3488_v39 = vrot.slane %v3486_v17, 5  ;;  %v6458_v59 = vadd.f32 %v8477_v0, %v8475_v13  ;;  %v6461_v27 = vadd.f32 %v8485_v4, %v8481_v36 }
 0x1a8   : > { %5221 = vmatprep.mubr.bf16.mxu1 %v6006_v32  ;;  %v6546_v51 = vadd.f32 %v8439_v40, %v8433_v19  ;;  %6903 = vmatmul.mubr.bf16.gmra.mrb[140].mxu0 %v6039_v44  ;;  %v3494_v41 = vrot.slane %v3492_v22, 5  ;;  %v3498_v58 = vrot.slane %v3496_v2, 4  ;;  %v6549_v62 = vadd.f32 %v8457_v52, %v8447_v46 }
 0x1a9   : > { %5222 = vmatmul.mubr.bf16.gmra.mrb[136].mxu1 %v7049_v50  ;;  %v3504_v10 = vrot.slane %v3502_v6, 5  ;;  %v3489_v30 = vor.u32 %v3488_v39, %v3485_v57  ;;  %v6464_v53 = vadd.f32 %v6463_v28, %v6462_v16  ;;  %v6467_v13 = vadd.f32 %v6466_v1, %v6465_v31  ;;  %v6562_v0 = vpop.f32.mrb[48].mxu1 }
 0x1aa   : > { %v8560_v18 = vadd.f32 %v6546_v51, %v8399_v45  ;;  %v3499_v61 = vor.u32 %v3498_v58, %v3494_v41  ;;  %v8563_v36 = vadd.f32 %v6549_v62, %v8403_v56  ;;  %v6552_v19 = vadd.f32 %v8483_v15, %v8479_v60  ;;  %v6563_v4 = vpop.f32.mrb[49].mxu1 }
 0x1ab   : > { %v6555_v40 = vadd.f32 %v8491_v63, %v8487_v21  ;;  %v3490_v6 = vrot.slane %v3489_v30, 4  ;;  %v6558_v46 = vadd.f32 %v6557_v20, %v6556_v9  ;;  %v6561_v52 = vadd.f32 %v6560_v23, %v6559_v55  ;;  %v6565_v45 = vpop.f32.mrb[50].mxu1  ;;  %v7050_v9 = vld [vmem:[#allocation2 + $0xcc] sm:$0xff]  }
 0x1ac   : > { %v6564_v49 = vadd.f32 %v6563_v4, %v6562_v0  ;;  %v3500_v54 = vrot.slane %v3499_v61, 4  ;;  %v8570_v16 = vadd.f32 %v6552_v19, %v8443_v34  ;;  %v6566_v56 = vpop.f32.mrb[51].mxu1 }
 0x1ad   : > { %v8573_v28 = vadd.f32 %v6555_v40, %v8453_v8  ;;  %v3495_v60 = vsel %vm7175_vm2, %v3490_v6, %v3494_v41  ;;  %v8578_v15 = vadd.f32 %v6558_v46, %v8499_v29  ;;  %v8581_v21 = vadd.f32 %v6561_v52, %v8503_v25 }
 0x1ae   : > { %v8584_v63 = vadd.f32 %v6564_v49, %v8523_v12  ;;  %v3505_v34 = vsel %vm7175_vm2, %v3500_v54, %v3504_v10  ;;  %v6567_v20 = vadd.f32 %v6566_v56, %v6565_v45 }
 0x1af   : > { %v6007_v8 = vcombine.low %v3495_v60, %v3505_v34  ;;  %v6468_v31 = vpop.f32.mrb[44].mxu0 }
 0x1b0   : > { %v6469_v55 = vpop.f32.mrb[45].mxu0  ;;  %v8589_v1 = vadd.f32 %v6567_v20, %v8527_v42 }
 0x1b1   : > { %5229 = vmatprep.mubr.bf16.mxu1 %v6007_v8  ;;  %v6470_v29 = vadd.f32 %v6469_v55, %v6468_v31  ;;  %v6471_v23 = vpop.f32.mrb[46].mxu0 }
 0x1b2   : > { %5230 = vmatmul.mubr.bf16.gmra.mrb[140].mxu1 %v7050_v9  ;;  %v6472_v25 = vpop.f32.mrb[47].mxu0 }
 0x1b3   : > { %v6473_v38 = vadd.f32 %v6472_v25, %v6471_v23  ;;  %v9055_v23 = vld [vmem:[#allocation14_spill] sm:$0xff] }
 0x1b4   : > { %v6568_v26 = vpop.f32.mrb[52].mxu1 }
 0x1b5   : > { %v6569_v12 = vpop.f32.mrb[53].mxu1 }
 0x1b6   : > { %v6570_v48 = vadd.f32 %v6569_v12, %v6568_v26  ;;  %v6571_v24 = vpop.f32.mrb[54].mxu1 }
 0x1b7   : > { %v6626_v33 = vpop.f32.mrb[48].mxu0  ;;  %v6572_v50 = vpop.f32.mrb[55].mxu1 }
 0x1b8   : > { %v6627_v5 = vpop.f32.mrb[49].mxu0  ;;  %v8591_v32 = vadd.f32 %v6570_v48, %v6458_v59  ;;  %v6573_v3 = vadd.f32 %v6572_v50, %v6571_v24  ;;  %v9056_v50 = vld [vmem:[#allocation4_spill] sm:$0xff] }
 0x1b9   : > { %v6628_v57 = vadd.f32 %v6627_v5, %v6626_v33  ;;  %v6629_v17 = vpop.f32.mrb[50].mxu0 }
 0x1ba   : > { %v6630_v42 = vpop.f32.mrb[51].mxu0  ;;  %v8593_v44 = vadd.f32 %v6573_v3, %v6461_v27 }
 0x1bb   : > { %v8596_v22 = vadd.f32 %v6628_v57, %v8380_v47  ;;  %v6631_v2 = vadd.f32 %v6630_v42, %v6629_v17  ;;  %v9057_v42 = vld [vmem:[#allocation5_spill] sm:$0xff] }
 0x1bc   : > { %v6574_v39 = vpop.f32.mrb[56].mxu1 }
 0x1bd   : > { %v8599_v51 = vadd.f32 %v6631_v2, %v8387_v14  ;;  %v6575_v41 = vpop.f32.mrb[57].mxu1 }
 0x1be   : > { %v6576_v58 = vadd.f32 %v6575_v41, %v6574_v39  ;;  %v6577_v10 = vpop.f32.mrb[58].mxu1 }
 0x1bf   : > { %v6632_v62 = vpop.f32.mrb[52].mxu0  ;;  %v6578_v59 = vpop.f32.mrb[59].mxu1 }
 0x1c0   : > { %v6633_v30 = vpop.f32.mrb[53].mxu0  ;;  %v8601_v0 = vadd.f32 %v6576_v58, %v6464_v53  ;;  %v6579_v61 = vadd.f32 %v6578_v59, %v6577_v10 }
 0x1c1   : > { %v6634_v19 = vadd.f32 %v6633_v30, %v6632_v62  ;;  %v6635_v27 = vpop.f32.mrb[54].mxu0 }
 0x1c2   : > { %v6636_v40 = vpop.f32.mrb[55].mxu0  ;;  %v8603_v4 = vadd.f32 %v6579_v61, %v6467_v13 }
 0x1c3   : > { %v8606_v47 = vadd.f32 %v6634_v19, %v8424_v11  ;;  %v6637_v6 = vadd.f32 %v6636_v40, %v6635_v27  ;;  %v9054_v11 = vld [vmem:[#allocation13_spill] sm:$0xff]  ;;  %v9058_v40 = vld [vmem:[#allocation6_spill] sm:$0xff] }
 0x1c4   : > { %v6580_v14 = vpop.f32.mrb[60].mxu1 }
 0x1c5   : > { %v8609_v46 = vadd.f32 %v6637_v6, %v8427_v7  ;;  %v6581_v52 = vpop.f32.mrb[61].mxu1 }
 0x1c6   : > { %v6582_v49 = vadd.f32 %v6581_v52, %v6580_v14  ;;  %v6583_v45 = vpop.f32.mrb[62].mxu1 }
 0x1c7   : > { %v6638_v54 = vpop.f32.mrb[56].mxu0  ;;  %v6584_v53 = vpop.f32.mrb[63].mxu1 }
 0x1c8   : > { %v6639_v56 = vpop.f32.mrb[57].mxu0  ;;  %v8611_v60 = vadd.f32 %v6582_v49, %v6470_v29  ;;  %v6585_v34 = vadd.f32 %v6584_v53, %v6583_v45  ;;  %v9060_v53 = vld [vmem:[#allocation10_spill] sm:$0xff] }
 0x1c9   : > { %v6640_v9 = vadd.f32 %v6639_v56, %v6638_v54  ;;  %v6641_v13 = vpop.f32.mrb[58].mxu0 }
 0x1ca   : > { %v6642_v20 = vpop.f32.mrb[59].mxu0  ;;  %v8613_v8 = vadd.f32 %v6585_v34, %v6473_v38 }
 0x1cb   : > { %v8616_v31 = vadd.f32 %v6640_v9, %v9054_v11  ;;  %v6643_v55 = vadd.f32 %v6642_v20, %v6641_v13 }
 0x1cc   : > { %v6586_v7 = vpop.f32.mrb[64].mxu1 }
 0x1cd   : > { %v8619_v25 = vadd.f32 %v6643_v55, %v9055_v23  ;;  %v6587_v26 = vpop.f32.mrb[65].mxu1 }
 0x1ce   : > { %v6588_v12 = vadd.f32 %v6587_v26, %v6586_v7  ;;  %v6589_v48 = vpop.f32.mrb[66].mxu1  ;;  %v9061_v26 = vld [vmem:[#allocation8_spill] sm:$0xff] }
 0x1cf   : > { %v6644_v24 = vpop.f32.mrb[60].mxu0  ;;  %v6590_v29 = vpop.f32.mrb[67].mxu1 }
 0x1d0   : > { %v6645_v33 = vpop.f32.mrb[61].mxu0  ;;  %v8622_v5 = vadd.f32 %v6588_v12, %v9056_v50  ;;  %v6591_v3 = vadd.f32 %v6590_v29, %v6589_v48  ;;  %v9062_v50 = vld [vmem:[#allocation9_spill] sm:$0xff] }
 0x1d1   : > { %v6646_v38 = vadd.f32 %v6645_v33, %v6644_v24  ;;  %v6647_v57 = vpop.f32.mrb[62].mxu0 }
 0x1d2   : > { %v6648_v17 = vpop.f32.mrb[63].mxu0  ;;  %v8625_v2 = vadd.f32 %v6591_v3, %v9057_v42 }
 0x1d3   : > { %v8628_v39 = vadd.f32 %v6646_v38, %v8514_v35  ;;  %v6649_v41 = vadd.f32 %v6648_v17, %v6647_v57  ;;  %v9059_v35 = vld [vmem:[#allocation7_spill] sm:$0xff] }
 0x1d4   : > { %v6592_v58 = vpop.f32.mrb[68].mxu1 }
 0x1d5   : > { %v8631_v10 = vadd.f32 %v6649_v41, %v8519_v37  ;;  %v6593_v62 = vpop.f32.mrb[69].mxu1 }
 0x1d6   : > { %v6594_v59 = vadd.f32 %v6593_v62, %v6592_v58  ;;  %v6595_v30 = vpop.f32.mrb[70].mxu1 }
 0x1d7   : > { %v6650_v61 = vpop.f32.mrb[64].mxu0  ;;  %v6596_v19 = vpop.f32.mrb[71].mxu1 }
 0x1d8   : > { %v6651_v27 = vpop.f32.mrb[65].mxu0  ;;  %v8634_v6 = vadd.f32 %v6594_v59, %v9058_v40  ;;  %v6597_v14 = vadd.f32 %v6596_v19, %v6595_v30 }
 0x1d9   : > { %v6652_v52 = vadd.f32 %v6651_v27, %v6650_v61  ;;  %v6653_v49 = vpop.f32.mrb[66].mxu0 }
 0x1da   : > { %v6654_v45 = vpop.f32.mrb[67].mxu0  ;;  %v8637_v54 = vadd.f32 %v6597_v14, %v9059_v35 }
 0x1db   : > { %v8640_v56 = vadd.f32 %v6652_v52, %v9060_v53  ;;  %v6655_v37 = vadd.f32 %v6654_v45, %v6653_v49 }
 0x1dc   : > { %v6598_v34 = vpop.f32.mrb[72].mxu1 }
 0x1dd   : > { %v8643_v9 = vadd.f32 %v6655_v37, %v8547_v43  ;;  %v6599_v13 = vpop.f32.mrb[73].mxu1 }
 0x1de   : > { %v6600_v20 = vadd.f32 %v6599_v13, %v6598_v34  ;;  %v6601_v11 = vpop.f32.mrb[74].mxu1 }
 0x1df   : > { %v6656_v55 = vpop.f32.mrb[68].mxu0  ;;  %v6602_v7 = vpop.f32.mrb[75].mxu1 }
 0x1e0   : > { %v6657_v23 = vpop.f32.mrb[69].mxu0  ;;  %v8646_v12 = vadd.f32 %v6600_v20, %v9061_v26  ;;  %v6603_v48 = vadd.f32 %v6602_v7, %v6601_v11  ;;  %v9064_v20 = vld [vmem:[#allocation12_spill] sm:$0xff] }
 0x1e1   : > { %v6658_v24 = vadd.f32 %v6657_v23, %v6656_v55  ;;  %v6659_v29 = vpop.f32.mrb[70].mxu0 }
 0x1e2   : > { %v6660_v33 = vpop.f32.mrb[71].mxu0  ;;  %v8649_v3 = vadd.f32 %v6603_v48, %v9062_v50 }
 0x1e3   : > { %v8652_v38 = vadd.f32 %v6658_v24, %v8560_v18  ;;  %v6661_v43 = vadd.f32 %v6660_v33, %v6659_v29 }
 0x1e5   : > { %v8655_v57 = vadd.f32 %v6661_v43, %v8563_v36 }
 0x1e7   : > { %v6662_v17 = vpop.f32.mrb[72].mxu0 }
 0x1e8   : > { %v6663_v42 = vpop.f32.mrb[73].mxu0 }
 0x1e9   : > { %v6664_v41 = vadd.f32 %v6663_v42, %v6662_v17  ;;  %v6665_v58 = vpop.f32.mrb[74].mxu0 }
 0x1ea   : > { %v6666_v62 = vpop.f32.mrb[75].mxu0 }
 0x1eb   : > { %v8658_v59 = vadd.f32 %v6664_v41, %v8570_v16  ;;  %v6667_v30 = vadd.f32 %v6666_v62, %v6665_v58  ;;  %v9063_v16 = vld [vmem:[#allocation11_spill] sm:$0xff] }
 0x1ed   : > { %v8661_v61 = vadd.f32 %v6667_v30, %v8573_v28 }
 0x1ef   : > { %v6668_v19 = vpop.f32.mrb[76].mxu0  ;;  %v6604_v18 = vpop.f32.mrb[76].mxu1 }
 0x1f0   : > { %v6669_v27 = vpop.f32.mrb[77].mxu0  ;;  %v6605_v52 = vpop.f32.mrb[77].mxu1 }
 0x1f1   : > { %v6670_v40 = vadd.f32 %v6669_v27, %v6668_v19  ;;  %v6671_v14 = vpop.f32.mrb[78].mxu0  ;;  %v6606_v49 = vadd.f32 %v6605_v52, %v6604_v18  ;;  %v6607_v45 = vpop.f32.mrb[78].mxu1 }
 0x1f2   : > { %v6672_v36 = vpop.f32.mrb[79].mxu0  ;;  %v6608_v37 = vpop.f32.mrb[79].mxu1 }
 0x1f3   : > { %v8664_v35 = vadd.f32 %v6670_v40, %v8578_v15  ;;  %v6673_v53 = vadd.f32 %v6672_v36, %v6671_v14  ;;  %v8667_v34 = vadd.f32 %v6606_v49, %v9063_v16  ;;  %v6609_v13 = vadd.f32 %v6608_v37, %v6607_v45 }
 0x1f5   : > { %v8670_v28 = vadd.f32 %v6673_v53, %v8581_v21  ;;  %v8673_v11 = vadd.f32 %v6609_v13, %v9064_v20 }
 0x1f7   : > { %v6674_v55 = vpop.f32.mrb[80].mxu0  ;;  %v6738_v23 = vpop.f32.mrb[80].mxu1 }
 0x1f8   : > { %v6675_v7 = vpop.f32.mrb[81].mxu0  ;;  %v6739_v24 = vpop.f32.mrb[81].mxu1 }
 0x1f9   : > { %v6676_v26 = vadd.f32 %v6675_v7, %v6674_v55  ;;  %v6677_v48 = vpop.f32.mrb[82].mxu0  ;;  %v6740_v29 = vadd.f32 %v6739_v24, %v6738_v23  ;;  %v6741_v33 = vpop.f32.mrb[82].mxu1 }
 0x1fa   : > { %v6678_v15 = vpop.f32.mrb[83].mxu0  ;;  %v6742_v17 = vpop.f32.mrb[83].mxu1 }
 0x1fb   : > { %v8676_v50 = vadd.f32 %v6676_v26, %v8584_v63  ;;  %v6679_v43 = vadd.f32 %v6678_v15, %v6677_v48  ;;  %v6743_v42 = vadd.f32 %v6742_v17, %v6741_v33  ;;  %v8679_v21 = vadd.f32 %v6740_v29, %v8596_v22 }
 0x1fd   : > { %v8682_v41 = vadd.f32 %v6679_v43, %v8589_v1  ;;  %v8685_v58 = vadd.f32 %v6743_v42, %v8599_v51 }
 0x1ff   : > { %v6680_v62 = vpop.f32.mrb[84].mxu0  ;;  %v6744_v19 = vpop.f32.mrb[84].mxu1 }
 0x200   : > { %v6681_v30 = vpop.f32.mrb[85].mxu0  ;;  %v6745_v40 = vpop.f32.mrb[85].mxu1 }
 0x201   : > { %v6682_v27 = vadd.f32 %v6681_v30, %v6680_v62  ;;  %v6683_v18 = vpop.f32.mrb[86].mxu0  ;;  %v6746_v14 = vadd.f32 %v6745_v40, %v6744_v19  ;;  %v6747_v52 = vpop.f32.mrb[86].mxu1 }
 0x202   : > { %v6684_v63 = vpop.f32.mrb[87].mxu0  ;;  %v6748_v49 = vpop.f32.mrb[87].mxu1 }
 0x203   : > { %v8688_v36 = vadd.f32 %v6682_v27, %v8591_v32  ;;  %v6685_v22 = vadd.f32 %v6684_v63, %v6683_v18  ;;  %v6749_v45 = vadd.f32 %v6748_v49, %v6747_v52  ;;  %v8691_v1 = vadd.f32 %v6746_v14, %v8606_v47 }
 0x205   : > { %v8694_v51 = vadd.f32 %v6685_v22, %v8593_v44  ;;  %v8697_v53 = vadd.f32 %v6749_v45, %v8609_v46 }
 0x207   : > { %v6686_v37 = vpop.f32.mrb[88].mxu0 }
 0x208   : > { %v6687_v16 = vpop.f32.mrb[89].mxu0 }
 0x209   : > { %v6688_v13 = vadd.f32 %v6687_v16, %v6686_v37  ;;  %v6689_v20 = vpop.f32.mrb[90].mxu0  ;;  %v6750_v55 = vpop.f32.mrb[88].mxu1 }
 0x20a   : > { %v6690_v7 = vpop.f32.mrb[91].mxu0  ;;  %v6751_v32 = vpop.f32.mrb[89].mxu1 }
 0x20b   : > { %v8700_v23 = vadd.f32 %v6688_v13, %v8601_v0  ;;  %v6691_v26 = vadd.f32 %v6690_v7, %v6689_v20  ;;  %v6752_v48 = vadd.f32 %v6751_v32, %v6750_v55  ;;  %v6753_v47 = vpop.f32.mrb[90].mxu1 }
 0x20c   : > { %v6754_v24 = vpop.f32.mrb[91].mxu1 }
 0x20d   : > { %v8703_v44 = vadd.f32 %v6691_v26, %v8603_v4  ;;  %v6755_v15 = vadd.f32 %v6754_v24, %v6753_v47  ;;  %v8706_v46 = vadd.f32 %v6752_v48, %v8616_v31 }
 0x20f   : > { %v6692_v29 = vpop.f32.mrb[92].mxu0  ;;  %v8709_v33 = vadd.f32 %v6755_v15, %v8619_v25 }
 0x210   : > { %v6693_v43 = vpop.f32.mrb[93].mxu0 }
 0x211   : > { %v6694_v17 = vadd.f32 %v6693_v43, %v6692_v29  ;;  %v6695_v42 = vpop.f32.mrb[94].mxu0 }
 0x212   : > { %v6696_v0 = vpop.f32.mrb[95].mxu0 }
 0x213   : > { %v8712_v62 = vadd.f32 %v6694_v17, %v8611_v60  ;;  %v6697_v30 = vadd.f32 %v6696_v0, %v6695_v42 }
 0x214   : > { %v6756_v19 = vpop.f32.mrb[92].mxu1 }
 0x215   : > { %v8715_v4 = vadd.f32 %v6697_v30, %v8613_v8  ;;  %v6757_v27 = vpop.f32.mrb[93].mxu1 }
 0x216   : > { %v6758_v18 = vadd.f32 %v6757_v27, %v6756_v19  ;;  %v6759_v31 = vpop.f32.mrb[94].mxu1 }
 0x217   : > { %v6698_v40 = vpop.f32.mrb[96].mxu0  ;;  %v6760_v63 = vpop.f32.mrb[95].mxu1 }
 0x218   : > { %v6699_v14 = vpop.f32.mrb[97].mxu0  ;;  %v6761_v25 = vadd.f32 %v6760_v63, %v6759_v31  ;;  %v8718_v52 = vadd.f32 %v6758_v18, %v8628_v39 }
 0x219   : > { %v6700_v22 = vadd.f32 %v6699_v14, %v6698_v40  ;;  %v6701_v49 = vpop.f32.mrb[98].mxu0 }
 0x21a   : > { %v6702_v45 = vpop.f32.mrb[99].mxu0  ;;  %v8721_v60 = vadd.f32 %v6761_v25, %v8631_v10 }
 0x21b   : > { %v8724_v37 = vadd.f32 %v6700_v22, %v8622_v5  ;;  %v6703_v8 = vadd.f32 %v6702_v45, %v6701_v49 }
 0x21d   : > { %v8727_v16 = vadd.f32 %v6703_v8, %v8625_v2 }
 0x21f   : > { %v6762_v13 = vpop.f32.mrb[96].mxu1 }
 0x220   : > { %v6704_v20 = vpop.f32.mrb[100].mxu0  ;;  %v6763_v55 = vpop.f32.mrb[97].mxu1 }
 0x221   : > { %v6705_v7 = vpop.f32.mrb[101].mxu0  ;;  %v6764_v32 = vadd.f32 %v6763_v55, %v6762_v13  ;;  %v6765_v39 = vpop.f32.mrb[98].mxu1 }
 0x222   : > { %v6706_v26 = vadd.f32 %v6705_v7, %v6704_v20  ;;  %v6707_v48 = vpop.f32.mrb[102].mxu0  ;;  %v6766_v47 = vpop.f32.mrb[99].mxu1 }
 0x223   : > { %v6708_v24 = vpop.f32.mrb[103].mxu0  ;;  %v6767_v15 = vadd.f32 %v6766_v47, %v6765_v39  ;;  %v8730_v10 = vadd.f32 %v6764_v32, %v8640_v56 }
 0x224   : > { %v8733_v5 = vadd.f32 %v6706_v26, %v8634_v6  ;;  %v6709_v29 = vadd.f32 %v6708_v24, %v6707_v48 }
 0x225   : > { %v8736_v2 = vadd.f32 %v6767_v15, %v8643_v9 }
 0x226   : > { %v8739_v43 = vadd.f32 %v6709_v29, %v8637_v54 }
 0x227   : > { %v6768_v17 = vpop.f32.mrb[100].mxu1 }
 0x228   : > { %v6769_v42 = vpop.f32.mrb[101].mxu1 }
 0x229   : > { %v6770_v0 = vadd.f32 %v6769_v42, %v6768_v17  ;;  %v6771_v30 = vpop.f32.mrb[102].mxu1 }
 0x22a   : > { %v6710_v19 = vpop.f32.mrb[104].mxu0  ;;  %v6772_v27 = vpop.f32.mrb[103].mxu1 }
 0x22b   : > { %v6711_v18 = vpop.f32.mrb[105].mxu0  ;;  %v6773_v31 = vadd.f32 %v6772_v27, %v6771_v30  ;;  %v8742_v56 = vadd.f32 %v6770_v0, %v8652_v38 }
 0x22c   : > { %v6712_v6 = vadd.f32 %v6711_v18, %v6710_v19  ;;  %v6713_v40 = vpop.f32.mrb[106].mxu0 }
 0x22d   : > { %v6714_v63 = vpop.f32.mrb[107].mxu0  ;;  %v8745_v9 = vadd.f32 %v6773_v31, %v8655_v57 }
 0x22e   : > { %v8748_v54 = vadd.f32 %v6712_v6, %v8646_v12  ;;  %v6715_v14 = vadd.f32 %v6714_v63, %v6713_v40 }
 0x230   : > { %v8751_v25 = vadd.f32 %v6715_v14, %v8649_v3 }
 0x232   : > { %v6774_v22 = vpop.f32.mrb[104].mxu1 }
 0x233   : > { %v6775_v49 = vpop.f32.mrb[105].mxu1 }
 0x234   : > { %v6716_v45 = vpop.f32.mrb[108].mxu0  ;;  %v6776_v8 = vadd.f32 %v6775_v49, %v6774_v22  ;;  %v6777_v13 = vpop.f32.mrb[106].mxu1 }
 0x235   : > { %v6717_v38 = vpop.f32.mrb[109].mxu0  ;;  %v6778_v20 = vpop.f32.mrb[107].mxu1 }
 0x236   : > { %v6718_v55 = vadd.f32 %v6717_v38, %v6716_v45  ;;  %v6719_v7 = vpop.f32.mrb[110].mxu0  ;;  %v6779_v32 = vadd.f32 %v6778_v20, %v6777_v13  ;;  %v8754_v57 = vadd.f32 %v6776_v8, %v8658_v59 }
 0x237   : > { %v6720_v39 = vpop.f32.mrb[111].mxu0 }
 0x238   : > { %v8757_v12 = vadd.f32 %v6718_v55, %v8667_v34  ;;  %v6721_v3 = vadd.f32 %v6720_v39, %v6719_v7  ;;  %v8760_v26 = vadd.f32 %v6779_v32, %v8661_v61 }
 0x23a   : > { %v8763_v48 = vadd.f32 %v6721_v3, %v8673_v11 }
 0x23c   : > { %v6780_v47 = vpop.f32.mrb[108].mxu1  ;;  %v6876_v24 = vpop.f32.mrb[112].mxu0 }
 0x23d   : > { %v8766_v15 = vadd.f32 %v6876_v24, %v8691_v1  ;;  %v6781_v29 = vpop.f32.mrb[109].mxu1  ;;  %v5272_v59 = vpop.f32.mrb[113].mxu0 }
 0x23e   : > { %v6782_v17 = vadd.f32 %v6781_v29, %v6780_v47  ;;  %v8769_v42 = vadd.f32 %v5272_v59, %v8679_v21  ;;  %v6783_v34 = vpop.f32.mrb[110].mxu1  ;;  %v6877_v0 = vpop.f32.mrb[114].mxu0 }
 0x23f   : > { %v8772_v30 = vadd.f32 %v6877_v0, %v8697_v53  ;;  %v6784_v61 = vpop.f32.mrb[111].mxu1  ;;  %v5275_v19 = vpop.f32.mrb[115].mxu0 }
 0x240   : > { %v6785_v11 = vadd.f32 %v6784_v61, %v6783_v34  ;;  %v8782_v1 = vadd.f32 %v5275_v19, %v8685_v58  ;;  %v5168_v21 = vadd.f32 %v6782_v17, %v8664_v35 }
 0x241   : > { %v6284_v53 = vpack.c.bf16 %v8772_v30, %v8766_v15 }
 0x242   : > { %v6279_v27 = vpack.c.bf16 %v8782_v1, %v8769_v42  ;;  %v5559_v18 = vadd.f32 %v8782_v1, %v8769_v42  ;;  %v5171_v31 = vadd.f32 %v6785_v11, %v8670_v28 }
 0x243   : > { %6371 = vst [vmem:[%s8779_s23 + $0x8] sm:$0xff] %v6284_v53  }
 0x244   : > { %6280 = vst [vmem:[%s8779_s23] sm:$0xff] %v6279_v27   ;;  %v5560_v6 = vadd.f32 %v5559_v18, %v8766_v15  ;;  %v6880_v40 = vpop.f32.mrb[116].mxu0 }
 0x245   : > { %v6786_v58 = vpop.f32.mrb[112].mxu1  ;;  %v8796_v63 = vadd.f32 %v6880_v40, %v8718_v52  ;;  %v5288_v35 = vpop.f32.mrb[117].mxu0 }
 0x246   : > { %v6787_v14 = vpop.f32.mrb[113].mxu1  ;;  %v8799_v22 = vadd.f32 %v5288_v35, %v8706_v46  ;;  %v5561_v49 = vadd.f32 %v5560_v6, %v8772_v30  ;;  %v6881_v45 = vpop.f32.mrb[118].mxu0 }
 0x247   : > { %v6788_v28 = vadd.f32 %v6787_v14, %v6786_v58  ;;  %v6789_v8 = vpop.f32.mrb[114].mxu1  ;;  %v8803_v13 = vadd.f32 %v6881_v45, %v8721_v60  ;;  %v5291_v38 = vpop.f32.mrb[119].mxu0 }
 0x248   : > { %v5562_v20 = vadd.f32 %v5561_v49, %v8799_v22  ;;  %v6790_v52 = vpop.f32.mrb[115].mxu1  ;;  %v8807_v55 = vadd.f32 %v5291_v38, %v8709_v33 }
 0x249   : > { %v6294_v46 = vpack.c.bf16 %v8803_v13, %v8796_v63  ;;  %v6791_v7 = vadd.f32 %v6790_v52, %v6789_v8  ;;  %v5176_v32 = vadd.f32 %v6788_v28, %v8676_v50 }
 0x24a   : > { %v6289_v39 = vpack.c.bf16 %v8807_v55, %v8799_v22  ;;  %v5563_v3 = vadd.f32 %v5562_v20, %v8807_v55 }
 0x24b   : > { %6373 = vst [vmem:[%s8779_s23 + $0x18] sm:$0xff] %v6294_v46   ;;  %v8817_v60 = vadd.f32 %v6791_v7, %v8682_v41 }
 0x24c   : > { %6372 = vst [vmem:[%s8779_s23 + $0x10] sm:$0xff] %v6289_v39   ;;  %v5564_v47 = vadd.f32 %v5563_v3, %v8796_v63  ;;  %v6884_v33 = vpop.f32.mrb[120].mxu0 }
 0x24d   : > { %v6792_v24 = vpop.f32.mrb[116].mxu1  ;;  %v8822_v29 = vadd.f32 %v6884_v33, %v8742_v56  ;;  %v5304_v59 = vpop.f32.mrb[121].mxu0 }
 0x24e   : > { %v6793_v17 = vpop.f32.mrb[117].mxu1  ;;  %v8825_v50 = vadd.f32 %v5304_v59, %v8730_v10  ;;  %v5565_v34 = vadd.f32 %v5564_v47, %v8803_v13  ;;  %v6885_v0 = vpop.f32.mrb[122].mxu0 }
 0x24f   : > { %v6794_v41 = vadd.f32 %v6793_v17, %v6792_v24  ;;  %v6795_v61 = vpop.f32.mrb[118].mxu1  ;;  %v8829_v19 = vadd.f32 %v6885_v0, %v8745_v9  ;;  %v5307_v11 = vpop.f32.mrb[123].mxu0 }
 0x250   : > { %v5566_v53 = vadd.f32 %v5565_v34, %v8825_v50  ;;  %v6796_v56 = vpop.f32.mrb[119].mxu1  ;;  %v8833_v27 = vadd.f32 %v5307_v11, %v8736_v2 }
 0x251   : > { %v6304_v10 = vpack.c.bf16 %v8829_v19, %v8822_v29  ;;  %v6797_v18 = vadd.f32 %v6796_v56, %v6795_v61  ;;  %v5184_v6 = vadd.f32 %v6794_v41, %v8688_v36 }
 0x252   : > { %v6299_v40 = vpack.c.bf16 %v8833_v27, %v8825_v50  ;;  %v5567_v58 = vadd.f32 %v5566_v53, %v8833_v27 }
 0x253   : > { %6375 = vst [vmem:[%s8779_s23 + $0x28] sm:$0xff] %v6304_v10   ;;  %v5187_v9 = vadd.f32 %v6797_v18, %v8694_v51 }
 0x254   : > { %6374 = vst [vmem:[%s8779_s23 + $0x20] sm:$0xff] %v6299_v40   ;;  %v5568_v35 = vadd.f32 %v5567_v58, %v8822_v29  ;;  %v6888_v14 = vpop.f32.mrb[124].mxu0 }
 0x255   : > { %v8845_v2 = vadd.f32 %v6888_v14, %v5168_v21  ;;  %v5320_v49 = vpop.f32.mrb[125].mxu0 }
 0x256   : > { %v8848_v45 = vadd.f32 %v5320_v49, %v8754_v57  ;;  %v5569_v36 = vadd.f32 %v5568_v35, %v8829_v19  ;;  %v6889_v28 = vpop.f32.mrb[126].mxu0 }
 0x257   : > { %v6798_v8 = vpop.f32.mrb[120].mxu1  ;;  %v8851_v38 = vadd.f32 %v6889_v28, %v5171_v31  ;;  %v5323_v20 = vpop.f32.mrb[127].mxu0 }
 0x258   : > { %v6799_v51 = vpop.f32.mrb[121].mxu1  ;;  %v5570_v52 = vadd.f32 %v5569_v36, %v8848_v45  ;;  %v8855_v46 = vadd.f32 %v5323_v20, %v8760_v26 }
 0x259   : > { %v6800_v21 = vadd.f32 %v6799_v51, %v6798_v8  ;;  %v6801_v7 = vpop.f32.mrb[122].mxu1  ;;  %v6314_v57 = vpack.c.bf16 %v8851_v38, %v8845_v2 }
 0x25a   : > { %v6802_v39 = vpop.f32.mrb[123].mxu1  ;;  %v6309_v3 = vpack.c.bf16 %v8855_v46, %v8848_v45  ;;  %v5571_v47 = vadd.f32 %v5570_v52, %v8855_v46 }
 0x25b   : > { %6377 = vst [vmem:[%s8779_s23 + $0x38] sm:$0xff] %v6314_v57   ;;  %v6803_v31 = vadd.f32 %v6802_v39, %v6801_v7  ;;  %v5192_v33 = vadd.f32 %v6800_v21, %v8700_v23 }
 0x25c   : > { %6376 = vst [vmem:[%s8779_s23 + $0x30] sm:$0xff] %v6309_v3   ;;  %v5572_v24 = vadd.f32 %v5571_v47, %v8845_v2 }
 0x25d   : > { %v5195_v26 = vadd.f32 %v6803_v31, %v8703_v44 }
 0x25e   : > { %v6892_v59 = vpop.f32.mrb[128].mxu0  ;;  %v5573_v17 = vadd.f32 %v5572_v24, %v8851_v38 }
 0x25f   : > { %v8868_v34 = vadd.f32 %v6892_v59, %v5184_v6  ;;  %v5336_v0 = vpop.f32.mrb[129].mxu0 }
 0x260   : > { %v6804_v41 = vpop.f32.mrb[124].mxu1  ;;  %v8870_v61 = vadd.f32 %v5336_v0, %v5176_v32  ;;  %v6893_v11 = vpop.f32.mrb[130].mxu0 }
 0x261   : > { %v6805_v53 = vpop.f32.mrb[125].mxu1  ;;  %v8872_v56 = vadd.f32 %v6893_v11, %v5187_v9  ;;  %v5339_v23 = vpop.f32.mrb[131].mxu0 }
 0x262   : > { %v6806_v10 = vadd.f32 %v6805_v53, %v6804_v41  ;;  %v5574_v18 = vadd.f32 %v5573_v17, %v8870_v61  ;;  %v6807_v44 = vpop.f32.mrb[126].mxu1  ;;  %v8876_v40 = vadd.f32 %v5339_v23, %v8817_v60 }
 0x263   : > { %v6324_v6 = vpack.c.bf16 %v8872_v56, %v8868_v34  ;;  %v6808_v58 = vpop.f32.mrb[127].mxu1 }
 0x264   : > { %v6809_v35 = vadd.f32 %v6808_v58, %v6807_v44  ;;  %v6319_v32 = vpack.c.bf16 %v8876_v40, %v8870_v61  ;;  %v5575_v14 = vadd.f32 %v5574_v18, %v8876_v40  ;;  %v5200_v9 = vadd.f32 %v6806_v10, %v8712_v62 }
 0x265   : > { %6379 = vst [vmem:[%s8779_s23 + $0x48] sm:$0xff] %v6324_v6  }
 0x266   : > { %6378 = vst [vmem:[%s8779_s23 + $0x40] sm:$0xff] %v6319_v32   ;;  %v5576_v49 = vadd.f32 %v5575_v14, %v8868_v34  ;;  %v5203_v36 = vadd.f32 %v6809_v35, %v8715_v4 }
 0x268   : > { %v6896_v60 = vpop.f32.mrb[132].mxu0  ;;  %v5577_v28 = vadd.f32 %v5576_v49, %v8872_v56 }
 0x269   : > { %v8889_v8 = vadd.f32 %v6896_v60, %v5200_v9  ;;  %v5352_v20 = vpop.f32.mrb[133].mxu0 }
 0x26a   : > { %v6810_v51 = vpop.f32.mrb[128].mxu1  ;;  %v8891_v52 = vadd.f32 %v5352_v20, %v5192_v33  ;;  %v6897_v21 = vpop.f32.mrb[134].mxu0 }
 0x26b   : > { %v6811_v7 = vpop.f32.mrb[129].mxu1  ;;  %v8893_v62 = vadd.f32 %v6897_v21, %v5203_v36  ;;  %v5355_v57 = vpop.f32.mrb[135].mxu0 }
 0x26c   : > { %v6812_v39 = vadd.f32 %v6811_v7, %v6810_v51  ;;  %v5578_v3 = vadd.f32 %v5577_v28, %v8891_v52  ;;  %v6813_v4 = vpop.f32.mrb[130].mxu1  ;;  %v8896_v47 = vadd.f32 %v5355_v57, %v5195_v26 }
 0x26d   : > { %v6334_v31 = vpack.c.bf16 %v8893_v62, %v8889_v8  ;;  %v6814_v24 = vpop.f32.mrb[131].mxu1 }
 0x26e   : > { %v6815_v59 = vadd.f32 %v6814_v24, %v6813_v4  ;;  %v6329_v33 = vpack.c.bf16 %v8896_v47, %v8891_v52  ;;  %v5579_v17 = vadd.f32 %v5578_v3, %v8896_v47  ;;  %v5208_v0 = vadd.f32 %v6812_v39, %v8724_v37 }
 0x26f   : > { %6381 = vst [vmem:[%s8779_s23 + $0x58] sm:$0xff] %v6334_v31  }
 0x270   : > { %6380 = vst [vmem:[%s8779_s23 + $0x50] sm:$0xff] %v6329_v33   ;;  %v5580_v41 = vadd.f32 %v5579_v17, %v8889_v8  ;;  %v5211_v26 = vadd.f32 %v6815_v59, %v8727_v16 }
 0x271   : > { %v6900_v11 = vpop.f32.mrb[136].mxu0 }
 0x272   : > { %v5368_v53 = vpop.f32.mrb[137].mxu0  ;;  %v6816_v23 = vpop.f32.mrb[132].mxu1  ;;  %v5581_v18 = vadd.f32 %v5580_v41, %v8893_v62 }
 0x273   : > { %v8908_v10 = vadd.f32 %v5368_v53, %v5208_v0  ;;  %v6901_v44 = vpop.f32.mrb[138].mxu0  ;;  %v6817_v6 = vpop.f32.mrb[133].mxu1 }
 0x274   : > { %v5371_v58 = vpop.f32.mrb[139].mxu0  ;;  %v6818_v35 = vadd.f32 %v6817_v6, %v6816_v23  ;;  %v6819_v32 = vpop.f32.mrb[134].mxu1 }
 0x275   : > { %v5582_v37 = vadd.f32 %v5581_v18, %v8908_v10  ;;  %v8912_v14 = vadd.f32 %v5371_v58, %v5211_v26  ;;  %v6820_v9 = vpop.f32.mrb[135].mxu1 }
 0x276   : > { %v5216_v49 = vadd.f32 %v6818_v35, %v8733_v5  ;;  %v6821_v16 = vadd.f32 %v6820_v9, %v6819_v32 }
 0x277   : > { %v6339_v36 = vpack.c.bf16 %v8912_v14, %v8908_v10  ;;  %v5583_v60 = vadd.f32 %v5582_v37, %v8912_v14 }
 0x278   : > { %v5377_v28 = vadd.f32 %v6900_v11, %v5216_v49  ;;  %v5219_v20 = vadd.f32 %v6821_v16, %v8739_v43 }
 0x279   : > { %6382 = vst [vmem:[%s8779_s23 + $0x60] sm:$0xff] %v6339_v36  }
 0x27a   : > { %v5380_v51 = vadd.f32 %v6901_v44, %v5219_v20  ;;  %v5584_v21 = vadd.f32 %v5583_v60, %v5377_v28 }
 0x27b   : > { %v6904_v57 = vpop.f32.mrb[140].mxu0 }
 0x27c   : > { %v6822_v7 = vpop.f32.mrb[136].mxu1  ;;  %v6344_v39 = vpack.c.bf16 %v5380_v51, %v5377_v28  ;;  %v5384_v4 = vpop.f32.mrb[141].mxu0  ;;  %v5585_v31 = vadd.f32 %v5584_v21, %v5380_v51 }
 0x27d   : > { %v6823_v3 = vpop.f32.mrb[137].mxu1  ;;  %v6905_v59 = vpop.f32.mrb[142].mxu0 }
 0x27e   : > { %v6824_v5 = vadd.f32 %v6823_v3, %v6822_v7  ;;  %v6825_v24 = vpop.f32.mrb[138].mxu1  ;;  %6383 = vst [vmem:[%s8779_s23 + $0x68] sm:$0xff] %v6344_v39   ;;  %v5387_v17 = vpop.f32.mrb[143].mxu0 }
 0x27f   : > { %v6826_v33 = vpop.f32.mrb[139].mxu1 }
 0x280   : > { %v6827_v0 = vadd.f32 %v6826_v33, %v6825_v24  ;;  %v5224_v41 = vadd.f32 %v6824_v5, %v8748_v54 }
 0x282   : > { %v5385_v43 = vadd.f32 %v5384_v4, %v5224_v41  ;;  %v5227_v11 = vadd.f32 %v6827_v0, %v8751_v25 }
 0x284   : > { %v5586_v26 = vadd.f32 %v5585_v31, %v5385_v43  ;;  %v5388_v53 = vadd.f32 %v5387_v17, %v5227_v11 }
 0x285   : > { %v6828_v44 = vpop.f32.mrb[140].mxu1 }
 0x286   : > { %v6349_v23 = vpack.c.bf16 %v5388_v53, %v5385_v43  ;;  %v5587_v18 = vadd.f32 %v5586_v26, %v5388_v53  ;;  %v6829_v6 = vpop.f32.mrb[141].mxu1 }
 0x287   : > { %v6830_v58 = vadd.f32 %v6829_v6, %v6828_v44  ;;  %v6831_v35 = vpop.f32.mrb[142].mxu1 }
 0x288   : > { %6384 = vst [vmem:[%s8779_s23 + $0x70] sm:$0xff] %v6349_v23   ;;  %v6832_v37 = vpop.f32.mrb[143].mxu1 }
 0x289   : > { %v5232_v32 = vadd.f32 %v6830_v58, %v8757_v12  ;;  %v6833_v9 = vadd.f32 %v6832_v37, %v6831_v35 }
 0x28b   : > { %v5393_v49 = vadd.f32 %v6904_v57, %v5232_v32  ;;  %v5235_v54 = vadd.f32 %v6833_v9, %v8763_v48 }
 0x28d   : > { %v5588_v16 = vadd.f32 %v5587_v18, %v5393_v49  ;;  %v5396_v25 = vadd.f32 %v6905_v59, %v5235_v54 }
 0x28f   : > { %v6354_v36 = vpack.c.bf16 %v5396_v25, %v5393_v49  ;;  %v5589_v60 = vadd.f32 %v5588_v16, %v5396_v25 }
 0x291   : > { %6385 = vst [vmem:[%s8779_s23 + $0x78] sm:$0xff] %v6354_v36   ;;  %v5590_v20 = vrot.slane %v5589_v60, 4 }
 0x293   : > { %v5591_v21 = vadd.f32 %v5590_v20, %v5589_v60 }
 0x295   : > { %v5592_v7 = vrot.slane %v5591_v21, 2 }
 0x297   : > { %v5593_v39 = vadd.f32 %v5592_v7, %v5591_v21 }
 0x299   : > { %v5594_v3 = vrot.slane %v5593_v39, 1 }
 0x29b   : > { %v5595_v4 = vadd.f32 %v5594_v3, %v5593_v39 }
 0x29d   : > { %v5596_v12 = vmul.f32 0.00390625, %v5595_v4 }
 0x29f   : > { %5629 = vst [vmem:[%s265_s24] sm:$0x1] %v5596_v12  ;;  %v8932_v57 = vsub.f32 %v8876_v40, %v5596_v12  ;;  %v8935_v48 = vsub.f32 %v8868_v34, %v5596_v12  ;;  %v8938_v31 = vsub.f32 %v8872_v56, %v5596_v12  ;;  %v8941_v5 = vsub.f32 %v8891_v52, %v5596_v12 }
 0x2a0   : > { %v8944_v24 = vsub.f32 %v8896_v47, %v5596_v12  ;;  %v8947_v59 = vsub.f32 %v8889_v8, %v5596_v12  ;;  %v8950_v33 = vsub.f32 %v8893_v62, %v5596_v12  ;;  %v8953_v40 = vsub.f32 %v8908_v10, %v5596_v12 }
 0x2a1   : > { %v8956_v34 = vsub.f32 %v8912_v14, %v5596_v12  ;;  %v8958_v56 = vsub.f32 %v5377_v28, %v5596_v12  ;;  %v8960_v17 = vsub.f32 %v5380_v51, %v5596_v12  ;;  %v8962_v52 = vsub.f32 %v5385_v43, %v5596_v12 }
 0x2a2   : > { %v8964_v47 = vsub.f32 %v5388_v53, %v5596_v12  ;;  %v8966_v0 = vsub.f32 %v5393_v49, %v5596_v12  ;;  %v8968_v8 = vsub.f32 %v5396_v25, %v5596_v12  ;;  %v5597_v62 = vsub.f32 %v8769_v42, %v5596_v12 }
 0x2a3   : > { %v5598_v10 = vsub.f32 %v8782_v1, %v5596_v12  ;;  %v5599_v41 = vsub.f32 %v8766_v15, %v5596_v12  ;;  %v5600_v28 = vsub.f32 %v8772_v30, %v5596_v12  ;;  %v5601_v51 = vsub.f32 %v8799_v22, %v5596_v12 }
 0x2a4   : > { %v5630_v14 = vmul.f32 %v5597_v62, %v5597_v62  ;;  %v5602_v53 = vsub.f32 %v8807_v55, %v5596_v12  ;;  %v5603_v44 = vsub.f32 %v8796_v63, %v5596_v12  ;;  %v5604_v1 = vsub.f32 %v8803_v13, %v5596_v12 }
 0x2a5   : > { %v5631_v11 = vmul.f32 %v5598_v10, %v5598_v10  ;;  %v5632_v43 = vmul.f32 %v5599_v41, %v5599_v41  ;;  %v5633_v23 = vmul.f32 %v5600_v28, %v5600_v28  ;;  %v5634_v6 = vmul.f32 %v5601_v51, %v5601_v51 }
 0x2a6   : > { %v5635_v58 = vmul.f32 %v5602_v53, %v5602_v53  ;;  %v5605_v35 = vsub.f32 %v8825_v50, %v5596_v12  ;;  %v5636_v37 = vmul.f32 %v5603_v44, %v5603_v44  ;;  %v5606_v22 = vsub.f32 %v8833_v27, %v5596_v12 }
 0x2a7   : > { %v5662_v26 = vadd.f32 %v5631_v11, %v5630_v14  ;;  %v5637_v32 = vmul.f32 %v5604_v1, %v5604_v1  ;;  %v5607_v55 = vsub.f32 %v8822_v29, %v5596_v12  ;;  %v5608_v63 = vsub.f32 %v8829_v19, %v5596_v12 }
 0x2a8   : > { %v5638_v49 = vmul.f32 %v5605_v35, %v5605_v35  ;;  %v5639_v16 = vmul.f32 %v5606_v22, %v5606_v22  ;;  %v5609_v13 = vsub.f32 %v8848_v45, %v5596_v12  ;;  %v5610_v50 = vsub.f32 %v8855_v46, %v5596_v12 }
 0x2a9   : > { %v5663_v18 = vadd.f32 %v5662_v26, %v5632_v43  ;;  %v5640_v36 = vmul.f32 %v5607_v55, %v5607_v55  ;;  %v5641_v20 = vmul.f32 %v5608_v63, %v5608_v63  ;;  %v5611_v27 = vsub.f32 %v8845_v2, %v5596_v12 }
 0x2aa   : > { %v5642_v7 = vmul.f32 %v5609_v13, %v5609_v13  ;;  %v5612_v29 = vsub.f32 %v8851_v38, %v5596_v12  ;;  %v5643_v3 = vmul.f32 %v5610_v50, %v5610_v50  ;;  %v5613_v19 = vsub.f32 %v8870_v61, %v5596_v12 }
 0x2ab   : > { %v5664_v42 = vadd.f32 %v5663_v18, %v5633_v23  ;;  %v5644_v62 = vmul.f32 %v5611_v27, %v5611_v27  ;;  %v5647_v46 = vmul.f32 %v8932_v57, %v8932_v57  ;;  %v5648_v2 = vmul.f32 %v8935_v48, %v8935_v48 }
 0x2ac   : > { %v5645_v41 = vmul.f32 %v5612_v29, %v5612_v29  ;;  %v5646_v14 = vmul.f32 %v5613_v19, %v5613_v19  ;;  %v5649_v38 = vmul.f32 %v8938_v31, %v8938_v31  ;;  %v5650_v61 = vmul.f32 %v8941_v5, %v8941_v5 }
 0x2ad   : > { %v5665_v15 = vadd.f32 %v5664_v42, %v5634_v6  ;;  %v5651_v26 = vmul.f32 %v8944_v24, %v8944_v24  ;;  %v5652_v57 = vmul.f32 %v8947_v59, %v8947_v59  ;;  %v5653_v48 = vmul.f32 %v8950_v33, %v8950_v33 }
 0x2ae   : > { %v5654_v31 = vmul.f32 %v8953_v40, %v8953_v40  ;;  %v5655_v5 = vmul.f32 %v8956_v34, %v8956_v34  ;;  %v5656_v24 = vmul.f32 %v8958_v56, %v8958_v56  ;;  %v5657_v59 = vmul.f32 %v8960_v17, %v8960_v17 }
 0x2af   : > { %v5666_v30 = vadd.f32 %v5665_v15, %v5635_v58  ;;  %v5658_v33 = vmul.f32 %v8962_v52, %v8962_v52  ;;  %v5659_v40 = vmul.f32 %v8964_v47, %v8964_v47  ;;  %v5660_v34 = vmul.f32 %v8966_v0, %v8966_v0 }
 0x2b0   : > { %v5661_v56 = vmul.f32 %v8968_v8, %v8968_v8 }
 0x2b1   : > { %v5667_v9 = vadd.f32 %v5666_v30, %v5636_v37 }
 0x2b3   : > { %v5668_v54 = vadd.f32 %v5667_v9, %v5637_v32 }
 0x2b5   : > { %v5669_v25 = vadd.f32 %v5668_v54, %v5638_v49 }
 0x2b7   : > { %v5670_v60 = vadd.f32 %v5669_v25, %v5639_v16 }
 0x2b9   : > { %v5671_v21 = vadd.f32 %v5670_v60, %v5640_v36 }
 0x2bb   : > { %v5672_v39 = vadd.f32 %v5671_v21, %v5641_v20 }
 0x2bd   : > { %v5673_v4 = vadd.f32 %v5672_v39, %v5642_v7 }
 0x2bf   : > { %v5674_v10 = vadd.f32 %v5673_v4, %v5643_v3 }
 0x2c1   : > { %v5675_v45 = vadd.f32 %v5674_v10, %v5644_v62 }
 0x2c3   : > { %v5676_v11 = vadd.f32 %v5675_v45, %v5645_v41 }
 0x2c5   : > { %v5677_v28 = vadd.f32 %v5676_v11, %v5646_v14 }
 0x2c7   : > { %v5678_v51 = vadd.f32 %v5677_v28, %v5647_v46 }
 0x2c9   : > { %v5679_v43 = vadd.f32 %v5678_v51, %v5648_v2 }
 0x2cb   : > { %v5680_v12 = vadd.f32 %v5679_v43, %v5649_v38 }
 0x2cd   : > { %v5681_v53 = vadd.f32 %v5680_v12, %v5650_v61 }
 0x2cf   : > { %v5682_v23 = vadd.f32 %v5681_v53, %v5651_v26 }
 0x2d1   : > { %v5683_v18 = vadd.f32 %v5682_v23, %v5652_v57 }
 0x2d3   : > { %v5684_v44 = vadd.f32 %v5683_v18, %v5653_v48 }
 0x2d5   : > { %v5685_v6 = vadd.f32 %v5684_v44, %v5654_v31 }
 0x2d7   : > { %v5686_v42 = vadd.f32 %v5685_v6, %v5655_v5 }
 0x2d9   : > { %v5687_v1 = vadd.f32 %v5686_v42, %v5656_v24 }
 0x2db   : > { %v5688_v58 = vadd.f32 %v5687_v1, %v5657_v59 }
 0x2dd   : > { %v5689_v15 = vadd.f32 %v5688_v58, %v5658_v33 }
 0x2df   : > { %v5690_v35 = vadd.f32 %v5689_v15, %v5659_v40 }
 0x2e1   : > { %v5691_v37 = vadd.f32 %v5690_v35, %v5660_v34 }
 0x2e3   : > { %v5692_v30 = vadd.f32 %v5691_v37, %v5661_v56 }
 0x2e5   : > { %v5693_v17 = vrot.slane %v5692_v30, 4 }
 0x2e7   : > { %v5694_v22 = vadd.f32 %v5693_v17, %v5692_v30 }
 0x2e9   : > { %v5695_v32 = vrot.slane %v5694_v22, 2 }
 0x2eb   : > { %v5696_v9 = vadd.f32 %v5695_v32, %v5694_v22 }
 0x2ed   : > { %v5697_v55 = vrot.slane %v5696_v9, 1 }
 0x2ef   : > { %v5698_v52 = vadd.f32 %v5697_v55, %v5696_v9 }
 0x2f1   : > { %5699 = vst [vmem:[%s268_s28] sm:$0x1] %v5698_v52 }
 0x2f2 PF: > { %s17_s21 = sadd.s32 1, %s7062_s21  }
 0x2f3   : > { %p14_p4 = scmp.ge.s32.totalorder %s17_s21, 4  }
 0x2f5   :  { %16 = sbr.rel (!%p14_p4) target bundleno = 1 (0x1), region = 92 }

// kernel: basic_block_forward.3
= control target key start
LH: loop header
LB: loop body
LE: loop exit
PB: predicated region body
PF: predicated region fallthrough
CT: control target
= control target key end

     0   :  { %s7390_s27 = smov 0   ;;  %s9597_s0 = inlined_call_operand.vmem [shape: bf16[2,18,18,128], index: 0, kind: input, shape index: {}]   ;;  %s9598_s1 = inlined_call_operand.vmem [shape: bf16[1152,128], index: 1, kind: input, shape index: {}]   ;;  %s9599_s2 = inlined_call_operand.vmem [shape: bf16[128,128], index: 2, kind: input, shape index: {}]   ;;  %s9600_s3 = inlined_call_operand.vmem [shape: bf16[2,256,128], index: 3, kind: output, shape index: {0}]   ;;  %s9601_s4 = inlined_call_operand.vmem [shape: f32[2,1,128], index: 4, kind: output, shape index: {1}]   ;;  %s9602_s5 = inlined_call_operand.vmem [shape: f32[2,1,128], index: 5, kind: output, shape index: {2}]   ;;  %s9603_s6 = inlined_call_operand.vmem [shape: bf16[2,256,128], index: 6, kind: output, shape index: {3}]   ;;  %s9604_s7 = inlined_call_operand.vmem [shape: f32[2,1,128], index: 7, kind: output, shape index: {4}]   ;;  %s9605_s8 = inlined_call_operand.vmem [shape: f32[2,1,128], index: 8, kind: output, shape index: {5}]  }
   0x1 LB: > { %s5748_s28 = sadd.s32 4294967295, %s7343_s27   ;;  %p5752_p0 = scmp.ge.s32.totalorder %s7343_s27, 1  ;;  %s7343_s27 = sphi %s7390_s27, %s19_s27  }
   0x2   : > { %p273_p1 = scmp.lt.s32.totalorder %s7343_s27, 3 }
   0x4   : > { %p274_p2 = pnand %p5752_p0, %p273_p1 }
   0x6   : > { %277 = sbr.rel (%p274_p2) target bundleno = 726 (0x2d6), region = 32 }
   0xd   : > { %v7209_v0 = vld [vmem:[%s9598_s1 + $0x40] sm:$0xff]   ;;  %v7213_v4 = vld [vmem:[%s9598_s1 + $0x48] sm:$0xff]   ;;  %v7217_v8 = vld [vmem:[%s9598_s1 + $0x50] sm:$0xff]   ;;  %p324_p3 = scmp.lt.s32.totalorder %s5748_s28, 1  ;;  %vm1107_vm0 = vcmask 1042432   ;;  %vm1108_vm1 = vcmask 1046532  }
   0xe   : > { %v7210_v1 = vld [vmem:[%s9598_s1 + $0xc0] sm:$0xff]   ;;  %6608 = vmatprep.subr.bf16.mxu0 %v7209_v0  ;;  %v7214_v5 = vld [vmem:[%s9598_s1 + $0xc8] sm:$0xff]   ;;  %v7218_v9 = vld [vmem:[%s9598_s1 + $0xd0] sm:$0xff]   ;;  %vm544_vm2 = vsmask.f32 3328 }
   0xf   : > { %v7211_v2 = vld [vmem:[%s9598_s1] sm:$0xff]   ;;  %6720 = vmatprep.subr.bf16.mxu1 %v7210_v1  ;;  %v7215_v6 = vld [vmem:[%s9598_s1 + $0x8] sm:$0xff]   ;;  %v7219_v10 = vld [vmem:[%s9598_s1 + $0x10] sm:$0xff]   ;;  %s9735_s28 = smov (!%p324_p3, %s5748_s28), 1  ;;  %vm545_vm3 = vsmask.f32 7440 }
  0x10   : > { %v7212_v3 = vld [vmem:[%s9598_s1 + $0x80] sm:$0xff]   ;;  %6609 = vmatpush3.bf16.msra.mxu0 %v7211_v2  ;;  %v7216_v7 = vld [vmem:[%s9598_s1 + $0x88] sm:$0xff]   ;;  %v7220_v11 = vld [vmem:[%s9598_s1 + $0x90] sm:$0xff]   ;;  %s7200_s19 = smul.u32 216, %s9735_s28  ;;  %s347_s24 = scalar_lea.vmem %s9604_s7, %s9735_s28 }
  0x11   : > { %6721 = vmatpush3.bf16.msra.mxu1 %v7212_v3  ;;  %6610 = vmatprep.subr.bf16.mxu0 %v7213_v4  ;;  %v7221_v12 = vld [vmem:[%s9598_s1 + $0x58] sm:$0xff]   ;;  %v7225_v16 = vld [vmem:[%s9598_s1 + $0x60] sm:$0xff]   ;;  %v7229_v20 = vld [vmem:[%s9598_s1 + $0x68] sm:$0xff]   ;;  %s336_s29 = scalar_lea.vmem %s9601_s4, %s9735_s28  ;;  %s339_s11 = scalar_lea.vmem %s9602_s5, %s9735_s28 }
  0x12   : > { %6722 = vmatprep.subr.bf16.mxu1 %v7214_v5  ;;  %v7222_v13 = vld [vmem:[%s9598_s1 + $0xd8] sm:$0xff]   ;;  %v7226_v17 = vld [vmem:[%s9598_s1 + $0xe0] sm:$0xff]   ;;  %v7230_v21 = vld [vmem:[%s9598_s1 + $0xe8] sm:$0xff]   ;;  %s7498_s10 = scalar_lea.vmem %s9597_s0, %s7200_s19  ;;  %s350_s14 = scalar_lea.vmem %s9605_s8, %s9735_s28 }
  0x13   : > { %v7223_v14 = vld [vmem:[%s9598_s1 + $0x18] sm:$0xff]   ;;  %v7227_v18 = vld [vmem:[%s9598_s1 + $0x20] sm:$0xff]   ;;  %v7231_v22 = vld [vmem:[%s9598_s1 + $0x28] sm:$0xff]  }
  0x14   : > { %6611 = vmatpush3.bf16.msra.mxu0 %v7215_v6  ;;  %v7224_v15 = vld [vmem:[%s9598_s1 + $0x98] sm:$0xff]   ;;  %v7228_v19 = vld [vmem:[%s9598_s1 + $0xa0] sm:$0xff]   ;;  %v7232_v23 = vld [vmem:[%s9598_s1 + $0xa8] sm:$0xff]  }
  0x15   : > { %6723 = vmatpush3.bf16.msra.mxu1 %v7216_v7  ;;  %6612 = vmatprep.subr.bf16.mxu0 %v7217_v8  ;;  %v7233_v24 = vld [vmem:[%s9598_s1 + $0x70] sm:$0xff]   ;;  %v7237_v28 = vld [vmem:[%s9598_s1 + $0x78] sm:$0xff]   ;;  %v496_v32 = vld [vmem:[%s7498_s10] sm:$0xf] }
  0x16   : > { %6724 = vmatprep.subr.bf16.mxu1 %v7218_v9  ;;  %v7234_v25 = vld [vmem:[%s9598_s1 + $0xf0] sm:$0xff]   ;;  %v7238_v29 = vld [vmem:[%s9598_s1 + $0xf8] sm:$0xff]   ;;  %v497_v33 = vld [vmem:[%s7498_s10 + $0x4] sm:$0xf]  ;;  %v548_v35 = vshrl.u32 %v496_v32, 16  ;;  %v551_v36 = vshll.u32 %v496_v32, 16 }
  0x17   : > { %v7235_v26 = vld [vmem:[%s9598_s1 + $0x30] sm:$0xff]   ;;  %v7239_v30 = vld [vmem:[%s9598_s1 + $0x38] sm:$0xff]   ;;  %v498_v34 = vld [vmem:[%s7498_s10 + $0x8] sm:$0x1]  ;;  %v557_v37 = vshll.u32 %v497_v33, 16  ;;  %v561_v38 = vshrl.u32 %v497_v33, 16 }
  0x18   : > { %6613 = vmatpush3.bf16.msra.mxu0 %v7219_v10  ;;  %v7236_v27 = vld [vmem:[%s9598_s1 + $0xb0] sm:$0xff]   ;;  %v7240_v31 = vld [vmem:[%s9598_s1 + $0xb8] sm:$0xff]   ;;  %v567_v39 = vshll.u32 %v498_v34, 16  ;;  %v550_v41 = vrot.slane %v548_v35, 4  ;;  %v553_v42 = vrot.slane %v551_v36, 5  ;;  %vm7512_vm4 = vmor %vm1107_vm0, %vm1108_vm1 }
  0x19   : > { %6725 = vmatpush3.bf16.msra.mxu1 %v7220_v11  ;;  %6614 = vmatprep.subr.bf16.mxu0 %v7221_v12  ;;  %v7241_v40 = vld [vmem:[%s7498_s10 + $0xc] sm:$0xff]   ;;  %v559_v43 = vrot.slane %v557_v37, 5  ;;  %v563_v44 = vrot.slane %v561_v38, 4  ;;  %v1011_v48 = vld [vmem:[%s7498_s10] sm:$0xe]  ;;  %vm7521_vm5 = vmor %vm544_vm2, %vm545_vm3 }
  0x1a   : > { %6726 = vmatprep.subr.bf16.mxu1 %v7222_v13  ;;  %v569_v45 = vrot.slane %v567_v39, 5  ;;  %4105 = vmatprep.mubr.bf16.mxu1 %v7241_v40  ;;  %v554_v47 = vor.u32 %v553_v42, %v550_v41  ;;  %v1012_v49 = vld [vmem:[%s7498_s10 + $0x4] sm:$0xf]  ;;  %v1013_v50 = vld [vmem:[%s7498_s10 + $0x8] sm:$0x1]  ;;  %v5790_v53 = vrot.slane %v1011_v48, 9 }
  0x1b   : > { %v564_v52 = vor.u32 %v563_v44, %v559_v43  ;;  %v1112_v54 = vrot.slane %v1012_v49, 5  ;;  %v1115_v55 = vrot.slane %v1013_v50, 5  ;;  %v7243_v56 = vld [vmem:[%s9598_s1 + $0x140] sm:$0xff]   ;;  %v499_v4 = vld [vmem:[%s7498_s10 + $0xc] sm:$0xf] }
  0x1c   : > { %6615 = vmatpush3.bf16.msra.mxu0 %v7223_v14  ;;  %v555_v57 = vrot.slane %v554_v47, 4  ;;  %v7242_v59 = vld [vmem:[%s7498_s10] sm:$0xff]   ;;  %v500_v7 = vld [vmem:[%s7498_s10 + $0x10] sm:$0xf]  ;;  %v501_v8 = vld [vmem:[%s7498_s10 + $0x14] sm:$0x1] }
  0x1d   : > { %6727 = vmatpush3.bf16.msra.mxu1 %v7224_v15  ;;  %6616 = vmatprep.subr.bf16.mxu0 %v7225_v16  ;;  %v565_v58 = vrot.slane %v564_v52, 4  ;;  %v1113_v60 = vsel %vm7512_vm4, %v5790_v53, %v1112_v54  ;;  %v1114_v61 = vrot.slane %v1112_v54, 4  ;;  %v7244_v63 = vld [vmem:[%s9598_s1 + $0x100] sm:$0xff]   ;;  %v572_v9 = vshrl.u32 %v499_v4, 16  ;;  %v7247_v14 = vld [vmem:[%s7498_s10 + $0x18] sm:$0xff]   ;;  %v7248_v34 = vld [vmem:[%s7498_s10 + $0xc] sm:$0xff]  }
  0x1e   : > { %6728 = vmatprep.subr.bf16.mxu1 %v7226_v17  ;;  %v560_v62 = vsel %vm7521_vm5, %v555_v57, %v559_v43  ;;  %v7245_v0 = vld [vmem:[%s9598_s1 + $0x1c0] sm:$0xff]   ;;  %v575_v10 = vshll.u32 %v499_v4, 16  ;;  %v581_v11 = vshll.u32 %v500_v7, 16  ;;  %v585_v12 = vshrl.u32 %v500_v7, 16  ;;  %v7251_v43 = vld [vmem:[%s9598_s1 + $0x148] sm:$0xff]   ;;  %v7250_v7 = vld [vmem:[%s7498_s10 + $0x18] sm:$0xff]  }
  0x1f   : > { %v570_v1 = vsel %vm7521_vm5, %v565_v58, %v569_v45  ;;  %v1116_v2 = vsel %vm7512_vm4, %v1114_v61, %v1115_v55  ;;  %v7246_v3 = vld [vmem:[%s9598_s1 + $0x180] sm:$0xff]   ;;  %v591_v13 = vshll.u32 %v501_v8, 16  ;;  %v574_v15 = vrot.slane %v572_v9, 4  ;;  %v1017_v54 = vld [vmem:[%s7498_s10 + $0x18] sm:$0xe]  ;;  %v7252_v61 = vld [vmem:[%s9598_s1 + $0x108] sm:$0xff]  }
  0x20   : > { %6617 = vmatpush3.bf16.msra.mxu0 %v7227_v18  ;;  %v5774_v5 = vcombine.low %v560_v62, %v570_v1  ;;  %v5806_v6 = vcombine.low %v1113_v60, %v1116_v2  ;;  %v577_v16 = vrot.slane %v575_v10, 5  ;;  %v583_v17 = vrot.slane %v581_v11, 5  ;;  %v7249_v38 = vld [vmem:[%s7498_s10 + $0x24] sm:$0xff]   ;;  %v1018_v55 = vld [vmem:[%s7498_s10 + $0x1c] sm:$0xf] }
  0x21   : > { %6729 = vmatpush3.bf16.msra.mxu1 %v7228_v19  ;;  %6618 = vmatprep.subr.bf16.mxu0 %v7229_v20  ;;  %v587_v18 = vrot.slane %v585_v12, 4  ;;  %v593_v19 = vrot.slane %v591_v13, 5  ;;  %v1019_v58 = vld [vmem:[%s7498_s10 + $0x20] sm:$0x1]  ;;  %v1126_v60 = vrot.slane %v1018_v55, 5 }
  0x22   : > { %6730 = vmatprep.subr.bf16.mxu1 %v7230_v21  ;;  %3944 = vmatprep.mubr.bf16.mxu0 %v5774_v5  ;;  %v578_v20 = vor.u32 %v577_v16, %v574_v15  ;;  %v1014_v21 = vld [vmem:[%s7498_s10 + $0xc] sm:$0xe]  ;;  %v505_v9 = vld [vmem:[%s7498_s10 + $0x24] sm:$0xf]  ;;  %v506_v12 = vld [vmem:[%s7498_s10 + $0x28] sm:$0xf] }
  0x23   : > { %v7254_v5 = vld [vmem:[%s9598_s1 + $0x188] sm:$0xff]   ;;  %v623_v15 = vshll.u32 %v505_v9, 16 }
  0x24   : > { %6619 = vmatpush3.bf16.msra.mxu0 %v7231_v22  ;;  %v1015_v22 = vld [vmem:[%s7498_s10 + $0x10] sm:$0xf]  ;;  %v507_v13 = vld [vmem:[%s7498_s10 + $0x2c] sm:$0x1] }
  0x25   : > { %6731 = vmatpush3.bf16.msra.mxu1 %v7232_v23  ;;  %6620 = vmatprep.subr.bf16.mxu0 %v7233_v24  ;;  %v1016_v23 = vld [vmem:[%s7498_s10 + $0x14] sm:$0x1]  ;;  %v588_v24 = vor.u32 %v587_v18, %v583_v17  ;;  %v633_v18 = vshrl.u32 %v506_v12, 16 }
  0x26   : > { %6732 = vmatprep.subr.bf16.mxu1 %v7234_v25  ;;  %v5791_v25 = vrot.slane %v1014_v21, 9 }
  0x27   : > { %v589_v33 = vrot.slane %v588_v24, 4  ;;  %v635_v24 = vrot.slane %v633_v18, 4  ;;  %v512_v18 = vld [vmem:[%s7498_s10 + $0x40] sm:$0xf] }
  0x28   : > { %6621 = vmatpush3.bf16.msra.mxu0 %v7235_v26  ;;  %v1119_v26 = vrot.slane %v1015_v22, 5  ;;  %v625_v22 = vrot.slane %v623_v15, 5  ;;  %v511_v15 = vld [vmem:[%s7498_s10 + $0x3c] sm:$0xf] }
  0x29   : > { %6733 = vmatpush3.bf16.msra.mxu1 %v7236_v27  ;;  %6622 = vmatprep.subr.bf16.mxu0 %v7237_v28  ;;  %v1122_v27 = vrot.slane %v1016_v23, 5  ;;  %v502_v28 = vld [vmem:[%s7498_s10 + $0x18] sm:$0xf]  ;;  %v594_v44 = vsel %vm7521_vm5, %v589_v33, %v593_v19  ;;  %v639_v19 = vshll.u32 %v507_v13, 16  ;;  %v7258_v13 = vld [vmem:[%s7498_s10 + $0x30] sm:$0xff]  }
  0x2a   : > { %6734 = vmatprep.subr.bf16.mxu1 %v7238_v29  ;;  %v579_v29 = vrot.slane %v578_v20, 4  ;;  %v596_v32 = vshrl.u32 %v502_v28, 16  ;;  %v1120_v35 = vsel %vm7512_vm4, %v5791_v25, %v1119_v26  ;;  %v1121_v36 = vrot.slane %v1119_v26, 4  ;;  %v7255_v20 = vld [vmem:[%s7498_s10 + $0x30] sm:$0xff]  }
  0x2b   : > { %v599_v37 = vshll.u32 %v502_v28, 16  ;;  %v641_v25 = vrot.slane %v639_v19, 5  ;;  %v1021_v28 = vld [vmem:[%s7498_s10 + $0x28] sm:$0xf]  ;;  %v513_v19 = vld [vmem:[%s7498_s10 + $0x44] sm:$0x1] }
  0x2c   : > { %6623 = vmatpush3.bf16.msra.mxu0 %v7239_v30  ;;  %v503_v30 = vld [vmem:[%s7498_s10 + $0x1c] sm:$0xf]  ;;  %v584_v39 = vsel %vm7521_vm5, %v579_v29, %v583_v17  ;;  %v598_v40 = vrot.slane %v596_v32, 4  ;;  %v1123_v45 = vsel %vm7512_vm4, %v1121_v36, %v1122_v27  ;;  %v629_v17 = vshll.u32 %v506_v12, 16  ;;  %v1020_v27 = vld [vmem:[%s7498_s10 + $0x24] sm:$0xe] }
  0x2d   : > { %6735 = vmatpush3.bf16.msra.mxu1 %v7240_v31  ;;  %6832 = vmatprep.subr.bf16.mxu0 %v7243_v56  ;;  %v504_v31 = vld [vmem:[%s7498_s10 + $0x20] sm:$0x1]  ;;  %v605_v41 = vshll.u32 %v503_v30, 16  ;;  %v609_v42 = vshrl.u32 %v503_v30, 16  ;;  %v601_v47 = vrot.slane %v599_v37, 5  ;;  %v5775_v49 = vcombine.low %v584_v39, %v594_v44 }
  0x2e   : > { %6944 = vmatprep.subr.bf16.mxu1 %v7245_v0  ;;  %v615_v48 = vshll.u32 %v504_v31, 16  ;;  %v5807_v50 = vcombine.low %v1120_v35, %v1123_v45  ;;  %v7253_v0 = vld [vmem:[%s9598_s1 + $0x1c8] sm:$0xff]   ;;  %v631_v23 = vrot.slane %v629_v17, 5  ;;  %v5793_v31 = vrot.slane %v1020_v27, 9  ;;  %v509_v36 = vld [vmem:[%s7498_s10 + $0x34] sm:$0xf] }
  0x2f   : > { %3945 = vmatmul.mubr.bf16.vlgmr.msra.gmra.mrb[0].mxu0 %v7242_v59  ;;  %v607_v52 = vrot.slane %v605_v41, 5  ;;  %v611_v53 = vrot.slane %v609_v42, 4  ;;  %v602_v56 = vor.u32 %v601_v47, %v598_v40  ;;  %v5792_v59 = vrot.slane %v1017_v54, 9  ;;  %v1022_v29 = vld [vmem:[%s7498_s10 + $0x2c] sm:$0x1]  ;;  %v7256_v40 = vld [vmem:[%s7498_s10 + $0x24] sm:$0xff]  }
  0x30   : > { %4106 = vmatmul.mubr.bf16.vlgmr.msra.gmra.mrb[0].mxu1 %v5806_v6  ;;  %6833 = vmatpush3.bf16.msra.mxu0 %v7244_v63  ;;  %v617_v57 = vrot.slane %v615_v48, 5  ;;  %v1129_v63 = vrot.slane %v1019_v58, 5  ;;  %v636_v30 = vor.u32 %v635_v24, %v631_v23  ;;  %v1133_v32 = vrot.slane %v1021_v28, 5  ;;  %v510_v37 = vld [vmem:[%s7498_s10 + $0x38] sm:$0x1]  ;;  %v7257_v44 = vld [vmem:[%s7498_s10 + $0x3c] sm:$0xff]  }
  0x31   : > { %6945 = vmatpush3.bf16.msra.mxu1 %v7246_v3  ;;  %4113 = vmatprep.mubr.bf16.mxu1 %v7247_v14  ;;  %v612_v62 = vor.u32 %v611_v53, %v607_v52  ;;  %v603_v1 = vrot.slane %v602_v56, 4  ;;  %v1127_v2 = vsel %vm7512_vm4, %v5792_v59, %v1126_v60  ;;  %v1128_v3 = vrot.slane %v1126_v60, 4  ;;  %v1023_v60 = vld [vmem:[%s7498_s10 + $0x30] sm:$0xe] }
  0x32   : > { %6834 = vmatprep.subr.bf16.mxu0 %v7251_v43  ;;  %3952 = vmatprep.mubr.bf16.mxu0 %v5775_v49  ;;  %v620_v14 = vshrl.u32 %v505_v9, 16  ;;  %v1136_v33 = vrot.slane %v1022_v29, 5  ;;  %v637_v39 = vrot.slane %v636_v30, 4  ;;  %v1134_v41 = vsel %vm7512_vm4, %v5793_v31, %v1133_v32 }
  0x33   : > { %v613_v4 = vrot.slane %v612_v62, 4  ;;  %6946 = vmatprep.subr.bf16.mxu1 %v7253_v0  ;;  %v608_v6 = vsel %vm7521_vm5, %v603_v1, %v607_v52  ;;  %v1130_v8 = vsel %vm7512_vm4, %v1128_v3, %v1129_v63  ;;  %v1135_v42 = vrot.slane %v1133_v32, 4  ;;  %v1025_v0 = vld [vmem:[%s7498_s10 + $0x38] sm:$0x1]  ;;  %v7260_v3 = vld [vmem:[%s9598_s1 + $0x110] sm:$0xff]  }
  0x34   : > { %6835 = vmatpush3.bf16.msra.mxu0 %v7252_v61  ;;  %v5808_v11 = vcombine.low %v1127_v2, %v1130_v8  ;;  %v622_v21 = vrot.slane %v620_v14, 4  ;;  %v653_v48 = vshll.u32 %v509_v36, 16  ;;  %v657_v49 = vshrl.u32 %v509_v36, 16  ;;  %v1024_v61 = vld [vmem:[%s7498_s10 + $0x34] sm:$0xf] }
  0x35   : > { %v618_v10 = vsel %vm7521_vm5, %v613_v4, %v617_v57  ;;  %6947 = vmatpush3.bf16.msra.mxu1 %v7254_v5  ;;  %v642_v52 = vsel %vm7521_vm5, %v637_v39, %v641_v25  ;;  %v1137_v53 = vsel %vm7512_vm4, %v1135_v42, %v1136_v33  ;;  %v663_v55 = vshll.u32 %v510_v37, 16  ;;  %v1026_v33 = vld [vmem:[%s7498_s10 + $0x3c] sm:$0xe]  ;;  %v515_v42 = vld [vmem:[%s7498_s10 + $0x4c] sm:$0xf] }
  0x36   : > { %v5776_v16 = vcombine.low %v608_v6, %v618_v10  ;;  %v626_v26 = vor.u32 %v625_v22, %v622_v21  ;;  %v5809_v57 = vcombine.low %v1134_v41, %v1137_v53  ;;  %v655_v58 = vrot.slane %v653_v48, 5  ;;  %v7261_v6 = vld [vmem:[%s9598_s1 + $0x1d0] sm:$0xff]  }
  0x37   : > { %3953 = vmatmul.mubr.bf16.gmra.mrb[4].mxu0 %v7248_v34  ;;  %v508_v34 = vld [vmem:[%s7498_s10 + $0x30] sm:$0xf]  ;;  %v659_v59 = vrot.slane %v657_v49, 4  ;;  %v665_v63 = vrot.slane %v663_v55, 5  ;;  %v5794_v1 = vrot.slane %v1023_v60, 9  ;;  %v1140_v2 = vrot.slane %v1024_v61, 5  ;;  %6948 = vmatprep.subr.bf16.mxu1 %v7261_v6 }
  0x38   : > { %4114 = vmatmul.mubr.bf16.gmra.mrb[4].mxu1 %v5807_v50  ;;  %3960 = vmatprep.mubr.bf16.mxu0 %v5776_v16  ;;  %v627_v35 = vrot.slane %v626_v26, 4  ;;  %v647_v43 = vshll.u32 %v508_v34, 16  ;;  %v7259_v50 = vld [vmem:[%s9598_s1 + $0x150] sm:$0xff]   ;;  %v1143_v5 = vrot.slane %v1025_v0, 5  ;;  %v671_v21 = vshll.u32 %v511_v15, 16  ;;  %v7263_v26 = vld [vmem:[%s7498_s10 + $0x48] sm:$0xff]  }
  0x39   : > { %4121 = vmatprep.mubr.bf16.mxu1 %v7249_v38  ;;  %v644_v38 = vshrl.u32 %v508_v34, 16  ;;  %6836 = vmatprep.subr.bf16.mxu0 %v7259_v50  ;;  %v660_v4 = vor.u32 %v659_v59, %v655_v58  ;;  %v1141_v8 = vsel %vm7512_vm4, %v5794_v1, %v1140_v2  ;;  %v1142_v9 = vrot.slane %v1140_v2, 4  ;;  %v1027_v34 = vld [vmem:[%s7498_s10 + $0x40] sm:$0xf]  ;;  %v1029_v2 = vld [vmem:[%s7498_s10 + $0x48] sm:$0xe] }
  0x3a   : > { %v632_v45 = vsel %vm7521_vm5, %v627_v35, %v631_v23  ;;  %v649_v54 = vrot.slane %v647_v43, 5  ;;  %6837 = vmatpush3.bf16.msra.mxu0 %v7260_v3  ;;  %v677_v23 = vshll.u32 %v512_v18, 16  ;;  %v681_v24 = vshrl.u32 %v512_v18, 16  ;;  %v1028_v35 = vld [vmem:[%s7498_s10 + $0x44] sm:$0x1] }
  0x3b   : > { %v646_v47 = vrot.slane %v644_v38, 4  ;;  %v5777_v56 = vcombine.low %v632_v45, %v642_v52  ;;  %v661_v10 = vrot.slane %v660_v4, 4  ;;  %v1144_v14 = vsel %vm7512_vm4, %v1142_v9, %v1143_v5  ;;  %v516_v43 = vld [vmem:[%s7498_s10 + $0x50] sm:$0x1]  ;;  %v7265_v52 = vld [vmem:[%s7498_s10 + $0x54] sm:$0xff]  }
  0x3c   : > { %v5810_v17 = vcombine.low %v1141_v8, %v1144_v14  ;;  %v687_v25 = vshll.u32 %v513_v19, 16  ;;  %v673_v28 = vrot.slane %v671_v21, 5  ;;  %v679_v29 = vrot.slane %v677_v23, 5  ;;  %v1030_v3 = vld [vmem:[%s7498_s10 + $0x4c] sm:$0xf]  ;;  %v7268_v9 = vld [vmem:[%s9598_s1 + $0x118] sm:$0xff]  }
  0x3d   : > { %v650_v62 = vor.u32 %v649_v54, %v646_v47  ;;  %v666_v16 = vsel %vm7521_vm5, %v661_v10, %v665_v63  ;;  %v683_v30 = vrot.slane %v681_v24, 4  ;;  %v5795_v37 = vrot.slane %v1026_v33, 9  ;;  %v7264_v47 = vld [vmem:[%s7498_s10 + $0x3c] sm:$0xff]   ;;  %v1031_v6 = vld [vmem:[%s7498_s10 + $0x50] sm:$0x1]  ;;  %v7266_v19 = vld [vmem:[%s7498_s10 + $0x48] sm:$0xff]  }
  0x3e   : > { %v689_v31 = vrot.slane %v687_v25, 5  ;;  %v1147_v38 = vrot.slane %v1027_v34, 5  ;;  %v1150_v39 = vrot.slane %v1028_v35, 5  ;;  %v701_v55 = vshll.u32 %v515_v42, 16  ;;  %v517_v21 = vld [vmem:[%s7498_s10 + $0x54] sm:$0xf] }
  0x3f   : > { %3961 = vmatmul.mubr.bf16.gmra.mrb[8].mxu0 %v7250_v7  ;;  %v651_v7 = vrot.slane %v650_v62, 4  ;;  %v684_v36 = vor.u32 %v683_v30, %v679_v29  ;;  %v711_v61 = vshll.u32 %v516_v43, 16  ;;  %v1154_v8 = vrot.slane %v1030_v3, 5  ;;  %v518_v24 = vld [vmem:[%s7498_s10 + $0x58] sm:$0xf] }
  0x40   : > { %4122 = vmatmul.mubr.bf16.gmra.mrb[8].mxu1 %v5808_v11  ;;  %3968 = vmatprep.mubr.bf16.mxu0 %v5777_v56  ;;  %v7262_v11 = vld [vmem:[%s9598_s1 + $0x190] sm:$0xff]   ;;  %v1148_v48 = vsel %vm7512_vm4, %v5795_v37, %v1147_v38  ;;  %v1149_v49 = vrot.slane %v1147_v38, 4  ;;  %v705_v56 = vshrl.u32 %v515_v42, 16  ;;  %v703_v0 = vrot.slane %v701_v55, 5  ;;  %v519_v25 = vld [vmem:[%s7498_s10 + $0x5c] sm:$0x1] }
  0x41   : > { %4129 = vmatprep.mubr.bf16.mxu1 %v7255_v20  ;;  %v656_v12 = vsel %vm7521_vm5, %v651_v7, %v655_v58  ;;  %6949 = vmatpush3.bf16.msra.mxu1 %v7262_v11  ;;  %v668_v20 = vshrl.u32 %v511_v15, 16  ;;  %v685_v45 = vrot.slane %v684_v36, 4  ;;  %v713_v5 = vrot.slane %v711_v61, 5 }
  0x42   : > { %v5778_v22 = vcombine.low %v656_v12, %v666_v16  ;;  %v1151_v59 = vsel %vm7512_vm4, %v1149_v49, %v1150_v39  ;;  %v707_v1 = vrot.slane %v705_v56, 4  ;;  %v5796_v7 = vrot.slane %v1029_v2, 9  ;;  %v7269_v12 = vld [vmem:[%s9598_s1 + $0x1d8] sm:$0xff]   ;;  %v1032_v39 = vld [vmem:[%s7498_s10 + $0x54] sm:$0xe] }
  0x43   : > { %v670_v27 = vrot.slane %v668_v20, 4  ;;  %v690_v58 = vsel %vm7521_vm5, %v685_v45, %v689_v31  ;;  %v5811_v63 = vcombine.low %v1148_v48, %v1151_v59  ;;  %v1157_v11 = vrot.slane %v1031_v6, 5  ;;  %6950 = vmatprep.subr.bf16.mxu1 %v7269_v12  ;;  %v521_v49 = vld [vmem:[%s7498_s10 + $0x64] sm:$0xf]  ;;  %v1037_v12 = vld [vmem:[%s7498_s10 + $0x68] sm:$0x1] }
  0x44   : > { %v708_v10 = vor.u32 %v707_v1, %v703_v0  ;;  %v1155_v14 = vsel %vm7512_vm4, %v5796_v7, %v1154_v8  ;;  %v1156_v15 = vrot.slane %v1154_v8, 4  ;;  %v729_v30 = vshrl.u32 %v518_v24, 16  ;;  %v1035_v8 = vld [vmem:[%s7498_s10 + $0x60] sm:$0xe] }
  0x45   : > { %v674_v32 = vor.u32 %v673_v28, %v670_v27  ;;  %v719_v27 = vshll.u32 %v517_v21, 16  ;;  %v735_v31 = vshll.u32 %v519_v25, 16  ;;  %v5797_v43 = vrot.slane %v1032_v39, 9  ;;  %v7274_v25 = vld [vmem:[%s7498_s10 + $0x60] sm:$0xff]  }
  0x46   : > { %v709_v16 = vrot.slane %v708_v10, 4  ;;  %v1158_v20 = vsel %vm7512_vm4, %v1156_v15, %v1157_v11  ;;  %v731_v36 = vrot.slane %v729_v30, 4  ;;  %v749_v61 = vshll.u32 %v521_v49, 16  ;;  %v7276_v15 = vld [vmem:[%s9598_s1 + $0x120] sm:$0xff]   ;;  %v524_v30 = vld [vmem:[%s7498_s10 + $0x70] sm:$0xf] }
  0x47   : > { %3969 = vmatmul.mubr.bf16.gmra.mrb[12].mxu0 %v7256_v40  ;;  %v514_v40 = vld [vmem:[%s7498_s10 + $0x48] sm:$0xf]  ;;  %v675_v41 = vrot.slane %v674_v32, 4  ;;  %v5812_v23 = vcombine.low %v1155_v14, %v1158_v20  ;;  %v7271_v32 = vld [vmem:[%s7498_s10 + $0x60] sm:$0xff]   ;;  %v721_v34 = vrot.slane %v719_v27, 5  ;;  %v737_v37 = vrot.slane %v735_v31, 5 }
  0x48   : > { %4130 = vmatmul.mubr.bf16.gmra.mrb[12].mxu1 %v5809_v57  ;;  %3976 = vmatprep.mubr.bf16.mxu0 %v5778_v22  ;;  %v695_v50 = vshll.u32 %v514_v40, 16  ;;  %v7267_v57 = vld [vmem:[%s9598_s1 + $0x158] sm:$0xff]   ;;  %v714_v22 = vsel %vm7521_vm5, %v709_v16, %v713_v5  ;;  %v751_v6 = vrot.slane %v749_v61, 5  ;;  %v523_v27 = vld [vmem:[%s7498_s10 + $0x6c] sm:$0xf] }
  0x49   : > { %4137 = vmatprep.mubr.bf16.mxu1 %v7257_v44  ;;  %v692_v44 = vshrl.u32 %v514_v40, 16  ;;  %v680_v53 = vsel %vm7521_vm5, %v675_v41, %v679_v29  ;;  %6838 = vmatprep.subr.bf16.mxu0 %v7267_v57  ;;  %v725_v29 = vshll.u32 %v518_v24, 16  ;;  %v1033_v40 = vld [vmem:[%s7498_s10 + $0x58] sm:$0xf]  ;;  %v1034_v41 = vld [vmem:[%s7498_s10 + $0x5c] sm:$0x1] }
  0x4a   : > { %v697_v60 = vrot.slane %v695_v50, 5  ;;  %v5779_v62 = vcombine.low %v680_v53, %v690_v58  ;;  %6839 = vmatpush3.bf16.msra.mxu0 %v7268_v9  ;;  %v1164_v45 = vrot.slane %v1034_v41, 5  ;;  %v522_v50 = vld [vmem:[%s7498_s10 + $0x68] sm:$0x1]  ;;  %v7273_v58 = vld [vmem:[%s7498_s10 + $0x6c] sm:$0xff]  }
  0x4b   : > { %v694_v54 = vrot.slane %v692_v44, 4  ;;  %v727_v35 = vrot.slane %v725_v29, 5  ;;  %v1161_v44 = vrot.slane %v1033_v40, 5  ;;  %v759_v3 = vshll.u32 %v522_v50, 16  ;;  %v1036_v9 = vld [vmem:[%s7498_s10 + $0x64] sm:$0xf] }
  0x4c   : > { %v1168_v14 = vrot.slane %v1036_v9, 5  ;;  %v525_v31 = vld [vmem:[%s7498_s10 + $0x74] sm:$0x1] }
  0x4d   : > { %v698_v4 = vor.u32 %v697_v60, %v694_v54  ;;  %v732_v42 = vor.u32 %v731_v36, %v727_v35  ;;  %v7272_v54 = vld [vmem:[%s7498_s10 + $0x54] sm:$0xff]   ;;  %v1162_v55 = vsel %vm7512_vm4, %v5797_v43, %v1161_v44  ;;  %v1163_v56 = vrot.slane %v1161_v44, 4 }
  0x4e   : > { %v761_v11 = vrot.slane %v759_v3, 5  ;;  %v777_v36 = vshrl.u32 %v524_v30, 16 }
  0x4f   : > { %3977 = vmatmul.mubr.bf16.gmra.mrb[16].mxu0 %v7258_v13  ;;  %v699_v13 = vrot.slane %v698_v4, 4  ;;  %v733_v53 = vrot.slane %v732_v42, 4  ;;  %v1165_v1 = vsel %vm7512_vm4, %v1163_v56, %v1164_v45  ;;  %v1038_v45 = vld [vmem:[%s7498_s10 + $0x6c] sm:$0xe]  ;;  %v527_v56 = vld [vmem:[%s7498_s10 + $0x7c] sm:$0xf] }
  0x50   : > { %4138 = vmatmul.mubr.bf16.gmra.mrb[16].mxu1 %v5810_v17  ;;  %3984 = vmatprep.mubr.bf16.mxu0 %v5779_v62  ;;  %v7270_v17 = vld [vmem:[%s9598_s1 + $0x198] sm:$0xff]   ;;  %v753_v62 = vshrl.u32 %v521_v49, 16  ;;  %v5813_v5 = vcombine.low %v1162_v55, %v1165_v1  ;;  %v779_v42 = vrot.slane %v777_v36, 4  ;;  %v5799_v50 = vrot.slane %v1038_v45, 9  ;;  %v530_v36 = vld [vmem:[%s7498_s10 + $0x88] sm:$0xf] }
  0x51   : > { %4145 = vmatprep.mubr.bf16.mxu1 %v7263_v26  ;;  %v704_v18 = vsel %vm7521_vm5, %v699_v13, %v703_v0  ;;  %6951 = vmatpush3.bf16.msra.mxu1 %v7270_v17  ;;  %v716_v26 = vshrl.u32 %v517_v21, 16  ;;  %v738_v0 = vsel %vm7521_vm5, %v733_v53, %v737_v37  ;;  %v5798_v13 = vrot.slane %v1035_v8, 9 }
  0x52   : > { %v5780_v28 = vcombine.low %v704_v18, %v714_v22  ;;  %v755_v7 = vrot.slane %v753_v62, 4  ;;  %v1171_v17 = vrot.slane %v1037_v12, 5  ;;  %v7277_v18 = vld [vmem:[%s9598_s1 + $0x1e0] sm:$0xff]   ;;  %v1170_v21 = vrot.slane %v1168_v14, 4 }
  0x53   : > { %v718_v33 = vrot.slane %v716_v26, 4  ;;  %v1169_v20 = vsel %vm7512_vm4, %v5798_v13, %v1168_v14  ;;  %6952 = vmatprep.subr.bf16.mxu1 %v7277_v18  ;;  %v783_v37 = vshll.u32 %v525_v31, 16  ;;  %v797_v3 = vshll.u32 %v527_v56, 16  ;;  %v1041_v14 = vld [vmem:[%s7498_s10 + $0x78] sm:$0xe] }
  0x54   : > { %v756_v16 = vor.u32 %v755_v7, %v751_v6  ;;  %v1172_v26 = vsel %vm7512_vm4, %v1170_v21, %v1171_v17  ;;  %v1043_v18 = vld [vmem:[%s7498_s10 + $0x80] sm:$0x1]  ;;  %v7284_v21 = vld [vmem:[%s9598_s1 + $0x128] sm:$0xff]   ;;  %v7282_v31 = vld [vmem:[%s7498_s10 + $0x78] sm:$0xff]  }
  0x55   : > { %v722_v38 = vor.u32 %v721_v34, %v718_v33  ;;  %v5814_v29 = vcombine.low %v1169_v20, %v1172_v26  ;;  %v767_v33 = vshll.u32 %v523_v27, 16  ;;  %v785_v43 = vrot.slane %v783_v37, 5  ;;  %v531_v37 = vld [vmem:[%s7498_s10 + $0x8c] sm:$0x1] }
  0x56   : > { %v757_v22 = vrot.slane %v756_v16, 4  ;;  %v799_v12 = vrot.slane %v797_v3, 5 }
  0x57   : > { %3985 = vmatmul.mubr.bf16.gmra.mrb[20].mxu0 %v7264_v47  ;;  %v520_v47 = vld [vmem:[%s7498_s10 + $0x60] sm:$0xf]  ;;  %v723_v48 = vrot.slane %v722_v38, 4  ;;  %v7279_v38 = vld [vmem:[%s7498_s10 + $0x78] sm:$0xff]   ;;  %v769_v40 = vrot.slane %v767_v33, 5 }
  0x58   : > { %4146 = vmatmul.mubr.bf16.gmra.mrb[20].mxu1 %v5811_v63  ;;  %3992 = vmatprep.mubr.bf16.mxu0 %v5780_v28  ;;  %v743_v57 = vshll.u32 %v520_v47, 16  ;;  %v7275_v63 = vld [vmem:[%s9598_s1 + $0x160] sm:$0xff]   ;;  %v762_v28 = vsel %vm7521_vm5, %v757_v22, %v761_v11 }
  0x59   : > { %4153 = vmatprep.mubr.bf16.mxu1 %v7265_v52  ;;  %v740_v52 = vshrl.u32 %v520_v47, 16  ;;  %v728_v59 = vsel %vm7521_vm5, %v723_v48, %v727_v35  ;;  %6840 = vmatprep.subr.bf16.mxu0 %v7275_v63  ;;  %v773_v35 = vshll.u32 %v524_v30, 16  ;;  %v1039_v47 = vld [vmem:[%s7498_s10 + $0x70] sm:$0xf]  ;;  %v1040_v48 = vld [vmem:[%s7498_s10 + $0x74] sm:$0x1] }
  0x5a   : > { %v745_v2 = vrot.slane %v743_v57, 5  ;;  %v5781_v4 = vcombine.low %v728_v59, %v738_v0  ;;  %6841 = vmatpush3.bf16.msra.mxu0 %v7276_v15  ;;  %v1178_v53 = vrot.slane %v1040_v48, 5  ;;  %v528_v57 = vld [vmem:[%s7498_s10 + $0x80] sm:$0x1]  ;;  %v7281_v0 = vld [vmem:[%s7498_s10 + $0x84] sm:$0xff]  }
  0x5b   : > { %v742_v60 = vrot.slane %v740_v52, 4  ;;  %v775_v41 = vrot.slane %v773_v35, 5  ;;  %v1175_v52 = vrot.slane %v1039_v47, 5  ;;  %v807_v9 = vshll.u32 %v528_v57, 16  ;;  %v1042_v15 = vld [vmem:[%s7498_s10 + $0x7c] sm:$0xf] }
  0x5c   : > { %v1182_v20 = vrot.slane %v1042_v15, 5  ;;  %v529_v33 = vld [vmem:[%s7498_s10 + $0x84] sm:$0xf] }
  0x5d   : > { %v746_v10 = vor.u32 %v745_v2, %v742_v60  ;;  %v780_v49 = vor.u32 %v779_v42, %v775_v41  ;;  %v7280_v60 = vld [vmem:[%s7498_s10 + $0x6c] sm:$0xff]   ;;  %v1176_v61 = vsel %vm7512_vm4, %v5799_v50, %v1175_v52  ;;  %v1177_v62 = vrot.slane %v1175_v52, 4 }
  0x5e   : > { %v809_v17 = vrot.slane %v807_v9, 5  ;;  %v825_v42 = vshrl.u32 %v530_v36, 16 }
  0x5f   : > { %3993 = vmatmul.mubr.bf16.gmra.mrb[24].mxu0 %v7266_v19  ;;  %v747_v19 = vrot.slane %v746_v10, 4  ;;  %v781_v59 = vrot.slane %v780_v49, 4  ;;  %v1179_v7 = vsel %vm7512_vm4, %v1177_v62, %v1178_v53  ;;  %v1044_v53 = vld [vmem:[%s7498_s10 + $0x84] sm:$0xe]  ;;  %v533_v62 = vld [vmem:[%s7498_s10 + $0x94] sm:$0xf] }
  0x60   : > { %4154 = vmatmul.mubr.bf16.gmra.mrb[24].mxu1 %v5812_v23  ;;  %4000 = vmatprep.mubr.bf16.mxu0 %v5781_v4  ;;  %v7278_v23 = vld [vmem:[%s9598_s1 + $0x1a0] sm:$0xff]   ;;  %v801_v4 = vshrl.u32 %v527_v56, 16  ;;  %v5815_v11 = vcombine.low %v1176_v61, %v1179_v7  ;;  %v827_v49 = vrot.slane %v825_v42, 4  ;;  %v5801_v57 = vrot.slane %v1044_v53, 9 }
  0x61   : > { %4161 = vmatprep.mubr.bf16.mxu1 %v7271_v32  ;;  %v752_v24 = vsel %vm7521_vm5, %v747_v19, %v751_v6  ;;  %6953 = vmatpush3.bf16.msra.mxu1 %v7278_v23  ;;  %v764_v32 = vshrl.u32 %v523_v27, 16  ;;  %v786_v6 = vsel %vm7521_vm5, %v781_v59, %v785_v43  ;;  %v5800_v19 = vrot.slane %v1041_v14, 9  ;;  %v536_v42 = vld [vmem:[%s7498_s10 + $0xa0] sm:$0xf] }
  0x62   : > { %v5782_v34 = vcombine.low %v752_v24, %v762_v28  ;;  %v803_v13 = vrot.slane %v801_v4, 4  ;;  %v1185_v23 = vrot.slane %v1043_v18, 5  ;;  %v7285_v24 = vld [vmem:[%s9598_s1 + $0x1e8] sm:$0xff]   ;;  %v1184_v27 = vrot.slane %v1182_v20, 4 }
  0x63   : > { %v766_v39 = vrot.slane %v764_v32, 4  ;;  %v1183_v26 = vsel %vm7512_vm4, %v5800_v19, %v1182_v20  ;;  %6954 = vmatprep.subr.bf16.mxu1 %v7285_v24  ;;  %v831_v43 = vshll.u32 %v531_v37, 16  ;;  %v845_v9 = vshll.u32 %v533_v62, 16  ;;  %v1047_v20 = vld [vmem:[%s7498_s10 + $0x90] sm:$0xe] }
  0x64   : > { %v804_v22 = vor.u32 %v803_v13, %v799_v12  ;;  %v1186_v32 = vsel %vm7512_vm4, %v1184_v27, %v1185_v23  ;;  %v1049_v24 = vld [vmem:[%s7498_s10 + $0x98] sm:$0x1]  ;;  %v7292_v27 = vld [vmem:[%s9598_s1 + $0x130] sm:$0xff]  }
  0x65   : > { %v770_v44 = vor.u32 %v769_v40, %v766_v39  ;;  %v5816_v35 = vcombine.low %v1183_v26, %v1186_v32  ;;  %v815_v39 = vshll.u32 %v529_v33, 16  ;;  %v833_v50 = vrot.slane %v831_v43, 5  ;;  %v7290_v37 = vld [vmem:[%s7498_s10 + $0x90] sm:$0xff]   ;;  %v537_v43 = vld [vmem:[%s7498_s10 + $0xa4] sm:$0x1] }
  0x66   : > { %v805_v28 = vrot.slane %v804_v22, 4  ;;  %v847_v18 = vrot.slane %v845_v9, 5 }
  0x67   : > { %4001 = vmatmul.mubr.bf16.gmra.mrb[28].mxu0 %v7272_v54  ;;  %v526_v54 = vld [vmem:[%s7498_s10 + $0x78] sm:$0xf]  ;;  %v771_v55 = vrot.slane %v770_v44, 4  ;;  %v7287_v44 = vld [vmem:[%s7498_s10 + $0x90] sm:$0xff]   ;;  %v817_v47 = vrot.slane %v815_v39, 5 }
  0x68   : > { %4162 = vmatmul.mubr.bf16.gmra.mrb[28].mxu1 %v5813_v5  ;;  %4008 = vmatprep.mubr.bf16.mxu0 %v5782_v34  ;;  %v791_v63 = vshll.u32 %v526_v54, 16  ;;  %v7283_v5 = vld [vmem:[%s9598_s1 + $0x168] sm:$0xff]   ;;  %v810_v34 = vsel %vm7521_vm5, %v805_v28, %v809_v17  ;;  %v535_v39 = vld [vmem:[%s7498_s10 + $0x9c] sm:$0xf] }
  0x69   : > { %4169 = vmatprep.mubr.bf16.mxu1 %v7273_v58  ;;  %v788_v58 = vshrl.u32 %v526_v54, 16  ;;  %v776_v1 = vsel %vm7521_vm5, %v771_v55, %v775_v41  ;;  %6842 = vmatprep.subr.bf16.mxu0 %v7283_v5  ;;  %v821_v41 = vshll.u32 %v530_v36, 16  ;;  %v1045_v54 = vld [vmem:[%s7498_s10 + $0x88] sm:$0xf]  ;;  %v1046_v55 = vld [vmem:[%s7498_s10 + $0x8c] sm:$0x1] }
  0x6a   : > { %v793_v8 = vrot.slane %v791_v63, 5  ;;  %v5783_v10 = vcombine.low %v776_v1, %v786_v6  ;;  %6843 = vmatpush3.bf16.msra.mxu0 %v7284_v21  ;;  %v1192_v59 = vrot.slane %v1046_v55, 5  ;;  %v534_v63 = vld [vmem:[%s7498_s10 + $0x98] sm:$0x1]  ;;  %v7289_v6 = vld [vmem:[%s7498_s10 + $0x9c] sm:$0xff]  }
  0x6b   : > { %v790_v2 = vrot.slane %v788_v58, 4  ;;  %v823_v48 = vrot.slane %v821_v41, 5  ;;  %v1189_v58 = vrot.slane %v1045_v54, 5  ;;  %v855_v15 = vshll.u32 %v534_v63, 16  ;;  %v1048_v21 = vld [vmem:[%s7498_s10 + $0x94] sm:$0xf] }
  0x6c   : > { %v1196_v26 = vrot.slane %v1048_v21, 5 }
  0x6d   : > { %v794_v16 = vor.u32 %v793_v8, %v790_v2  ;;  %v828_v56 = vor.u32 %v827_v49, %v823_v48  ;;  %v7288_v2 = vld [vmem:[%s7498_s10 + $0x84] sm:$0xff]   ;;  %v1190_v3 = vsel %vm7512_vm4, %v5801_v57, %v1189_v58  ;;  %v1191_v4 = vrot.slane %v1189_v58, 4 }
  0x6e   : > { %v857_v23 = vrot.slane %v855_v15, 5  ;;  %v873_v49 = vshrl.u32 %v536_v42, 16 }
  0x6f   : > { %4009 = vmatmul.mubr.bf16.gmra.mrb[32].mxu0 %v7274_v25  ;;  %v795_v25 = vrot.slane %v794_v16, 4  ;;  %v829_v1 = vrot.slane %v828_v56, 4  ;;  %v1193_v13 = vsel %vm7512_vm4, %v1191_v4, %v1192_v59  ;;  %v1050_v59 = vld [vmem:[%s7498_s10 + $0x9c] sm:$0xe]  ;;  %v539_v4 = vld [vmem:[%s7498_s10 + $0xac] sm:$0xf] }
  0x70   : > { %4170 = vmatmul.mubr.bf16.gmra.mrb[32].mxu1 %v5814_v29  ;;  %4016 = vmatprep.mubr.bf16.mxu0 %v5783_v10  ;;  %v7286_v29 = vld [vmem:[%s9598_s1 + $0x1a8] sm:$0xff]   ;;  %v849_v10 = vshrl.u32 %v533_v62, 16  ;;  %v5817_v17 = vcombine.low %v1190_v3, %v1193_v13  ;;  %v875_v56 = vrot.slane %v873_v49, 4  ;;  %v5803_v63 = vrot.slane %v1050_v59, 9  ;;  %v542_v49 = vld [vmem:[%s7498_s10 + $0xb8] sm:$0xf] }
  0x71   : > { %4177 = vmatprep.mubr.bf16.mxu1 %v7279_v38  ;;  %v800_v30 = vsel %vm7521_vm5, %v795_v25, %v799_v12  ;;  %6955 = vmatpush3.bf16.msra.mxu1 %v7286_v29  ;;  %v812_v38 = vshrl.u32 %v529_v33, 16  ;;  %v834_v12 = vsel %vm7521_vm5, %v829_v1, %v833_v50  ;;  %v5802_v25 = vrot.slane %v1047_v20, 9 }
  0x72   : > { %v5784_v40 = vcombine.low %v800_v30, %v810_v34  ;;  %v851_v19 = vrot.slane %v849_v10, 4  ;;  %v1199_v29 = vrot.slane %v1049_v24, 5  ;;  %v7293_v30 = vld [vmem:[%s9598_s1 + $0x1f0] sm:$0xff]   ;;  %v1198_v33 = vrot.slane %v1196_v26, 4 }
  0x73   : > { %v814_v45 = vrot.slane %v812_v38, 4  ;;  %v1197_v32 = vsel %vm7512_vm4, %v5802_v25, %v1196_v26  ;;  %6956 = vmatprep.subr.bf16.mxu1 %v7293_v30  ;;  %v879_v50 = vshll.u32 %v537_v43, 16  ;;  %v893_v15 = vshll.u32 %v539_v4, 16  ;;  %v1053_v26 = vld [vmem:[%s7498_s10 + $0xa8] sm:$0xe] }
  0x74   : > { %v852_v28 = vor.u32 %v851_v19, %v847_v18  ;;  %v1200_v38 = vsel %vm7512_vm4, %v1198_v33, %v1199_v29  ;;  %v1055_v30 = vld [vmem:[%s7498_s10 + $0xb0] sm:$0x1]  ;;  %v7300_v33 = vld [vmem:[%s9598_s1 + $0x138] sm:$0xff]   ;;  %v7298_v43 = vld [vmem:[%s7498_s10 + $0xa8] sm:$0xff]  }
  0x75   : > { %v818_v52 = vor.u32 %v817_v47, %v814_v45  ;;  %v5818_v41 = vcombine.low %v1197_v32, %v1200_v38  ;;  %v863_v45 = vshll.u32 %v535_v39, 16  ;;  %v881_v57 = vrot.slane %v879_v50, 5  ;;  %v543_v50 = vld [vmem:[%s7498_s10 + $0xbc] sm:$0x1] }
  0x76   : > { %v853_v34 = vrot.slane %v852_v28, 4  ;;  %v895_v24 = vrot.slane %v893_v15, 5 }
  0x77   : > { %4017 = vmatmul.mubr.bf16.gmra.mrb[36].mxu0 %v7280_v60  ;;  %v532_v60 = vld [vmem:[%s7498_s10 + $0x90] sm:$0xf]  ;;  %v819_v61 = vrot.slane %v818_v52, 4  ;;  %v7295_v52 = vld [vmem:[%s7498_s10 + $0xa8] sm:$0xff]   ;;  %v865_v54 = vrot.slane %v863_v45, 5 }
  0x78   : > { %4178 = vmatmul.mubr.bf16.gmra.mrb[36].mxu1 %v5815_v11  ;;  %4024 = vmatprep.mubr.bf16.mxu0 %v5784_v40  ;;  %v839_v5 = vshll.u32 %v532_v60, 16  ;;  %v7291_v11 = vld [vmem:[%s9598_s1 + $0x170] sm:$0xff]   ;;  %v858_v40 = vsel %vm7521_vm5, %v853_v34, %v857_v23 }
  0x79   : > { %4185 = vmatprep.mubr.bf16.mxu1 %v7281_v0  ;;  %v836_v0 = vshrl.u32 %v532_v60, 16  ;;  %v824_v7 = vsel %vm7521_vm5, %v819_v61, %v823_v48  ;;  %6844 = vmatprep.subr.bf16.mxu0 %v7291_v11  ;;  %v869_v48 = vshll.u32 %v536_v42, 16  ;;  %v1051_v60 = vld [vmem:[%s7498_s10 + $0xa0] sm:$0xf]  ;;  %v1052_v61 = vld [vmem:[%s7498_s10 + $0xa4] sm:$0x1] }
  0x7a   : > { %v841_v14 = vrot.slane %v839_v5, 5  ;;  %v5785_v16 = vcombine.low %v824_v7, %v834_v12  ;;  %6845 = vmatpush3.bf16.msra.mxu0 %v7292_v27  ;;  %v1206_v1 = vrot.slane %v1052_v61, 5  ;;  %v540_v5 = vld [vmem:[%s7498_s10 + $0xb0] sm:$0x1]  ;;  %v7297_v12 = vld [vmem:[%s7498_s10 + $0xb4] sm:$0xff]  }
  0x7b   : > { %v838_v8 = vrot.slane %v836_v0, 4  ;;  %v871_v55 = vrot.slane %v869_v48, 5  ;;  %v1203_v0 = vrot.slane %v1051_v60, 5  ;;  %v903_v21 = vshll.u32 %v540_v5, 16  ;;  %v1054_v27 = vld [vmem:[%s7498_s10 + $0xac] sm:$0xf] }
  0x7c   : > { %v1210_v32 = vrot.slane %v1054_v27, 5  ;;  %v541_v45 = vld [vmem:[%s7498_s10 + $0xb4] sm:$0xf] }
  0x7d   : > { %v842_v22 = vor.u32 %v841_v14, %v838_v8  ;;  %v876_v62 = vor.u32 %v875_v56, %v871_v55  ;;  %v7296_v8 = vld [vmem:[%s7498_s10 + $0x9c] sm:$0xff]   ;;  %v1204_v9 = vsel %vm7512_vm4, %v5803_v63, %v1203_v0  ;;  %v1205_v10 = vrot.slane %v1203_v0, 4 }
  0x7e   : > { %v905_v29 = vrot.slane %v903_v21, 5  ;;  %v921_v56 = vshrl.u32 %v542_v49, 16 }
  0x7f   : > { %4025 = vmatmul.mubr.bf16.gmra.mrb[40].mxu0 %v7282_v31  ;;  %v843_v31 = vrot.slane %v842_v22, 4  ;;  %v877_v7 = vrot.slane %v876_v62, 4  ;;  %v1207_v19 = vsel %vm7512_vm4, %v1205_v10, %v1206_v1  ;;  %v1056_v1 = vld [vmem:[%s7498_s10 + $0xb4] sm:$0xe]  ;;  %v5935_v10 = vld [vmem:[%s7498_s10 + $0x10] sm:$0xf] }
  0x80   : > { %4186 = vmatmul.mubr.bf16.gmra.mrb[40].mxu1 %v5816_v35  ;;  %4032 = vmatprep.mubr.bf16.mxu0 %v5785_v16  ;;  %v7294_v35 = vld [vmem:[%s9598_s1 + $0x1b0] sm:$0xff]   ;;  %v897_v16 = vshrl.u32 %v539_v4, 16  ;;  %v5819_v23 = vcombine.low %v1204_v9, %v1207_v19  ;;  %v923_v62 = vrot.slane %v921_v56, 4  ;;  %v5805_v5 = vrot.slane %v1056_v1, 9  ;;  %v7871_v19 = vld [vmem:[%s9598_s1 + $0x200] sm:$0xff]  }
  0x81   : > { %4193 = vmatprep.mubr.bf16.mxu1 %v7287_v44  ;;  %v848_v36 = vsel %vm7521_vm5, %v843_v31, %v847_v18  ;;  %6957 = vmatpush3.bf16.msra.mxu1 %v7294_v35  ;;  %v860_v44 = vshrl.u32 %v535_v39, 16  ;;  %v882_v18 = vsel %vm7521_vm5, %v877_v7, %v881_v57  ;;  %v5804_v31 = vrot.slane %v1053_v26, 9 }
  0x82   : > { %v5786_v47 = vcombine.low %v848_v36, %v858_v40  ;;  %v899_v25 = vrot.slane %v897_v16, 4  ;;  %v1213_v35 = vrot.slane %v1055_v30, 5  ;;  %v7301_v36 = vld [vmem:[%s9598_s1 + $0x1f8] sm:$0xff]   ;;  %v1212_v39 = vrot.slane %v1210_v32, 4  ;;  %v5871_v30 = vld [vmem:[%s7498_s10 + $0x10] sm:$0xf] }
  0x83   : > { %v862_v53 = vrot.slane %v860_v44, 4  ;;  %v1211_v38 = vsel %vm7512_vm4, %v5804_v31, %v1210_v32  ;;  %6958 = vmatprep.subr.bf16.mxu1 %v7301_v36  ;;  %v927_v57 = vshll.u32 %v543_v50, 16  ;;  %v7889_v31 = vld [vmem:[%s9599_s2] sm:$0xff]   ;;  %v5872_v36 = vld [vmem:[%s7498_s10 + $0x14] sm:$0x1] }
  0x84   : > { %v900_v34 = vor.u32 %v899_v25, %v895_v24  ;;  %v1214_v44 = vsel %vm7512_vm4, %v1212_v39, %v1213_v35 }
  0x85   : > { %v866_v58 = vor.u32 %v865_v54, %v862_v53  ;;  %v5820_v48 = vcombine.low %v1211_v38, %v1214_v44  ;;  %v911_v53 = vshll.u32 %v541_v45, 16  ;;  %v929_v63 = vrot.slane %v927_v57, 5 }
  0x86   : > { %v901_v40 = vrot.slane %v900_v34, 4  ;;  %v1515_v57 = vshll.u32 %v5872_v36, 16 }
  0x87   : > { %4033 = vmatmul.mubr.bf16.gmra.mrb[44].mxu0 %v7288_v2  ;;  %v538_v2 = vld [vmem:[%s7498_s10 + $0xa8] sm:$0xf]  ;;  %v867_v3 = vrot.slane %v866_v58, 4  ;;  %v7303_v58 = vld [vmem:[%s7498_s10 + $0xc0] sm:$0xff]   ;;  %v913_v60 = vrot.slane %v911_v53, 5 }
  0x88   : > { %4194 = vmatmul.mubr.bf16.gmra.mrb[44].mxu1 %v5817_v17  ;;  %4040 = vmatprep.mubr.bf16.mxu0 %v5786_v47  ;;  %v887_v11 = vshll.u32 %v538_v2, 16  ;;  %v7299_v17 = vld [vmem:[%s9598_s1 + $0x178] sm:$0xff]   ;;  %v906_v47 = vsel %vm7521_vm5, %v901_v40, %v905_v29  ;;  %v5870_v29 = vld [vmem:[%s7498_s10 + $0xc] sm:$0xf]  ;;  %v1517_v1 = vrot.slane %v1515_v57, 5 }
  0x89   : > { %4201 = vmatprep.mubr.bf16.mxu1 %v7289_v6  ;;  %v884_v6 = vshrl.u32 %v538_v2, 16  ;;  %v872_v13 = vsel %vm7521_vm5, %v867_v3, %v871_v55  ;;  %6846 = vmatprep.subr.bf16.mxu0 %v7299_v17  ;;  %v917_v55 = vshll.u32 %v542_v49, 16  ;;  %v1057_v2 = vld [vmem:[%s7498_s10 + $0xb8] sm:$0xf]  ;;  %v1058_v3 = vld [vmem:[%s7498_s10 + $0xbc] sm:$0x1] }
  0x8a   : > { %v889_v20 = vrot.slane %v887_v11, 5  ;;  %v5787_v22 = vcombine.low %v872_v13, %v882_v18  ;;  %6847 = vmatpush3.bf16.msra.mxu0 %v7300_v33  ;;  %v1220_v7 = vrot.slane %v1058_v3, 5  ;;  %v5936_v11 = vld [vmem:[%s7498_s10 + $0x14] sm:$0x1]  ;;  %v2057_v17 = vrot.slane %v5935_v10, 5 }
  0x8b   : > { %v886_v14 = vrot.slane %v884_v6, 4  ;;  %v919_v61 = vrot.slane %v917_v55, 5  ;;  %v1217_v6 = vrot.slane %v1057_v2, 5  ;;  %v6062_v18 = vld [vmem:[%s7498_s10 + $0x18] sm:$0xf]  ;;  %v2060_v21 = vrot.slane %v5936_v11, 5  ;;  %7104 = vmatprep.subr.bf16.mxu0 %v7871_v19 }
  0x8c   : > { %v2444_v35 = vshll.u32 %v6062_v18, 16  ;;  %v1499_v44 = vshll.u32 %v5870_v29, 16  ;;  %v1505_v49 = vshll.u32 %v5871_v30, 16  ;;  %v6066_v10 = vld [vmem:[%s7498_s10 + $0x28] sm:$0xf] }
  0x8d   : > { %v890_v28 = vor.u32 %v889_v20, %v886_v14  ;;  %v924_v4 = vor.u32 %v923_v62, %v919_v61  ;;  %v7304_v14 = vld [vmem:[%s7498_s10 + $0xb4] sm:$0xff]   ;;  %v1218_v15 = vsel %vm7512_vm4, %v5805_v5, %v1217_v6  ;;  %v1219_v16 = vrot.slane %v1217_v6, 4  ;;  %v5938_v62 = vld [vmem:[%s7498_s10 + $0x1c] sm:$0xf] }
  0x8e   : > { %v1501_v53 = vrot.slane %v1499_v44, 5  ;;  %v1507_v56 = vrot.slane %v1505_v49, 5  ;;  %v2064_v3 = vrot.slane %v5938_v62, 5  ;;  %v7314_v62 = vld [vmem:[%s9598_s1 + $0x210] sm:$0xff]  }
  0x8f   : > { %4041 = vmatmul.mubr.bf16.gmra.mrb[48].mxu0 %v7290_v37  ;;  %v891_v37 = vrot.slane %v890_v28, 4  ;;  %v925_v13 = vrot.slane %v924_v4, 4  ;;  %v1221_v26 = vsel %vm7512_vm4, %v1219_v16, %v1220_v7  ;;  %v2059_v28 = vrot.slane %v2057_v17, 4  ;;  %v6065_v4 = vld [vmem:[%s7498_s10 + $0x24] sm:$0xf] }
  0x90   : > { %4202 = vmatmul.mubr.bf16.gmra.mrb[48].mxu1 %v5818_v41  ;;  %4048 = vmatprep.mubr.bf16.mxu0 %v5787_v22  ;;  %v7302_v41 = vld [vmem:[%s9598_s1 + $0x1b8] sm:$0xff]   ;;  %v5821_v33 = vcombine.low %v1218_v15, %v1221_v26  ;;  %v2465_v15 = vshrl.u32 %v6065_v4, 16  ;;  %v2478_v26 = vshrl.u32 %v6066_v10, 16 }
  0x91   : > { %4209 = vmatprep.mubr.bf16.mxu1 %v7295_v52  ;;  %v896_v42 = vsel %vm7521_vm5, %v891_v37, %v895_v24  ;;  %6959 = vmatpush3.bf16.msra.mxu1 %v7302_v41  ;;  %v908_v52 = vshrl.u32 %v541_v45, 16  ;;  %v6063_v22 = vld [vmem:[%s7498_s10 + $0x1c] sm:$0xf]  ;;  %v2441_v24 = vshrl.u32 %v6062_v18, 16  ;;  %v930_v25 = vsel %vm7521_vm5, %v925_v13, %v929_v63  ;;  %v5939_v63 = vld [vmem:[%s7498_s10 + $0x20] sm:$0x1] }
  0x92   : > { %v5788_v54 = vcombine.low %v896_v42, %v906_v47  ;;  %v2061_v37 = vsel %vm7512_vm4, %v2059_v28, %v2060_v21  ;;  %v2450_v38 = vshll.u32 %v6063_v22, 16  ;;  %v2454_v39 = vshrl.u32 %v6063_v22, 16  ;;  %7152 = vmatprep.subr.bf16.mxu1 %v7889_v31  ;;  %v5873_v16 = vld [vmem:[%s7498_s10 + $0x18] sm:$0xf]  ;;  %v5874_v22 = vld [vmem:[%s7498_s10 + $0x1c] sm:$0xf] }
  0x93   : > { %v910_v59 = vrot.slane %v908_v52, 4  ;;  %v2443_v34 = vrot.slane %v2441_v24, 4  ;;  %v2446_v42 = vrot.slane %v2444_v35, 5  ;;  %v2066_v13 = vrot.slane %v2064_v3, 4 }
  0x94   : > { %v2452_v45 = vrot.slane %v2450_v38, 5  ;;  %v2456_v47 = vrot.slane %v2454_v39, 4  ;;  %v2468_v21 = vshll.u32 %v6065_v4, 16  ;;  %v2467_v24 = vrot.slane %v2465_v15, 4  ;;  %v5941_v39 = vld [vmem:[%s7498_s10 + $0x28] sm:$0xf] }
  0x95   : > { %v914_v0 = vor.u32 %v913_v60, %v910_v59  ;;  %v2447_v50 = vor.u32 %v2446_v42, %v2443_v34  ;;  %v5940_v34 = vld [vmem:[%s7498_s10 + $0x24] sm:$0xe]  ;;  %v1520_v38 = vshrl.u32 %v5873_v16, 16  ;;  %v1529_v44 = vshll.u32 %v5874_v22, 16 }
  0x96   : > { %v2457_v55 = vor.u32 %v2456_v47, %v2452_v45  ;;  %v1533_v49 = vshrl.u32 %v5874_v22, 16 }
  0x97   : > { %4049 = vmatmul.mubr.bf16.gmra.mrb[52].mxu0 %v7296_v8  ;;  %v5934_v8 = vld [vmem:[%s7498_s10 + $0xc] sm:$0xe]  ;;  %v915_v9 = vrot.slane %v914_v0, 4  ;;  %v2448_v59 = vrot.slane %v2447_v50, 4 }
  0x98   : > { %4210 = vmatmul.mubr.bf16.gmra.mrb[52].mxu1 %v5819_v23  ;;  %4056 = vmatprep.mubr.bf16.mxu0 %v5788_v54  ;;  %v6064_v23 = vld [vmem:[%s7498_s10 + $0x20] sm:$0x1]  ;;  %v1509_v54 = vshrl.u32 %v5871_v30, 16  ;;  %v2458_v0 = vrot.slane %v2457_v55, 4  ;;  %v2470_v30 = vrot.slane %v2468_v21, 5  ;;  %v5984_v55 = vrot.slane %v5940_v34, 9 }
  0x99   : > { %4217 = vmatprep.mubr.bf16.mxu1 %v7297_v12  ;;  %v5982_v12 = vrot.slane %v5934_v8, 9  ;;  %v920_v20 = vsel %vm7521_vm5, %v915_v9, %v919_v61  ;;  %v2460_v40 = vshll.u32 %v6064_v23, 16  ;;  %v2453_v5 = vsel %vm7521_vm5, %v2448_v59, %v2452_v45  ;;  %v7305_v8 = vld [vmem:[%s7498_s10 + $0x18] sm:$0xff]   ;;  %v5942_v45 = vld [vmem:[%s7498_s10 + $0x2c] sm:$0x1] }
  0x9a   : > { %v5789_v32 = vcombine.low %v920_v20, %v930_v25  ;;  %v1511_v61 = vrot.slane %v1509_v54, 4  ;;  %v2067_v9 = vrot.slane %v5939_v63, 5  ;;  %v2474_v25 = vshll.u32 %v6066_v10, 16 }
  0x9b   : > { %v2058_v27 = vsel %vm7512_vm4, %v5982_v12, %v2057_v17  ;;  %v1531_v54 = vrot.slane %v1529_v44, 5 }
  0x9c   : > { %v5998_v41 = vcombine.low %v2058_v27, %v2061_v37  ;;  %v1512_v7 = vor.u32 %v1511_v61, %v1507_v56  ;;  %v2068_v23 = vsel %vm7512_vm4, %v2066_v13, %v2067_v9  ;;  %v7311_v27 = vld [vmem:[%s9599_s2 + $0x8] sm:$0xff]   ;;  %v2476_v36 = vrot.slane %v2474_v25, 5 }
  0x9d   : > { %v2480_v37 = vrot.slane %v2478_v26, 4  ;;  %v2071_v61 = vrot.slane %v5941_v39, 5  ;;  %v5877_v13 = vld [vmem:[%s7498_s10 + $0x28] sm:$0xf] }
  0x9e   : > { %v1513_v20 = vrot.slane %v1512_v7, 4  ;;  %v1553_v39 = vshll.u32 %v5877_v13, 16 }
  0x9f   : > { %4057 = vmatmul.mubr.bf16.gmra.mrb[56].mxu0 %v7298_v43  ;;  %v1496_v43 = vshrl.u32 %v5870_v29, 16  ;;  %v2481_v47 = vor.u32 %v2480_v37, %v2476_v36  ;;  %v2073_v7 = vrot.slane %v2071_v61, 4 }
  0xa0   : > { %4218 = vmatmul.mubr.bf16.gmra.mrb[56].mxu1 %v5820_v48  ;;  %4064 = vmatprep.mubr.bf16.mxu0 %v5789_v32  ;;  %v2462_v48 = vrot.slane %v2460_v40, 5  ;;  %v1518_v28 = vsel %vm7521_vm5, %v1513_v20, %v1517_v1  ;;  %v7310_v40 = vld [vmem:[%s9598_s1 + $0x208] sm:$0xff]   ;;  %v6070_v1 = vld [vmem:[%s7498_s10 + $0x38] sm:$0x1] }
  0xa1   : > { %4225 = vmatprep.mubr.bf16.mxu1 %v7303_v58  ;;  %v1498_v52 = vrot.slane %v1496_v43, 4  ;;  %v5937_v58 = vld [vmem:[%s7498_s10 + $0x18] sm:$0xe]  ;;  %v1523_v43 = vshll.u32 %v5873_v16, 16  ;;  %v2482_v57 = vrot.slane %v2481_v47, 4 }
  0xa2   : > { %v5983_v2 = vrot.slane %v5937_v58, 9  ;;  %v2463_v11 = vsel %vm7521_vm5, %v2458_v0, %v2462_v48  ;;  %v1522_v48 = vrot.slane %v1520_v38, 4  ;;  %v1535_v58 = vrot.slane %v1533_v49, 4 }
  0xa3   : > { %v1502_v60 = vor.u32 %v1501_v53, %v1498_v52  ;;  %v6110_v17 = vcombine.low %v2453_v5, %v2463_v11  ;;  %v6068_v52 = vld [vmem:[%s7498_s10 + $0x30] sm:$0xf]  ;;  %v1525_v53 = vrot.slane %v1523_v43, 5  ;;  %v2074_v0 = vrot.slane %v5942_v45, 5 }
  0xa4   : > { %v2065_v12 = vsel %vm7512_vm4, %v5983_v2, %v2064_v3  ;;  %v2489_v2 = vshrl.u32 %v6068_v52, 16  ;;  %v5876_v3 = vld [vmem:[%s7498_s10 + $0x24] sm:$0xf]  ;;  %v1536_v5 = vor.u32 %v1535_v58, %v1531_v54  ;;  %v1555_v49 = vrot.slane %v1553_v39, 5 }
  0xa5   : > { %v1503_v6 = vrot.slane %v1502_v60, 4  ;;  %v5999_v29 = vcombine.low %v2065_v12, %v2068_v23  ;;  %v7308_v60 = vld [vmem:[%s7498_s10 + $0x24] sm:$0xff]   ;;  %v1526_v63 = vor.u32 %v1525_v53, %v1522_v48  ;;  %v2492_v12 = vshll.u32 %v6068_v52, 16 }
  0xa6   : > { %v2491_v11 = vrot.slane %v2489_v2, 4  ;;  %v2075_v15 = vsel %vm7512_vm4, %v2073_v7, %v2074_v0  ;;  %v2508_v23 = vshll.u32 %v6070_v1, 16  ;;  %v1547_v34 = vshll.u32 %v5876_v3, 16  ;;  %v5879_v7 = vld [vmem:[%s7498_s10 + $0x30] sm:$0xf] }
  0xa7   : > { %4065 = vmatmul.mubr.bf16.gmra.mrb[60].mxu0 %v7304_v14  ;;  %v6067_v14 = vld [vmem:[%s7498_s10 + $0x2c] sm:$0x1]  ;;  %v1508_v18 = vsel %vm7521_vm5, %v1503_v6, %v1507_v56  ;;  %v6069_v56 = vld [vmem:[%s7498_s10 + $0x34] sm:$0xf]  ;;  %v2072_v6 = vsel %vm7512_vm4, %v5984_v55, %v2071_v61  ;;  %v1527_v10 = vrot.slane %v1526_v63, 4  ;;  %v2494_v22 = vrot.slane %v2492_v12, 5 }
  0xa8   : > { %4226 = vmatmul.mubr.bf16.gmra.mrb[60].mxu1 %v5821_v33  ;;  %4266 = vmatprep.mubr.bf16.mxu0 %v5998_v41  ;;  %v2484_v32 = vshll.u32 %v6067_v14, 16  ;;  %v5875_v33 = vld [vmem:[%s7498_s10 + $0x20] sm:$0x1]  ;;  %v7921_v35 = vcombine.low %v1508_v18, %v1518_v28  ;;  %v2471_v41 = vor.u32 %v2470_v30, %v2467_v24  ;;  %v1537_v14 = vrot.slane %v1536_v5, 4  ;;  %v5878_v18 = vld [vmem:[%s7498_s10 + $0x2c] sm:$0x1] }
  0xa9   : > { %4427 = vmatprep.mubr.bf16.mxu1 %v6110_v17  ;;  %v1539_v50 = vshll.u32 %v5875_v33, 16  ;;  %v2498_v16 = vshll.u32 %v6069_v56, 16  ;;  %v2502_v17 = vshrl.u32 %v6069_v56, 16  ;;  %v1532_v20 = vsel %vm7521_vm5, %v1527_v10, %v1531_v54  ;;  %v5943_v28 = vld [vmem:[%s7498_s10 + $0x30] sm:$0xe] }
  0xaa   : > { %v2486_v42 = vrot.slane %v2484_v32, 5  ;;  %v6000_v21 = vcombine.low %v2072_v6, %v2075_v15  ;;  %v2495_v32 = vor.u32 %v2494_v22, %v2491_v11  ;;  %v2510_v33 = vrot.slane %v2508_v23, 5 }
  0xab   : > { %v1541_v59 = vrot.slane %v1539_v50, 5  ;;  %v2500_v25 = vrot.slane %v2498_v16, 5  ;;  %v2504_v26 = vrot.slane %v2502_v17, 4  ;;  %v1549_v44 = vrot.slane %v1547_v34, 5  ;;  %v6074_v34 = vld [vmem:[%s7498_s10 + $0x48] sm:$0xf] }
  0xac   : > { %v2487_v4 = vsel %vm7521_vm5, %v2482_v57, %v2486_v42  ;;  %v7319_v42 = vld [vmem:[%s9599_s2 + $0x18] sm:$0xff]   ;;  %v2496_v43 = vrot.slane %v2495_v32, 4  ;;  %v1563_v45 = vshll.u32 %v5878_v18, 16  ;;  %v5985_v47 = vrot.slane %v5943_v28, 9  ;;  %v6072_v57 = vld [vmem:[%s7498_s10 + $0x40] sm:$0xf] }
  0xad   : > { %v1542_v24 = vsel %vm7521_vm5, %v1537_v14, %v1541_v59  ;;  %v2505_v37 = vor.u32 %v2504_v26, %v2500_v25  ;;  %v2522_v5 = vshll.u32 %v6072_v57, 16  ;;  %v2526_v6 = vshrl.u32 %v6072_v57, 16  ;;  %v5881_v14 = vld [vmem:[%s7498_s10 + $0x38] sm:$0x1]  ;;  %v5947_v26 = vld [vmem:[%s7498_s10 + $0x40] sm:$0xf] }
  0xae   : > { %v7960_v30 = vcombine.low %v1532_v20, %v1542_v24  ;;  %v2501_v53 = vsel %vm7521_vm5, %v2496_v43, %v2500_v25  ;;  %v1565_v55 = vrot.slane %v1563_v45, 5  ;;  %v5946_v20 = vld [vmem:[%s7498_s10 + $0x3c] sm:$0xe]  ;;  %v1568_v24 = vshrl.u32 %v5879_v7, 16 }
  0xaf   : > { %4267 = vmatmul.mubr.bf16.vlgmr.msra.gmra.mrb[64].mxu0 %v7921_v35  ;;  %v2506_v48 = vrot.slane %v2505_v37, 4  ;;  %v2524_v16 = vrot.slane %v2522_v5, 5  ;;  %v2528_v17 = vrot.slane %v2526_v6, 4  ;;  %v1571_v25 = vshll.u32 %v5879_v7, 16 }
  0xb0   : > { %4428 = vmatmul.mubr.bf16.vlgmr.msra.gmra.mrb[64].mxu1 %v7305_v8  ;;  %7105 = vmatpush3.bf16.msra.mxu0 %v7871_v19  ;;  %v7315_v8 = vld [vmem:[%s9599_s2 + $0x10] sm:$0xff]   ;;  %v1570_v37 = vrot.slane %v1568_v24, 4  ;;  %v1587_v39 = vshll.u32 %v5881_v14, 16  ;;  %v5986_v45 = vrot.slane %v5946_v20, 9 }
  0xb1   : > { %7153 = vmatpush3.bf16.msra.mxu1 %v7889_v31  ;;  %4274 = vmatprep.mubr.bf16.mxu0 %v5999_v29  ;;  %v2472_v31 = vrot.slane %v2471_v41, 4  ;;  %v7318_v29 = vld [vmem:[%s9598_s1 + $0x218] sm:$0xff]   ;;  %v2511_v58 = vsel %vm7521_vm5, %v2506_v48, %v2510_v33  ;;  %v2529_v28 = vor.u32 %v2528_v17, %v2524_v16 }
  0xb2   : > { %7154 = vmatprep.subr.bf16.mxu1 %v7311_v27  ;;  %7106 = vmatprep.subr.bf16.mxu0 %v7310_v40  ;;  %v5945_v41 = vld [vmem:[%s7498_s10 + $0x38] sm:$0x1]  ;;  %v6112_v63 = vcombine.low %v2501_v53, %v2511_v58 }
  0xb3   : > { %v2477_v19 = vsel %vm7521_vm5, %v2472_v31, %v2476_v36  ;;  %v5944_v36 = vld [vmem:[%s7498_s10 + $0x34] sm:$0xf]  ;;  %v6071_v31 = vld [vmem:[%s7498_s10 + $0x3c] sm:$0xf]  ;;  %v2081_v56 = vrot.slane %v5945_v41, 5  ;;  %v2530_v41 = vrot.slane %v2529_v28, 4 }
  0xb4   : > { %v6111_v9 = vcombine.low %v2477_v19, %v2487_v4  ;;  %7107 = vmatpush3.bf16.msra.mxu0 %v7310_v40  ;;  %v1557_v40 = vshrl.u32 %v5877_v13, 16  ;;  %v2078_v52 = vrot.slane %v5944_v36, 5  ;;  %v6073_v19 = vld [vmem:[%s7498_s10 + $0x44] sm:$0x1]  ;;  %v2513_v1 = vshrl.u32 %v6071_v31, 16 }
  0xb5   : > { %7155 = vmatpush3.bf16.msra.mxu1 %v7311_v27  ;;  %7108 = vmatprep.subr.bf16.mxu0 %v7314_v62  ;;  %v1544_v27 = vshrl.u32 %v5876_v3, 16  ;;  %v2516_v2 = vshll.u32 %v6071_v31, 16  ;;  %v5880_v13 = vld [vmem:[%s7498_s10 + $0x34] sm:$0xf]  ;;  %v2532_v18 = vshll.u32 %v6073_v19, 16 }
  0xb6   : > { %7156 = vmatprep.subr.bf16.mxu1 %v7315_v8  ;;  %4435 = vmatprep.mubr.bf16.mxu1 %v6111_v9  ;;  %v1559_v50 = vrot.slane %v1557_v40, 4  ;;  %v2079_v61 = vsel %vm7512_vm4, %v5985_v47, %v2078_v52  ;;  %v2515_v11 = vrot.slane %v2513_v1, 4  ;;  %v1577_v32 = vshll.u32 %v5880_v13, 16  ;;  %v6075_v40 = vld [vmem:[%s7498_s10 + $0x4c] sm:$0xf] }
  0xb7   : > { %v1546_v38 = vrot.slane %v1544_v27, 4  ;;  %4275 = vmatmul.mubr.bf16.gmra.mrb[68].mxu0 %v7960_v30  ;;  %v2518_v12 = vrot.slane %v2516_v2, 5  ;;  %v5948_v27 = vld [vmem:[%s7498_s10 + $0x44] sm:$0x1]  ;;  %v1581_v33 = vshrl.u32 %v5880_v13, 16  ;;  %v2546_v19 = vshll.u32 %v6075_v40, 16 }
  0xb8   : > { %4436 = vmatmul.mubr.bf16.gmra.mrb[68].mxu1 %v7308_v60  ;;  %7109 = vmatpush3.bf16.msra.mxu0 %v7314_v62  ;;  %v1560_v59 = vor.u32 %v1559_v50, %v1555_v49  ;;  %v7309_v60 = vld [vmem:[%s7498_s10 + $0x30] sm:$0xff]   ;;  %v2080_v62 = vrot.slane %v2078_v52, 4  ;;  %v1589_v50 = vrot.slane %v1587_v39, 5  ;;  %v2085_v52 = vrot.slane %v5947_v26, 5 }
  0xb9   : > { %7157 = vmatpush3.bf16.msra.mxu1 %v7315_v8  ;;  %7110 = vmatprep.subr.bf16.mxu0 %v7318_v29  ;;  %v1550_v54 = vor.u32 %v1549_v44, %v1546_v38  ;;  %v7322_v8 = vld [vmem:[%s9598_s1 + $0x220] sm:$0xff]   ;;  %v2519_v23 = vor.u32 %v2518_v12, %v2515_v11  ;;  %v1573_v38 = vrot.slane %v1571_v25, 5  ;;  %v1583_v43 = vrot.slane %v1581_v33, 4  ;;  %v6076_v47 = vld [vmem:[%s7498_s10 + $0x50] sm:$0x1] }
  0xba   : > { %4282 = vmatprep.mubr.bf16.mxu0 %v6000_v21  ;;  %7158 = vmatprep.subr.bf16.mxu1 %v7319_v42  ;;  %v1561_v3 = vrot.slane %v1560_v59, 4  ;;  %v2082_v4 = vsel %vm7512_vm4, %v2080_v62, %v2081_v56  ;;  %v7323_v21 = vld [vmem:[%s9599_s2 + $0x20] sm:$0xff]   ;;  %v2086_v58 = vsel %vm7512_vm4, %v5986_v45, %v2085_v52  ;;  %v2087_v59 = vrot.slane %v2085_v52, 4  ;;  %v6077_v28 = vld [vmem:[%s7498_s10 + $0x54] sm:$0xf] }
  0xbb   : > { %v1551_v0 = vrot.slane %v1550_v54, 4  ;;  %4443 = vmatprep.mubr.bf16.mxu1 %v6112_v63  ;;  %v6001_v10 = vcombine.low %v2079_v61, %v2082_v4  ;;  %v2520_v36 = vrot.slane %v2519_v23, 4  ;;  %v7312_v44 = vld [vmem:[%s7498_s10 + $0x3c] sm:$0xff]   ;;  %v2088_v54 = vrot.slane %v5948_v27, 5  ;;  %v7326_v23 = vld [vmem:[%s9598_s1 + $0x228] sm:$0xff]  }
  0xbc   : > { %7111 = vmatpush3.bf16.msra.mxu0 %v7318_v29  ;;  %v1566_v15 = vsel %vm7521_vm5, %v1561_v3, %v1565_v55  ;;  %v2534_v29 = vrot.slane %v2532_v18, 5  ;;  %v2537_v55 = vshrl.u32 %v6074_v34, 16  ;;  %v2540_v62 = vshll.u32 %v6074_v34, 16  ;;  %v5882_v63 = vld [vmem:[%s7498_s10 + $0x3c] sm:$0xf] }
  0xbd   : > { %7159 = vmatpush3.bf16.msra.mxu1 %v7319_v42  ;;  %v1556_v9 = vsel %vm7521_vm5, %v1551_v0, %v1555_v49  ;;  %7112 = vmatprep.subr.bf16.mxu0 %v7322_v8  ;;  %v1579_v42 = vrot.slane %v1577_v32, 5  ;;  %v2525_v48 = vsel %vm7521_vm5, %v2520_v36, %v2524_v16  ;;  %v1574_v49 = vor.u32 %v1573_v38, %v1570_v37  ;;  %v5883_v4 = vld [vmem:[%s7498_s10 + $0x40] sm:$0xf]  ;;  %v6079_v52 = vld [vmem:[%s7498_s10 + $0x5c] sm:$0x1] }
  0xbe   : > { %v7994_v22 = vcombine.low %v1556_v9, %v1566_v15  ;;  %7160 = vmatprep.subr.bf16.mxu1 %v7323_v21  ;;  %v2535_v31 = vsel %vm7521_vm5, %v2530_v41, %v2534_v29  ;;  %v2539_v61 = vrot.slane %v2537_v55, 4  ;;  %v2089_v1 = vsel %vm7512_vm4, %v2087_v59, %v2088_v54  ;;  %v5884_v9 = vld [vmem:[%s7498_s10 + $0x44] sm:$0x1]  ;;  %v5950_v15 = vld [vmem:[%s7498_s10 + $0x4c] sm:$0xf] }
  0xbf   : > { %v1584_v53 = vor.u32 %v1583_v43, %v1579_v42  ;;  %v6113_v56 = vcombine.low %v2525_v48, %v2535_v31  ;;  %v1575_v57 = vrot.slane %v1574_v49, 4  ;;  %v2550_v2 = vshrl.u32 %v6075_v40, 16  ;;  %v7327_v29 = vld [vmem:[%s9599_s2 + $0x28] sm:$0xff]  }
  0xc0   : > { %4444 = vmatmul.mubr.bf16.gmra.mrb[72].mxu1 %v7309_v60  ;;  %7113 = vmatpush3.bf16.msra.mxu0 %v7322_v8  ;;  %v2556_v3 = vshll.u32 %v6076_v47, 16  ;;  %v6002_v6 = vcombine.low %v2086_v58, %v2089_v1  ;;  %v2542_v7 = vrot.slane %v2540_v62, 5  ;;  %v2548_v8 = vrot.slane %v2546_v19, 5  ;;  %v7313_v48 = vld [vmem:[%s7498_s10 + $0x48] sm:$0xff]   ;;  %v7330_v19 = vld [vmem:[%s9598_s1 + $0x230] sm:$0xff]  }
  0xc1   : > { %4283 = vmatmul.mubr.bf16.gmra.mrb[72].mxu0 %v7994_v22  ;;  %7161 = vmatpush3.bf16.msra.mxu1 %v7323_v21  ;;  %v1585_v60 = vrot.slane %v1584_v53, 4  ;;  %v1580_v0 = vsel %vm7521_vm5, %v1575_v57, %v1579_v42  ;;  %v2552_v12 = vrot.slane %v2550_v2, 4  ;;  %v1592_v14 = vshrl.u32 %v5882_v63, 16  ;;  %v5951_v21 = vld [vmem:[%s7498_s10 + $0x50] sm:$0x1] }
  0xc2   : > { %4290 = vmatprep.mubr.bf16.mxu0 %v6001_v10  ;;  %4451 = vmatprep.mubr.bf16.mxu1 %v6113_v56  ;;  %v5949_v10 = vld [vmem:[%s7498_s10 + $0x48] sm:$0xe]  ;;  %v2558_v13 = vrot.slane %v2556_v3, 5  ;;  %v2543_v16 = vor.u32 %v2542_v7, %v2539_v61  ;;  %v1595_v17 = vshll.u32 %v5882_v63, 16  ;;  %v1601_v18 = vshll.u32 %v5883_v4, 16 }
  0xc3   : > { %v1590_v5 = vsel %vm7521_vm5, %v1585_v60, %v1589_v50  ;;  %v1605_v20 = vshrl.u32 %v5883_v4, 16  ;;  %v2553_v24 = vor.u32 %v2552_v12, %v2548_v8  ;;  %v1594_v25 = vrot.slane %v1592_v14, 4  ;;  %7114 = vmatprep.subr.bf16.mxu0 %v7326_v23  ;;  %7162 = vmatprep.subr.bf16.mxu1 %v7327_v29  ;;  %v5885_v57 = vld [vmem:[%s7498_s10 + $0x48] sm:$0xf]  ;;  %v5886_v62 = vld [vmem:[%s7498_s10 + $0x4c] sm:$0xf] }
  0xc4   : > { %v8019_v11 = vcombine.low %v1580_v0, %v1590_v5  ;;  %v1611_v26 = vshll.u32 %v5884_v9, 16  ;;  %v5987_v27 = vrot.slane %v5949_v10, 9  ;;  %v2544_v32 = vrot.slane %v2543_v16, 4  ;;  %7115 = vmatpush3.bf16.msra.mxu0 %v7326_v23  ;;  %v5887_v3 = vld [vmem:[%s7498_s10 + $0x50] sm:$0x1] }
  0xc5   : > { %v1597_v33 = vrot.slane %v1595_v17, 5  ;;  %v1603_v34 = vrot.slane %v1601_v18, 5  ;;  %v1607_v36 = vrot.slane %v1605_v20, 4  ;;  %v2554_v37 = vrot.slane %v2553_v24, 4  ;;  %7163 = vmatpush3.bf16.msra.mxu1 %v7327_v29  ;;  %v5952_v4 = vld [vmem:[%s7498_s10 + $0x54] sm:$0xe]  ;;  %7116 = vmatprep.subr.bf16.mxu0 %v7330_v19 }
  0xc6   : > { %v1613_v38 = vrot.slane %v1611_v26, 5  ;;  %v2092_v39 = vrot.slane %v5950_v15, 5  ;;  %v2095_v40 = vrot.slane %v5951_v21, 5  ;;  %v2549_v41 = vsel %vm7521_vm5, %v2544_v32, %v2548_v8  ;;  %v7331_v5 = vld [vmem:[%s9599_s2 + $0x30] sm:$0xff]   ;;  %v5953_v10 = vld [vmem:[%s7498_s10 + $0x58] sm:$0xf] }
  0xc7   : > { %v1598_v42 = vor.u32 %v1597_v33, %v1594_v25  ;;  %v1608_v43 = vor.u32 %v1607_v36, %v1603_v34  ;;  %v2561_v45 = vshrl.u32 %v6077_v28, 16  ;;  %v2559_v47 = vsel %vm7521_vm5, %v2554_v37, %v2558_v13  ;;  %v5954_v12 = vld [vmem:[%s7498_s10 + $0x5c] sm:$0x1]  ;;  %v6080_v13 = vld [vmem:[%s7498_s10 + $0x60] sm:$0xf]  ;;  %7164 = vmatprep.subr.bf16.mxu1 %v7331_v5  ;;  %v7316_v36 = vld [vmem:[%s7498_s10 + $0x54] sm:$0xff]  }
  0xc8   : > { %4452 = vmatmul.mubr.bf16.gmra.mrb[76].mxu1 %v7312_v44  ;;  %v6078_v44 = vld [vmem:[%s7498_s10 + $0x58] sm:$0xf]  ;;  %v2093_v49 = vsel %vm7512_vm4, %v5987_v27, %v2092_v39  ;;  %v2094_v50 = vrot.slane %v2092_v39, 4  ;;  %v2564_v31 = vshll.u32 %v6077_v28, 16  ;;  %v6114_v53 = vcombine.low %v2549_v41, %v2559_v47  ;;  %v6081_v18 = vld [vmem:[%s7498_s10 + $0x64] sm:$0xf]  ;;  %7117 = vmatpush3.bf16.msra.mxu0 %v7330_v19 }
  0xc9   : > { %4291 = vmatmul.mubr.bf16.gmra.mrb[76].mxu0 %v8019_v11  ;;  %v1599_v54 = vrot.slane %v1598_v42, 4  ;;  %v1609_v55 = vrot.slane %v1608_v43, 4  ;;  %v2563_v56 = vrot.slane %v2561_v45, 4  ;;  %v2570_v60 = vshll.u32 %v6078_v44, 16  ;;  %7165 = vmatpush3.bf16.msra.mxu1 %v7331_v5  ;;  %v7334_v41 = vld [vmem:[%s9598_s1 + $0x238] sm:$0xff]  }
  0xca   : > { %4298 = vmatprep.mubr.bf16.mxu0 %v6002_v6  ;;  %v2096_v58 = vsel %vm7512_vm4, %v2094_v50, %v2095_v40  ;;  %v2566_v59 = vrot.slane %v2564_v31, 5  ;;  %v2574_v61 = vshrl.u32 %v6078_v44, 16  ;;  %4459 = vmatprep.mubr.bf16.mxu1 %v6114_v53  ;;  %v2580_v2 = vshll.u32 %v6079_v52, 16  ;;  %v6082_v44 = vld [vmem:[%s7498_s10 + $0x68] sm:$0x1]  ;;  %v7335_v5 = vld [vmem:[%s9599_s2 + $0x38] sm:$0xff]  }
  0xcb   : > { %v1604_v63 = vsel %vm7521_vm5, %v1599_v54, %v1603_v34  ;;  %v1614_v0 = vsel %vm7521_vm5, %v1609_v55, %v1613_v38  ;;  %v6003_v1 = vcombine.low %v2093_v49, %v2096_v58  ;;  %v2572_v8 = vrot.slane %v2570_v60, 5  ;;  %v5888_v31 = vld [vmem:[%s7498_s10 + $0x54] sm:$0xf]  ;;  %7118 = vmatprep.subr.bf16.mxu0 %v7334_v41  ;;  %v5955_v19 = vld [vmem:[%s7498_s10 + $0x60] sm:$0xe]  ;;  %7166 = vmatprep.subr.bf16.mxu1 %v7335_v5 }
  0xcc   : > { %v8056_v6 = vcombine.low %v1604_v63, %v1614_v0  ;;  %v2567_v7 = vor.u32 %v2566_v59, %v2563_v56  ;;  %v2576_v9 = vrot.slane %v2574_v61, 4  ;;  %v2582_v14 = vrot.slane %v2580_v2, 5  ;;  %7119 = vmatpush3.bf16.msra.mxu0 %v7334_v41 }
  0xcd   : > { %v1616_v15 = vshrl.u32 %v5885_v57, 16  ;;  %v1619_v16 = vshll.u32 %v5885_v57, 16  ;;  %v1625_v17 = vshll.u32 %v5886_v62, 16  ;;  %v1629_v23 = vshrl.u32 %v5886_v62, 16  ;;  %v5889_v57 = vld [vmem:[%s7498_s10 + $0x58] sm:$0xf]  ;;  %7167 = vmatpush3.bf16.msra.mxu1 %v7335_v5 }
  0xce   : > { %v2568_v20 = vrot.slane %v2567_v7, 4  ;;  %v2577_v21 = vor.u32 %v2576_v9, %v2572_v8  ;;  %v1635_v24 = vshll.u32 %v5887_v3, 16  ;;  %v5988_v28 = vrot.slane %v5952_v4, 9  ;;  %v5890_v62 = vld [vmem:[%s7498_s10 + $0x5c] sm:$0x1] }
  0xcf   : > { %v1618_v25 = vrot.slane %v1616_v15, 4  ;;  %v1621_v26 = vrot.slane %v1619_v16, 5  ;;  %v1627_v27 = vrot.slane %v1625_v17, 5  ;;  %v1631_v33 = vrot.slane %v1629_v23, 4  ;;  %v5956_v3 = vld [vmem:[%s7498_s10 + $0x64] sm:$0xf] }
  0xd0   : > { %4460 = vmatmul.mubr.bf16.gmra.mrb[80].mxu1 %v7313_v48  ;;  %v2573_v29 = vsel %vm7521_vm5, %v2568_v20, %v2572_v8  ;;  %v2578_v32 = vrot.slane %v2577_v21, 4  ;;  %v1637_v34 = vrot.slane %v1635_v24, 5  ;;  %v2099_v38 = vrot.slane %v5953_v10, 5  ;;  %v5957_v4 = vld [vmem:[%s7498_s10 + $0x68] sm:$0x1] }
  0xd1   : > { %4299 = vmatmul.mubr.bf16.gmra.mrb[80].mxu0 %v8056_v6  ;;  %v1622_v37 = vor.u32 %v1621_v26, %v1618_v25  ;;  %v2102_v39 = vrot.slane %v5954_v12, 5  ;;  %v2585_v40 = vshrl.u32 %v6080_v13, 16  ;;  %v1632_v43 = vor.u32 %v1631_v33, %v1627_v27  ;;  %v6083_v12 = vld [vmem:[%s7498_s10 + $0x6c] sm:$0xf] }
  0xd2   : > { %4306 = vmatprep.mubr.bf16.mxu0 %v6003_v1  ;;  %v2583_v42 = vsel %vm7521_vm5, %v2578_v32, %v2582_v14  ;;  %v2588_v45 = vshll.u32 %v6080_v13, 16  ;;  %v2594_v47 = vshll.u32 %v6081_v18, 16  ;;  %v2100_v50 = vsel %vm7512_vm4, %v5988_v28, %v2099_v38 }
  0xd3   : > { %v6115_v48 = vcombine.low %v2573_v29, %v2583_v42  ;;  %v1623_v49 = vrot.slane %v1622_v37, 4  ;;  %v2101_v52 = vrot.slane %v2099_v38, 4  ;;  %v1633_v53 = vrot.slane %v1632_v43, 4  ;;  %v6085_v38 = vld [vmem:[%s7498_s10 + $0x74] sm:$0x1]  ;;  %v7317_v42 = vld [vmem:[%s7498_s10 + $0x60] sm:$0xff]  }
  0xd4   : > { %v2587_v54 = vrot.slane %v2585_v40, 4  ;;  %v2590_v55 = vrot.slane %v2588_v45, 5  ;;  %v2596_v56 = vrot.slane %v2594_v47, 5  ;;  %v2598_v60 = vshrl.u32 %v6081_v18, 16  ;;  %v5891_v45 = vld [vmem:[%s7498_s10 + $0x60] sm:$0xf] }
  0xd5   : > { %4467 = vmatprep.mubr.bf16.mxu1 %v6115_v48  ;;  %v1628_v58 = vsel %vm7521_vm5, %v1623_v49, %v1627_v27  ;;  %v2103_v59 = vsel %vm7512_vm4, %v2101_v52, %v2102_v39  ;;  %v2604_v61 = vshll.u32 %v6082_v44, 16  ;;  %v1638_v63 = vsel %vm7521_vm5, %v1633_v53, %v1637_v34  ;;  %v6084_v27 = vld [vmem:[%s7498_s10 + $0x70] sm:$0xf]  ;;  %v5892_v52 = vld [vmem:[%s7498_s10 + $0x64] sm:$0xf] }
  0xd6   : > { %v6004_v0 = vcombine.low %v2100_v50, %v2103_v59  ;;  %v2591_v1 = vor.u32 %v2590_v55, %v2587_v54  ;;  %v1640_v2 = vshrl.u32 %v5888_v31, 16  ;;  %v8089_v7 = vcombine.low %v1628_v58, %v1638_v63  ;;  %v5959_v58 = vld [vmem:[%s7498_s10 + $0x70] sm:$0xf] }
  0xd7   : > { %v2600_v8 = vrot.slane %v2598_v60, 4  ;;  %v2606_v9 = vrot.slane %v2604_v61, 5  ;;  %v1643_v10 = vshll.u32 %v5888_v31, 16  ;;  %v1649_v15 = vshll.u32 %v5889_v57, 16  ;;  %v5893_v31 = vld [vmem:[%s7498_s10 + $0x68] sm:$0x1] }
  0xd8   : > { %4468 = vmatmul.mubr.bf16.gmra.mrb[84].mxu1 %v7316_v36  ;;  %9636 = vst [vmem:[#allocation3_spill] sm:$0xff] %v8089_v7  ;;  %v2592_v13 = vrot.slane %v2591_v1, 4  ;;  %v1642_v14 = vrot.slane %v1640_v2, 4  ;;  %v1653_v16 = vshrl.u32 %v5889_v57, 16  ;;  %v1659_v20 = vshll.u32 %v5890_v62, 16 }
  0xd9   : > { %4307 = vmatmul.mubr.bf16.gmra.mrb[84].mxu0 %v8089_v7  ;;  %v2601_v17 = vor.u32 %v2600_v8, %v2596_v56  ;;  %v1645_v18 = vrot.slane %v1643_v10, 5  ;;  %v5989_v21 = vrot.slane %v5955_v19, 9  ;;  %v1651_v24 = vrot.slane %v1649_v15, 5  ;;  %v5958_v57 = vld [vmem:[%s7498_s10 + $0x6c] sm:$0xe] }
  0xda   : > { %4314 = vmatprep.mubr.bf16.mxu0 %v6004_v0  ;;  %v2597_v23 = vsel %vm7521_vm5, %v2592_v13, %v2596_v56  ;;  %v1655_v25 = vrot.slane %v1653_v16, 4  ;;  %v2106_v26 = vrot.slane %v5956_v3, 5  ;;  %v1661_v32 = vrot.slane %v1659_v20, 5  ;;  %v5960_v19 = vld [vmem:[%s7498_s10 + $0x74] sm:$0x1] }
  0xdb   : > { %v2602_v28 = vrot.slane %v2601_v17, 4  ;;  %v1646_v29 = vor.u32 %v1645_v18, %v1642_v14  ;;  %v2109_v33 = vrot.slane %v5957_v4, 5  ;;  %v2609_v39 = vshrl.u32 %v6083_v12, 16  ;;  %v6087_v10 = vld [vmem:[%s7498_s10 + $0x7c] sm:$0xf] }
  0xdc   : > { %v1656_v34 = vor.u32 %v1655_v25, %v1651_v24  ;;  %v2107_v36 = vsel %vm7512_vm4, %v5989_v21, %v2106_v26  ;;  %v2108_v37 = vrot.slane %v2106_v26, 4  ;;  %v2612_v43 = vshll.u32 %v6083_v12, 16 }
  0xdd   : > { %v2607_v40 = vsel %vm7521_vm5, %v2602_v28, %v2606_v9  ;;  %v1647_v41 = vrot.slane %v1646_v29, 4  ;;  %v2618_v44 = vshll.u32 %v6084_v27, 16  ;;  %v2611_v50 = vrot.slane %v2609_v39, 4  ;;  %v6086_v9 = vld [vmem:[%s7498_s10 + $0x78] sm:$0xf] }
  0xde   : > { %v6116_v47 = vcombine.low %v2597_v23, %v2607_v40  ;;  %v1657_v48 = vrot.slane %v1656_v34, 4  ;;  %v2110_v49 = vsel %vm7512_vm4, %v2108_v37, %v2109_v33  ;;  %v2614_v55 = vrot.slane %v2612_v43, 5  ;;  %v7320_v33 = vld [vmem:[%s7498_s10 + $0x6c] sm:$0xff]  }
  0xdf   : > { %v1652_v53 = vsel %vm7521_vm5, %v1647_v41, %v1651_v24  ;;  %v6005_v54 = vcombine.low %v2107_v36, %v2110_v49  ;;  %v2620_v56 = vrot.slane %v2618_v44, 5  ;;  %v2622_v60 = vshrl.u32 %v6084_v27, 16  ;;  %v6088_v41 = vld [vmem:[%s7498_s10 + $0x80] sm:$0x1]  ;;  %v5894_v43 = vld [vmem:[%s7498_s10 + $0x6c] sm:$0xf] }
  0xe0   : > { %4475 = vmatprep.mubr.bf16.mxu1 %v6116_v47  ;;  %v1662_v59 = vsel %vm7521_vm5, %v1657_v48, %v1661_v32  ;;  %v2628_v61 = vshll.u32 %v6085_v38, 16  ;;  %v1664_v62 = vshrl.u32 %v5891_v45, 16  ;;  %v2615_v0 = vor.u32 %v2614_v55, %v2611_v50  ;;  %v5895_v49 = vld [vmem:[%s7498_s10 + $0x70] sm:$0xf]  ;;  %v5896_v50 = vld [vmem:[%s7498_s10 + $0x74] sm:$0x1] }
  0xe1   : > { %v8114_v63 = vcombine.low %v1652_v53, %v1662_v59  ;;  %4476 = vmatmul.mubr.bf16.gmra.mrb[88].mxu1 %v7317_v42  ;;  %v1667_v1 = vshll.u32 %v5891_v45, 16  ;;  %v1673_v2 = vshll.u32 %v5892_v52, 16  ;;  %v2624_v3 = vrot.slane %v2622_v60, 4 }
  0xe2   : > { %v2630_v4 = vrot.slane %v2628_v61, 5  ;;  %v1666_v5 = vrot.slane %v1664_v62, 4  ;;  %v1677_v8 = vshrl.u32 %v5892_v52, 16  ;;  %v2616_v12 = vrot.slane %v2615_v0, 4  ;;  %v5962_v0 = vld [vmem:[%s7498_s10 + $0x7c] sm:$0xf] }
  0xe3   : > { %9637 = vst [vmem:[#allocation4_spill] sm:$0xff] %v8114_v63  ;;  %4315 = vmatmul.mubr.bf16.gmra.mrb[88].mxu0 %v8114_v63  ;;  %v1669_v13 = vrot.slane %v1667_v1, 5  ;;  %v1675_v14 = vrot.slane %v1673_v2, 5  ;;  %v1683_v15 = vshll.u32 %v5893_v31, 16  ;;  %v2625_v16 = vor.u32 %v2624_v3, %v2620_v56  ;;  %v6131_v63 = vld [vmem:[%s7498_s10 + $0x2c] sm:$0x1] }
  0xe4   : > { %4322 = vmatprep.mubr.bf16.mxu0 %v6005_v54  ;;  %v1679_v17 = vrot.slane %v1677_v8, 4  ;;  %v5990_v18 = vrot.slane %v5958_v57, 9  ;;  %v2113_v20 = vrot.slane %v5959_v58, 5  ;;  %v2621_v21 = vsel %vm7521_vm5, %v2616_v12, %v2620_v56 }
  0xe5   : > { %v1670_v23 = vor.u32 %v1669_v13, %v1666_v5  ;;  %v1685_v24 = vrot.slane %v1683_v15, 5  ;;  %v2116_v25 = vrot.slane %v5960_v19, 5  ;;  %v2626_v26 = vrot.slane %v2625_v16, 4  ;;  %v5961_v19 = vld [vmem:[%s7498_s10 + $0x78] sm:$0xe] }
  0xe6   : > { %v1680_v27 = vor.u32 %v1679_v17, %v1675_v14  ;;  %v2114_v28 = vsel %vm7512_vm4, %v5990_v18, %v2113_v20  ;;  %v2115_v29 = vrot.slane %v2113_v20, 4  ;;  %v2633_v34 = vshrl.u32 %v6086_v9, 16  ;;  %v5963_v5 = vld [vmem:[%s7498_s10 + $0x80] sm:$0x1]  ;;  %v6089_v13 = vld [vmem:[%s7498_s10 + $0x84] sm:$0xf] }
  0xe7   : > { %v1671_v32 = vrot.slane %v1670_v23, 4  ;;  %v2636_v36 = vshll.u32 %v6086_v9, 16  ;;  %v2642_v37 = vshll.u32 %v6087_v10, 16  ;;  %v2631_v38 = vsel %vm7521_vm5, %v2626_v26, %v2630_v4  ;;  %v6090_v18 = vld [vmem:[%s7498_s10 + $0x88] sm:$0xf] }
  0xe8   : > { %v1681_v39 = vrot.slane %v1680_v27, 4  ;;  %v2117_v40 = vsel %vm7512_vm4, %v2115_v29, %v2116_v25  ;;  %v2646_v42 = vshrl.u32 %v6087_v10, 16  ;;  %v6117_v44 = vcombine.low %v2621_v21, %v2631_v38  ;;  %v6091_v26 = vld [vmem:[%s7498_s10 + $0x8c] sm:$0x1] }
  0xe9   : > { %v1676_v45 = vsel %vm7521_vm5, %v1671_v32, %v1675_v14  ;;  %v6006_v47 = vcombine.low %v2114_v28, %v2117_v40  ;;  %v2635_v48 = vrot.slane %v2633_v34, 4  ;;  %v2638_v31 = vrot.slane %v2636_v36, 5  ;;  %v5898_v34 = vld [vmem:[%s7498_s10 + $0x7c] sm:$0xf]  ;;  %v5899_v40 = vld [vmem:[%s7498_s10 + $0x80] sm:$0x1] }
  0xea   : > { %v1686_v52 = vsel %vm7521_vm5, %v1681_v39, %v1685_v24  ;;  %v2644_v53 = vrot.slane %v2642_v37, 5  ;;  %v2648_v54 = vrot.slane %v2646_v42, 4  ;;  %4483 = vmatprep.mubr.bf16.mxu1 %v6117_v44  ;;  %v2652_v56 = vshll.u32 %v6088_v41, 16  ;;  %v7321_v24 = vld [vmem:[%s7498_s10 + $0x78] sm:$0xff]   ;;  %v5964_v41 = vld [vmem:[%s7498_s10 + $0x84] sm:$0xe] }
  0xeb   : > { %v8136_v55 = vcombine.low %v1676_v45, %v1686_v52  ;;  %v1688_v57 = vshrl.u32 %v5894_v43, 16  ;;  %v1691_v58 = vshll.u32 %v5894_v43, 16  ;;  %4484 = vmatmul.mubr.bf16.gmra.mrb[92].mxu1 %v7320_v33  ;;  %v2639_v59 = vor.u32 %v2638_v31, %v2635_v48  ;;  %v5897_v33 = vld [vmem:[%s7498_s10 + $0x78] sm:$0xf]  ;;  %v5965_v52 = vld [vmem:[%s7498_s10 + $0x88] sm:$0xf] }
  0xec   : > { %v2649_v60 = vor.u32 %v2648_v54, %v2644_v53  ;;  %v1697_v61 = vshll.u32 %v5895_v49, 16  ;;  %v1701_v62 = vshrl.u32 %v5895_v49, 16  ;;  %v2654_v1 = vrot.slane %v2652_v56, 5 }
  0xed   : > { %9638 = vst [vmem:[#allocation5_spill] sm:$0xff] %v8136_v55  ;;  %4323 = vmatmul.mubr.bf16.gmra.mrb[92].mxu0 %v8136_v55  ;;  %v1690_v2 = vrot.slane %v1688_v57, 4  ;;  %v1693_v3 = vrot.slane %v1691_v58, 5  ;;  %v1707_v4 = vshll.u32 %v5896_v50, 16  ;;  %v2640_v8 = vrot.slane %v2639_v59, 4 }
  0xee   : > { %4330 = vmatprep.mubr.bf16.mxu0 %v6006_v47  ;;  %v2650_v9 = vrot.slane %v2649_v60, 4  ;;  %v1699_v10 = vrot.slane %v1697_v61, 5  ;;  %v1703_v12 = vrot.slane %v1701_v62, 4  ;;  %v5991_v16 = vrot.slane %v5961_v19, 9  ;;  %v5966_v57 = vld [vmem:[%s7498_s10 + $0x8c] sm:$0x1] }
  0xef   : > { %v1694_v14 = vor.u32 %v1693_v3, %v1690_v2  ;;  %v1709_v15 = vrot.slane %v1707_v4, 5  ;;  %v2120_v17 = vrot.slane %v5962_v0, 5  ;;  %v2645_v20 = vsel %vm7521_vm5, %v2640_v8, %v2644_v53  ;;  %v6092_v58 = vld [vmem:[%s7498_s10 + $0x90] sm:$0xf] }
  0xf0   : > { %v2655_v21 = vsel %vm7521_vm5, %v2650_v9, %v2654_v1  ;;  %v1704_v23 = vor.u32 %v1703_v12, %v1699_v10  ;;  %v2123_v25 = vrot.slane %v5963_v5, 5  ;;  %v2657_v37 = vshrl.u32 %v6089_v13, 16 }
  0xf1   : > { %v6118_v27 = vcombine.low %v2645_v20, %v2655_v21  ;;  %v1695_v28 = vrot.slane %v1694_v14, 4  ;;  %v2121_v29 = vsel %vm7512_vm4, %v5991_v16, %v2120_v17  ;;  %v2122_v32 = vrot.slane %v2120_v17, 4 }
  0xf2   : > { %v1705_v36 = vrot.slane %v1704_v23, 4  ;;  %v2660_v38 = vshll.u32 %v6089_v13, 16  ;;  %v2666_v39 = vshll.u32 %v6090_v18, 16  ;;  %v2670_v44 = vshrl.u32 %v6090_v18, 16 }
  0xf3   : > { %4491 = vmatprep.mubr.bf16.mxu1 %v6118_v27  ;;  %v1700_v42 = vsel %vm7521_vm5, %v1695_v28, %v1699_v10  ;;  %v2124_v43 = vsel %vm7512_vm4, %v2122_v32, %v2123_v25  ;;  %v2676_v45 = vshll.u32 %v6091_v26, 16  ;;  %v2659_v49 = vrot.slane %v2657_v37, 4  ;;  %v6093_v27 = vld [vmem:[%s7498_s10 + $0x94] sm:$0xf]  ;;  %v6094_v37 = vld [vmem:[%s7498_s10 + $0x98] sm:$0x1] }
  0xf4   : > { %v1710_v47 = vsel %vm7521_vm5, %v1705_v36, %v1709_v15  ;;  %4492 = vmatmul.mubr.bf16.gmra.mrb[96].mxu1 %v7321_v24  ;;  %v6007_v48 = vcombine.low %v2121_v29, %v2124_v43  ;;  %v2662_v50 = vrot.slane %v2660_v38, 5  ;;  %v2668_v53 = vrot.slane %v2666_v39, 5  ;;  %v5900_v43 = vld [vmem:[%s7498_s10 + $0x84] sm:$0xf] }
  0xf5   : > { %v8163_v31 = vcombine.low %v1700_v42, %v1710_v47  ;;  %v2672_v54 = vrot.slane %v2670_v44, 4  ;;  %v2678_v56 = vrot.slane %v2676_v45, 5  ;;  %v1712_v61 = vshrl.u32 %v5897_v33, 16 }
  0xf6   : > { %v2663_v60 = vor.u32 %v2662_v50, %v2659_v49  ;;  %v1715_v62 = vshll.u32 %v5897_v33, 16  ;;  %v1721_v19 = vshll.u32 %v5898_v34, 16  ;;  %v1725_v3 = vshrl.u32 %v5898_v34, 16  ;;  %v7324_v33 = vld [vmem:[%s7498_s10 + $0x84] sm:$0xff]  }
  0xf7   : > { %9639 = vst [vmem:[#allocation6_spill] sm:$0xff] %v8163_v31  ;;  %4331 = vmatmul.mubr.bf16.gmra.mrb[96].mxu0 %v8163_v31  ;;  %v2673_v2 = vor.u32 %v2672_v54, %v2668_v53  ;;  %v1731_v4 = vshll.u32 %v5899_v40, 16  ;;  %v5992_v5 = vrot.slane %v5964_v41, 9  ;;  %v1714_v12 = vrot.slane %v1712_v61, 4 }
  0xf8   : > { %4338 = vmatprep.mubr.bf16.mxu0 %v6007_v48  ;;  %v2664_v10 = vrot.slane %v2663_v60, 4  ;;  %v1717_v13 = vrot.slane %v1715_v62, 5  ;;  %v1723_v14 = vrot.slane %v1721_v19, 5  ;;  %v1727_v18 = vrot.slane %v1725_v3, 4  ;;  %v5902_v62 = vld [vmem:[%s7498_s10 + $0x8c] sm:$0x1] }
  0xf9   : > { %v2674_v17 = vrot.slane %v2673_v2, 4  ;;  %v1733_v20 = vrot.slane %v1731_v4, 5  ;;  %v2127_v21 = vrot.slane %v5965_v52, 5  ;;  %v2130_v26 = vrot.slane %v5966_v57, 5  ;;  %v5901_v57 = vld [vmem:[%s7498_s10 + $0x88] sm:$0xf] }
  0xfa   : > { %v2669_v24 = vsel %vm7521_vm5, %v2664_v10, %v2668_v53  ;;  %v1718_v25 = vor.u32 %v1717_v13, %v1714_v12  ;;  %v2681_v28 = vshrl.u32 %v6092_v58, 16  ;;  %v1728_v32 = vor.u32 %v1727_v18, %v1723_v14  ;;  %v5967_v18 = vld [vmem:[%s7498_s10 + $0x90] sm:$0xe] }
  0xfb   : > { %v2679_v29 = vsel %vm7521_vm5, %v2674_v17, %v2678_v56  ;;  %v2128_v34 = vsel %vm7512_vm4, %v5992_v5, %v2127_v21  ;;  %v2129_v36 = vrot.slane %v2127_v21, 4  ;;  %v2684_v42 = vshll.u32 %v6092_v58, 16 }
  0xfc   : > { %v6119_v39 = vcombine.low %v2669_v24, %v2679_v29  ;;  %v1719_v40 = vrot.slane %v1718_v25, 4  ;;  %v2683_v41 = vrot.slane %v2681_v28, 4  ;;  %v1729_v45 = vrot.slane %v1728_v32, 4 }
  0xfd   : > { %v2131_v47 = vsel %vm7512_vm4, %v2129_v36, %v2130_v26  ;;  %v2690_v48 = vshll.u32 %v6093_v27, 16  ;;  %v2694_v49 = vshrl.u32 %v6093_v27, 16  ;;  %v2686_v54 = vrot.slane %v2684_v42, 5  ;;  %v5969_v42 = vld [vmem:[%s7498_s10 + $0x98] sm:$0x1] }
  0xfe   : > { %4499 = vmatprep.mubr.bf16.mxu1 %v6119_v39  ;;  %v1724_v52 = vsel %vm7521_vm5, %v1719_v40, %v1723_v14  ;;  %v6008_v53 = vcombine.low %v2128_v34, %v2131_v47  ;;  %v2700_v56 = vshll.u32 %v6094_v37, 16  ;;  %v1734_v58 = vsel %vm7521_vm5, %v1729_v45, %v1733_v20  ;;  %v5968_v37 = vld [vmem:[%s7498_s10 + $0x94] sm:$0xf] }
  0xff   : > { %4500 = vmatmul.mubr.bf16.gmra.mrb[100].mxu1 %v7324_v33  ;;  %v2692_v60 = vrot.slane %v2690_v48, 5  ;;  %v2696_v61 = vrot.slane %v2694_v49, 4  ;;  %v1736_v19 = vshrl.u32 %v5900_v43, 16  ;;  %v8210_v3 = vcombine.low %v1724_v52, %v1734_v58  ;;  %v7325_v47 = vld [vmem:[%s7498_s10 + $0x90] sm:$0xff]   ;;  %v6096_v52 = vld [vmem:[%s7498_s10 + $0xa0] sm:$0xf] }
 0x100   : > { %v2687_v4 = vor.u32 %v2686_v54, %v2683_v41  ;;  %v2702_v5 = vrot.slane %v2700_v56, 5  ;;  %v1739_v10 = vshll.u32 %v5900_v43, 16  ;;  %v1745_v14 = vshll.u32 %v5901_v57, 16  ;;  %v6095_v43 = vld [vmem:[%s7498_s10 + $0x9c] sm:$0xf] }
 0x101   : > { %9640 = vst [vmem:[#allocation7_spill] sm:$0xff] %v8210_v3  ;;  %v2697_v12 = vor.u32 %v2696_v61, %v2692_v60  ;;  %v1738_v13 = vrot.slane %v1736_v19, 4  ;;  %v1749_v17 = vshrl.u32 %v5901_v57, 16  ;;  %4339 = vmatmul.mubr.bf16.gmra.mrb[100].mxu0 %v8210_v3  ;;  %v1755_v26 = vshll.u32 %v5902_v62, 16  ;;  %v5903_v57 = vld [vmem:[%s7498_s10 + $0x90] sm:$0xf] }
 0x102   : > { %v8167_v59 = vpop.f32.mrb[0].mxu0  ;;  %v2688_v24 = vrot.slane %v2687_v4, 4  ;;  %v1741_v25 = vrot.slane %v1739_v10, 5  ;;  %4346 = vmatprep.mubr.bf16.mxu0 %v6008_v53  ;;  %v1747_v33 = vrot.slane %v1745_v14, 5  ;;  %v6097_v53 = vld [vmem:[%s7498_s10 + $0xa4] sm:$0x1] }
 0x103   : > { %v8169_v0 = vpop.f32.mrb[0].mxu1  ;;  %v8171_v1 = vpop.f32.mrb[1].mxu0  ;;  %v2698_v32 = vrot.slane %v2697_v12, 4  ;;  %v1751_v34 = vrot.slane %v1749_v17, 4  ;;  %v1757_v40 = vrot.slane %v1755_v26, 5  ;;  %v2137_v62 = vrot.slane %v5969_v42, 5 }
 0x104   : > { %v8174_v8 = vpop.f32.mrb[1].mxu1  ;;  %v8176_v9 = vpop.f32.mrb[2].mxu0  ;;  %v6626_v27 = vadd.f32 %v8171_v1, %v8167_v59  ;;  %v2693_v59 = vsel %vm7521_vm5, %v2688_v24, %v2692_v60  ;;  %v1742_v1 = vor.u32 %v1741_v25, %v1738_v13  ;;  %v2705_v19 = vshrl.u32 %v6095_v43, 16  ;;  %v5904_v4 = vld [vmem:[%s7498_s10 + $0x94] sm:$0xf] }
 0x105   : > { %v8178_v15 = vpop.f32.mrb[2].mxu1  ;;  %v8180_v16 = vpop.f32.mrb[3].mxu0  ;;  %v6738_v36 = vadd.f32 %v8174_v8, %v8169_v0  ;;  %v2703_v0 = vsel %vm7521_vm5, %v2698_v32, %v2702_v5  ;;  %v1752_v8 = vor.u32 %v1751_v34, %v1747_v33  ;;  %v2708_v12 = vshll.u32 %v6095_v43, 16  ;;  %v5905_v13 = vld [vmem:[%s7498_s10 + $0x98] sm:$0x1] }
 0x106   : > { %v8182_v23 = vpop.f32.mrb[3].mxu1  ;;  %v6629_v41 = vadd.f32 %v8180_v16, %v8176_v9  ;;  %v6120_v54 = vcombine.low %v2693_v59, %v2703_v0  ;;  %v1743_v56 = vrot.slane %v1742_v1, 4  ;;  %v5993_v9 = vrot.slane %v5967_v18, 9  ;;  %v6126_v3 = vld [vmem:[%s7498_s10 + $0x18] sm:$0xe] }
 0x107   : > { %v8240_v48 = vadd.f32 %v6738_v36, %v6626_v27  ;;  %v6741_v49 = vadd.f32 %v8182_v23, %v8178_v15  ;;  %v2134_v16 = vrot.slane %v5968_v37, 5  ;;  %v1753_v60 = vrot.slane %v1752_v8, 4 }
 0x108   : > { %4507 = vmatprep.mubr.bf16.mxu1 %v6120_v54  ;;  %v1748_v15 = vsel %vm7521_vm5, %v1743_v56, %v1747_v33  ;;  %v2707_v17 = vrot.slane %v2705_v19, 4  ;;  %v2714_v18 = vshll.u32 %v6096_v52, 16  ;;  %v2718_v24 = vshrl.u32 %v6096_v52, 16 }
 0x109   : > { %9641 = vst [vmem:[#allocation8_spill] sm:$0xff] %v8240_v48  ;;  %v8249_v61 = vadd.f32 %v6741_v49, %v6629_v41  ;;  %v2135_v23 = vsel %vm7512_vm4, %v5993_v9, %v2134_v16  ;;  %v2136_v10 = vrot.slane %v2134_v16, 4  ;;  %v1758_v14 = vsel %vm7521_vm5, %v1753_v60, %v1757_v40  ;;  %4508 = vmatmul.mubr.bf16.gmra.mrb[104].mxu1 %v7325_v47 }
 0x10a   : > { %v8196_v44 = vpop.f32.mrb[4].mxu0  ;;  %v8263_v26 = vcombine.low %v1748_v15, %v1758_v14  ;;  %v2710_v32 = vrot.slane %v2708_v12, 5  ;;  %v2724_v33 = vshll.u32 %v6097_v53, 16  ;;  %v2716_v36 = vrot.slane %v2714_v18, 5  ;;  %v7328_v14 = vld [vmem:[%s7498_s10 + $0x9c] sm:$0xff]  }
 0x10b   : > { %v8193_v38 = vpop.f32.mrb[4].mxu1  ;;  %v8200_v50 = vpop.f32.mrb[5].mxu0  ;;  %9642 = vst [vmem:[#allocation9_spill] sm:$0xff] %v8249_v61  ;;  %v2138_v27 = vsel %vm7512_vm4, %v2136_v10, %v2137_v62  ;;  %v2720_v37 = vrot.slane %v2718_v24, 4  ;;  %v1760_v59 = vshrl.u32 %v5903_v57, 16  ;;  %v1763_v42 = vshll.u32 %v5903_v57, 16 }
 0x10c   : > { %v8208_v2 = vpop.f32.mrb[5].mxu1  ;;  %v8213_v21 = vpop.f32.mrb[6].mxu0  ;;  %9643 = vst [vmem:[#allocation10_spill] sm:$0xff] %v8263_v26  ;;  %v6009_v34 = vcombine.low %v2135_v23, %v2138_v27  ;;  %4347 = vmatmul.mubr.bf16.gmra.mrb[104].mxu0 %v8263_v26  ;;  %v2711_v40 = vor.u32 %v2710_v32, %v2707_v17  ;;  %v2726_v41 = vrot.slane %v2724_v33, 5  ;;  %v1769_v43 = vshll.u32 %v5904_v4, 16 }
 0x10d   : > { %v8215_v20 = vpop.f32.mrb[6].mxu1  ;;  %v8220_v28 = vpop.f32.mrb[7].mxu0  ;;  %v2721_v8 = vor.u32 %v2720_v37, %v2716_v36  ;;  %v1762_v47 = vrot.slane %v1760_v59, 4  ;;  %v1773_v49 = vshrl.u32 %v5904_v4, 16  ;;  %v1779_v52 = vshll.u32 %v5905_v13, 16 }
 0x10e   : > { %v8222_v29 = vpop.f32.mrb[7].mxu1  ;;  %4354 = vmatprep.mubr.bf16.mxu0 %v6009_v34  ;;  %v2712_v54 = vrot.slane %v2711_v40, 4  ;;  %v1765_v56 = vrot.slane %v1763_v42, 5  ;;  %v1771_v9 = vrot.slane %v1769_v43, 5  ;;  %v6632_v16 = vadd.f32 %v8200_v50, %v8196_v44  ;;  %v5970_v57 = vld [vmem:[%s7498_s10 + $0x9c] sm:$0xe] }
 0x10f   : > { %v2722_v62 = vrot.slane %v2721_v8, 4  ;;  %v1775_v19 = vrot.slane %v1773_v49, 4  ;;  %v1781_v15 = vrot.slane %v1779_v52, 5  ;;  %v6744_v4 = vadd.f32 %v8208_v2, %v8193_v38  ;;  %v5971_v23 = vld [vmem:[%s7498_s10 + $0xa0] sm:$0xf] }
 0x110   : > { %v2717_v12 = vsel %vm7521_vm5, %v2712_v54, %v2716_v36  ;;  %v1766_v13 = vor.u32 %v1765_v56, %v1762_v47  ;;  %v6635_v44 = vadd.f32 %v8220_v28, %v8213_v21  ;;  %v6747_v50 = vadd.f32 %v8222_v29, %v8215_v20  ;;  %v5972_v17 = vld [vmem:[%s7498_s10 + $0xa4] sm:$0x1]  ;;  %v6098_v18 = vld [vmem:[%s7498_s10 + $0xa8] sm:$0xf]  ;;  %v6099_v32 = vld [vmem:[%s7498_s10 + $0xac] sm:$0xf] }
 0x111   : > { %v2727_v38 = vsel %vm7521_vm5, %v2722_v62, %v2726_v41  ;;  %v1776_v2 = vor.u32 %v1775_v19, %v1771_v9  ;;  %v8295_v24 = vadd.f32 %v6744_v4, %v6632_v16  ;;  %v5994_v27 = vrot.slane %v5970_v57, 9  ;;  %v6100_v33 = vld [vmem:[%s7498_s10 + $0xb0] sm:$0x1]  ;;  %v5906_v20 = vld [vmem:[%s7498_s10 + $0x9c] sm:$0xf] }
 0x112   : > { %v8235_v45 = vpop.f32.mrb[8].mxu0  ;;  %v6121_v36 = vcombine.low %v2717_v12, %v2727_v38  ;;  %v1767_v37 = vrot.slane %v1766_v13, 4  ;;  %v8301_v21 = vadd.f32 %v6747_v50, %v6635_v44  ;;  %v2141_v28 = vrot.slane %v5971_v23, 5  ;;  %v5907_v49 = vld [vmem:[%s7498_s10 + $0xa0] sm:$0xf] }
 0x113   : > { %v8227_v39 = vpop.f32.mrb[8].mxu1  ;;  %v8247_v58 = vpop.f32.mrb[9].mxu0  ;;  %9644 = vst [vmem:[#allocation11_spill] sm:$0xff] %v8295_v24  ;;  %v1777_v29 = vrot.slane %v1776_v2, 4  ;;  %v2144_v59 = vrot.slane %v5972_v17, 5  ;;  %v2729_v40 = vshrl.u32 %v6098_v18, 16 }
 0x114   : > { %v8252_v5 = vpop.f32.mrb[9].mxu1  ;;  %v8261_v25 = vpop.f32.mrb[10].mxu0  ;;  %9645 = vst [vmem:[#allocation12_spill] sm:$0xff] %v8301_v21  ;;  %v2732_v42 = vshll.u32 %v6098_v18, 16  ;;  %4515 = vmatprep.mubr.bf16.mxu1 %v6121_v36  ;;  %v1772_v41 = vsel %vm7521_vm5, %v1767_v37, %v1771_v9  ;;  %v2142_v43 = vsel %vm7512_vm4, %v5994_v27, %v2141_v28  ;;  %v2143_v8 = vrot.slane %v2141_v28, 4 }
 0x115   : > { %v8267_v1 = vpop.f32.mrb[10].mxu1  ;;  %v8270_v0 = vpop.f32.mrb[11].mxu0  ;;  %v2738_v47 = vshll.u32 %v6099_v32, 16  ;;  %v1782_v56 = vsel %vm7521_vm5, %v1777_v29, %v1781_v15  ;;  %4516 = vmatmul.mubr.bf16.gmra.mrb[108].mxu1 %v7328_v14  ;;  %v2731_v16 = vrot.slane %v2729_v40, 4  ;;  %v2742_v62 = vshrl.u32 %v6099_v32, 16 }
 0x116   : > { %v8272_v53 = vpop.f32.mrb[11].mxu1  ;;  %v2734_v57 = vrot.slane %v2732_v42, 5  ;;  %v8319_v4 = vcombine.low %v1772_v41, %v1782_v56  ;;  %v2145_v23 = vsel %vm7512_vm4, %v2143_v8, %v2144_v59  ;;  %v2748_v13 = vshll.u32 %v6100_v33, 16  ;;  %v5908_v44 = vld [vmem:[%s7498_s10 + $0xa4] sm:$0x1] }
 0x117   : > { %v2740_v12 = vrot.slane %v2738_v47, 5  ;;  %v6010_v14 = vcombine.low %v2142_v43, %v2145_v23  ;;  %v2744_v18 = vrot.slane %v2742_v62, 4  ;;  %v1784_v38 = vshrl.u32 %v5906_v20, 16  ;;  %v5973_v37 = vld [vmem:[%s7498_s10 + $0xa8] sm:$0xe] }
 0x118   : > { %9646 = vst [vmem:[#allocation13_spill] sm:$0xff] %v8319_v4  ;;  %v2735_v17 = vor.u32 %v2734_v57, %v2731_v16  ;;  %4355 = vmatmul.mubr.bf16.gmra.mrb[108].mxu0 %v8319_v4  ;;  %v2750_v2 = vrot.slane %v2748_v13, 5  ;;  %v1787_v27 = vshll.u32 %v5906_v20, 16  ;;  %v1793_v32 = vshll.u32 %v5907_v49, 16  ;;  %v5974_v40 = vld [vmem:[%s7498_s10 + $0xac] sm:$0xf] }
 0x119   : > { %v1797_v36 = vshrl.u32 %v5907_v49, 16  ;;  %4362 = vmatprep.mubr.bf16.mxu0 %v6010_v14  ;;  %v2745_v28 = vor.u32 %v2744_v18, %v2740_v12  ;;  %v1786_v29 = vrot.slane %v1784_v38, 4  ;;  %v1803_v59 = vshll.u32 %v5908_v44, 16  ;;  %v5975_v47 = vld [vmem:[%s7498_s10 + $0xb0] sm:$0x1]  ;;  %v7329_v62 = vld [vmem:[%s7498_s10 + $0xa8] sm:$0xff]  }
 0x11a   : > { %v8277_v60 = vpop.f32.mrb[12].mxu0  ;;  %v2736_v33 = vrot.slane %v2735_v17, 4  ;;  %v1789_v41 = vrot.slane %v1787_v27, 5  ;;  %v1795_v43 = vrot.slane %v1793_v32, 5  ;;  %v6638_v20 = vadd.f32 %v8247_v58, %v8235_v45  ;;  %v6101_v13 = vld [vmem:[%s7498_s10 + $0xb4] sm:$0xf] }
 0x11b   : > { %v8282_v10 = vpop.f32.mrb[12].mxu1  ;;  %v8299_v34 = vpop.f32.mrb[13].mxu0  ;;  %v1799_v8 = vrot.slane %v1797_v36, 4  ;;  %v2746_v16 = vrot.slane %v2745_v28, 4  ;;  %v1805_v57 = vrot.slane %v1803_v59, 5  ;;  %v6750_v23 = vadd.f32 %v8252_v5, %v8227_v39 }
 0x11c   : > { %v8309_v52 = vpop.f32.mrb[13].mxu1  ;;  %v8311_v54 = vpop.f32.mrb[14].mxu0  ;;  %v2741_v56 = vsel %vm7521_vm5, %v2736_v33, %v2740_v12  ;;  %v6102_v44 = vld [vmem:[%s7498_s10 + $0xb8] sm:$0xf]  ;;  %v1790_v14 = vor.u32 %v1789_v41, %v1786_v29  ;;  %v6641_v45 = vadd.f32 %v8270_v0, %v8261_v25  ;;  %v6753_v58 = vadd.f32 %v8272_v53, %v8267_v1  ;;  %v6103_v32 = vld [vmem:[%s7498_s10 + $0xbc] sm:$0x1] }
 0x11d   : > { %v8315_v19 = vpop.f32.mrb[14].mxu1  ;;  %v8317_v9 = vpop.f32.mrb[15].mxu0  ;;  %v1800_v17 = vor.u32 %v1799_v8, %v1795_v43  ;;  %v2751_v12 = vsel %vm7521_vm5, %v2746_v16, %v2750_v2  ;;  %v8351_v18 = vadd.f32 %v6750_v23, %v6638_v20  ;;  %v5995_v38 = vrot.slane %v5973_v37, 9  ;;  %v5909_v28 = vld [vmem:[%s7498_s10 + $0xa8] sm:$0xf] }
 0x11e   : > { %v8324_v50 = vpop.f32.mrb[15].mxu1  ;;  %v2148_v27 = vrot.slane %v5974_v40, 5  ;;  %v6122_v39 = vcombine.low %v2741_v56, %v2751_v12  ;;  %v1791_v5 = vrot.slane %v1790_v14, 4  ;;  %v8354_v33 = vadd.f32 %v6753_v58, %v6641_v45  ;;  %v5910_v56 = vld [vmem:[%s7498_s10 + $0xac] sm:$0xf] }
 0x11f   : > { %9647 = vst [vmem:[#allocation14_spill] sm:$0xff] %v8351_v18  ;;  %v1801_v36 = vrot.slane %v1800_v17, 4  ;;  %v2151_v53 = vrot.slane %v5975_v47, 5  ;;  %v2753_v2 = vshrl.u32 %v6101_v13, 16  ;;  %v2756_v8 = vshll.u32 %v6101_v13, 16 }
 0x120   : > { %9648 = vst [vmem:[#allocation15_spill] sm:$0xff] %v8354_v33  ;;  %v2149_v1 = vsel %vm7512_vm4, %v5995_v38, %v2148_v27  ;;  %v2150_v0 = vrot.slane %v2148_v27, 4  ;;  %4523 = vmatprep.mubr.bf16.mxu1 %v6122_v39  ;;  %v1796_v40 = vsel %vm7521_vm5, %v1791_v5, %v1795_v43  ;;  %v2762_v20 = vshll.u32 %v6102_v44, 16  ;;  %v5911_v58 = vld [vmem:[%s7498_s10 + $0xb0] sm:$0x1] }
 0x121   : > { %v1806_v41 = vsel %vm7521_vm5, %v1801_v36, %v1805_v57  ;;  %4524 = vmatmul.mubr.bf16.gmra.mrb[112].mxu1 %v7329_v62  ;;  %v2755_v17 = vrot.slane %v2753_v2, 4  ;;  %v2766_v45 = vshrl.u32 %v6102_v44, 16  ;;  %v2758_v12 = vrot.slane %v2756_v8, 5  ;;  %v5976_v2 = vld [vmem:[%s7498_s10 + $0xb4] sm:$0xe] }
 0x122   : > { %v8326_v15 = vpop.f32.mrb[16].mxu0  ;;  %v8376_v47 = vcombine.low %v1796_v40, %v1806_v41  ;;  %v2152_v14 = vsel %vm7512_vm4, %v2150_v0, %v2151_v53  ;;  %v2764_v57 = vrot.slane %v2762_v20, 5  ;;  %v2772_v13 = vshll.u32 %v6103_v32, 16  ;;  %v5977_v20 = vld [vmem:[%s7498_s10 + $0xb8] sm:$0xf] }
 0x123   : > { %v8331_v42 = vpop.f32.mrb[16].mxu1  ;;  %v8336_v49 = vpop.f32.mrb[17].mxu0  ;;  %v6011_v43 = vcombine.low %v2149_v1, %v2152_v14  ;;  %v2768_v27 = vrot.slane %v2766_v45, 4  ;;  %v1808_v39 = vshrl.u32 %v5909_v28, 16  ;;  %v1811_v5 = vshll.u32 %v5909_v28, 16 }
 0x124   : > { %v8357_v29 = vpop.f32.mrb[17].mxu1  ;;  %v8359_v25 = vpop.f32.mrb[18].mxu0  ;;  %9649 = vst [vmem:[#allocation16_spill] sm:$0xff] %v8376_v47  ;;  %4363 = vmatmul.mubr.bf16.gmra.mrb[112].mxu0 %v8376_v47  ;;  %v1817_v62 = vshll.u32 %v5910_v56, 16  ;;  %v2759_v36 = vor.u32 %v2758_v12, %v2755_v17  ;;  %v2774_v0 = vrot.slane %v2772_v13, 5  ;;  %v1821_v44 = vshrl.u32 %v5910_v56, 16 }
 0x125   : > { %v8363_v37 = vpop.f32.mrb[18].mxu1  ;;  %v8365_v59 = vpop.f32.mrb[19].mxu0  ;;  %4370 = vmatprep.mubr.bf16.mxu0 %v6011_v43  ;;  %v1827_v53 = vshll.u32 %v5911_v58, 16  ;;  %v2769_v40 = vor.u32 %v2768_v27, %v2764_v57  ;;  %v1810_v32 = vrot.slane %v1808_v39, 4  ;;  %v1813_v41 = vrot.slane %v1811_v5, 5 }
 0x126   : > { %v8372_v16 = vpop.f32.mrb[19].mxu1  ;;  %v1819_v8 = vrot.slane %v1817_v62, 5  ;;  %v2760_v45 = vrot.slane %v2759_v36, 4  ;;  %v1823_v28 = vrot.slane %v1821_v44, 4  ;;  %v6644_v17 = vadd.f32 %v8299_v34, %v8277_v60  ;;  %v5978_v43 = vld [vmem:[%s7498_s10 + $0xbc] sm:$0x1] }
 0x127   : > { %v1829_v33 = vrot.slane %v1827_v53, 5  ;;  %v2770_v58 = vrot.slane %v2769_v40, 4  ;;  %v1814_v12 = vor.u32 %v1813_v41, %v1810_v32  ;;  %v6756_v13 = vadd.f32 %v8309_v52, %v8282_v10  ;;  %v6104_v39 = vld [vmem:[%s7498_s10 + $0xc0] sm:$0xf]  ;;  %v6105_v40 = vld [vmem:[%s7498_s10 + $0xc4] sm:$0xf] }
 0x128   : > { %v6647_v27 = vadd.f32 %v8317_v9, %v8311_v54  ;;  %v2765_v62 = vsel %vm7521_vm5, %v2760_v45, %v2764_v57  ;;  %v1824_v60 = vor.u32 %v1823_v28, %v1819_v8  ;;  %v6759_v34 = vadd.f32 %v8324_v50, %v8315_v19  ;;  %v7332_v54 = vld [vmem:[%s7498_s10 + $0xb4] sm:$0xff]   ;;  %v6106_v50 = vld [vmem:[%s7498_s10 + $0xc8] sm:$0x1] }
 0x129   : > { %v5996_v36 = vrot.slane %v5976_v2, 9  ;;  %v2775_v10 = vsel %vm7521_vm5, %v2770_v58, %v2774_v0  ;;  %v1815_v52 = vrot.slane %v1814_v12, 4  ;;  %v8413_v9 = vadd.f32 %v6756_v13, %v6644_v17  ;;  %v5912_v12 = vld [vmem:[%s7498_s10 + $0xb4] sm:$0xf]  ;;  %v5913_v17 = vld [vmem:[%s7498_s10 + $0xb8] sm:$0xf] }
 0x12a   : > { %v8374_v23 = vpop.f32.mrb[20].mxu0  ;;  %v2155_v57 = vrot.slane %v5977_v20, 5  ;;  %v6123_v32 = vcombine.low %v2765_v62, %v2775_v10  ;;  %v1825_v41 = vrot.slane %v1824_v60, 4  ;;  %v8416_v45 = vadd.f32 %v6759_v34, %v6647_v27 }
 0x12b   : > { %v8381_v38 = vpop.f32.mrb[20].mxu1  ;;  %v8385_v1 = vpop.f32.mrb[21].mxu0  ;;  %9650 = vst [vmem:[#allocation17_spill] sm:$0xff] %v8413_v9  ;;  %v2158_v19 = vrot.slane %v5978_v43, 5  ;;  %v1820_v2 = vsel %vm7521_vm5, %v1815_v52, %v1819_v8  ;;  %v2777_v58 = vshrl.u32 %v6104_v39, 16  ;;  %v2780_v13 = vshll.u32 %v6104_v39, 16 }
 0x12c   : > { %v8388_v14 = vpop.f32.mrb[21].mxu1  ;;  %v8393_v56 = vpop.f32.mrb[22].mxu0  ;;  %9651 = vst [vmem:[#allocation18_spill] sm:$0xff] %v8416_v45  ;;  %v2156_v28 = vsel %vm7512_vm4, %v5996_v36, %v2155_v57  ;;  %v2157_v0 = vrot.slane %v2155_v57, 4  ;;  %4531 = vmatprep.mubr.bf16.mxu1 %v6123_v32  ;;  %v1830_v20 = vsel %vm7521_vm5, %v1825_v41, %v1829_v33  ;;  %v2786_v27 = vshll.u32 %v6105_v40, 16 }
 0x12d   : > { %v8400_v5 = vpop.f32.mrb[22].mxu1  ;;  %v8406_v44 = vpop.f32.mrb[23].mxu0  ;;  %v2790_v62 = vshrl.u32 %v6105_v40, 16  ;;  %v8431_v8 = vcombine.low %v1820_v2, %v1830_v20  ;;  %4532 = vmatmul.mubr.bf16.gmra.mrb[116].mxu1 %v7332_v54  ;;  %v2779_v36 = vrot.slane %v2777_v58, 4  ;;  %v2796_v10 = vshll.u32 %v6106_v50, 16 }
 0x12e   : > { %v8408_v53 = vpop.f32.mrb[23].mxu1  ;;  %v2159_v34 = vsel %vm7512_vm4, %v2157_v0, %v2158_v19  ;;  %v5914_v52 = vld [vmem:[%s7498_s10 + $0xbc] sm:$0x1]  ;;  %v2782_v39 = vrot.slane %v2780_v13, 5  ;;  %v2788_v40 = vrot.slane %v2786_v27, 5  ;;  %v1832_v19 = vshrl.u32 %v5912_v12, 16 }
 0x12f   : > { %9652 = vst [vmem:[#allocation19_spill] sm:$0xff] %v8431_v8  ;;  %v6012_v33 = vcombine.low %v2156_v28, %v2159_v34  ;;  %v2792_v41 = vrot.slane %v2790_v62, 4  ;;  %4371 = vmatmul.mubr.bf16.gmra.mrb[116].mxu0 %v8431_v8  ;;  %v2798_v54 = vrot.slane %v2796_v10, 5  ;;  %v1835_v2 = vshll.u32 %v5912_v12, 16  ;;  %v5979_v12 = vld [vmem:[%s7498_s10 + $0xc0] sm:$0xe] }
 0x130   : > { %v1841_v50 = vshll.u32 %v5913_v17, 16  ;;  %v2783_v28 = vor.u32 %v2782_v39, %v2779_v36  ;;  %v1845_v13 = vshrl.u32 %v5913_v17, 16  ;;  %v1851_v27 = vshll.u32 %v5914_v52, 16 }
 0x131   : > { %4378 = vmatprep.mubr.bf16.mxu0 %v6012_v33  ;;  %v2793_v20 = vor.u32 %v2792_v41, %v2788_v40  ;;  %v1834_v62 = vrot.slane %v1832_v19, 4  ;;  %v1837_v34 = vrot.slane %v1835_v2, 5  ;;  %v6650_v10 = vadd.f32 %v8336_v49, %v8326_v15  ;;  %v5980_v33 = vld [vmem:[%s7498_s10 + $0xc4] sm:$0xf]  ;;  %v5981_v49 = vld [vmem:[%s7498_s10 + $0xc8] sm:$0x1] }
 0x132   : > { %v8427_v43 = vpop.f32.mrb[24].mxu0  ;;  %v1843_v18 = vrot.slane %v1841_v50, 5  ;;  %v2784_v24 = vrot.slane %v2783_v28, 4  ;;  %v1847_v48 = vrot.slane %v1845_v13, 4  ;;  %v1853_v36 = vrot.slane %v1851_v27, 5 }
 0x133   : > { %v8429_v60 = vpop.f32.mrb[24].mxu1  ;;  %v8436_v57 = vpop.f32.mrb[25].mxu0  ;;  %v2794_v61 = vrot.slane %v2793_v20, 4  ;;  %v1838_v17 = vor.u32 %v1837_v34, %v1834_v62  ;;  %v6762_v52 = vadd.f32 %v8357_v29, %v8331_v42  ;;  %v6653_v39 = vadd.f32 %v8365_v59, %v8359_v25  ;;  %v6107_v41 = vld [vmem:[%s7498_s10 + $0xcc] sm:$0xf]  ;;  %v7333_v29 = vld [vmem:[%s7498_s10 + $0xc0] sm:$0xff]  }
 0x134   : > { %v8438_v32 = vpop.f32.mrb[25].mxu1  ;;  %v8440_v45 = vpop.f32.mrb[26].mxu0  ;;  %v6765_v15 = vadd.f32 %v8372_v16, %v8363_v37  ;;  %v2789_v50 = vsel %vm7521_vm5, %v2784_v24, %v2788_v40  ;;  %v1848_v42 = vor.u32 %v1847_v48, %v1843_v18  ;;  %v5997_v20 = vrot.slane %v5979_v12, 9  ;;  %v6108_v25 = vld [vmem:[%s7498_s10 + $0xd0] sm:$0xf] }
 0x135   : > { %v8442_v9 = vpop.f32.mrb[26].mxu1  ;;  %v8445_v0 = vpop.f32.mrb[27].mxu0  ;;  %v2799_v28 = vsel %vm7521_vm5, %v2794_v61, %v2798_v54  ;;  %v1839_v13 = vrot.slane %v1838_v17, 4  ;;  %v8477_v27 = vadd.f32 %v6762_v52, %v6650_v10  ;;  %v6109_v34 = vld [vmem:[%s7498_s10 + $0xd4] sm:$0x1]  ;;  %v2162_v61 = vrot.slane %v5980_v33, 5 }
 0x136   : > { %v8447_v58 = vpop.f32.mrb[27].mxu1  ;;  %v6124_v16 = vcombine.low %v2789_v50, %v2799_v28  ;;  %v8479_v62 = vadd.f32 %v6765_v15, %v6653_v39  ;;  %v1849_v48 = vrot.slane %v1848_v42, 4  ;;  %v2165_v54 = vrot.slane %v5981_v49, 5  ;;  %v5915_v15 = vld [vmem:[%s7498_s10 + $0xc0] sm:$0xf] }
 0x137   : > { %9653 = vst [vmem:[#allocation20_spill] sm:$0xff] %v8477_v27  ;;  %v2801_v12 = vshrl.u32 %v6107_v41, 16  ;;  %v1844_v10 = vsel %vm7521_vm5, %v1839_v13, %v1843_v18  ;;  %v2804_v17 = vshll.u32 %v6107_v41, 16  ;;  %v2810_v52 = vshll.u32 %v6108_v25, 16  ;;  %v5916_v27 = vld [vmem:[%s7498_s10 + $0xc4] sm:$0xf] }
 0x138   : > { %9654 = vst [vmem:[#allocation21_spill] sm:$0xff] %v8479_v62  ;;  %4539 = vmatprep.mubr.bf16.mxu1 %v6124_v16  ;;  %v2814_v39 = vshrl.u32 %v6108_v25, 16  ;;  %v1854_v33 = vsel %vm7521_vm5, %v1849_v48, %v1853_v36  ;;  %v2163_v49 = vsel %vm7512_vm4, %v5997_v20, %v2162_v61  ;;  %v2164_v42 = vrot.slane %v2162_v61, 4  ;;  %v5917_v16 = vld [vmem:[%s7498_s10 + $0xc8] sm:$0x1] }
 0x139   : > { %4540 = vmatmul.mubr.bf16.gmra.mrb[120].mxu1 %v7333_v29  ;;  %v2803_v62 = vrot.slane %v2801_v12, 4  ;;  %v8501_v47 = vcombine.low %v1844_v10, %v1854_v33  ;;  %v2806_v18 = vrot.slane %v2804_v17, 5  ;;  %v2812_v41 = vrot.slane %v2810_v52, 5 }
 0x13a   : > { %v8452_v21 = vpop.f32.mrb[28].mxu0  ;;  %v2816_v13 = vrot.slane %v2814_v39, 4  ;;  %v2166_v36 = vsel %vm7512_vm4, %v2164_v42, %v2165_v54  ;;  %v2820_v29 = vshll.u32 %v6109_v34, 16  ;;  %v1856_v48 = vshrl.u32 %v5915_v15, 16 }
 0x13b   : > { %v8463_v19 = vpop.f32.mrb[28].mxu1  ;;  %v8465_v2 = vpop.f32.mrb[29].mxu0  ;;  %9655 = vst [vmem:[#allocation22_spill] sm:$0xff] %v8501_v47  ;;  %v1859_v20 = vshll.u32 %v5915_v15, 16  ;;  %4379 = vmatmul.mubr.bf16.gmra.mrb[120].mxu0 %v8501_v47  ;;  %v6013_v10 = vcombine.low %v2163_v49, %v2166_v36  ;;  %v2807_v17 = vor.u32 %v2806_v18, %v2803_v62  ;;  %v1865_v39 = vshll.u32 %v5916_v27, 16 }
 0x13c   : > { %v8473_v59 = vpop.f32.mrb[29].mxu1  ;;  %v8475_v37 = vpop.f32.mrb[30].mxu0  ;;  %v2817_v52 = vor.u32 %v2816_v13, %v2812_v41  ;;  %v2822_v34 = vrot.slane %v2820_v29, 5  ;;  %v1858_v54 = vrot.slane %v1856_v48, 4  ;;  %v1869_v42 = vshrl.u32 %v5916_v27, 16 }
 0x13d   : > { %v8482_v24 = vpop.f32.mrb[30].mxu1  ;;  %v8484_v40 = vpop.f32.mrb[31].mxu0  ;;  %v1861_v15 = vrot.slane %v1859_v20, 5  ;;  %4386 = vmatprep.mubr.bf16.mxu0 %v6013_v10  ;;  %v2808_v31 = vrot.slane %v2807_v17, 4  ;;  %v1867_v49 = vrot.slane %v1865_v39, 5  ;;  %v1875_v62 = vshll.u32 %v5917_v16, 16 }
 0x13e   : > { %v8486_v8 = vpop.f32.mrb[31].mxu1  ;;  %v2818_v47 = vrot.slane %v2817_v52, 4  ;;  %v6127_v18 = vld [vmem:[%s7498_s10 + $0x1c] sm:$0xf]  ;;  %v1871_v36 = vrot.slane %v1869_v42, 4  ;;  %v6656_v55 = vadd.f32 %v8385_v1, %v8374_v23  ;;  %v6768_v29 = vadd.f32 %v8388_v14, %v8381_v38  ;;  %v7336_v52 = vld [vmem:[%s7498_s10 + $0xcc] sm:$0xff]  }
 0x13f   : > { %v1862_v13 = vor.u32 %v1861_v15, %v1858_v54  ;;  %v6128_v48 = vld [vmem:[%s7498_s10 + $0x20] sm:$0x1]  ;;  %v6129_v27 = vld [vmem:[%s7498_s10 + $0x24] sm:$0xe]  ;;  %v2813_v10 = vsel %vm7521_vm5, %v2808_v31, %v2812_v41  ;;  %v1877_v17 = vrot.slane %v1875_v62, 5  ;;  %v6659_v39 = vadd.f32 %v8406_v44, %v8393_v56 }
 0x140   : > { %v2823_v16 = vsel %vm7521_vm5, %v2818_v47, %v2822_v34  ;;  %v6130_v23 = vld [vmem:[%s7498_s10 + $0x28] sm:$0xf]  ;;  %v1872_v15 = vor.u32 %v1871_v36, %v1867_v49  ;;  %v8540_v42 = vadd.f32 %v6768_v29, %v6656_v55  ;;  %v6771_v47 = vadd.f32 %v8408_v53, %v8400_v5 }
 0x141   : > { %v6125_v14 = vcombine.low %v2813_v10, %v2823_v16  ;;  %v1863_v54 = vrot.slane %v1862_v13, 4  ;;  %v6174_v34 = vrot.slane %v6126_v3, 9  ;;  %v3002_v56 = vrot.slane %v6127_v18, 5 }
 0x142   : > { %v8488_v50 = vpop.f32.mrb[32].mxu0  ;;  %v3005_v44 = vrot.slane %v6128_v48, 5  ;;  %v1873_v13 = vrot.slane %v1872_v15, 4  ;;  %v6175_v36 = vrot.slane %v6129_v27, 9  ;;  %v3009_v29 = vrot.slane %v6130_v23, 5 }
 0x143   : > { %v8493_v28 = vpop.f32.mrb[32].mxu1  ;;  %v8503_v25 = vpop.f32.mrb[33].mxu0  ;;  %4547 = vmatprep.mubr.bf16.mxu1 %v6125_v14  ;;  %v1868_v55 = vsel %vm7521_vm5, %v1863_v54, %v1867_v49  ;;  %v8557_v3 = vadd.f32 %v6771_v47, %v6659_v39  ;;  %v3003_v5 = vsel %vm7512_vm4, %v6174_v34, %v3002_v56  ;;  %v3004_v53 = vrot.slane %v3002_v56, 4  ;;  %v6132_v48 = vld [vmem:[%s7498_s10 + $0x30] sm:$0xe] }
 0x144   : > { %v8505_v4 = vpop.f32.mrb[33].mxu1  ;;  %v8509_v61 = vpop.f32.mrb[34].mxu0  ;;  %4548 = vmatmul.mubr.bf16.gmra.mrb[124].mxu1 %v7336_v52  ;;  %v3012_v18 = vrot.slane %v6131_v63, 5  ;;  %v1878_v49 = vsel %vm7521_vm5, %v1873_v13, %v1877_v17  ;;  %v8567_v27 = vsel %vm7512_vm4, %v6175_v36, %v3009_v29  ;;  %v3011_v16 = vrot.slane %v3009_v29, 4  ;;  %v6133_v39 = vld [vmem:[%s7498_s10 + $0x34] sm:$0xf] }
 0x145   : > { %v8511_v12 = vpop.f32.mrb[34].mxu1  ;;  %v8514_v33 = vpop.f32.mrb[35].mxu0  ;;  %7168 = vmatprep.mubr.bf16.mxu1 %v7921_v35  ;;  %v6662_v52 = vadd.f32 %v8436_v57, %v8427_v43  ;;  %v6134_v23 = vld [vmem:[%s7498_s10 + $0x38] sm:$0x1]  ;;  %v8575_v63 = vcombine.low %v1868_v55, %v1878_v49  ;;  %v3006_v51 = vsel %vm7512_vm4, %v3004_v53, %v3005_v44  ;;  %v6774_v35 = vadd.f32 %v8438_v32, %v8429_v60  ;;  %v6136_v54 = vld [vmem:[%s7498_s10 + $0x40] sm:$0xf] }
 0x146   : > { %v8516_v26 = vpop.f32.mrb[35].mxu1  ;;  %v6665_v17 = vadd.f32 %v8445_v0, %v8440_v45  ;;  %v6190_v57 = vcombine.low %v3003_v5, %v3006_v51  ;;  %v3013_v47 = vsel %vm7512_vm4, %v3011_v16, %v3012_v18  ;;  %v6777_v34 = vadd.f32 %v8447_v58, %v8442_v9  ;;  %v6135_v44 = vld [vmem:[%s7498_s10 + $0x3c] sm:$0xe]  ;;  %v6137_v13 = vld [vmem:[%s7498_s10 + $0x44] sm:$0x1] }
 0x147   : > { %v6176_v56 = vrot.slane %v6132_v48, 9  ;;  %4387 = vmatmul.mubr.bf16.gmra.mrb[124].mxu0 %v8575_v63  ;;  %v8598_v45 = vadd.f32 %v6774_v35, %v6662_v52  ;;  %v3016_v0 = vrot.slane %v6133_v39, 5  ;;  %v3019_v55 = vrot.slane %v6134_v23, 5  ;;  %v6139_v53 = vld [vmem:[%s7498_s10 + $0x4c] sm:$0xf] }
 0x148   : > { %7120 = vmatprep.mubr.bf16.mxu0 %v6190_v57  ;;  %v6191_v9 = vcombine.low %v8567_v27, %v3013_v47  ;;  %v8606_v58 = vadd.f32 %v6777_v34, %v6665_v17  ;;  %v3023_v5 = vrot.slane %v6136_v54, 5  ;;  %v6668_v16 = vadd.f32 %v8465_v2, %v8452_v21  ;;  %v6138_v35 = vld [vmem:[%s7498_s10 + $0x48] sm:$0xe]  ;;  %v6140_v17 = vld [vmem:[%s7498_s10 + $0x50] sm:$0x1] }
 0x149   : > { %v3017_v48 = vsel %vm7512_vm4, %v6176_v56, %v3016_v0  ;;  %v3018_v49 = vrot.slane %v3016_v0, 4  ;;  %v6780_v52 = vadd.f32 %v8473_v59, %v8463_v19  ;;  %v6177_v39 = vrot.slane %v6135_v44, 9 }
 0x14a   : > { %v8526_v20 = vpop.f32.mrb[36].mxu0  ;;  %v3026_v23 = vrot.slane %v6137_v13, 5  ;;  %v6671_v27 = vadd.f32 %v8484_v40, %v8475_v37  ;;  %v6783_v51 = vadd.f32 %v8486_v8, %v8482_v24  ;;  %v3025_v21 = vrot.slane %v3023_v5, 4  ;;  %v6142_v8 = vld [vmem:[%s7498_s10 + $0x58] sm:$0xf] }
 0x14b   : > { %v8536_v1 = vpop.f32.mrb[36].mxu1  ;;  %v8538_v38 = vpop.f32.mrb[37].mxu0  ;;  %v3020_v54 = vsel %vm7512_vm4, %v3018_v49, %v3019_v55  ;;  %v8626_v2 = vadd.f32 %v6780_v52, %v6668_v16  ;;  %v3030_v19 = vrot.slane %v6139_v53, 5  ;;  %v6178_v40 = vrot.slane %v6138_v35, 9  ;;  %v6145_v55 = vld [vmem:[%s7498_s10 + $0x64] sm:$0xf] }
 0x14c   : > { %v8543_v31 = vpop.f32.mrb[37].mxu1  ;;  %v8545_v41 = vpop.f32.mrb[38].mxu0  ;;  %7169 = vmatmul.mubr.bf16.vlgmr.msra.gmra.mrb[128].mxu1 %v7960_v30  ;;  %v6192_v57 = vcombine.low %v3017_v48, %v3020_v54  ;;  %v8631_v37 = vadd.f32 %v6783_v51, %v6671_v27  ;;  %v3033_v34 = vrot.slane %v6140_v17, 5  ;;  %v6674_v0 = vadd.f32 %v8503_v25, %v8488_v50  ;;  %v6141_v16 = vld [vmem:[%s7498_s10 + $0x54] sm:$0xe] }
 0x14d   : > { %v8549_v62 = vpop.f32.mrb[38].mxu1  ;;  %v8551_v7 = vpop.f32.mrb[39].mxu0  ;;  %7172 = vmatprep.mubr.bf16.mxu1 %v7994_v22  ;;  %v3032_v47 = vrot.slane %v3030_v19, 4  ;;  %v6786_v22 = vadd.f32 %v8505_v4, %v8493_v28  ;;  %v3024_v48 = vsel %vm7512_vm4, %v6177_v39, %v3023_v5  ;;  %v3027_v49 = vsel %vm7512_vm4, %v3025_v21, %v3026_v23  ;;  %v6143_v25 = vld [vmem:[%s7498_s10 + $0x5c] sm:$0x1] }
 0x14e   : > { %v8555_v10 = vpop.f32.mrb[39].mxu1  ;;  %v6677_v50 = vadd.f32 %v8514_v33, %v8509_v61  ;;  %v6789_v4 = vadd.f32 %v8516_v26, %v8511_v12  ;;  %v6144_v5 = vld [vmem:[%s7498_s10 + $0x60] sm:$0xe]  ;;  %v3031_v39 = vsel %vm7512_vm4, %v6178_v40, %v3030_v19  ;;  %v3044_v61 = vrot.slane %v6145_v55, 5  ;;  %v6146_v26 = vld [vmem:[%s7498_s10 + $0x68] sm:$0x1] }
 0x14f   : > { %7121 = vmatmul.mubr.bf16.vlgmr.msra.gmra.mrb[128].mxu0 %v6191_v9  ;;  %v3037_v9 = vrot.slane %v6142_v8, 5  ;;  %v8663_v52 = vadd.f32 %v6786_v22, %v6674_v0  ;;  %v3034_v23 = vsel %vm7512_vm4, %v3032_v47, %v3033_v34  ;;  %v6193_v33 = vcombine.low %v3024_v48, %v3027_v49  ;;  %v6148_v54 = vld [vmem:[%s7498_s10 + $0x70] sm:$0xf]  ;;  %v6147_v55 = vld [vmem:[%s7498_s10 + $0x6c] sm:$0xe] }
 0x150   : > { %7124 = vmatprep.mubr.bf16.mxu0 %v6192_v57  ;;  %v8670_v27 = vadd.f32 %v6789_v4, %v6677_v50  ;;  %v6680_v12 = vadd.f32 %v8538_v38, %v8526_v20  ;;  %v6179_v51 = vrot.slane %v6141_v16, 9  ;;  %v3040_v35 = vrot.slane %v6143_v25, 5  ;;  %v6149_v48 = vld [vmem:[%s7498_s10 + $0x74] sm:$0x1] }
 0x151   : > { %v6180_v17 = vrot.slane %v6144_v5, 9  ;;  %v6792_v21 = vadd.f32 %v8543_v31, %v8536_v1  ;;  %v6194_v57 = vcombine.low %v3031_v39, %v3034_v23  ;;  %v3039_v8 = vrot.slane %v3037_v9, 4  ;;  %v6150_v5 = vld [vmem:[%s7498_s10 + $0x78] sm:$0xe] }
 0x152   : > { %v8573_v14 = vpop.f32.mrb[40].mxu0  ;;  %v6683_v40 = vadd.f32 %v8551_v7, %v8545_v41  ;;  %v3046_v1 = vrot.slane %v3044_v61, 4  ;;  %v3047_v31 = vrot.slane %v6146_v26, 5  ;;  %v3051_v0 = vrot.slane %v6148_v54, 5  ;;  %v6151_v41 = vld [vmem:[%s7498_s10 + $0x7c] sm:$0xf] }
 0x153   : > { %v8584_v15 = vpop.f32.mrb[40].mxu1  ;;  %v8586_v43 = vpop.f32.mrb[41].mxu0  ;;  %v8690_v47 = vadd.f32 %v6792_v21, %v6680_v12  ;;  %v3041_v16 = vsel %vm7512_vm4, %v3039_v8, %v3040_v35  ;;  %v3045_v50 = vsel %vm7512_vm4, %v6180_v17, %v3044_v61  ;;  %v3058_v39 = vrot.slane %v6151_v41, 5  ;;  %v9657_v54 = vld [vmem:[#allocation4_spill] sm:$0xff] }
 0x154   : > { %v8593_v60 = vpop.f32.mrb[41].mxu1  ;;  %v8595_v32 = vpop.f32.mrb[42].mxu0  ;;  %7173 = vmatmul.mubr.bf16.gmra.mrb[132].mxu1 %v8019_v11  ;;  %v6795_v11 = vadd.f32 %v8555_v10, %v8549_v62  ;;  %v3038_v10 = vsel %vm7512_vm4, %v6179_v51, %v3037_v9  ;;  %v6686_v4 = vadd.f32 %v8586_v43, %v8573_v14  ;;  %v3048_v9 = vsel %vm7512_vm4, %v3046_v1, %v3047_v31  ;;  %v6152_v14 = vld [vmem:[%s7498_s10 + $0x80] sm:$0x1] }
 0x155   : > { %v8601_v36 = vpop.f32.mrb[42].mxu1  ;;  %v8603_v29 = vpop.f32.mrb[43].mxu0  ;;  %7176 = vmatprep.mubr.bf16.mxu1 %v8056_v6  ;;  %v6798_v25 = vadd.f32 %v8593_v60, %v8584_v15  ;;  %v6181_v61 = vrot.slane %v6147_v55, 9  ;;  %v3053_v26 = vrot.slane %v3051_v0, 4  ;;  %v3054_v12 = vrot.slane %v6149_v48, 5  ;;  %v9656_v60 = vld [vmem:[#allocation3_spill] sm:$0xff] }
 0x156   : > { %v8609_v18 = vpop.f32.mrb[43].mxu1  ;;  %v8696_v7 = vadd.f32 %v6795_v11, %v6683_v40  ;;  %v6689_v23 = vadd.f32 %v8603_v29, %v8595_v32  ;;  %v6195_v15 = vcombine.low %v3038_v10, %v3041_v16  ;;  %v6196_v17 = vcombine.low %v3045_v50, %v3048_v9  ;;  %v6154_v32 = vld [vmem:[%s7498_s10 + $0x88] sm:$0xf]  ;;  %v8733_v29 = vld [vmem:[%s7498_s10 + $0x94] sm:$0xf] }
 0x157   : > { %7125 = vmatmul.mubr.bf16.gmra.mrb[132].mxu0 %v6193_v33  ;;  %v6801_v33 = vadd.f32 %v8609_v18, %v8601_v36  ;;  %v8723_v43 = vadd.f32 %v6798_v25, %v6686_v4  ;;  %v3060_v8 = vrot.slane %v3058_v39, 4  ;;  %v3061_v40 = vrot.slane %v6152_v14, 5 }
 0x158   : > { %7128 = vmatprep.mubr.bf16.mxu0 %v6194_v57  ;;  %v6182_v57 = vrot.slane %v6150_v5, 9  ;;  %v3052_v41 = vsel %vm7512_vm4, %v6181_v61, %v3051_v0  ;;  %v3055_v10 = vsel %vm7512_vm4, %v3053_v26, %v3054_v12  ;;  %v3065_v16 = vrot.slane %v6154_v32, 5  ;;  %v6156_v0 = vld [vmem:[%s7498_s10 + $0x90] sm:$0xe] }
 0x159   : > { %v8726_v51 = vadd.f32 %v6801_v33, %v6689_v23  ;;  %v3072_v25 = vrot.slane %v8733_v29, 5  ;;  %v9658_v26 = vld [vmem:[#allocation5_spill] sm:$0xff]  ;;  %v6184_v14 = vrot.slane %v6156_v0, 9  ;;  %v6161_v0 = vld [vmem:[%s7498_s10 + $0xa4] sm:$0x1] }
 0x15a   : > { %v8634_v24 = vpop.f32.mrb[44].mxu0  ;;  %v3067_v12 = vrot.slane %v3065_v16, 4 }
 0x15b   : > { %v8628_v59 = vpop.f32.mrb[44].mxu1  ;;  %v8638_v56 = vpop.f32.mrb[45].mxu0  ;;  %v3074_v32 = vrot.slane %v3072_v25, 4 }
 0x15c   : > { %v8636_v30 = vpop.f32.mrb[45].mxu1  ;;  %v8647_v13 = vpop.f32.mrb[46].mxu0  ;;  %7177 = vmatmul.mubr.bf16.gmra.mrb[136].mxu1 %v9656_v60  ;;  %v6692_v36 = vadd.f32 %v8638_v56, %v8634_v24 }
 0x15d   : > { %v8640_v44 = vpop.f32.mrb[46].mxu1  ;;  %v8660_v28 = vpop.f32.mrb[47].mxu0  ;;  %7180 = vmatprep.mubr.bf16.mxu1 %v9657_v54  ;;  %v6804_v11 = vadd.f32 %v8636_v30, %v8628_v59  ;;  %v6153_v59 = vld [vmem:[%s7498_s10 + $0x84] sm:$0xe]  ;;  %v6155_v30 = vld [vmem:[%s7498_s10 + $0x8c] sm:$0x1] }
 0x15e   : > { %v8649_v53 = vpop.f32.mrb[47].mxu1  ;;  %v6695_v24 = vadd.f32 %v8660_v28, %v8647_v13  ;;  %v6197_v13 = vcombine.low %v3052_v41, %v3055_v10  ;;  %v6158_v28 = vld [vmem:[%s7498_s10 + $0x98] sm:$0x1]  ;;  %v6183_v5 = vrot.slane %v6153_v59, 9  ;;  %v3068_v23 = vrot.slane %v6155_v30, 5 }
 0x15f   : > { %v6807_v56 = vadd.f32 %v8649_v53, %v8640_v44  ;;  %7129 = vmatmul.mubr.bf16.gmra.mrb[136].mxu0 %v6195_v15  ;;  %v8749_v50 = vadd.f32 %v6804_v11, %v6692_v36  ;;  %v3059_v44 = vsel %vm7512_vm4, %v6182_v57, %v3058_v39  ;;  %v3062_v53 = vsel %vm7512_vm4, %v3060_v8, %v3061_v40  ;;  %v9659_v54 = vld [vmem:[#allocation6_spill] sm:$0xff] }
 0x160   : > { %7132 = vmatprep.mubr.bf16.mxu0 %v6196_v17  ;;  %v6198_v17 = vcombine.low %v3059_v44, %v3062_v53  ;;  %v3075_v29 = vrot.slane %v6158_v28, 5  ;;  %v3066_v40 = vsel %vm7512_vm4, %v6183_v5, %v3065_v16  ;;  %v3069_v11 = vsel %vm7512_vm4, %v3067_v12, %v3068_v23  ;;  %v6162_v16 = vld [vmem:[%s7498_s10 + $0xa8] sm:$0xe]  ;;  %v6164_v5 = vld [vmem:[%s7498_s10 + $0xb0] sm:$0x1] }
 0x161   : > { %v8753_v9 = vadd.f32 %v6807_v56, %v6695_v24  ;;  %v3073_v56 = vsel %vm7512_vm4, %v6184_v14, %v3072_v25  ;;  %v6199_v23 = vcombine.low %v3066_v40, %v3069_v11  ;;  %v9660_v25 = vld [vmem:[#allocation7_spill] sm:$0xff]  ;;  %v3082_v12 = vrot.slane %v6161_v0, 5  ;;  %v6170_v0 = vld [vmem:[%s7498_s10 + $0xc8] sm:$0x1] }
 0x162   : > { %v8686_v20 = vpop.f32.mrb[48].mxu0  ;;  %v6186_v14 = vrot.slane %v6162_v16, 9 }
 0x163   : > { %v8679_v19 = vpop.f32.mrb[48].mxu1  ;;  %v8692_v34 = vpop.f32.mrb[49].mxu0 }
 0x164   : > { %v8688_v38 = vpop.f32.mrb[49].mxu1  ;;  %v8699_v22 = vpop.f32.mrb[50].mxu0  ;;  %v6698_v33 = vadd.f32 %v8692_v34, %v8686_v20  ;;  %7181 = vmatmul.mubr.bf16.gmra.mrb[140].mxu1 %v9658_v26  ;;  %v6160_v20 = vld [vmem:[%s7498_s10 + $0xa0] sm:$0xf] }
 0x165   : > { %v8694_v6 = vpop.f32.mrb[50].mxu1  ;;  %v6700_v49 = vpop.f32.mrb[51].mxu0  ;;  %v6810_v61 = vadd.f32 %v8688_v38, %v8679_v19  ;;  %7184 = vmatprep.mubr.bf16.mxu1 %v9659_v54  ;;  %v3079_v41 = vrot.slane %v6160_v20, 5  ;;  %v6166_v54 = vld [vmem:[%s7498_s10 + $0xb8] sm:$0xf] }
 0x166   : > { %v8701_v62 = vpop.f32.mrb[51].mxu1  ;;  %v6701_v39 = vadd.f32 %v6700_v49, %v8699_v22  ;;  %v6163_v22 = vld [vmem:[%s7498_s10 + $0xac] sm:$0xf]  ;;  %v3093_v11 = vrot.slane %v6166_v54, 5 }
 0x167   : > { %v6813_v15 = vadd.f32 %v8701_v62, %v8694_v6  ;;  %v8770_v34 = vadd.f32 %v6810_v61, %v6698_v33  ;;  %7133 = vmatmul.mubr.bf16.gmra.mrb[140].mxu0 %v6197_v13  ;;  %v3086_v13 = vrot.slane %v6163_v22, 5  ;;  %v3081_v26 = vrot.slane %v3079_v41, 4 }
 0x168   : > { %7136 = vmatprep.mubr.bf16.mxu0 %v6198_v17  ;;  %v3089_v17 = vrot.slane %v6164_v5, 5 }
 0x169   : > { %v8772_v36 = vadd.f32 %v6813_v15, %v6701_v39  ;;  %v3083_v40 = vsel %vm7512_vm4, %v3081_v26, %v3082_v12  ;;  %v6171_v26 = vld [vmem:[%s7498_s10 + $0xcc] sm:$0xe] }
 0x16a   : > { %v6702_v18 = vpop.f32.mrb[52].mxu0 }
 0x16b   : > { %v8728_v35 = vpop.f32.mrb[52].mxu1  ;;  %v6703_v1 = vpop.f32.mrb[53].mxu0 }
 0x16c   : > { %v6815_v21 = vpop.f32.mrb[53].mxu1  ;;  %v6705_v55 = vpop.f32.mrb[54].mxu0  ;;  %v6704_v49 = vadd.f32 %v6703_v1, %v6702_v18  ;;  %v3076_v18 = vsel %vm7512_vm4, %v3074_v32, %v3075_v29  ;;  %v6159_v1 = vld [vmem:[%s7498_s10 + $0x9c] sm:$0xe]  ;;  %7185 = vmatmul.mubr.bf16.gmra.mrb[144].mxu1 %v9660_v25 }
 0x16d   : > { %v6817_v31 = vpop.f32.mrb[54].mxu1  ;;  %v6706_v4 = vpop.f32.mrb[55].mxu0  ;;  %v6816_v10 = vadd.f32 %v6815_v21, %v8728_v35  ;;  %v6185_v33 = vrot.slane %v6159_v1, 9  ;;  %v6165_v1 = vld [vmem:[%s7498_s10 + $0xb4] sm:$0xe] }
 0x16e   : > { %v6818_v48 = vpop.f32.mrb[55].mxu1  ;;  %v6707_v59 = vadd.f32 %v6706_v4, %v6705_v55  ;;  %v9661_v4 = vld [vmem:[#allocation10_spill] sm:$0xff] }
 0x16f   : > { %v6819_v30 = vadd.f32 %v6818_v48, %v6817_v31  ;;  %v8787_v44 = vadd.f32 %v6816_v10, %v6704_v49  ;;  %v6200_v48 = vcombine.low %v3073_v56, %v3076_v18  ;;  %7188 = vmatprep.mubr.bf16.mxu1 %v9661_v4  ;;  %7137 = vmatmul.mubr.bf16.gmra.mrb[144].mxu0 %v6199_v23  ;;  %v3095_v23 = vrot.slane %v3093_v11, 4 }
 0x170   : > { %v3080_v49 = vsel %vm7512_vm4, %v6185_v33, %v3079_v41  ;;  %v3087_v56 = vsel %vm7512_vm4, %v6186_v14, %v3086_v13 }
 0x171   : > { %v8790_v35 = vadd.f32 %v6819_v30, %v6707_v59  ;;  %7140 = vmatprep.mubr.bf16.mxu0 %v6200_v48  ;;  %v6167_v59 = vld [vmem:[%s7498_s10 + $0xbc] sm:$0x1]  ;;  %v6168_v30 = vld [vmem:[%s7498_s10 + $0xc0] sm:$0xe]  ;;  %v6172_v48 = vld [vmem:[%s7498_s10 + $0xd0] sm:$0xf] }
 0x172   : > { %v6708_v19 = vpop.f32.mrb[56].mxu0  ;;  %v3096_v25 = vrot.slane %v6167_v59, 5  ;;  %v6188_v33 = vrot.slane %v6168_v30, 9  ;;  %v9666_v59 = vld [vmem:[#allocation8_spill] sm:$0xff] }
 0x173   : > { %v6820_v60 = vpop.f32.mrb[56].mxu1  ;;  %v6709_v57 = vpop.f32.mrb[57].mxu0 }
 0x174   : > { %v6821_v38 = vpop.f32.mrb[57].mxu1  ;;  %v6711_v6 = vpop.f32.mrb[58].mxu0  ;;  %v6710_v53 = vadd.f32 %v6709_v57, %v6708_v19 }
 0x175   : > { %v6823_v8 = vpop.f32.mrb[58].mxu1  ;;  %v6712_v24 = vpop.f32.mrb[59].mxu0  ;;  %v6822_v28 = vadd.f32 %v6821_v38, %v6820_v60  ;;  %v3088_v60 = vrot.slane %v3086_v13, 4  ;;  %v6169_v38 = vld [vmem:[%s7498_s10 + $0xc4] sm:$0xf]  ;;  %v6187_v13 = vrot.slane %v6165_v1, 9 }
 0x176   : > { %v6824_v62 = vpop.f32.mrb[59].mxu1  ;;  %v6713_v21 = vadd.f32 %v6712_v24, %v6711_v6  ;;  %v3100_v41 = vrot.slane %v6169_v38, 5 }
 0x177   : > { %v8793_v61 = vadd.f32 %v6822_v28, %v6710_v53  ;;  %v6825_v55 = vadd.f32 %v6824_v62, %v6823_v8  ;;  %v3090_v18 = vsel %vm7512_vm4, %v3088_v60, %v3089_v17  ;;  %v6201_v53 = vcombine.low %v3080_v49, %v3083_v40  ;;  %v9662_v28 = vld [vmem:[#allocation13_spill] sm:$0xff] }
 0x178   : > { %7189 = vmatmul.mubr.bf16.gmra.mrb[148].mxu1 %v9662_v28  ;;  %v6202_v5 = vcombine.low %v3087_v56, %v3090_v18  ;;  %v3094_v14 = vsel %vm7512_vm4, %v6187_v13, %v3093_v11  ;;  %v3107_v60 = vrot.slane %v6172_v48, 5  ;;  %v6189_v40 = vrot.slane %v6171_v26, 9  ;;  %v9665_v18 = vld [vmem:[#allocation22_spill] sm:$0xff] }
 0x179   : > { %v8797_v32 = vadd.f32 %v6825_v55, %v6713_v21  ;;  %v9663_v21 = vld [vmem:[#allocation16_spill] sm:$0xff]  ;;  %v3102_v55 = vrot.slane %v3100_v41, 4  ;;  %7141 = vmatmul.mubr.bf16.gmra.mrb[148].mxu0 %v6201_v53 }
 0x17a   : > { %v6714_v39 = vpop.f32.mrb[60].mxu0  ;;  %7192 = vmatprep.mubr.bf16.mxu1 %v9663_v21  ;;  %7144 = vmatprep.mubr.bf16.mxu0 %v6202_v5  ;;  %v3109_v1 = vrot.slane %v3107_v60, 4  ;;  %v3108_v5 = vsel %vm7512_vm4, %v6189_v40, %v3107_v60  ;;  %v9668_v60 = vld [vmem:[#allocation11_spill] sm:$0xff] }
 0x17b   : > { %v6826_v31 = vpop.f32.mrb[60].mxu1  ;;  %v6715_v29 = vpop.f32.mrb[61].mxu0 }
 0x17c   : > { %v6827_v15 = vpop.f32.mrb[61].mxu1  ;;  %v6716_v57 = vadd.f32 %v6715_v29, %v6714_v39  ;;  %v6717_v8 = vpop.f32.mrb[62].mxu0  ;;  %v3097_v39 = vsel %vm7512_vm4, %v3095_v23, %v3096_v25 }
 0x17d   : > { %v6828_v20 = vadd.f32 %v6827_v15, %v6826_v31  ;;  %v6829_v19 = vpop.f32.mrb[62].mxu1  ;;  %v6718_v6 = vpop.f32.mrb[63].mxu0  ;;  %v3103_v31 = vrot.slane %v6170_v0, 5  ;;  %v6173_v15 = vld [vmem:[%s7498_s10 + $0xd4] sm:$0x1]  ;;  %s6352_s10 = sshll.u32 %s9735_s28, 7 }
 0x17e   : > { %v6830_v22 = vpop.f32.mrb[63].mxu1  ;;  %v6719_v24 = vadd.f32 %v6718_v6, %v6717_v8  ;;  %v6203_v6 = vcombine.low %v3094_v14, %v3097_v39  ;;  %v3110_v11 = vrot.slane %v6173_v15, 5  ;;  %v9667_v0 = vld [vmem:[#allocation9_spill] sm:$0xff]  ;;  %s8936_s18 = scalar_lea.vmem %s9603_s6, %s6352_s10  ;;  %s8967_s21 = scalar_lea.vmem %s9600_s3, %s6352_s10 }
 0x17f   : > { %v6831_v62 = vadd.f32 %v6830_v22, %v6829_v19  ;;  %v8804_v10 = vadd.f32 %v6828_v20, %v6716_v57  ;;  %v3101_v20 = vsel %vm7512_vm4, %v6188_v33, %v3100_v41  ;;  %v3104_v19 = vsel %vm7512_vm4, %v3102_v55, %v3103_v31 }
 0x180   : > { %v6204_v56 = vcombine.low %v3101_v20, %v3104_v19  ;;  %v3111_v21 = vsel %vm7512_vm4, %v3109_v1, %v3110_v11 }
 0x181   : > { %v8814_v16 = vadd.f32 %v6831_v62, %v6719_v24  ;;  %v9664_v62 = vld [vmem:[#allocation19_spill] sm:$0xff]  ;;  %7145 = vmatmul.mubr.bf16.gmra.mrb[152].mxu0 %v6203_v6  ;;  %v6205_v31 = vcombine.low %v3108_v5, %v3111_v21 }
 0x182   : > { %v6848_v17 = vpop.f32.mrb[64].mxu0  ;;  %7193 = vmatmul.mubr.bf16.gmra.mrb[152].mxu1 %v9664_v62  ;;  %7148 = vmatprep.mubr.bf16.mxu0 %v6204_v56  ;;  %v9670_v56 = vld [vmem:[#allocation14_spill] sm:$0xff] }
 0x183   : > { %v6960_v4 = vpop.f32.mrb[64].mxu1  ;;  %v6849_v38 = vpop.f32.mrb[65].mxu0  ;;  %7196 = vmatprep.mubr.bf16.mxu1 %v9665_v18 }
 0x184   : > { %v6961_v12 = vpop.f32.mrb[65].mxu1  ;;  %v6850_v8 = vadd.f32 %v6849_v38, %v6848_v17  ;;  %v6851_v22 = vpop.f32.mrb[66].mxu0 }
 0x185   : > { %v6962_v54 = vadd.f32 %v6961_v12, %v6960_v4  ;;  %v6963_v29 = vpop.f32.mrb[66].mxu1  ;;  %v6852_v24 = vpop.f32.mrb[67].mxu0 }
 0x186   : > { %v6964_v57 = vpop.f32.mrb[67].mxu1  ;;  %v4269_v41 = vadd.f32 %v6850_v8, %v9666_v59  ;;  %v6853_v30 = vadd.f32 %v6852_v24, %v6851_v22  ;;  %v9671_v59 = vld [vmem:[#allocation15_spill] sm:$0xff] }
 0x187   : > { %v6965_v49 = vadd.f32 %v6964_v57, %v6963_v29 }
 0x188   : > { %v4272_v53 = vadd.f32 %v6853_v30, %v9667_v0  ;;  %v8833_v28 = vadd.f32 %v6962_v54, %v4269_v41  ;;  %v9669_v54 = vld [vmem:[#allocation12_spill] sm:$0xff] }
 0x189   : > { %7149 = vmatmul.mubr.bf16.gmra.mrb[156].mxu0 %v6205_v31 }
 0x18a   : > { %v8839_v23 = vadd.f32 %v6965_v49, %v4272_v53  ;;  %7197 = vmatmul.mubr.bf16.gmra.mrb[156].mxu1 %v8575_v63  ;;  %v6854_v48 = vpop.f32.mrb[68].mxu0 }
 0x18b   : > { %v6966_v13 = vpop.f32.mrb[68].mxu1  ;;  %v6855_v26 = vpop.f32.mrb[69].mxu0 }
 0x18c   : > { %v6967_v25 = vpop.f32.mrb[69].mxu1  ;;  %v6856_v14 = vadd.f32 %v6855_v26, %v6854_v48  ;;  %v6857_v39 = vpop.f32.mrb[70].mxu0 }
 0x18d   : > { %v6968_v33 = vadd.f32 %v6967_v25, %v6966_v13  ;;  %v6969_v55 = vpop.f32.mrb[70].mxu1  ;;  %v6858_v15 = vpop.f32.mrb[71].mxu0 }
 0x18e   : > { %v6970_v4 = vpop.f32.mrb[71].mxu1  ;;  %v4277_v46 = vadd.f32 %v6856_v14, %v9668_v60  ;;  %v6859_v17 = vadd.f32 %v6858_v15, %v6857_v39  ;;  %v9673_v15 = vld [vmem:[#allocation18_spill] sm:$0xff] }
 0x18f   : > { %v6971_v12 = vadd.f32 %v6970_v4, %v6969_v55 }
 0x190   : > { %v4280_v29 = vadd.f32 %v6859_v17, %v9669_v54  ;;  %v8844_v20 = vadd.f32 %v6968_v33, %v4277_v46 }
 0x192   : > { %v8846_v57 = vadd.f32 %v6971_v12, %v4280_v29  ;;  %v9672_v12 = vld [vmem:[#allocation17_spill] sm:$0xff] }
 0x193   : > { %v6972_v19 = vpop.f32.mrb[72].mxu1 }
 0x194   : > { %v6973_v38 = vpop.f32.mrb[73].mxu1  ;;  %v6860_v22 = vpop.f32.mrb[72].mxu0 }
 0x195   : > { %v6974_v63 = vadd.f32 %v6973_v38, %v6972_v19  ;;  %v6975_v8 = vpop.f32.mrb[74].mxu1  ;;  %v6861_v6 = vpop.f32.mrb[73].mxu0 }
 0x196   : > { %v6976_v49 = vpop.f32.mrb[75].mxu1  ;;  %v6862_v40 = vadd.f32 %v6861_v6, %v6860_v22  ;;  %v6863_v11 = vpop.f32.mrb[74].mxu0 }
 0x197   : > { %v6977_v62 = vadd.f32 %v6976_v49, %v6975_v8  ;;  %v6864_v24 = vpop.f32.mrb[75].mxu0 }
 0x198   : > { %v4285_v18 = vadd.f32 %v6862_v40, %v9670_v56  ;;  %v6865_v1 = vadd.f32 %v6864_v24, %v6863_v11  ;;  %v9674_v11 = vld [vmem:[#allocation20_spill] sm:$0xff] }
 0x19a   : > { %v4288_v41 = vadd.f32 %v6865_v1, %v9671_v59  ;;  %v8850_v30 = vadd.f32 %v6974_v63, %v4285_v18  ;;  %v9675_v18 = vld [vmem:[#allocation21_spill] sm:$0xff] }
 0x19b   : > { %v6978_v0 = vpop.f32.mrb[76].mxu1 }
 0x19c   : > { %v6979_v53 = vpop.f32.mrb[77].mxu1  ;;  %v8852_v5 = vadd.f32 %v6977_v62, %v4288_v41  ;;  %v6866_v25 = vpop.f32.mrb[76].mxu0 }
 0x19d   : > { %v6980_v21 = vadd.f32 %v6979_v53, %v6978_v0  ;;  %v6981_v13 = vpop.f32.mrb[78].mxu1  ;;  %v6867_v55 = vpop.f32.mrb[77].mxu0 }
 0x19e   : > { %v6982_v33 = vpop.f32.mrb[79].mxu1  ;;  %v6868_v48 = vadd.f32 %v6867_v55, %v6866_v25  ;;  %v6869_v4 = vpop.f32.mrb[78].mxu0 }
 0x19f   : > { %v6983_v31 = vadd.f32 %v6982_v33, %v6981_v13  ;;  %v6870_v26 = vpop.f32.mrb[79].mxu0 }
 0x1a0   : > { %v4293_v14 = vadd.f32 %v6868_v48, %v9672_v12  ;;  %v6871_v39 = vadd.f32 %v6870_v26, %v6869_v4 }
 0x1a2   : > { %v4296_v60 = vadd.f32 %v6871_v39, %v9673_v15  ;;  %v8856_v46 = vadd.f32 %v6980_v21, %v4293_v14 }
 0x1a3   : > { %v6984_v17 = vpop.f32.mrb[80].mxu1 }
 0x1a4   : > { %v8858_v54 = vadd.f32 %v6983_v31, %v4296_v60  ;;  %v6985_v29 = vpop.f32.mrb[81].mxu1  ;;  %v6872_v19 = vpop.f32.mrb[80].mxu0 }
 0x1a5   : > { %v6986_v38 = vadd.f32 %v6985_v29, %v6984_v17  ;;  %v6987_v63 = vpop.f32.mrb[82].mxu1  ;;  %v6873_v8 = vpop.f32.mrb[81].mxu0 }
 0x1a6   : > { %v6988_v22 = vpop.f32.mrb[83].mxu1  ;;  %v6874_v49 = vadd.f32 %v6873_v8, %v6872_v19  ;;  %v6875_v6 = vpop.f32.mrb[82].mxu0 }
 0x1a7   : > { %v6989_v62 = vadd.f32 %v6988_v22, %v6987_v63  ;;  %v6876_v40 = vpop.f32.mrb[83].mxu0 }
 0x1a8   : > { %v4301_v24 = vadd.f32 %v6874_v49, %v9674_v11  ;;  %v6877_v56 = vadd.f32 %v6876_v40, %v6875_v6 }
 0x1aa   : > { %v4304_v1 = vadd.f32 %v6877_v56, %v9675_v18  ;;  %v8862_v59 = vadd.f32 %v6986_v38, %v4301_v24 }
 0x1ab   : > { %v6990_v41 = vpop.f32.mrb[84].mxu1 }
 0x1ac   : > { %v8864_v0 = vadd.f32 %v6989_v62, %v4304_v1  ;;  %v6991_v53 = vpop.f32.mrb[85].mxu1  ;;  %v6878_v25 = vpop.f32.mrb[84].mxu0 }
 0x1ad   : > { %v6992_v21 = vadd.f32 %v6991_v53, %v6990_v41  ;;  %v6993_v13 = vpop.f32.mrb[86].mxu1  ;;  %v6879_v55 = vpop.f32.mrb[85].mxu0 }
 0x1ae   : > { %v6994_v33 = vpop.f32.mrb[87].mxu1  ;;  %v6880_v48 = vadd.f32 %v6879_v55, %v6878_v25  ;;  %v6881_v4 = vpop.f32.mrb[86].mxu0 }
 0x1af   : > { %v6995_v31 = vadd.f32 %v6994_v33, %v6993_v13  ;;  %v6882_v26 = vpop.f32.mrb[87].mxu0 }
 0x1b0   : > { %v4309_v12 = vadd.f32 %v6880_v48, %v8540_v42  ;;  %v6883_v14 = vadd.f32 %v6882_v26, %v6881_v4 }
 0x1b2   : > { %v4312_v39 = vadd.f32 %v6883_v14, %v8557_v3  ;;  %v8868_v15 = vadd.f32 %v6992_v21, %v4309_v12 }
 0x1b4   : > { %v6996_v60 = vpop.f32.mrb[88].mxu1  ;;  %v8870_v17 = vadd.f32 %v6995_v31, %v4312_v39 }
 0x1b5   : > { %v6997_v29 = vpop.f32.mrb[89].mxu1 }
 0x1b6   : > { %v6884_v19 = vpop.f32.mrb[88].mxu0  ;;  %v6998_v38 = vadd.f32 %v6997_v29, %v6996_v60  ;;  %v6999_v63 = vpop.f32.mrb[90].mxu1 }
 0x1b7   : > { %v6885_v8 = vpop.f32.mrb[89].mxu0  ;;  %v7000_v22 = vpop.f32.mrb[91].mxu1 }
 0x1b8   : > { %v6886_v49 = vadd.f32 %v6885_v8, %v6884_v19  ;;  %v6887_v6 = vpop.f32.mrb[90].mxu0  ;;  %v7001_v62 = vadd.f32 %v7000_v22, %v6999_v63 }
 0x1b9   : > { %v6888_v40 = vpop.f32.mrb[91].mxu0 }
 0x1ba   : > { %v4317_v42 = vadd.f32 %v6886_v49, %v8598_v45  ;;  %v6889_v11 = vadd.f32 %v6888_v40, %v6887_v6 }
 0x1bc   : > { %v4320_v3 = vadd.f32 %v6889_v11, %v8606_v58  ;;  %v8874_v24 = vadd.f32 %v6998_v38, %v4317_v42 }
 0x1be   : > { %v8876_v56 = vadd.f32 %v7001_v62, %v4320_v3  ;;  %v7002_v18 = vpop.f32.mrb[92].mxu1 }
 0x1bf   : > { %v7003_v41 = vpop.f32.mrb[93].mxu1 }
 0x1c0   : > { %v6890_v1 = vpop.f32.mrb[92].mxu0  ;;  %v7004_v21 = vadd.f32 %v7003_v41, %v7002_v18  ;;  %v7005_v13 = vpop.f32.mrb[94].mxu1 }
 0x1c1   : > { %v6891_v53 = vpop.f32.mrb[93].mxu0  ;;  %v7006_v55 = vpop.f32.mrb[95].mxu1 }
 0x1c2   : > { %v6892_v25 = vadd.f32 %v6891_v53, %v6890_v1  ;;  %v6893_v33 = vpop.f32.mrb[94].mxu0  ;;  %v7007_v48 = vadd.f32 %v7006_v55, %v7005_v13 }
 0x1c3   : > { %v6894_v31 = vpop.f32.mrb[95].mxu0 }
 0x1c4   : > { %v4325_v45 = vadd.f32 %v6892_v25, %v8626_v2  ;;  %v6895_v4 = vadd.f32 %v6894_v31, %v6893_v33 }
 0x1c6   : > { %v4328_v58 = vadd.f32 %v6895_v4, %v8631_v37  ;;  %v8880_v26 = vadd.f32 %v7004_v21, %v4325_v45 }
 0x1c7   : > { %v7008_v12 = vpop.f32.mrb[96].mxu1 }
 0x1c8   : > { %v7009_v14 = vpop.f32.mrb[97].mxu1  ;;  %v8882_v39 = vadd.f32 %v7007_v48, %v4328_v58 }
 0x1c9   : > { %v7010_v60 = vadd.f32 %v7009_v14, %v7008_v12  ;;  %v7011_v29 = vpop.f32.mrb[98].mxu1 }
 0x1ca   : > { %v6896_v19 = vpop.f32.mrb[96].mxu0  ;;  %v7012_v38 = vpop.f32.mrb[99].mxu1 }
 0x1cb   : > { %v6897_v63 = vpop.f32.mrb[97].mxu0  ;;  %v7013_v8 = vadd.f32 %v7012_v38, %v7011_v29 }
 0x1cc   : > { %v6898_v22 = vadd.f32 %v6897_v63, %v6896_v19  ;;  %v6899_v49 = vpop.f32.mrb[98].mxu0 }
 0x1cd   : > { %v6900_v6 = vpop.f32.mrb[99].mxu0 }
 0x1ce   : > { %v4333_v2 = vadd.f32 %v6898_v22, %v8663_v52  ;;  %v6901_v62 = vadd.f32 %v6900_v6, %v6899_v49 }
 0x1d0   : > { %v4336_v37 = vadd.f32 %v6901_v62, %v8670_v27  ;;  %v8886_v40 = vadd.f32 %v7010_v60, %v4333_v2 }
 0x1d2   : > { %v7014_v42 = vpop.f32.mrb[100].mxu1  ;;  %v8888_v11 = vadd.f32 %v7013_v8, %v4336_v37 }
 0x1d3   : > { %v7015_v3 = vpop.f32.mrb[101].mxu1 }
 0x1d4   : > { %v7016_v18 = vadd.f32 %v7015_v3, %v7014_v42  ;;  %v7017_v1 = vpop.f32.mrb[102].mxu1  ;;  %v6902_v41 = vpop.f32.mrb[100].mxu0 }
 0x1d5   : > { %v7018_v53 = vpop.f32.mrb[103].mxu1  ;;  %v6903_v21 = vpop.f32.mrb[101].mxu0 }
 0x1d6   : > { %v7019_v13 = vadd.f32 %v7018_v53, %v7017_v1  ;;  %v6904_v25 = vadd.f32 %v6903_v21, %v6902_v41  ;;  %v6905_v33 = vpop.f32.mrb[102].mxu0 }
 0x1d7   : > { %v6906_v55 = vpop.f32.mrb[103].mxu0 }
 0x1d8   : > { %v4341_v52 = vadd.f32 %v6904_v25, %v8690_v47  ;;  %v6907_v31 = vadd.f32 %v6906_v55, %v6905_v33 }
 0x1da   : > { %v4344_v27 = vadd.f32 %v6907_v31, %v8696_v7  ;;  %v8892_v48 = vadd.f32 %v7016_v18, %v4341_v52 }
 0x1dc   : > { %v7020_v45 = vpop.f32.mrb[104].mxu1  ;;  %v8894_v58 = vadd.f32 %v7019_v13, %v4344_v27 }
 0x1dd   : > { %v7021_v4 = vpop.f32.mrb[105].mxu1 }
 0x1de   : > { %v7022_v12 = vadd.f32 %v7021_v4, %v7020_v45  ;;  %v7023_v14 = vpop.f32.mrb[106].mxu1 }
 0x1df   : > { %v6908_v60 = vpop.f32.mrb[104].mxu0  ;;  %v7024_v29 = vpop.f32.mrb[107].mxu1 }
 0x1e0   : > { %v6909_v19 = vpop.f32.mrb[105].mxu0  ;;  %v7025_v38 = vadd.f32 %v7024_v29, %v7023_v14 }
 0x1e1   : > { %v6910_v63 = vadd.f32 %v6909_v19, %v6908_v60  ;;  %v6911_v8 = vpop.f32.mrb[106].mxu0 }
 0x1e2   : > { %v6912_v22 = vpop.f32.mrb[107].mxu0 }
 0x1e3   : > { %v4349_v47 = vadd.f32 %v6910_v63, %v8723_v43  ;;  %v6913_v49 = vadd.f32 %v6912_v22, %v6911_v8 }
 0x1e5   : > { %v4352_v7 = vadd.f32 %v6913_v49, %v8726_v51  ;;  %v8898_v6 = vadd.f32 %v7022_v12, %v4349_v47 }
 0x1e7   : > { %v8900_v2 = vadd.f32 %v7025_v38, %v4352_v7 }
 0x1e8   : > { %v7026_v62 = vpop.f32.mrb[108].mxu1 }
 0x1e9   : > { %v7027_v37 = vpop.f32.mrb[109].mxu1 }
 0x1ea   : > { %v7028_v42 = vadd.f32 %v7027_v37, %v7026_v62  ;;  %v7029_v3 = vpop.f32.mrb[110].mxu1 }
 0x1eb   : > { %v6914_v18 = vpop.f32.mrb[108].mxu0  ;;  %v7030_v1 = vpop.f32.mrb[111].mxu1 }
 0x1ec   : > { %v6915_v41 = vpop.f32.mrb[109].mxu0  ;;  %v7031_v53 = vadd.f32 %v7030_v1, %v7029_v3 }
 0x1ed   : > { %v6916_v21 = vadd.f32 %v6915_v41, %v6914_v18  ;;  %v6917_v13 = vpop.f32.mrb[110].mxu0 }
 0x1ee   : > { %v6918_v25 = vpop.f32.mrb[111].mxu0 }
 0x1ef   : > { %v4357_v43 = vadd.f32 %v6916_v21, %v8749_v50  ;;  %v6919_v33 = vadd.f32 %v6918_v25, %v6917_v13 }
 0x1f1   : > { %v4360_v51 = vadd.f32 %v6919_v33, %v8753_v9  ;;  %v8904_v55 = vadd.f32 %v7028_v42, %v4357_v43 }
 0x1f3   : > { %v8906_v52 = vadd.f32 %v7031_v53, %v4360_v51 }
 0x1f4   : > { %v7032_v31 = vpop.f32.mrb[112].mxu1 }
 0x1f5   : > { %v7033_v27 = vpop.f32.mrb[113].mxu1 }
 0x1f6   : > { %v7034_v4 = vadd.f32 %v7033_v27, %v7032_v31  ;;  %v7035_v12 = vpop.f32.mrb[114].mxu1 }
 0x1f7   : > { %v6920_v45 = vpop.f32.mrb[112].mxu0  ;;  %v7036_v60 = vpop.f32.mrb[115].mxu1 }
 0x1f8   : > { %v6921_v14 = vpop.f32.mrb[113].mxu0  ;;  %v7037_v38 = vadd.f32 %v7036_v60, %v7035_v12 }
 0x1f9   : > { %v6922_v29 = vadd.f32 %v6921_v14, %v6920_v45  ;;  %v6923_v19 = vpop.f32.mrb[114].mxu0 }
 0x1fa   : > { %v6924_v63 = vpop.f32.mrb[115].mxu0 }
 0x1fb   : > { %v4365_v50 = vadd.f32 %v6922_v29, %v8770_v34  ;;  %v6925_v8 = vadd.f32 %v6924_v63, %v6923_v19 }
 0x1fd   : > { %v4368_v9 = vadd.f32 %v6925_v8, %v8772_v36  ;;  %v8910_v22 = vadd.f32 %v7034_v4, %v4365_v50 }
 0x1ff   : > { %v8912_v47 = vadd.f32 %v7037_v38, %v4368_v9 }
 0x200   : > { %v7038_v49 = vpop.f32.mrb[116].mxu1 }
 0x201   : > { %v7039_v7 = vpop.f32.mrb[117].mxu1 }
 0x202   : > { %v6926_v62 = vpop.f32.mrb[116].mxu0  ;;  %v7040_v37 = vadd.f32 %v7039_v7, %v7038_v49  ;;  %v7041_v42 = vpop.f32.mrb[118].mxu1 }
 0x203   : > { %v6927_v3 = vpop.f32.mrb[117].mxu0  ;;  %v7042_v18 = vpop.f32.mrb[119].mxu1 }
 0x204   : > { %v6928_v1 = vadd.f32 %v6927_v3, %v6926_v62  ;;  %v6929_v41 = vpop.f32.mrb[118].mxu0  ;;  %v7043_v53 = vadd.f32 %v7042_v18, %v7041_v42 }
 0x205   : > { %v6930_v21 = vpop.f32.mrb[119].mxu0 }
 0x206   : > { %v4373_v34 = vadd.f32 %v6928_v1, %v8787_v44  ;;  %v6931_v13 = vadd.f32 %v6930_v21, %v6929_v41 }
 0x208   : > { %v4376_v36 = vadd.f32 %v6931_v13, %v8790_v35  ;;  %v8916_v25 = vadd.f32 %v7040_v37, %v4373_v34 }
 0x20a   : > { %v8918_v43 = vadd.f32 %v7043_v53, %v4376_v36 }
 0x20c   : > { %v7044_v33 = vpop.f32.mrb[120].mxu1 }
 0x20d   : > { %v7045_v51 = vpop.f32.mrb[121].mxu1 }
 0x20e   : > { %v7046_v31 = vadd.f32 %v7045_v51, %v7044_v33  ;;  %v7047_v27 = vpop.f32.mrb[122].mxu1  ;;  %v6932_v45 = vpop.f32.mrb[120].mxu0 }
 0x20f   : > { %v7048_v4 = vpop.f32.mrb[123].mxu1  ;;  %v6933_v12 = vpop.f32.mrb[121].mxu0 }
 0x210   : > { %v7049_v14 = vadd.f32 %v7048_v4, %v7047_v27  ;;  %v6934_v60 = vadd.f32 %v6933_v12, %v6932_v45  ;;  %v6935_v29 = vpop.f32.mrb[122].mxu0 }
 0x211   : > { %v6936_v19 = vpop.f32.mrb[123].mxu0 }
 0x212   : > { %v4381_v44 = vadd.f32 %v6934_v60, %v8793_v61  ;;  %v6937_v38 = vadd.f32 %v6936_v19, %v6935_v29 }
 0x214   : > { %v4384_v35 = vadd.f32 %v6937_v38, %v8797_v32  ;;  %v8922_v63 = vadd.f32 %v7046_v31, %v4381_v44 }
 0x216   : > { %v8924_v8 = vadd.f32 %v7049_v14, %v4384_v35 }
 0x217   : > { %v7050_v50 = vpop.f32.mrb[124].mxu1 }
 0x218   : > { %v7051_v9 = vpop.f32.mrb[125].mxu1 }
 0x219   : > { %v7052_v49 = vadd.f32 %v7051_v9, %v7050_v50  ;;  %v7053_v7 = vpop.f32.mrb[126].mxu1 }
 0x21a   : > { %v7054_v62 = vpop.f32.mrb[127].mxu1  ;;  %v6938_v37 = vpop.f32.mrb[124].mxu0 }
 0x21b   : > { %v7055_v42 = vadd.f32 %v7054_v62, %v7053_v7  ;;  %v6939_v3 = vpop.f32.mrb[125].mxu0 }
 0x21c   : > { %v6940_v18 = vadd.f32 %v6939_v3, %v6938_v37  ;;  %v6941_v1 = vpop.f32.mrb[126].mxu0 }
 0x21d   : > { %v6942_v41 = vpop.f32.mrb[127].mxu0 }
 0x21e   : > { %v4389_v61 = vadd.f32 %v6940_v18, %v8804_v10  ;;  %v6943_v53 = vadd.f32 %v6942_v41, %v6941_v1 }
 0x21f   : > { %v8928_v32 = vpop.f32.mrb[128].mxu1 }
 0x220   : > { %v8930_v21 = vpop.f32.mrb[129].mxu1  ;;  %v4392_v34 = vadd.f32 %v6943_v53, %v8814_v16  ;;  %v8940_v36 = vadd.f32 %v7052_v49, %v4389_v61 }
 0x221   : > { %v8938_v13 = vpop.f32.mrb[130].mxu1 }
 0x222   : > { %v6506_v10 = vpack.c.bf16 %v8938_v13, %v8928_v32  ;;  %v8944_v33 = vpop.f32.mrb[131].mxu1  ;;  %v7122_v51 = vpop.f32.mrb[128].mxu0  ;;  %v8950_v27 = vadd.f32 %v7055_v42, %v4392_v34 }
 0x223   : > { %v6501_v16 = vpack.c.bf16 %v8944_v33, %v8930_v21  ;;  %v5419_v31 = vadd.f32 %v8944_v33, %v8930_v21  ;;  %v8953_v45 = vadd.f32 %v7122_v51, %v8844_v20  ;;  %v4590_v4 = vpop.f32.mrb[129].mxu0 }
 0x224   : > { %6593 = vst [vmem:[%s8936_s18 + $0x8] sm:$0xff] %v6506_v10   ;;  %v8957_v12 = vadd.f32 %v4590_v4, %v8833_v28  ;;  %v7123_v14 = vpop.f32.mrb[130].mxu0 }
 0x225   : > { %6502 = vst [vmem:[%s8936_s18] sm:$0xff] %v6501_v16   ;;  %v5420_v60 = vadd.f32 %v8928_v32, %v5419_v31  ;;  %v8962_v29 = vadd.f32 %v7123_v14, %v8846_v57  ;;  %v4593_v19 = vpop.f32.mrb[131].mxu0 }
 0x226   : > { %v8970_v20 = vadd.f32 %v4593_v19, %v8839_v23 }
 0x227   : > { %9676 = vst [vmem:[#allocation3_spill] sm:$0xff] %v8962_v29  ;;  %v8972_v28 = vpop.f32.mrb[132].mxu1  ;;  %v5421_v44 = vadd.f32 %v8938_v13, %v5420_v60  ;;  %v6426_v38 = vpack.c.bf16 %v8962_v29, %v8953_v45 }
 0x228   : > { %v8977_v57 = vpop.f32.mrb[133].mxu1  ;;  %v6421_v35 = vpack.c.bf16 %v8970_v20, %v8957_v12  ;;  %v4877_v50 = vadd.f32 %v8970_v20, %v8957_v12 }
 0x229   : > { %v5422_v9 = vadd.f32 %v5421_v44, %v8977_v57  ;;  %v8984_v23 = vpop.f32.mrb[134].mxu1  ;;  %6578 = vst [vmem:[%s8967_s21 + $0x8] sm:$0xff] %v6426_v38  }
 0x22a   : > { %v6516_v49 = vpack.c.bf16 %v8984_v23, %v8972_v28  ;;  %v8989_v7 = vpop.f32.mrb[135].mxu1  ;;  %6422 = vst [vmem:[%s8967_s21] sm:$0xff] %v6421_v35   ;;  %v4878_v62 = vadd.f32 %v4877_v50, %v8953_v45  ;;  %v7126_v37 = vpop.f32.mrb[132].mxu0 }
 0x22b   : > { %v6511_v42 = vpack.c.bf16 %v8989_v7, %v8977_v57  ;;  %v5423_v3 = vadd.f32 %v5422_v9, %v8989_v7  ;;  %v8997_v18 = vadd.f32 %v7126_v37, %v8856_v46  ;;  %v4606_v1 = vpop.f32.mrb[133].mxu0 }
 0x22c   : > { %6595 = vst [vmem:[%s8936_s18 + $0x18] sm:$0xff] %v6516_v49   ;;  %v9001_v41 = vadd.f32 %v4606_v1, %v8850_v30  ;;  %v4879_v61 = vadd.f32 %v4878_v62, %v8962_v29  ;;  %v7127_v53 = vpop.f32.mrb[134].mxu0 }
 0x22d   : > { %9677 = vst [vmem:[#allocation4_spill] sm:$0xff] %v8997_v18  ;;  %6594 = vst [vmem:[%s8936_s18 + $0x10] sm:$0xff] %v6511_v42   ;;  %v5424_v34 = vadd.f32 %v8972_v28, %v5423_v3  ;;  %v9007_v10 = vadd.f32 %v7127_v53, %v8858_v54  ;;  %v4609_v51 = vpop.f32.mrb[135].mxu0 }
 0x22e   : > { %9678 = vst [vmem:[#allocation5_spill] sm:$0xff] %v9001_v41  ;;  %v4880_v46 = vadd.f32 %v4879_v61, %v9001_v41  ;;  %v9011_v16 = vadd.f32 %v4609_v51, %v8852_v5 }
 0x22f   : > { %9679 = vst [vmem:[#allocation6_spill] sm:$0xff] %v9007_v10  ;;  %v9013_v31 = vpop.f32.mrb[136].mxu1  ;;  %v5425_v30 = vadd.f32 %v8984_v23, %v5424_v34  ;;  %v6436_v4 = vpack.c.bf16 %v9007_v10, %v8997_v18 }
 0x230   : > { %9680 = vst [vmem:[#allocation7_spill] sm:$0xff] %v9011_v16  ;;  %v9018_v14 = vpop.f32.mrb[137].mxu1  ;;  %v6431_v54 = vpack.c.bf16 %v9011_v16, %v9001_v41  ;;  %v4881_v60 = vadd.f32 %v4880_v46, %v9011_v16 }
 0x231   : > { %v5426_v19 = vadd.f32 %v5425_v30, %v9018_v14  ;;  %v9024_v5 = vpop.f32.mrb[138].mxu1  ;;  %6580 = vst [vmem:[%s8967_s21 + $0x18] sm:$0xff] %v6436_v4  }
 0x232   : > { %v6526_v44 = vpack.c.bf16 %v9024_v5, %v9013_v31  ;;  %v9029_v38 = vpop.f32.mrb[139].mxu1  ;;  %6579 = vst [vmem:[%s8967_s21 + $0x10] sm:$0xff] %v6431_v54   ;;  %v4882_v35 = vadd.f32 %v4881_v60, %v8997_v18  ;;  %v7130_v50 = vpop.f32.mrb[136].mxu0 }
 0x233   : > { %v6521_v9 = vpack.c.bf16 %v9029_v38, %v9018_v14  ;;  %v5427_v49 = vadd.f32 %v5426_v19, %v9029_v38  ;;  %v9037_v62 = vadd.f32 %v7130_v50, %v8868_v15  ;;  %v4622_v37 = vpop.f32.mrb[137].mxu0 }
 0x234   : > { %6597 = vst [vmem:[%s8936_s18 + $0x28] sm:$0xff] %v6526_v44   ;;  %v9041_v42 = vadd.f32 %v4622_v37, %v8862_v59  ;;  %v4883_v3 = vadd.f32 %v4882_v35, %v9007_v10  ;;  %v7131_v1 = vpop.f32.mrb[138].mxu0 }
 0x235   : > { %6596 = vst [vmem:[%s8936_s18 + $0x20] sm:$0xff] %v6521_v9   ;;  %v5428_v61 = vadd.f32 %v9013_v31, %v5427_v49  ;;  %v9047_v53 = vadd.f32 %v7131_v1, %v8870_v17  ;;  %v4625_v34 = vpop.f32.mrb[139].mxu0 }
 0x236   : > { %v4884_v15 = vadd.f32 %v4883_v3, %v9041_v42  ;;  %v9051_v51 = vadd.f32 %v4625_v34, %v8864_v0 }
 0x237   : > { %v9053_v46 = vpop.f32.mrb[140].mxu1  ;;  %v5429_v59 = vadd.f32 %v9024_v5, %v5428_v61  ;;  %v6446_v30 = vpack.c.bf16 %v9047_v53, %v9037_v62 }
 0x238   : > { %v9058_v4 = vpop.f32.mrb[141].mxu1  ;;  %v6441_v17 = vpack.c.bf16 %v9051_v51, %v9041_v42  ;;  %v4885_v54 = vadd.f32 %v4884_v15, %v9051_v51 }
 0x239   : > { %v5430_v60 = vadd.f32 %v5429_v59, %v9058_v4  ;;  %v9064_v0 = vpop.f32.mrb[142].mxu1  ;;  %6582 = vst [vmem:[%s8967_s21 + $0x28] sm:$0xff] %v6446_v30  }
 0x23a   : > { %v6536_v19 = vpack.c.bf16 %v9064_v0, %v9053_v46  ;;  %v9069_v44 = vpop.f32.mrb[143].mxu1  ;;  %6581 = vst [vmem:[%s8967_s21 + $0x20] sm:$0xff] %v6441_v17   ;;  %v4886_v35 = vadd.f32 %v4885_v54, %v9037_v62  ;;  %v7134_v50 = vpop.f32.mrb[140].mxu0 }
 0x23b   : > { %v6531_v9 = vpack.c.bf16 %v9069_v44, %v9058_v4  ;;  %v5431_v49 = vadd.f32 %v5430_v60, %v9069_v44  ;;  %v9077_v37 = vadd.f32 %v7134_v50, %v8880_v26  ;;  %v4638_v3 = vpop.f32.mrb[141].mxu0 }
 0x23c   : > { %6599 = vst [vmem:[%s8936_s18 + $0x38] sm:$0xff] %v6536_v19   ;;  %v9081_v1 = vadd.f32 %v4638_v3, %v8874_v24  ;;  %v4887_v61 = vadd.f32 %v4886_v35, %v9047_v53  ;;  %v7135_v34 = vpop.f32.mrb[142].mxu0 }
 0x23d   : > { %6598 = vst [vmem:[%s8936_s18 + $0x30] sm:$0xff] %v6531_v9   ;;  %v5432_v15 = vadd.f32 %v9053_v46, %v5431_v49  ;;  %v9087_v59 = vadd.f32 %v7135_v34, %v8882_v39  ;;  %v4641_v30 = vpop.f32.mrb[143].mxu0 }
 0x23e   : > { %v4888_v26 = vadd.f32 %v4887_v61, %v9081_v1  ;;  %v9091_v17 = vadd.f32 %v4641_v30, %v8876_v56 }
 0x23f   : > { %v9093_v54 = vpop.f32.mrb[144].mxu1  ;;  %v5433_v24 = vadd.f32 %v9064_v0, %v5432_v15  ;;  %v6456_v60 = vpack.c.bf16 %v9087_v59, %v9077_v37 }
 0x240   : > { %v9098_v19 = vpop.f32.mrb[145].mxu1  ;;  %v6451_v39 = vpack.c.bf16 %v9091_v17, %v9081_v1  ;;  %v4889_v35 = vadd.f32 %v4888_v26, %v9091_v17 }
 0x241   : > { %v5434_v50 = vadd.f32 %v5433_v24, %v9098_v19  ;;  %v9104_v56 = vpop.f32.mrb[146].mxu1  ;;  %6584 = vst [vmem:[%s8967_s21 + $0x38] sm:$0xff] %v6456_v60  }
 0x242   : > { %v6546_v9 = vpack.c.bf16 %v9104_v56, %v9093_v54  ;;  %v9109_v49 = vpop.f32.mrb[147].mxu1  ;;  %6583 = vst [vmem:[%s8967_s21 + $0x30] sm:$0xff] %v6451_v39   ;;  %v4890_v3 = vadd.f32 %v4889_v35, %v9077_v37  ;;  %v7138_v61 = vpop.f32.mrb[144].mxu0 }
 0x243   : > { %v6541_v34 = vpack.c.bf16 %v9109_v49, %v9098_v19  ;;  %v5435_v15 = vadd.f32 %v5434_v50, %v9109_v49  ;;  %v9117_v30 = vadd.f32 %v7138_v61, %v8892_v48  ;;  %v4654_v26 = vpop.f32.mrb[145].mxu0 }
 0x244   : > { %6601 = vst [vmem:[%s8936_s18 + $0x48] sm:$0xff] %v6546_v9   ;;  %v9121_v24 = vadd.f32 %v4654_v26, %v8886_v40  ;;  %v4891_v60 = vadd.f32 %v4890_v3, %v9087_v59  ;;  %v7139_v39 = vpop.f32.mrb[146].mxu0 }
 0x245   : > { %6600 = vst [vmem:[%s8936_s18 + $0x40] sm:$0xff] %v6541_v34   ;;  %v5436_v35 = vadd.f32 %v9093_v54, %v5435_v15  ;;  %v9127_v10 = vadd.f32 %v7139_v39, %v8894_v58  ;;  %v4657_v50 = vpop.f32.mrb[147].mxu0 }
 0x246   : > { %v4892_v48 = vadd.f32 %v4891_v60, %v9121_v24  ;;  %v9131_v61 = vadd.f32 %v4657_v50, %v8888_v11 }
 0x247   : > { %v5437_v40 = vadd.f32 %v9104_v56, %v5436_v35  ;;  %v6466_v3 = vpack.c.bf16 %v9127_v10, %v9117_v30 }
 0x248   : > { %v6461_v58 = vpack.c.bf16 %v9131_v61, %v9121_v24  ;;  %v4893_v15 = vadd.f32 %v4892_v48, %v9131_v61 }
 0x249   : > { %6586 = vst [vmem:[%s8967_s21 + $0x48] sm:$0xff] %v6466_v3  }
 0x24a   : > { %6585 = vst [vmem:[%s8967_s21 + $0x40] sm:$0xff] %v6461_v58   ;;  %v4894_v35 = vadd.f32 %v4893_v15, %v9117_v30 }
 0x24b   : > { %v9133_v9 = vpop.f32.mrb[148].mxu1 }
 0x24c   : > { %9681 = vst [vmem:[#allocation10_spill] sm:$0xff] %v9133_v9  ;;  %v9138_v34 = vpop.f32.mrb[149].mxu1  ;;  %v7142_v50 = vpop.f32.mrb[148].mxu0  ;;  %v4895_v41 = vadd.f32 %v4894_v35, %v9127_v10 }
 0x24d   : > { %v5438_v26 = vadd.f32 %v5437_v40, %v9138_v34  ;;  %v9144_v11 = vpop.f32.mrb[150].mxu1  ;;  %v9157_v40 = vadd.f32 %v7142_v50, %v8904_v55  ;;  %v4670_v16 = vpop.f32.mrb[149].mxu0 }
 0x24e   : > { %9682 = vst [vmem:[#allocation13_spill] sm:$0xff] %v9144_v11  ;;  %v6556_v60 = vpack.c.bf16 %v9144_v11, %v9133_v9  ;;  %v9149_v39 = vpop.f32.mrb[151].mxu1  ;;  %v9161_v3 = vadd.f32 %v4670_v16, %v8898_v6  ;;  %v7143_v58 = vpop.f32.mrb[150].mxu0 }
 0x24f   : > { %9683 = vst [vmem:[#allocation16_spill] sm:$0xff] %v9149_v39  ;;  %v6551_v18 = vpack.c.bf16 %v9149_v39, %v9138_v34  ;;  %v5439_v48 = vadd.f32 %v5438_v26, %v9149_v39  ;;  %v9167_v29 = vadd.f32 %v7143_v58, %v8906_v52  ;;  %v4673_v26 = vpop.f32.mrb[151].mxu0 }
 0x250   : > { %6603 = vst [vmem:[%s8936_s18 + $0x58] sm:$0xff] %v6556_v60   ;;  %v4896_v55 = vadd.f32 %v4895_v41, %v9161_v3  ;;  %v9171_v50 = vadd.f32 %v4673_v26, %v8900_v2 }
 0x251   : > { %6602 = vst [vmem:[%s8936_s18 + $0x50] sm:$0xff] %v6551_v18   ;;  %v5440_v15 = vadd.f32 %v9133_v9, %v5439_v48  ;;  %v6476_v16 = vpack.c.bf16 %v9167_v29, %v9157_v40 }
 0x252   : > { %v6471_v52 = vpack.c.bf16 %v9171_v50, %v9161_v3  ;;  %v4897_v35 = vadd.f32 %v4896_v55, %v9171_v50 }
 0x253   : > { %v5441_v6 = vadd.f32 %v9144_v11, %v5440_v15  ;;  %6588 = vst [vmem:[%s8967_s21 + $0x58] sm:$0xff] %v6476_v16  }
 0x254   : > { %6587 = vst [vmem:[%s8967_s21 + $0x50] sm:$0xff] %v6471_v52   ;;  %v4898_v15 = vadd.f32 %v4897_v35, %v9157_v40  ;;  %v7146_v26 = vpop.f32.mrb[152].mxu0 }
 0x255   : > { %v9173_v60 = vpop.f32.mrb[152].mxu1  ;;  %v4686_v9 = vpop.f32.mrb[153].mxu0 }
 0x256   : > { %9684 = vst [vmem:[#allocation19_spill] sm:$0xff] %v9173_v60  ;;  %v9178_v18 = vpop.f32.mrb[153].mxu1  ;;  %v9201_v16 = vadd.f32 %v4686_v9, %v8910_v22  ;;  %v4899_v39 = vadd.f32 %v4898_v15, %v9167_v29  ;;  %v7147_v52 = vpop.f32.mrb[154].mxu0 }
 0x257   : > { %9685 = vst [vmem:[#allocation22_spill] sm:$0xff] %v9178_v18  ;;  %v5442_v41 = vadd.f32 %v5441_v6, %v9178_v18  ;;  %v9184_v2 = vpop.f32.mrb[154].mxu1  ;;  %v9197_v6 = vadd.f32 %v7146_v26, %v8916_v25 }
 0x258   : > { %9686 = vst [vmem:[#allocation8_spill] sm:$0xff] %v9184_v2  ;;  %v6566_v48 = vpack.c.bf16 %v9184_v2, %v9173_v60  ;;  %v9189_v58 = vpop.f32.mrb[155].mxu1  ;;  %v4900_v25 = vadd.f32 %v4899_v39, %v9201_v16 }
 0x259   : > { %9687 = vst [vmem:[#allocation9_spill] sm:$0xff] %v9189_v58  ;;  %v6561_v11 = vpack.c.bf16 %v9189_v58, %v9178_v18  ;;  %v5443_v55 = vadd.f32 %v5442_v41, %v9189_v58  ;;  %v9207_v18 = vadd.f32 %v7147_v52, %v8918_v43  ;;  %v4689_v41 = vpop.f32.mrb[155].mxu0 }
 0x25a   : > { %6605 = vst [vmem:[%s8936_s18 + $0x68] sm:$0xff] %v6566_v48   ;;  %v9211_v26 = vadd.f32 %v4689_v41, %v8912_v47 }
 0x25b   : > { %6604 = vst [vmem:[%s8936_s18 + $0x60] sm:$0xff] %v6561_v11   ;;  %v5444_v35 = vadd.f32 %v9173_v60, %v5443_v55  ;;  %v6486_v9 = vpack.c.bf16 %v9207_v18, %v9197_v6 }
 0x25c   : > { %v6481_v43 = vpack.c.bf16 %v9211_v26, %v9201_v16  ;;  %v4901_v15 = vadd.f32 %v4900_v25, %v9211_v26  ;;  %v7150_v41 = vpop.f32.mrb[156].mxu0 }
 0x25d   : > { %v9213_v48 = vpop.f32.mrb[156].mxu1  ;;  %v5445_v22 = vadd.f32 %v9184_v2, %v5444_v35  ;;  %6590 = vst [vmem:[%s8967_s21 + $0x68] sm:$0xff] %v6486_v9   ;;  %v4702_v60 = vpop.f32.mrb[157].mxu0 }
 0x25e   : > { %9688 = vst [vmem:[#allocation11_spill] sm:$0xff] %v9213_v48  ;;  %v9218_v11 = vpop.f32.mrb[157].mxu1  ;;  %6589 = vst [vmem:[%s8967_s21 + $0x60] sm:$0xff] %v6481_v43   ;;  %v4902_v35 = vadd.f32 %v4901_v15, %v9197_v6  ;;  %v9241_v9 = vadd.f32 %v4702_v60, %v8922_v63  ;;  %v7151_v58 = vpop.f32.mrb[158].mxu0 }
 0x25f   : > { %9689 = vst [vmem:[#allocation12_spill] sm:$0xff] %v9218_v11  ;;  %v5446_v39 = vadd.f32 %v5445_v22, %v9218_v11  ;;  %v9224_v47 = vpop.f32.mrb[158].mxu1  ;;  %v9237_v22 = vadd.f32 %v7150_v41, %v8940_v36 }
 0x260   : > { %9690 = vst [vmem:[#allocation14_spill] sm:$0xff] %v9224_v47  ;;  %v6576_v55 = vpack.c.bf16 %v9224_v47, %v9213_v48  ;;  %v9229_v52 = vpop.f32.mrb[159].mxu1  ;;  %v4903_v43 = vadd.f32 %v4902_v35, %v9207_v18 }
 0x261   : > { %9691 = vst [vmem:[#allocation15_spill] sm:$0xff] %v9229_v52  ;;  %v6571_v2 = vpack.c.bf16 %v9229_v52, %v9218_v11  ;;  %v5447_v25 = vadd.f32 %v5446_v39, %v9229_v52  ;;  %v9247_v11 = vadd.f32 %v7151_v58, %v8950_v27  ;;  %v4705_v39 = vpop.f32.mrb[159].mxu0 }
 0x262   : > { %6607 = vst [vmem:[%s8936_s18 + $0x78] sm:$0xff] %v6576_v55   ;;  %v4904_v36 = vadd.f32 %v4903_v43, %v9241_v9  ;;  %v9251_v41 = vadd.f32 %v4705_v39, %v8924_v8 }
 0x263   : > { %6606 = vst [vmem:[%s8936_s18 + $0x70] sm:$0xff] %v6571_v2   ;;  %v5448_v15 = vadd.f32 %v9213_v48, %v5447_v25  ;;  %v6496_v63 = vpack.c.bf16 %v9247_v11, %v9237_v22 }
 0x264   : > { %v6491_v60 = vpack.c.bf16 %v9251_v41, %v9241_v9  ;;  %v4905_v2 = vadd.f32 %v4904_v36, %v9251_v41 }
 0x265   : > { %v5449_v55 = vadd.f32 %v9224_v47, %v5448_v15  ;;  %6592 = vst [vmem:[%s8967_s21 + $0x78] sm:$0xff] %v6496_v63  }
 0x266   : > { %6591 = vst [vmem:[%s8967_s21 + $0x70] sm:$0xff] %v6491_v60   ;;  %v4906_v27 = vadd.f32 %v4905_v2, %v9237_v22 }
 0x267   : > { %v5450_v35 = vrot.slane %v5449_v55, 4 }
 0x268   : > { %v4907_v8 = vadd.f32 %v4906_v27, %v9247_v11 }
 0x269   : > { %v5451_v58 = vadd.f32 %v5450_v35, %v5449_v55 }
 0x26a   : > { %v4908_v43 = vrot.slane %v4907_v8, 4 }
 0x26b   : > { %v5452_v25 = vrot.slane %v5451_v58, 2 }
 0x26c   : > { %v4909_v39 = vadd.f32 %v4908_v43, %v4907_v8 }
 0x26d   : > { %v5453_v15 = vadd.f32 %v5452_v25, %v5451_v58 }
 0x26e   : > { %v4910_v48 = vrot.slane %v4909_v39, 2 }
 0x26f   : > { %v5454_v47 = vrot.slane %v5453_v15, 1 }
 0x270   : > { %v4911_v36 = vadd.f32 %v4910_v48, %v4909_v39  ;;  %v9697_v39 = vld [vmem:[#allocation5_spill] sm:$0xff] }
 0x271   : > { %v5455_v52 = vadd.f32 %v5454_v47, %v5453_v15 }
 0x272   : > { %v4912_v60 = vrot.slane %v4911_v36, 1 }
 0x273   : > { %v9267_v63 = vmul.f32 0.00390625, %v5455_v52 }
 0x275   : > { %v9271_v55 = vsub.f32 %v8930_v21, %v9267_v63  ;;  %v9275_v2 = vsub.f32 %v8944_v33, %v9267_v63  ;;  %v9279_v47 = vsub.f32 %v8928_v32, %v9267_v63  ;;  %5489 = vst [vmem:[%s347_s24] sm:$0x1] %v9267_v63  ;;  %v9284_v48 = vsub.f32 %v8938_v13, %v9267_v63 }
 0x276   : > { %v9288_v52 = vsub.f32 %v8977_v57, %v9267_v63  ;;  %v9292_v21 = vsub.f32 %v8989_v7, %v9267_v63  ;;  %v9296_v33 = vsub.f32 %v8972_v28, %v9267_v63  ;;  %v4913_v32 = vadd.f32 %v4912_v60, %v4911_v36 }
 0x277   : > { %v9300_v35 = vsub.f32 %v8984_v23, %v9267_v63  ;;  %v9304_v13 = vsub.f32 %v9018_v14, %v9267_v63  ;;  %v9308_v57 = vsub.f32 %v9029_v38, %v9267_v63  ;;  %v9316_v28 = vsub.f32 %v9013_v31, %v9267_v63 }
 0x278   : > { %v9320_v23 = vsub.f32 %v9024_v5, %v9267_v63  ;;  %v9324_v7 = vsub.f32 %v9058_v4, %v9267_v63  ;;  %v9328_v14 = vsub.f32 %v9069_v44, %v9267_v63  ;;  %v4914_v38 = vmul.f32 0.00390625, %v4913_v32 }
 0x279   : > { %v9332_v27 = vsub.f32 %v9053_v46, %v9267_v63  ;;  %v9336_v31 = vsub.f32 %v9064_v0, %v9267_v63  ;;  %v9340_v5 = vsub.f32 %v9098_v19, %v9267_v63  ;;  %v9344_v4 = vsub.f32 %v9109_v49, %v9267_v63 }
 0x27a   : > { %v9348_v44 = vsub.f32 %v9093_v54, %v9267_v63  ;;  %v9352_v46 = vsub.f32 %v9104_v56, %v9267_v63  ;;  %v9356_v0 = vsub.f32 %v9138_v34, %v9267_v63  ;;  %4947 = vst [vmem:[%s336_s29] sm:$0x1] %v4914_v38  ;;  %v4923_v19 = vsub.f32 %v9041_v42, %v4914_v38 }
 0x27b   : > { %v4924_v58 = vsub.f32 %v9051_v51, %v4914_v38  ;;  %v9361_v49 = vsub.f32 %v9037_v62, %v4914_v38  ;;  %v9364_v8 = vsub.f32 %v9047_v53, %v4914_v38  ;;  %v9367_v54 = vsub.f32 %v9081_v1, %v4914_v38 }
 0x27c   : > { %v9370_v56 = vsub.f32 %v9091_v17, %v4914_v38  ;;  %v9373_v34 = vsub.f32 %v9077_v37, %v4914_v38  ;;  %v9376_v25 = vsub.f32 %v9087_v59, %v4914_v38  ;;  %v9379_v42 = vsub.f32 %v9121_v24, %v4914_v38 }
 0x27d   : > { %v9382_v62 = vsub.f32 %v9131_v61, %v4914_v38  ;;  %v9385_v53 = vsub.f32 %v9117_v30, %v4914_v38  ;;  %v9388_v51 = vsub.f32 %v9127_v10, %v4914_v38  ;;  %v9391_v1 = vsub.f32 %v9161_v3, %v4914_v38 }
 0x27e   : > { %v9394_v37 = vsub.f32 %v9171_v50, %v4914_v38  ;;  %v9397_v59 = vsub.f32 %v9157_v40, %v4914_v38  ;;  %v9400_v17 = vsub.f32 %v9167_v29, %v4914_v38  ;;  %v9403_v24 = vsub.f32 %v9201_v16, %v4914_v38 }
 0x27f   : > { %v9406_v30 = vsub.f32 %v9211_v26, %v4914_v38  ;;  %v9409_v10 = vsub.f32 %v9197_v6, %v4914_v38  ;;  %v9412_v61 = vsub.f32 %v9207_v18, %v4914_v38  ;;  %v9415_v3 = vsub.f32 %v9241_v9, %v4914_v38  ;;  %v9696_v18 = vld [vmem:[#allocation3_spill] sm:$0xff] }
 0x280   : > { %v9418_v40 = vsub.f32 %v9251_v41, %v4914_v38  ;;  %v9421_v29 = vsub.f32 %v9237_v22, %v4914_v38  ;;  %v9424_v50 = vsub.f32 %v9247_v11, %v4914_v38  ;;  %v4915_v16 = vsub.f32 %v8957_v12, %v4914_v38  ;;  %v9698_v41 = vld [vmem:[#allocation7_spill] sm:$0xff]  ;;  %v9699_v11 = vld [vmem:[#allocation16_spill] sm:$0xff]  ;;  %v9700_v12 = vld [vmem:[#allocation10_spill] sm:$0xff] }
 0x281   : > { %9692 = vst [vmem:[#allocation17_spill] sm:$0xff] %v9415_v3  ;;  %v4916_v6 = vsub.f32 %v8970_v20, %v4914_v38  ;;  %v4917_v26 = vsub.f32 %v8953_v45, %v4914_v38  ;;  %v4918_v43 = vsub.f32 %v9696_v18, %v4914_v38  ;;  %v4919_v36 = vsub.f32 %v9697_v39, %v4914_v38  ;;  %v9702_v45 = vld [vmem:[#allocation13_spill] sm:$0xff]  ;;  %v9710_v39 = vld [vmem:[#allocation8_spill] sm:$0xff] }
 0x282   : > { %9693 = vst [vmem:[#allocation18_spill] sm:$0xff] %v9418_v40  ;;  %9694 = vst [vmem:[#allocation20_spill] sm:$0xff] %v9421_v29  ;;  %v4948_v15 = vmul.f32 %v4915_v16, %v4915_v16  ;;  %v4920_v60 = vsub.f32 %v9698_v41, %v4914_v38  ;;  %v9438_v20 = vsub.f32 %v9700_v12, %v9267_v63  ;;  %v9704_v16 = vld [vmem:[#allocation22_spill] sm:$0xff]  ;;  %v9712_v12 = vld [vmem:[#allocation12_spill] sm:$0xff] }
 0x283   : > { %9695 = vst [vmem:[#allocation21_spill] sm:$0xff] %v9424_v50  ;;  %v4949_v9 = vmul.f32 %v4916_v6, %v4916_v6  ;;  %v4950_v32 = vmul.f32 %v4917_v26, %v4917_v26  ;;  %v4951_v22 = vmul.f32 %v4918_v43, %v4918_v43  ;;  %v9434_v50 = vsub.f32 %v9699_v11, %v9267_v63  ;;  %v9706_v26 = vld [vmem:[#allocation9_spill] sm:$0xff] }
 0x284   : > { %9701 = vst [vmem:[#allocation3_spill] sm:$0xff] %v9438_v20  ;;  %v9442_v18 = vsub.f32 %v9702_v45, %v9267_v63  ;;  %v9446_v6 = vsub.f32 %v9704_v16, %v9267_v63  ;;  %v9450_v43 = vsub.f32 %v9706_v26, %v9267_v63  ;;  %v9458_v41 = vsub.f32 %v9710_v39, %v9267_v63  ;;  %v9714_v16 = vld [vmem:[#allocation15_spill] sm:$0xff] }
 0x285   : > { %v4980_v29 = vadd.f32 %v4949_v9, %v4948_v15  ;;  %v9708_v15 = vld [vmem:[#allocation19_spill] sm:$0xff]  ;;  %v9462_v45 = vsub.f32 %v9712_v12, %v9267_v63  ;;  %v4953_v12 = vmul.f32 %v4920_v60, %v4920_v60  ;;  %v5493_v60 = vmul.f32 %v9284_v48, %v9284_v48 }
 0x286   : > { %9703 = vst [vmem:[#allocation5_spill] sm:$0xff] %v9442_v18  ;;  %9705 = vst [vmem:[#allocation7_spill] sm:$0xff] %v9446_v6  ;;  %v9454_v9 = vsub.f32 %v9708_v15, %v9267_v63  ;;  %v9466_v6 = vsub.f32 %v9714_v16, %v9267_v63  ;;  %v9716_v26 = vld [vmem:[#allocation11_spill] sm:$0xff]  ;;  %v9718_v15 = vld [vmem:[#allocation14_spill] sm:$0xff]  ;;  %v5490_v16 = vmul.f32 %v9271_v55, %v9271_v55 }
 0x287   : > { %9707 = vst [vmem:[#allocation16_spill] sm:$0xff] %v9450_v43  ;;  %9711 = vst [vmem:[#allocation13_spill] sm:$0xff] %v9458_v41  ;;  %v4981_v11 = vadd.f32 %v4980_v29, %v4950_v32  ;;  %v9470_v43 = vsub.f32 %v9716_v26, %v9267_v63  ;;  %v9719_v18 = vld [vmem:[#allocation4_spill] sm:$0xff]  ;;  %v4952_v41 = vmul.f32 %v4919_v36, %v4919_v36  ;;  %v9720_v32 = vld [vmem:[#allocation6_spill] sm:$0xff] }
 0x288   : > { %9709 = vst [vmem:[#allocation10_spill] sm:$0xff] %v9454_v9  ;;  %9713 = vst [vmem:[#allocation22_spill] sm:$0xff] %v9462_v45  ;;  %v9474_v9 = vsub.f32 %v9718_v15, %v9267_v63  ;;  %v4921_v39 = vsub.f32 %v9719_v18, %v4914_v38  ;;  %v4922_v40 = vsub.f32 %v9720_v32, %v4914_v38 }
 0x289   : > { %9715 = vst [vmem:[#allocation9_spill] sm:$0xff] %v9466_v6  ;;  %9717 = vst [vmem:[#allocation19_spill] sm:$0xff] %v9470_v43  ;;  %v4982_v29 = vadd.f32 %v4981_v11, %v4951_v22  ;;  %v5491_v26 = vmul.f32 %v9275_v2, %v9275_v2  ;;  %v4956_v63 = vmul.f32 %v4923_v19, %v4923_v19 }
 0x28a   : > { %v4954_v20 = vmul.f32 %v4921_v39, %v4921_v39  ;;  %v4955_v43 = vmul.f32 %v4922_v40, %v4922_v40  ;;  %v5492_v36 = vmul.f32 %v9279_v47, %v9279_v47  ;;  %v4957_v18 = vmul.f32 %v4924_v58, %v4924_v58 }
 0x28b   : > { %v4983_v45 = vadd.f32 %v4982_v29, %v4952_v41  ;;  %v5522_v22 = vadd.f32 %v5491_v26, %v5490_v16  ;;  %v4958_v55 = vmul.f32 %v9361_v49, %v9361_v49  ;;  %v5494_v2 = vmul.f32 %v9288_v52, %v9288_v52 }
 0x28c   : > { %v4959_v19 = vmul.f32 %v9364_v8, %v9364_v8  ;;  %v5495_v47 = vmul.f32 %v9292_v21, %v9292_v21  ;;  %v4960_v48 = vmul.f32 %v9367_v54, %v9367_v54  ;;  %v5496_v49 = vmul.f32 %v9296_v33, %v9296_v33 }
 0x28d   : > { %v4984_v3 = vadd.f32 %v4983_v45, %v4953_v12  ;;  %v5523_v41 = vadd.f32 %v5522_v22, %v5492_v36  ;;  %v4961_v52 = vmul.f32 %v9370_v56, %v9370_v56  ;;  %v5497_v8 = vmul.f32 %v9300_v35, %v9300_v35 }
 0x28e   : > { %v4962_v21 = vmul.f32 %v9373_v34, %v9373_v34  ;;  %v5498_v54 = vmul.f32 %v9304_v13, %v9304_v13  ;;  %v4963_v33 = vmul.f32 %v9376_v25, %v9376_v25  ;;  %v5499_v56 = vmul.f32 %v9308_v57, %v9308_v57 }
 0x28f   : > { %v4985_v6 = vadd.f32 %v4984_v3, %v4954_v20  ;;  %v5524_v3 = vadd.f32 %v5523_v41, %v5493_v60  ;;  %v4964_v35 = vmul.f32 %v9379_v42, %v9379_v42  ;;  %v5500_v34 = vmul.f32 %v9316_v28, %v9316_v28 }
 0x290   : > { %v4965_v13 = vmul.f32 %v9382_v62, %v9382_v62  ;;  %v5501_v25 = vmul.f32 %v9320_v23, %v9320_v23  ;;  %v4966_v57 = vmul.f32 %v9385_v53, %v9385_v53  ;;  %v5502_v42 = vmul.f32 %v9324_v7, %v9324_v7 }
 0x291   : > { %v4986_v15 = vadd.f32 %v4985_v6, %v4955_v43  ;;  %v5525_v58 = vadd.f32 %v5524_v3, %v5494_v2  ;;  %v4967_v28 = vmul.f32 %v9388_v51, %v9388_v51  ;;  %v5503_v62 = vmul.f32 %v9328_v14, %v9328_v14 }
 0x292   : > { %v4968_v23 = vmul.f32 %v9391_v1, %v9391_v1  ;;  %v5504_v53 = vmul.f32 %v9332_v27, %v9332_v27  ;;  %v4969_v7 = vmul.f32 %v9394_v37, %v9394_v37  ;;  %v5505_v51 = vmul.f32 %v9336_v31, %v9336_v31 }
 0x293   : > { %v4987_v38 = vadd.f32 %v4986_v15, %v4956_v63  ;;  %v5526_v6 = vadd.f32 %v5525_v58, %v5495_v47  ;;  %v4970_v14 = vmul.f32 %v9397_v59, %v9397_v59  ;;  %v5506_v1 = vmul.f32 %v9340_v5, %v9340_v5 }
 0x294   : > { %v4971_v27 = vmul.f32 %v9400_v17, %v9400_v17  ;;  %v5507_v37 = vmul.f32 %v9344_v4, %v9344_v4  ;;  %v4972_v31 = vmul.f32 %v9403_v24, %v9403_v24  ;;  %v5508_v59 = vmul.f32 %v9348_v44, %v9348_v44 }
 0x295   : > { %v4988_v11 = vadd.f32 %v4987_v38, %v4957_v18  ;;  %v5527_v45 = vadd.f32 %v5526_v6, %v5496_v49  ;;  %v4973_v5 = vmul.f32 %v9406_v30, %v9406_v30  ;;  %v5509_v17 = vmul.f32 %v9352_v46, %v9352_v46 }
 0x296   : > { %v4974_v4 = vmul.f32 %v9409_v10, %v9409_v10  ;;  %v5510_v24 = vmul.f32 %v9356_v0, %v9356_v0  ;;  %v4975_v44 = vmul.f32 %v9412_v61, %v9412_v61  ;;  %v5511_v30 = vmul.f32 %v9434_v50, %v9434_v50 }
 0x297   : > { %v4989_v40 = vadd.f32 %v4988_v11, %v4958_v55  ;;  %v5528_v29 = vadd.f32 %v5527_v45, %v5497_v8  ;;  %v9721_v8 = vld [vmem:[#allocation17_spill] sm:$0xff] }
 0x298   : > { %v4976_v46 = vmul.f32 %v9721_v8, %v9721_v8 }
 0x299   : > { %v4990_v20 = vadd.f32 %v4989_v40, %v4959_v19  ;;  %v5529_v12 = vadd.f32 %v5528_v29, %v5498_v54  ;;  %v9723_v54 = vld [vmem:[#allocation18_spill] sm:$0xff] }
 0x29a   : > { %v4977_v0 = vmul.f32 %v9723_v54, %v9723_v54 }
 0x29b   : > { %v4991_v43 = vadd.f32 %v4990_v20, %v4960_v48  ;;  %v5530_v26 = vadd.f32 %v5529_v12, %v5499_v56  ;;  %v9725_v56 = vld [vmem:[#allocation20_spill] sm:$0xff] }
 0x29c   : > { %v4978_v50 = vmul.f32 %v9725_v56, %v9725_v56 }
 0x29d   : > { %v4992_v39 = vadd.f32 %v4991_v43, %v4961_v52  ;;  %v5531_v15 = vadd.f32 %v5530_v26, %v5500_v34  ;;  %v9727_v26 = vld [vmem:[#allocation21_spill] sm:$0xff] }
 0x29f   : > { %v4993_v32 = vadd.f32 %v4992_v39, %v4962_v21  ;;  %v5532_v22 = vadd.f32 %v5531_v15, %v5501_v25  ;;  %v9722_v21 = vld [vmem:[#allocation3_spill] sm:$0xff]  ;;  %v9728_v25 = vld [vmem:[#allocation16_spill] sm:$0xff] }
 0x2a0   : > { %v5512_v10 = vmul.f32 %v9722_v21, %v9722_v21  ;;  %v5515_v15 = vmul.f32 %v9728_v25, %v9728_v25 }
 0x2a1   : > { %v4994_v16 = vadd.f32 %v4993_v32, %v4963_v33  ;;  %v5533_v38 = vadd.f32 %v5532_v22, %v5502_v42  ;;  %v9724_v33 = vld [vmem:[#allocation5_spill] sm:$0xff]  ;;  %v9729_v42 = vld [vmem:[#allocation10_spill] sm:$0xff] }
 0x2a2   : > { %v5513_v61 = vmul.f32 %v9724_v33, %v9724_v33  ;;  %v5516_v22 = vmul.f32 %v9729_v42, %v9729_v42 }
 0x2a3   : > { %v4995_v63 = vadd.f32 %v4994_v16, %v4964_v35  ;;  %v5534_v41 = vadd.f32 %v5533_v38, %v5503_v62  ;;  %v9726_v35 = vld [vmem:[#allocation7_spill] sm:$0xff]  ;;  %v9730_v62 = vld [vmem:[#allocation13_spill] sm:$0xff] }
 0x2a4   : > { %v5514_v16 = vmul.f32 %v9726_v35, %v9726_v35  ;;  %v5517_v38 = vmul.f32 %v9730_v62, %v9730_v62 }
 0x2a5   : > { %v4996_v36 = vadd.f32 %v4995_v63, %v4965_v13  ;;  %v5535_v11 = vadd.f32 %v5534_v41, %v5504_v53  ;;  %v4979_v13 = vmul.f32 %v9727_v26, %v9727_v26  ;;  %v9731_v53 = vld [vmem:[#allocation22_spill] sm:$0xff] }
 0x2a6   : > { %v5518_v41 = vmul.f32 %v9731_v53, %v9731_v53 }
 0x2a7   : > { %v4997_v18 = vadd.f32 %v4996_v36, %v4966_v57  ;;  %v5536_v3 = vadd.f32 %v5535_v11, %v5505_v51  ;;  %v9732_v51 = vld [vmem:[#allocation9_spill] sm:$0xff] }
 0x2a8   : > { %v5519_v11 = vmul.f32 %v9732_v51, %v9732_v51 }
 0x2a9   : > { %v4998_v60 = vadd.f32 %v4997_v18, %v4967_v28  ;;  %v5537_v40 = vadd.f32 %v5536_v3, %v5506_v1  ;;  %v9733_v1 = vld [vmem:[#allocation19_spill] sm:$0xff] }
 0x2aa   : > { %v5520_v3 = vmul.f32 %v9733_v1, %v9733_v1 }
 0x2ab   : > { %v4999_v55 = vadd.f32 %v4998_v60, %v4968_v23  ;;  %v5538_v58 = vadd.f32 %v5537_v40, %v5507_v37  ;;  %v5521_v37 = vmul.f32 %v9474_v9, %v9474_v9 }
 0x2ad   : > { %v5000_v2 = vadd.f32 %v4999_v55, %v4969_v7  ;;  %v5539_v20 = vadd.f32 %v5538_v58, %v5508_v59 }
 0x2af   : > { %v5001_v19 = vadd.f32 %v5000_v2, %v4970_v14  ;;  %v5540_v6 = vadd.f32 %v5539_v20, %v5509_v17 }
 0x2b1   : > { %v5002_v47 = vadd.f32 %v5001_v19, %v4971_v27  ;;  %v5541_v43 = vadd.f32 %v5540_v6, %v5510_v24 }
 0x2b3   : > { %v5003_v48 = vadd.f32 %v5002_v47, %v4972_v31  ;;  %v5542_v39 = vadd.f32 %v5541_v43, %v5511_v30 }
 0x2b5   : > { %v5004_v49 = vadd.f32 %v5003_v48, %v4973_v5  ;;  %v5543_v32 = vadd.f32 %v5542_v39, %v5512_v10 }
 0x2b7   : > { %v5005_v52 = vadd.f32 %v5004_v49, %v4974_v4  ;;  %v5544_v34 = vadd.f32 %v5543_v32, %v5513_v61 }
 0x2b9   : > { %v5006_v45 = vadd.f32 %v5005_v52, %v4975_v44  ;;  %v5545_v57 = vadd.f32 %v5544_v34, %v5514_v16 }
 0x2bb   : > { %v5007_v29 = vadd.f32 %v5006_v45, %v4976_v46  ;;  %v5546_v28 = vadd.f32 %v5545_v57, %v5515_v15 }
 0x2bd   : > { %v5008_v12 = vadd.f32 %v5007_v29, %v4977_v0  ;;  %v5547_v23 = vadd.f32 %v5546_v28, %v5516_v22 }
 0x2bf   : > { %v5009_v63 = vadd.f32 %v5008_v12, %v4978_v50  ;;  %v5548_v7 = vadd.f32 %v5547_v23, %v5517_v38 }
 0x2c1   : > { %v5010_v36 = vadd.f32 %v5009_v63, %v4979_v13  ;;  %v5549_v14 = vadd.f32 %v5548_v7, %v5518_v41 }
 0x2c3   : > { %v5011_v18 = vrot.slane %v5010_v36, 4  ;;  %v5550_v27 = vadd.f32 %v5549_v14, %v5519_v11 }
 0x2c5   : > { %v5012_v60 = vadd.f32 %v5011_v18, %v5010_v36  ;;  %v5551_v40 = vadd.f32 %v5550_v27, %v5520_v3 }
 0x2c7   : > { %v5013_v55 = vrot.slane %v5012_v60, 2  ;;  %v5552_v47 = vadd.f32 %v5551_v40, %v5521_v37 }
 0x2c9   : > { %v5014_v2 = vadd.f32 %v5013_v55, %v5012_v60  ;;  %v5553_v59 = vrot.slane %v5552_v47, 4 }
 0x2cb   : > { %v5015_v19 = vrot.slane %v5014_v2, 1  ;;  %v5554_v58 = vadd.f32 %v5553_v59, %v5552_v47 }
 0x2cd   : > { %v5016_v31 = vadd.f32 %v5015_v19, %v5014_v2  ;;  %v5555_v5 = vrot.slane %v5554_v58, 2 }
 0x2cf   : > { %5017 = vst [vmem:[%s339_s11] sm:$0x1] %v5016_v31  ;;  %v5556_v48 = vadd.f32 %v5555_v5, %v5554_v58 }
 0x2d1   : > { %v5557_v17 = vrot.slane %v5556_v48, 1 }
 0x2d3   : > { %v5558_v20 = vadd.f32 %v5557_v17, %v5556_v48 }
 0x2d5   : > { %5559 = vst [vmem:[%s350_s14] sm:$0x1] %v5558_v20 }
 0x2d6 PF: > { %s19_s27 = sadd.s32 1, %s7343_s27  }
 0x2d7   : > { %p16_p4 = scmp.ge.s32.totalorder %s19_s27, 4  }
 0x2d9   :  { %18 = sbr.rel (!%p16_p4) target bundleno = 1 (0x1), region = 124 }

</bundles_post_ra>
